<compile_context>
chip_gen: v5e
topology: v5e:2x2
jax: 0.10.0
libtpu: 0.0.40
codegen_flags: <defaults>
</compile_context>

<pallas_src>
import jax
import jax.numpy as jnp
from jax.experimental import pallas as pl
from jax.experimental.pallas import tpu as pltpu


# ----------------------------------------------------------------------------
# In-kernel helpers
# ----------------------------------------------------------------------------
def _bilstm_layer(x_ref, m_ref, w_ref, b_ref, out_ref):
    """Both LSTM directions over the full (resident) sequence.

    x_ref:   (T, B, Din)   time-major activations (VMEM)
    m_ref:   (T, B, 1)     1.0 for valid tokens, 0.0 for padding (right-padded)
    w_ref:   (2, Din+H, 4H)  stacked [W_ih ; W_hh]^T, dir 0 = fwd, dir 1 = bwd
    b_ref:   (2, 1, 4H)      b_ih + b_hh per direction
    out_ref: (T, B, 2H)      fwd hidden in [..., :H], bwd hidden in [..., H:]
    """
    T, B, _ = x_ref.shape
    H = out_ref.shape[-1] // 2

    w_f, w_b = w_ref[0], w_ref[1]          # (Din+H, 4H)
    b_f, b_b = b_ref[0], b_ref[1]          # (1, 4H)

    def cell(x_t, h_prev, c_prev, w, b):
        # fused input/recurrent matmul: one MXU push per direction per step
        gates = jnp.dot(jnp.concatenate([x_t, h_prev], axis=-1), w,
                        preferred_element_type=jnp.float32) + b      # (B, 4H)
        i_g = jax.nn.sigmoid(gates[:, 0 * H:1 * H])
        f_g = jax.nn.sigmoid(gates[:, 1 * H:2 * H])
        g_g = jnp.tanh(gates[:, 2 * H:3 * H])
        o_g = jax.nn.sigmoid(gates[:, 3 * H:4 * H])
        c_new = f_g * c_prev + i_g * g_g
        h_new = o_g * jnp.tanh(c_new)
        return h_new, c_new

    z = jnp.zeros((B, H), jnp.float32)
    hf, cf, hb, cb = z, z, z, z            # h0 = c0 = 0 (init_hidden)

    # T is small and static -> fully unrolled loop; states stay in vregs and
    # the output slab stays resident in VMEM (single writeback).
    for i in range(T):
        tf = i              # forward direction walks t = 0 .. T-1
        tb = T - 1 - i      # backward direction walks t = T-1 .. 0

        mf = m_ref[tf] > 0.5                # (B, 1) bool
        mb = m_ref[tb] > 0.5

        hf_new, cf_new = cell(x_ref[tf], hf, cf, w_f, b_f)
        hb_new, cb_new = cell(x_ref[tb], hb, cb, w_b, b_b)

        # packed-sequence semantics: emit zeros and freeze state on padding
        out_ref[tf, :, 0:H] = jnp.where(mf, hf_new, 0.0).astype(out_ref.dtype)
        out_ref[tb, :, H:2 * H] = jnp.where(mb, hb_new, 0.0).astype(out_ref.dtype)

        hf = jnp.where(mf, hf_new, hf)
        cf = jnp.where(mf, cf_new, cf)
        hb = jnp.where(mb, hb_new, hb)
        cb = jnp.where(mb, cb_new, cb)


def bert_bilstm_kernel(x_ref, m_ref, w0_ref, b0_ref, w1_ref, b1_ref,
                       lw_ref, lb_ref, o_ref, h1_ref, h2_ref):
    """Whole network: BiLSTM layer 0 -> BiLSTM layer 1 -> Linear classifier."""
    _bilstm_layer(x_ref, m_ref, w0_ref, b0_ref, h1_ref)     # (T, B, 2H)
    _bilstm_layer(h1_ref, m_ref, w1_ref, b1_ref, h2_ref)    # (T, B, 2H)

    # Fused classifier epilogue on the resident layer-2 slab.
    T = o_ref.shape[0]
    lw = lw_ref[...]                                         # (2H, O)
    lb = lb_ref[...]                                         # (1, O)
    for t in range(T):
        o_ref[t] = (jnp.dot(h2_ref[t], lw, preferred_element_type=jnp.float32)
                    + lb).astype(o_ref.dtype)


# ----------------------------------------------------------------------------
# Wrapper
# ----------------------------------------------------------------------------
def bert_bilstm_forward(x_ids, mask, params):
    # TODO(synk): stand-in for BertModel(...).last_hidden_state (deterministic
    # embedding-table lookup); word_dropout / lstm_dropout are identity in eval.
    emb_tbe = params["emb_table"][x_ids.T]                    # (T, B, E)
    mask_tb1 = mask.T[:, :, None].astype(jnp.float32)         # (T, B, 1)

    T, B, _ = emb_tbe.shape
    H = params["w0"].shape[-1] // 4
    O = params["lin_b"].shape[-1]

    vmem_spec = pl.BlockSpec(memory_space=pltpu.MemorySpace.VMEM)

    out_tbo = pl.pallas_call(
        bert_bilstm_kernel,
        out_shape=jax.ShapeDtypeStruct((T, B, O), jnp.float32),
        in_specs=[vmem_spec] * 8,
        out_specs=vmem_spec,
        scratch_shapes=[pltpu.VMEM((T, B, 2 * H), jnp.float32),   # layer-1 out
                        pltpu.VMEM((T, B, 2 * H), jnp.float32)],  # layer-2 out
    )(emb_tbe, mask_tb1,
      params["w0"], params["b0"], params["w1"], params["b1"],
      params["lin_w"], params["lin_b"])

    return jnp.transpose(out_tbo, (1, 0, 2))                  # (B, T, O)


# ----------------------------------------------------------------------------
# Deterministic parameter construction (shapes follow nn.LSTM / nn.Linear)
# ----------------------------------------------------------------------------
def make_lstm_dir_params(key, in_dim, hidden):
    k1, k2, k3, k4 = jax.random.split(key, 4)
    # PyTorch stores weight_ih: (4H, in), weight_hh: (4H, H); gate order i,f,g,o.
    w_ih = jax.random.normal(k1, (4 * hidden, in_dim), jnp.float32) * 0.1
    w_hh = jax.random.normal(k2, (4 * hidden, hidden), jnp.float32) * 0.1
    b_ih = jax.random.normal(k3, (4 * hidden,), jnp.float32) * 0.1
    b_hh = jax.random.normal(k4, (4 * hidden,), jnp.float32) * 0.1
    w = jnp.concatenate([w_ih, w_hh], axis=1).T               # (in+H, 4H)
    b = (b_ih + b_hh)[None, :]                                # (1, 4H)
    return w, b


def make_params(key, vocab_size, emb_dim, hidden, out_dim):
    keys = jax.random.split(key, 8)
    w0f, b0f = make_lstm_dir_params(keys[1], emb_dim, hidden)
    w0b, b0b = make_lstm_dir_params(keys[2], emb_dim, hidden)
    w1f, b1f = make_lstm_dir_params(keys[3], 2 * hidden, hidden)
    w1b, b1b = make_lstm_dir_params(keys[4], 2 * hidden, hidden)
    return {
        "emb_table": jax.random.normal(keys[0], (vocab_size, emb_dim),
                                       jnp.float32) * 0.1,
        "w0": jnp.stack([w0f, w0b]),       # (2, E+H, 4H)
        "b0": jnp.stack([b0f, b0b]),       # (2, 1, 4H)
        "w1": jnp.stack([w1f, w1b]),       # (2, 3H, 4H)
        "b1": jnp.stack([b1f, b1b]),       # (2, 1, 4H)
        "lin_w": (jax.random.normal(keys[5], (out_dim, 2 * hidden),
                                    jnp.float32) * 0.1).T,    # (2H, O)
        "lin_b": (jax.random.normal(keys[6], (out_dim,),
                                    jnp.float32) * 0.1)[None, :],  # (1, O)
    }


# ----------------------------------------------------------------------------
if __name__ == "__main__":
    # H=32 -> 4H=128: lane-aligned gates and a full-lane matmul N dimension.
    VOCAB, EMB, HID, OUT = 100, 32, 32, 5
    B, T = 2, 8

    key = jax.random.PRNGKey(0)
    k_ids, k_par = jax.random.split(key)

    x_ids = jax.random.randint(k_ids, (B, T), 0, VOCAB, dtype=jnp.int32)
    # lengths [8, 5]: one full-length sequence, one right-padded sequence
    mask = jnp.array([[1] * 8, [1] * 5 + [0] * 3], dtype=jnp.int32)

    params = make_params(k_par, VOCAB, EMB, HID, OUT)

    out = jax.jit(bert_bilstm_forward)(x_ids, mask, params)
    out = jax.block_until_ready(out)

    assert out.shape == (B, T, OUT), out.shape
    assert jnp.all(jnp.isfinite(out))
    print("KERNEL_OK")
</pallas_src>

<mosaic_0001>
module attributes {stable_mosaic.version = 11 : i64} {
  func.func @bert_bilstm_kernel(%arg0: memref<8x2x32xf32, #tpu.memory_space<vmem>>, %arg1: memref<8x2x1xf32, #tpu.memory_space<vmem>>, %arg2: memref<2x64x128xf32, #tpu.memory_space<vmem>>, %arg3: memref<2x1x128xf32, #tpu.memory_space<vmem>>, %arg4: memref<2x96x128xf32, #tpu.memory_space<vmem>>, %arg5: memref<2x1x128xf32, #tpu.memory_space<vmem>>, %arg6: memref<64x5xf32, #tpu.memory_space<vmem>>, %arg7: memref<1x5xf32, #tpu.memory_space<vmem>>, %arg8: memref<8x2x5xf32, #tpu.memory_space<vmem>>, %arg9: memref<8x2x64xf32, #tpu.memory_space<vmem>>, %arg10: memref<8x2x64xf32, #tpu.memory_space<vmem>>) attributes {dimension_semantics = [], scalar_prefetch = 0 : i64, scratch_operands = 2 : i64, tpu.core_type = #tpu.core_type<tc>} {
    %c0 = arith.constant 0 : index
    %c0_0 = arith.constant 0 : index
    %c0_1 = arith.constant 0 : index
    %0 = vector.load %arg2[%c0, %c0_0, %c0_1] : memref<2x64x128xf32, #tpu.memory_space<vmem>>, vector<1x64x128xf32>
    %1 = vector.shape_cast %0 : vector<1x64x128xf32> to vector<64x128xf32>
    %c1 = arith.constant 1 : index
    %c0_2 = arith.constant 0 : index
    %c0_3 = arith.constant 0 : index
    %2 = vector.load %arg2[%c1, %c0_2, %c0_3] : memref<2x64x128xf32, #tpu.memory_space<vmem>>, vector<1x64x128xf32>
    %3 = vector.shape_cast %2 : vector<1x64x128xf32> to vector<64x128xf32>
    %c0_4 = arith.constant 0 : index
    %c0_5 = arith.constant 0 : index
    %c0_6 = arith.constant 0 : index
    %4 = vector.load %arg3[%c0_4, %c0_5, %c0_6] : memref<2x1x128xf32, #tpu.memory_space<vmem>>, vector<1x1x128xf32>
    %5 = vector.shape_cast %4 : vector<1x1x128xf32> to vector<1x128xf32>
    %c1_7 = arith.constant 1 : index
    %c0_8 = arith.constant 0 : index
    %c0_9 = arith.constant 0 : index
    %6 = vector.load %arg3[%c1_7, %c0_8, %c0_9] : memref<2x1x128xf32, #tpu.memory_space<vmem>>, vector<1x1x128xf32>
    %7 = vector.shape_cast %6 : vector<1x1x128xf32> to vector<1x128xf32>
    %cst = arith.constant 0.000000e+00 : f32
    %8 = vector.broadcast %cst : f32 to vector<2x32xf32>
    %c0_10 = arith.constant 0 : index
    %c0_11 = arith.constant 0 : index
    %c0_12 = arith.constant 0 : index
    %9 = vector.load %arg1[%c0_10, %c0_11, %c0_12] : memref<8x2x1xf32, #tpu.memory_space<vmem>>, vector<1x2x1xf32>
    %10 = vector.shape_cast %9 : vector<1x2x1xf32> to vector<2x1xf32>
    %cst_13 = arith.constant 5.000000e-01 : f32
    %11 = vector.broadcast %cst_13 : f32 to vector<2x1xf32>
    %12 = arith.cmpf ogt, %10, %11 : vector<2x1xf32>
    %c7 = arith.constant 7 : index
    %c0_14 = arith.constant 0 : index
    %c0_15 = arith.constant 0 : index
    %13 = vector.load %arg1[%c7, %c0_14, %c0_15] : memref<8x2x1xf32, #tpu.memory_space<vmem>>, vector<1x2x1xf32>
    %14 = vector.shape_cast %13 : vector<1x2x1xf32> to vector<2x1xf32>
    %cst_16 = arith.constant 5.000000e-01 : f32
    %15 = vector.broadcast %cst_16 : f32 to vector<2x1xf32>
    %16 = arith.cmpf ogt, %14, %15 : vector<2x1xf32>
    %c0_17 = arith.constant 0 : index
    %c0_18 = arith.constant 0 : index
    %c0_19 = arith.constant 0 : index
    %17 = vector.load %arg0[%c0_17, %c0_18, %c0_19] : memref<8x2x32xf32, #tpu.memory_space<vmem>>, vector<1x2x32xf32>
    %18 = vector.shape_cast %17 : vector<1x2x32xf32> to vector<2x32xf32>
    %19 = tpu.concatenate %18, %8 in 1 : vector<2x32xf32>, vector<2x32xf32> -> vector<2x64xf32>
    %cst_20 = arith.constant dense<0.000000e+00> : vector<2x128xf32>
    %20 = tpu.matmul %19, %1, %cst_20 {dimension_numbers = #tpu.dot_dimension_numbers<[1], [0], [0], [1], [0, 0, 1, 1], [], []>} : vector<2x64xf32>, vector<64x128xf32>, vector<2x128xf32> -> vector<2x128xf32>
    %21 = vector.broadcast %5 : vector<1x128xf32> to vector<2x128xf32>
    %22 = arith.addf %20, %21 : vector<2x128xf32>
    %23 = vector.extract_strided_slice %22 {offsets = [0, 0], sizes = [2, 32], strides = [1, 1]} : vector<2x128xf32> to vector<2x32xf32>
    %24 = arith.negf %23 : vector<2x32xf32>
    %25 = math.exp %24 : vector<2x32xf32>
    %cst_21 = arith.constant 1.000000e+00 : f32
    %26 = vector.broadcast %cst_21 : f32 to vector<2x32xf32>
    %27 = arith.addf %26, %25 : vector<2x32xf32>
    %28 = arith.divf %26, %27 : vector<2x32xf32>
    %29 = vector.extract_strided_slice %22 {offsets = [0, 32], sizes = [2, 32], strides = [1, 1]} : vector<2x128xf32> to vector<2x32xf32>
    %30 = arith.negf %29 : vector<2x32xf32>
    %31 = math.exp %30 : vector<2x32xf32>
    %cst_22 = arith.constant 1.000000e+00 : f32
    %32 = vector.broadcast %cst_22 : f32 to vector<2x32xf32>
    %33 = arith.addf %32, %31 : vector<2x32xf32>
    %34 = arith.divf %32, %33 : vector<2x32xf32>
    %35 = vector.extract_strided_slice %22 {offsets = [0, 64], sizes = [2, 32], strides = [1, 1]} : vector<2x128xf32> to vector<2x32xf32>
    %36 = math.tanh %35 : vector<2x32xf32>
    %37 = vector.extract_strided_slice %22 {offsets = [0, 96], sizes = [2, 32], strides = [1, 1]} : vector<2x128xf32> to vector<2x32xf32>
    %38 = arith.negf %37 : vector<2x32xf32>
    %39 = math.exp %38 : vector<2x32xf32>
    %cst_23 = arith.constant 1.000000e+00 : f32
    %40 = vector.broadcast %cst_23 : f32 to vector<2x32xf32>
    %41 = arith.addf %40, %39 : vector<2x32xf32>
    %42 = arith.divf %40, %41 : vector<2x32xf32>
    %43 = arith.mulf %34, %8 : vector<2x32xf32>
    %44 = arith.mulf %28, %36 : vector<2x32xf32>
    %45 = arith.addf %43, %44 : vector<2x32xf32>
    %46 = math.tanh %45 : vector<2x32xf32>
    %47 = arith.mulf %42, %46 : vector<2x32xf32>
    %c7_24 = arith.constant 7 : index
    %c0_25 = arith.constant 0 : index
    %c0_26 = arith.constant 0 : index
    %48 = vector.load %arg0[%c7_24, %c0_25, %c0_26] : memref<8x2x32xf32, #tpu.memory_space<vmem>>, vector<1x2x32xf32>
    %49 = vector.shape_cast %48 : vector<1x2x32xf32> to vector<2x32xf32>
    %50 = tpu.concatenate %49, %8 in 1 : vector<2x32xf32>, vector<2x32xf32> -> vector<2x64xf32>
    %cst_27 = arith.constant dense<0.000000e+00> : vector<2x128xf32>
    %51 = tpu.matmul %50, %3, %cst_27 {dimension_numbers = #tpu.dot_dimension_numbers<[1], [0], [0], [1], [0, 0, 1, 1], [], []>} : vector<2x64xf32>, vector<64x128xf32>, vector<2x128xf32> -> vector<2x128xf32>
    %52 = vector.broadcast %7 : vector<1x128xf32> to vector<2x128xf32>
    %53 = arith.addf %51, %52 : vector<2x128xf32>
    %54 = vector.extract_strided_slice %53 {offsets = [0, 0], sizes = [2, 32], strides = [1, 1]} : vector<2x128xf32> to vector<2x32xf32>
    %55 = arith.negf %54 : vector<2x32xf32>
    %56 = math.exp %55 : vector<2x32xf32>
    %cst_28 = arith.constant 1.000000e+00 : f32
    %57 = vector.broadcast %cst_28 : f32 to vector<2x32xf32>
    %58 = arith.addf %57, %56 : vector<2x32xf32>
    %59 = arith.divf %57, %58 : vector<2x32xf32>
    %60 = vector.extract_strided_slice %53 {offsets = [0, 32], sizes = [2, 32], strides = [1, 1]} : vector<2x128xf32> to vector<2x32xf32>
    %61 = arith.negf %60 : vector<2x32xf32>
    %62 = math.exp %61 : vector<2x32xf32>
    %cst_29 = arith.constant 1.000000e+00 : f32
    %63 = vector.broadcast %cst_29 : f32 to vector<2x32xf32>
    %64 = arith.addf %63, %62 : vector<2x32xf32>
    %65 = arith.divf %63, %64 : vector<2x32xf32>
    %66 = vector.extract_strided_slice %53 {offsets = [0, 64], sizes = [2, 32], strides = [1, 1]} : vector<2x128xf32> to vector<2x32xf32>
    %67 = math.tanh %66 : vector<2x32xf32>
    %68 = vector.extract_strided_slice %53 {offsets = [0, 96], sizes = [2, 32], strides = [1, 1]} : vector<2x128xf32> to vector<2x32xf32>
    %69 = arith.negf %68 : vector<2x32xf32>
    %70 = math.exp %69 : vector<2x32xf32>
    %cst_30 = arith.constant 1.000000e+00 : f32
    %71 = vector.broadcast %cst_30 : f32 to vector<2x32xf32>
    %72 = arith.addf %71, %70 : vector<2x32xf32>
    %73 = arith.divf %71, %72 : vector<2x32xf32>
    %74 = arith.mulf %65, %8 : vector<2x32xf32>
    %75 = arith.mulf %59, %67 : vector<2x32xf32>
    %76 = arith.addf %74, %75 : vector<2x32xf32>
    %77 = math.tanh %76 : vector<2x32xf32>
    %78 = arith.mulf %73, %77 : vector<2x32xf32>
    %cst_31 = arith.constant 0.000000e+00 : f32
    %79 = vector.shape_cast %12 : vector<2x1xi1> to vector<2x1xi1>
    %80 = vector.broadcast %79 : vector<2x1xi1> to vector<2x32xi1>
    %81 = vector.broadcast %cst_31 : f32 to vector<2x32xf32>
    %82 = arith.select %80, %47, %81 : vector<2x32xi1>, vector<2x32xf32>
    %c0_32 = arith.constant 0 : index
    %c0_33 = arith.constant 0 : index
    %c0_34 = arith.constant 0 : index
    %83 = vector.load %arg9[%c0_32, %c0_33, %c0_34] : memref<8x2x64xf32, #tpu.memory_space<vmem>>, vector<1x2x32xf32>
    %84 = vector.shape_cast %83 : vector<1x2x32xf32> to vector<2x32xf32>
    %85 = vector.shape_cast %82 : vector<2x32xf32> to vector<1x2x32xf32>
    tpu.vector_store %arg9[%c0_32, %c0_33, %c0_34], %85 {strides = array<i32>} : memref<8x2x64xf32, #tpu.memory_space<vmem>>, vector<1x2x32xf32>,
    %cst_35 = arith.constant 0.000000e+00 : f32
    %86 = vector.shape_cast %16 : vector<2x1xi1> to vector<2x1xi1>
    %87 = vector.broadcast %86 : vector<2x1xi1> to vector<2x32xi1>
    %88 = vector.broadcast %cst_35 : f32 to vector<2x32xf32>
    %89 = arith.select %87, %78, %88 : vector<2x32xi1>, vector<2x32xf32>
    %c7_36 = arith.constant 7 : index
    %c0_37 = arith.constant 0 : index
    %c32 = arith.constant 32 : index
    %90 = vector.load %arg9[%c7_36, %c0_37, %c32] : memref<8x2x64xf32, #tpu.memory_space<vmem>>, vector<1x2x32xf32>
    %91 = vector.shape_cast %90 : vector<1x2x32xf32> to vector<2x32xf32>
    %92 = vector.shape_cast %89 : vector<2x32xf32> to vector<1x2x32xf32>
    tpu.vector_store %arg9[%c7_36, %c0_37, %c32], %92 {strides = array<i32>} : memref<8x2x64xf32, #tpu.memory_space<vmem>>, vector<1x2x32xf32>,
    %93 = vector.shape_cast %12 : vector<2x1xi1> to vector<2x1xi1>
    %94 = vector.broadcast %93 : vector<2x1xi1> to vector<2x32xi1>
    %95 = arith.select %94, %47, %8 : vector<2x32xi1>, vector<2x32xf32>
    %96 = vector.shape_cast %12 : vector<2x1xi1> to vector<2x1xi1>
    %97 = vector.broadcast %96 : vector<2x1xi1> to vector<2x32xi1>
    %98 = arith.select %97, %45, %8 : vector<2x32xi1>, vector<2x32xf32>
    %99 = vector.shape_cast %16 : vector<2x1xi1> to vector<2x1xi1>
    %100 = vector.broadcast %99 : vector<2x1xi1> to vector<2x32xi1>
    %101 = arith.select %100, %78, %8 : vector<2x32xi1>, vector<2x32xf32>
    %102 = vector.shape_cast %16 : vector<2x1xi1> to vector<2x1xi1>
    %103 = vector.broadcast %102 : vector<2x1xi1> to vector<2x32xi1>
    %104 = arith.select %103, %76, %8 : vector<2x32xi1>, vector<2x32xf32>
    %c1_38 = arith.constant 1 : index
    %c0_39 = arith.constant 0 : index
    %c0_40 = arith.constant 0 : index
    %105 = vector.load %arg1[%c1_38, %c0_39, %c0_40] : memref<8x2x1xf32, #tpu.memory_space<vmem>>, vector<1x2x1xf32>
    %106 = vector.shape_cast %105 : vector<1x2x1xf32> to vector<2x1xf32>
    %cst_41 = arith.constant 5.000000e-01 : f32
    %107 = vector.broadcast %cst_41 : f32 to vector<2x1xf32>
    %108 = arith.cmpf ogt, %106, %107 : vector<2x1xf32>
    %c6 = arith.constant 6 : index
    %c0_42 = arith.constant 0 : index
    %c0_43 = arith.constant 0 : index
    %109 = vector.load %arg1[%c6, %c0_42, %c0_43] : memref<8x2x1xf32, #tpu.memory_space<vmem>>, vector<1x2x1xf32>
    %110 = vector.shape_cast %109 : vector<1x2x1xf32> to vector<2x1xf32>
    %cst_44 = arith.constant 5.000000e-01 : f32
    %111 = vector.broadcast %cst_44 : f32 to vector<2x1xf32>
    %112 = arith.cmpf ogt, %110, %111 : vector<2x1xf32>
    %c1_45 = arith.constant 1 : index
    %c0_46 = arith.constant 0 : index
    %c0_47 = arith.constant 0 : index
    %113 = vector.load %arg0[%c1_45, %c0_46, %c0_47] : memref<8x2x32xf32, #tpu.memory_space<vmem>>, vector<1x2x32xf32>
    %114 = vector.shape_cast %113 : vector<1x2x32xf32> to vector<2x32xf32>
    %115 = tpu.concatenate %114, %95 in 1 : vector<2x32xf32>, vector<2x32xf32> -> vector<2x64xf32>
    %cst_48 = arith.constant dense<0.000000e+00> : vector<2x128xf32>
    %116 = tpu.matmul %115, %1, %cst_48 {dimension_numbers = #tpu.dot_dimension_numbers<[1], [0], [0], [1], [0, 0, 1, 1], [], []>} : vector<2x64xf32>, vector<64x128xf32>, vector<2x128xf32> -> vector<2x128xf32>
    %117 = vector.broadcast %5 : vector<1x128xf32> to vector<2x128xf32>
    %118 = arith.addf %116, %117 : vector<2x128xf32>
    %119 = vector.extract_strided_slice %118 {offsets = [0, 0], sizes = [2, 32], strides = [1, 1]} : vector<2x128xf32> to vector<2x32xf32>
    %120 = arith.negf %119 : vector<2x32xf32>
    %121 = math.exp %120 : vector<2x32xf32>
    %cst_49 = arith.constant 1.000000e+00 : f32
    %122 = vector.broadcast %cst_49 : f32 to vector<2x32xf32>
    %123 = arith.addf %122, %121 : vector<2x32xf32>
    %124 = arith.divf %122, %123 : vector<2x32xf32>
    %125 = vector.extract_strided_slice %118 {offsets = [0, 32], sizes = [2, 32], strides = [1, 1]} : vector<2x128xf32> to vector<2x32xf32>
    %126 = arith.negf %125 : vector<2x32xf32>
    %127 = math.exp %126 : vector<2x32xf32>
    %cst_50 = arith.constant 1.000000e+00 : f32
    %128 = vector.broadcast %cst_50 : f32 to vector<2x32xf32>
    %129 = arith.addf %128, %127 : vector<2x32xf32>
    %130 = arith.divf %128, %129 : vector<2x32xf32>
    %131 = vector.extract_strided_slice %118 {offsets = [0, 64], sizes = [2, 32], strides = [1, 1]} : vector<2x128xf32> to vector<2x32xf32>
    %132 = math.tanh %131 : vector<2x32xf32>
    %133 = vector.extract_strided_slice %118 {offsets = [0, 96], sizes = [2, 32], strides = [1, 1]} : vector<2x128xf32> to vector<2x32xf32>
    %134 = arith.negf %133 : vector<2x32xf32>
    %135 = math.exp %134 : vector<2x32xf32>
    %cst_51 = arith.constant 1.000000e+00 : f32
    %136 = vector.broadcast %cst_51 : f32 to vector<2x32xf32>
    %137 = arith.addf %136, %135 : vector<2x32xf32>
    %138 = arith.divf %136, %137 : vector<2x32xf32>
    %139 = arith.mulf %130, %98 : vector<2x32xf32>
    %140 = arith.mulf %124, %132 : vector<2x32xf32>
    %141 = arith.addf %139, %140 : vector<2x32xf32>
    %142 = math.tanh %141 : vector<2x32xf32>
    %143 = arith.mulf %138, %142 : vector<2x32xf32>
    %c6_52 = arith.constant 6 : index
    %c0_53 = arith.constant 0 : index
    %c0_54 = arith.constant 0 : index
    %144 = vector.load %arg0[%c6_52, %c0_53, %c0_54] : memref<8x2x32xf32, #tpu.memory_space<vmem>>, vector<1x2x32xf32>
    %145 = vector.shape_cast %144 : vector<1x2x32xf32> to vector<2x32xf32>
    %146 = tpu.concatenate %145, %101 in 1 : vector<2x32xf32>, vector<2x32xf32> -> vector<2x64xf32>
    %cst_55 = arith.constant dense<0.000000e+00> : vector<2x128xf32>
    %147 = tpu.matmul %146, %3, %cst_55 {dimension_numbers = #tpu.dot_dimension_numbers<[1], [0], [0], [1], [0, 0, 1, 1], [], []>} : vector<2x64xf32>, vector<64x128xf32>, vector<2x128xf32> -> vector<2x128xf32>
    %148 = vector.broadcast %7 : vector<1x128xf32> to vector<2x128xf32>
    %149 = arith.addf %147, %148 : vector<2x128xf32>
    %150 = vector.extract_strided_slice %149 {offsets = [0, 0], sizes = [2, 32], strides = [1, 1]} : vector<2x128xf32> to vector<2x32xf32>
    %151 = arith.negf %150 : vector<2x32xf32>
    %152 = math.exp %151 : vector<2x32xf32>
    %cst_56 = arith.constant 1.000000e+00 : f32
    %153 = vector.broadcast %cst_56 : f32 to vector<2x32xf32>
    %154 = arith.addf %153, %152 : vector<2x32xf32>
    %155 = arith.divf %153, %154 : vector<2x32xf32>
    %156 = vector.extract_strided_slice %149 {offsets = [0, 32], sizes = [2, 32], strides = [1, 1]} : vector<2x128xf32> to vector<2x32xf32>
    %157 = arith.negf %156 : vector<2x32xf32>
    %158 = math.exp %157 : vector<2x32xf32>
    %cst_57 = arith.constant 1.000000e+00 : f32
    %159 = vector.broadcast %cst_57 : f32 to vector<2x32xf32>
    %160 = arith.addf %159, %158 : vector<2x32xf32>
    %161 = arith.divf %159, %160 : vector<2x32xf32>
    %162 = vector.extract_strided_slice %149 {offsets = [0, 64], sizes = [2, 32], strides = [1, 1]} : vector<2x128xf32> to vector<2x32xf32>
    %163 = math.tanh %162 : vector<2x32xf32>
    %164 = vector.extract_strided_slice %149 {offsets = [0, 96], sizes = [2, 32], strides = [1, 1]} : vector<2x128xf32> to vector<2x32xf32>
    %165 = arith.negf %164 : vector<2x32xf32>
    %166 = math.exp %165 : vector<2x32xf32>
    %cst_58 = arith.constant 1.000000e+00 : f32
    %167 = vector.broadcast %cst_58 : f32 to vector<2x32xf32>
    %168 = arith.addf %167, %166 : vector<2x32xf32>
    %169 = arith.divf %167, %168 : vector<2x32xf32>
    %170 = arith.mulf %161, %104 : vector<2x32xf32>
    %171 = arith.mulf %155, %163 : vector<2x32xf32>
    %172 = arith.addf %170, %171 : vector<2x32xf32>
    %173 = math.tanh %172 : vector<2x32xf32>
    %174 = arith.mulf %169, %173 : vector<2x32xf32>
    %cst_59 = arith.constant 0.000000e+00 : f32
    %175 = vector.shape_cast %108 : vector<2x1xi1> to vector<2x1xi1>
    %176 = vector.broadcast %175 : vector<2x1xi1> to vector<2x32xi1>
    %177 = vector.broadcast %cst_59 : f32 to vector<2x32xf32>
    %178 = arith.select %176, %143, %177 : vector<2x32xi1>, vector<2x32xf32>
    %c1_60 = arith.constant 1 : index
    %c0_61 = arith.constant 0 : index
    %c0_62 = arith.constant 0 : index
    %179 = vector.load %arg9[%c1_60, %c0_61, %c0_62] : memref<8x2x64xf32, #tpu.memory_space<vmem>>, vector<1x2x32xf32>
    %180 = vector.shape_cast %179 : vector<1x2x32xf32> to vector<2x32xf32>
    %181 = vector.shape_cast %178 : vector<2x32xf32> to vector<1x2x32xf32>
    tpu.vector_store %arg9[%c1_60, %c0_61, %c0_62], %181 {strides = array<i32>} : memref<8x2x64xf32, #tpu.memory_space<vmem>>, vector<1x2x32xf32>,
    %cst_63 = arith.constant 0.000000e+00 : f32
    %182 = vector.shape_cast %112 : vector<2x1xi1> to vector<2x1xi1>
    %183 = vector.broadcast %182 : vector<2x1xi1> to vector<2x32xi1>
    %184 = vector.broadcast %cst_63 : f32 to vector<2x32xf32>
    %185 = arith.select %183, %174, %184 : vector<2x32xi1>, vector<2x32xf32>
    %c6_64 = arith.constant 6 : index
    %c0_65 = arith.constant 0 : index
    %c32_66 = arith.constant 32 : index
    %186 = vector.load %arg9[%c6_64, %c0_65, %c32_66] : memref<8x2x64xf32, #tpu.memory_space<vmem>>, vector<1x2x32xf32>
    %187 = vector.shape_cast %186 : vector<1x2x32xf32> to vector<2x32xf32>
    %188 = vector.shape_cast %185 : vector<2x32xf32> to vector<1x2x32xf32>
    tpu.vector_store %arg9[%c6_64, %c0_65, %c32_66], %188 {strides = array<i32>} : memref<8x2x64xf32, #tpu.memory_space<vmem>>, vector<1x2x32xf32>,
    %189 = vector.shape_cast %108 : vector<2x1xi1> to vector<2x1xi1>
    %190 = vector.broadcast %189 : vector<2x1xi1> to vector<2x32xi1>
    %191 = arith.select %190, %143, %95 : vector<2x32xi1>, vector<2x32xf32>
    %192 = vector.shape_cast %108 : vector<2x1xi1> to vector<2x1xi1>
    %193 = vector.broadcast %192 : vector<2x1xi1> to vector<2x32xi1>
    %194 = arith.select %193, %141, %98 : vector<2x32xi1>, vector<2x32xf32>
    %195 = vector.shape_cast %112 : vector<2x1xi1> to vector<2x1xi1>
    %196 = vector.broadcast %195 : vector<2x1xi1> to vector<2x32xi1>
    %197 = arith.select %196, %174, %101 : vector<2x32xi1>, vector<2x32xf32>
    %198 = vector.shape_cast %112 : vector<2x1xi1> to vector<2x1xi1>
    %199 = vector.broadcast %198 : vector<2x1xi1> to vector<2x32xi1>
    %200 = arith.select %199, %172, %104 : vector<2x32xi1>, vector<2x32xf32>
    %c2 = arith.constant 2 : index
    %c0_67 = arith.constant 0 : index
    %c0_68 = arith.constant 0 : index
    %201 = vector.load %arg1[%c2, %c0_67, %c0_68] : memref<8x2x1xf32, #tpu.memory_space<vmem>>, vector<1x2x1xf32>
    %202 = vector.shape_cast %201 : vector<1x2x1xf32> to vector<2x1xf32>
    %cst_69 = arith.constant 5.000000e-01 : f32
    %203 = vector.broadcast %cst_69 : f32 to vector<2x1xf32>
    %204 = arith.cmpf ogt, %202, %203 : vector<2x1xf32>
    %c5 = arith.constant 5 : index
    %c0_70 = arith.constant 0 : index
    %c0_71 = arith.constant 0 : index
    %205 = vector.load %arg1[%c5, %c0_70, %c0_71] : memref<8x2x1xf32, #tpu.memory_space<vmem>>, vector<1x2x1xf32>
    %206 = vector.shape_cast %205 : vector<1x2x1xf32> to vector<2x1xf32>
    %cst_72 = arith.constant 5.000000e-01 : f32
    %207 = vector.broadcast %cst_72 : f32 to vector<2x1xf32>
    %208 = arith.cmpf ogt, %206, %207 : vector<2x1xf32>
    %c2_73 = arith.constant 2 : index
    %c0_74 = arith.constant 0 : index
    %c0_75 = arith.constant 0 : index
    %209 = vector.load %arg0[%c2_73, %c0_74, %c0_75] : memref<8x2x32xf32, #tpu.memory_space<vmem>>, vector<1x2x32xf32>
    %210 = vector.shape_cast %209 : vector<1x2x32xf32> to vector<2x32xf32>
    %211 = tpu.concatenate %210, %191 in 1 : vector<2x32xf32>, vector<2x32xf32> -> vector<2x64xf32>
    %cst_76 = arith.constant dense<0.000000e+00> : vector<2x128xf32>
    %212 = tpu.matmul %211, %1, %cst_76 {dimension_numbers = #tpu.dot_dimension_numbers<[1], [0], [0], [1], [0, 0, 1, 1], [], []>} : vector<2x64xf32>, vector<64x128xf32>, vector<2x128xf32> -> vector<2x128xf32>
    %213 = vector.broadcast %5 : vector<1x128xf32> to vector<2x128xf32>
    %214 = arith.addf %212, %213 : vector<2x128xf32>
    %215 = vector.extract_strided_slice %214 {offsets = [0, 0], sizes = [2, 32], strides = [1, 1]} : vector<2x128xf32> to vector<2x32xf32>
    %216 = arith.negf %215 : vector<2x32xf32>
    %217 = math.exp %216 : vector<2x32xf32>
    %cst_77 = arith.constant 1.000000e+00 : f32
    %218 = vector.broadcast %cst_77 : f32 to vector<2x32xf32>
    %219 = arith.addf %218, %217 : vector<2x32xf32>
    %220 = arith.divf %218, %219 : vector<2x32xf32>
    %221 = vector.extract_strided_slice %214 {offsets = [0, 32], sizes = [2, 32], strides = [1, 1]} : vector<2x128xf32> to vector<2x32xf32>
    %222 = arith.negf %221 : vector<2x32xf32>
    %223 = math.exp %222 : vector<2x32xf32>
    %cst_78 = arith.constant 1.000000e+00 : f32
    %224 = vector.broadcast %cst_78 : f32 to vector<2x32xf32>
    %225 = arith.addf %224, %223 : vector<2x32xf32>
    %226 = arith.divf %224, %225 : vector<2x32xf32>
    %227 = vector.extract_strided_slice %214 {offsets = [0, 64], sizes = [2, 32], strides = [1, 1]} : vector<2x128xf32> to vector<2x32xf32>
    %228 = math.tanh %227 : vector<2x32xf32>
    %229 = vector.extract_strided_slice %214 {offsets = [0, 96], sizes = [2, 32], strides = [1, 1]} : vector<2x128xf32> to vector<2x32xf32>
    %230 = arith.negf %229 : vector<2x32xf32>
    %231 = math.exp %230 : vector<2x32xf32>
    %cst_79 = arith.constant 1.000000e+00 : f32
    %232 = vector.broadcast %cst_79 : f32 to vector<2x32xf32>
    %233 = arith.addf %232, %231 : vector<2x32xf32>
    %234 = arith.divf %232, %233 : vector<2x32xf32>
    %235 = arith.mulf %226, %194 : vector<2x32xf32>
    %236 = arith.mulf %220, %228 : vector<2x32xf32>
    %237 = arith.addf %235, %236 : vector<2x32xf32>
    %238 = math.tanh %237 : vector<2x32xf32>
    %239 = arith.mulf %234, %238 : vector<2x32xf32>
    %c5_80 = arith.constant 5 : index
    %c0_81 = arith.constant 0 : index
    %c0_82 = arith.constant 0 : index
    %240 = vector.load %arg0[%c5_80, %c0_81, %c0_82] : memref<8x2x32xf32, #tpu.memory_space<vmem>>, vector<1x2x32xf32>
    %241 = vector.shape_cast %240 : vector<1x2x32xf32> to vector<2x32xf32>
    %242 = tpu.concatenate %241, %197 in 1 : vector<2x32xf32>, vector<2x32xf32> -> vector<2x64xf32>
    %cst_83 = arith.constant dense<0.000000e+00> : vector<2x128xf32>
    %243 = tpu.matmul %242, %3, %cst_83 {dimension_numbers = #tpu.dot_dimension_numbers<[1], [0], [0], [1], [0, 0, 1, 1], [], []>} : vector<2x64xf32>, vector<64x128xf32>, vector<2x128xf32> -> vector<2x128xf32>
    %244 = vector.broadcast %7 : vector<1x128xf32> to vector<2x128xf32>
    %245 = arith.addf %243, %244 : vector<2x128xf32>
    %246 = vector.extract_strided_slice %245 {offsets = [0, 0], sizes = [2, 32], strides = [1, 1]} : vector<2x128xf32> to vector<2x32xf32>
    %247 = arith.negf %246 : vector<2x32xf32>
    %248 = math.exp %247 : vector<2x32xf32>
    %cst_84 = arith.constant 1.000000e+00 : f32
    %249 = vector.broadcast %cst_84 : f32 to vector<2x32xf32>
    %250 = arith.addf %249, %248 : vector<2x32xf32>
    %251 = arith.divf %249, %250 : vector<2x32xf32>
    %252 = vector.extract_strided_slice %245 {offsets = [0, 32], sizes = [2, 32], strides = [1, 1]} : vector<2x128xf32> to vector<2x32xf32>
    %253 = arith.negf %252 : vector<2x32xf32>
    %254 = math.exp %253 : vector<2x32xf32>
    %cst_85 = arith.constant 1.000000e+00 : f32
    %255 = vector.broadcast %cst_85 : f32 to vector<2x32xf32>
    %256 = arith.addf %255, %254 : vector<2x32xf32>
    %257 = arith.divf %255, %256 : vector<2x32xf32>
    %258 = vector.extract_strided_slice %245 {offsets = [0, 64], sizes = [2, 32], strides = [1, 1]} : vector<2x128xf32> to vector<2x32xf32>
    %259 = math.tanh %258 : vector<2x32xf32>
    %260 = vector.extract_strided_slice %245 {offsets = [0, 96], sizes = [2, 32], strides = [1, 1]} : vector<2x128xf32> to vector<2x32xf32>
    %261 = arith.negf %260 : vector<2x32xf32>
    %262 = math.exp %261 : vector<2x32xf32>
    %cst_86 = arith.constant 1.000000e+00 : f32
    %263 = vector.broadcast %cst_86 : f32 to vector<2x32xf32>
    %264 = arith.addf %263, %262 : vector<2x32xf32>
    %265 = arith.divf %263, %264 : vector<2x32xf32>
    %266 = arith.mulf %257, %200 : vector<2x32xf32>
    %267 = arith.mulf %251, %259 : vector<2x32xf32>
    %268 = arith.addf %266, %267 : vector<2x32xf32>
    %269 = math.tanh %268 : vector<2x32xf32>
    %270 = arith.mulf %265, %269 : vector<2x32xf32>
    %cst_87 = arith.constant 0.000000e+00 : f32
    %271 = vector.shape_cast %204 : vector<2x1xi1> to vector<2x1xi1>
    %272 = vector.broadcast %271 : vector<2x1xi1> to vector<2x32xi1>
    %273 = vector.broadcast %cst_87 : f32 to vector<2x32xf32>
    %274 = arith.select %272, %239, %273 : vector<2x32xi1>, vector<2x32xf32>
    %c2_88 = arith.constant 2 : index
    %c0_89 = arith.constant 0 : index
    %c0_90 = arith.constant 0 : index
    %275 = vector.load %arg9[%c2_88, %c0_89, %c0_90] : memref<8x2x64xf32, #tpu.memory_space<vmem>>, vector<1x2x32xf32>
    %276 = vector.shape_cast %275 : vector<1x2x32xf32> to vector<2x32xf32>
    %277 = vector.shape_cast %274 : vector<2x32xf32> to vector<1x2x32xf32>
    tpu.vector_store %arg9[%c2_88, %c0_89, %c0_90], %277 {strides = array<i32>} : memref<8x2x64xf32, #tpu.memory_space<vmem>>, vector<1x2x32xf32>,
    %cst_91 = arith.constant 0.000000e+00 : f32
    %278 = vector.shape_cast %208 : vector<2x1xi1> to vector<2x1xi1>
    %279 = vector.broadcast %278 : vector<2x1xi1> to vector<2x32xi1>
    %280 = vector.broadcast %cst_91 : f32 to vector<2x32xf32>
    %281 = arith.select %279, %270, %280 : vector<2x32xi1>, vector<2x32xf32>
    %c5_92 = arith.constant 5 : index
    %c0_93 = arith.constant 0 : index
    %c32_94 = arith.constant 32 : index
    %282 = vector.load %arg9[%c5_92, %c0_93, %c32_94] : memref<8x2x64xf32, #tpu.memory_space<vmem>>, vector<1x2x32xf32>
    %283 = vector.shape_cast %282 : vector<1x2x32xf32> to vector<2x32xf32>
    %284 = vector.shape_cast %281 : vector<2x32xf32> to vector<1x2x32xf32>
    tpu.vector_store %arg9[%c5_92, %c0_93, %c32_94], %284 {strides = array<i32>} : memref<8x2x64xf32, #tpu.memory_space<vmem>>, vector<1x2x32xf32>,
    %285 = vector.shape_cast %204 : vector<2x1xi1> to vector<2x1xi1>
    %286 = vector.broadcast %285 : vector<2x1xi1> to vector<2x32xi1>
    %287 = arith.select %286, %239, %191 : vector<2x32xi1>, vector<2x32xf32>
    %288 = vector.shape_cast %204 : vector<2x1xi1> to vector<2x1xi1>
    %289 = vector.broadcast %288 : vector<2x1xi1> to vector<2x32xi1>
    %290 = arith.select %289, %237, %194 : vector<2x32xi1>, vector<2x32xf32>
    %291 = vector.shape_cast %208 : vector<2x1xi1> to vector<2x1xi1>
    %292 = vector.broadcast %291 : vector<2x1xi1> to vector<2x32xi1>
    %293 = arith.select %292, %270, %197 : vector<2x32xi1>, vector<2x32xf32>
    %294 = vector.shape_cast %208 : vector<2x1xi1> to vector<2x1xi1>
    %295 = vector.broadcast %294 : vector<2x1xi1> to vector<2x32xi1>
    %296 = arith.select %295, %268, %200 : vector<2x32xi1>, vector<2x32xf32>
    %c3 = arith.constant 3 : index
    %c0_95 = arith.constant 0 : index
    %c0_96 = arith.constant 0 : index
    %297 = vector.load %arg1[%c3, %c0_95, %c0_96] : memref<8x2x1xf32, #tpu.memory_space<vmem>>, vector<1x2x1xf32>
    %298 = vector.shape_cast %297 : vector<1x2x1xf32> to vector<2x1xf32>
    %cst_97 = arith.constant 5.000000e-01 : f32
    %299 = vector.broadcast %cst_97 : f32 to vector<2x1xf32>
    %300 = arith.cmpf ogt, %298, %299 : vector<2x1xf32>
    %c4 = arith.constant 4 : index
    %c0_98 = arith.constant 0 : index
    %c0_99 = arith.constant 0 : index
    %301 = vector.load %arg1[%c4, %c0_98, %c0_99] : memref<8x2x1xf32, #tpu.memory_space<vmem>>, vector<1x2x1xf32>
    %302 = vector.shape_cast %301 : vector<1x2x1xf32> to vector<2x1xf32>
    %cst_100 = arith.constant 5.000000e-01 : f32
    %303 = vector.broadcast %cst_100 : f32 to vector<2x1xf32>
    %304 = arith.cmpf ogt, %302, %303 : vector<2x1xf32>
    %c3_101 = arith.constant 3 : index
    %c0_102 = arith.constant 0 : index
    %c0_103 = arith.constant 0 : index
    %305 = vector.load %arg0[%c3_101, %c0_102, %c0_103] : memref<8x2x32xf32, #tpu.memory_space<vmem>>, vector<1x2x32xf32>
    %306 = vector.shape_cast %305 : vector<1x2x32xf32> to vector<2x32xf32>
    %307 = tpu.concatenate %306, %287 in 1 : vector<2x32xf32>, vector<2x32xf32> -> vector<2x64xf32>
    %cst_104 = arith.constant dense<0.000000e+00> : vector<2x128xf32>
    %308 = tpu.matmul %307, %1, %cst_104 {dimension_numbers = #tpu.dot_dimension_numbers<[1], [0], [0], [1], [0, 0, 1, 1], [], []>} : vector<2x64xf32>, vector<64x128xf32>, vector<2x128xf32> -> vector<2x128xf32>
    %309 = vector.broadcast %5 : vector<1x128xf32> to vector<2x128xf32>
    %310 = arith.addf %308, %309 : vector<2x128xf32>
    %311 = vector.extract_strided_slice %310 {offsets = [0, 0], sizes = [2, 32], strides = [1, 1]} : vector<2x128xf32> to vector<2x32xf32>
    %312 = arith.negf %311 : vector<2x32xf32>
    %313 = math.exp %312 : vector<2x32xf32>
    %cst_105 = arith.constant 1.000000e+00 : f32
    %314 = vector.broadcast %cst_105 : f32 to vector<2x32xf32>
    %315 = arith.addf %314, %313 : vector<2x32xf32>
    %316 = arith.divf %314, %315 : vector<2x32xf32>
    %317 = vector.extract_strided_slice %310 {offsets = [0, 32], sizes = [2, 32], strides = [1, 1]} : vector<2x128xf32> to vector<2x32xf32>
    %318 = arith.negf %317 : vector<2x32xf32>
    %319 = math.exp %318 : vector<2x32xf32>
    %cst_106 = arith.constant 1.000000e+00 : f32
    %320 = vector.broadcast %cst_106 : f32 to vector<2x32xf32>
    %321 = arith.addf %320, %319 : vector<2x32xf32>
    %322 = arith.divf %320, %321 : vector<2x32xf32>
    %323 = vector.extract_strided_slice %310 {offsets = [0, 64], sizes = [2, 32], strides = [1, 1]} : vector<2x128xf32> to vector<2x32xf32>
    %324 = math.tanh %323 : vector<2x32xf32>
    %325 = vector.extract_strided_slice %310 {offsets = [0, 96], sizes = [2, 32], strides = [1, 1]} : vector<2x128xf32> to vector<2x32xf32>
    %326 = arith.negf %325 : vector<2x32xf32>
    %327 = math.exp %326 : vector<2x32xf32>
    %cst_107 = arith.constant 1.000000e+00 : f32
    %328 = vector.broadcast %cst_107 : f32 to vector<2x32xf32>
    %329 = arith.addf %328, %327 : vector<2x32xf32>
    %330 = arith.divf %328, %329 : vector<2x32xf32>
    %331 = arith.mulf %322, %290 : vector<2x32xf32>
    %332 = arith.mulf %316, %324 : vector<2x32xf32>
    %333 = arith.addf %331, %332 : vector<2x32xf32>
    %334 = math.tanh %333 : vector<2x32xf32>
    %335 = arith.mulf %330, %334 : vector<2x32xf32>
    %c4_108 = arith.constant 4 : index
    %c0_109 = arith.constant 0 : index
    %c0_110 = arith.constant 0 : index
    %336 = vector.load %arg0[%c4_108, %c0_109, %c0_110] : memref<8x2x32xf32, #tpu.memory_space<vmem>>, vector<1x2x32xf32>
    %337 = vector.shape_cast %336 : vector<1x2x32xf32> to vector<2x32xf32>
    %338 = tpu.concatenate %337, %293 in 1 : vector<2x32xf32>, vector<2x32xf32> -> vector<2x64xf32>
    %cst_111 = arith.constant dense<0.000000e+00> : vector<2x128xf32>
    %339 = tpu.matmul %338, %3, %cst_111 {dimension_numbers = #tpu.dot_dimension_numbers<[1], [0], [0], [1], [0, 0, 1, 1], [], []>} : vector<2x64xf32>, vector<64x128xf32>, vector<2x128xf32> -> vector<2x128xf32>
    %340 = vector.broadcast %7 : vector<1x128xf32> to vector<2x128xf32>
    %341 = arith.addf %339, %340 : vector<2x128xf32>
    %342 = vector.extract_strided_slice %341 {offsets = [0, 0], sizes = [2, 32], strides = [1, 1]} : vector<2x128xf32> to vector<2x32xf32>
    %343 = arith.negf %342 : vector<2x32xf32>
    %344 = math.exp %343 : vector<2x32xf32>
    %cst_112 = arith.constant 1.000000e+00 : f32
    %345 = vector.broadcast %cst_112 : f32 to vector<2x32xf32>
    %346 = arith.addf %345, %344 : vector<2x32xf32>
    %347 = arith.divf %345, %346 : vector<2x32xf32>
    %348 = vector.extract_strided_slice %341 {offsets = [0, 32], sizes = [2, 32], strides = [1, 1]} : vector<2x128xf32> to vector<2x32xf32>
    %349 = arith.negf %348 : vector<2x32xf32>
    %350 = math.exp %349 : vector<2x32xf32>
    %cst_113 = arith.constant 1.000000e+00 : f32
    %351 = vector.broadcast %cst_113 : f32 to vector<2x32xf32>
    %352 = arith.addf %351, %350 : vector<2x32xf32>
    %353 = arith.divf %351, %352 : vector<2x32xf32>
    %354 = vector.extract_strided_slice %341 {offsets = [0, 64], sizes = [2, 32], strides = [1, 1]} : vector<2x128xf32> to vector<2x32xf32>
    %355 = math.tanh %354 : vector<2x32xf32>
    %356 = vector.extract_strided_slice %341 {offsets = [0, 96], sizes = [2, 32], strides = [1, 1]} : vector<2x128xf32> to vector<2x32xf32>
    %357 = arith.negf %356 : vector<2x32xf32>
    %358 = math.exp %357 : vector<2x32xf32>
    %cst_114 = arith.constant 1.000000e+00 : f32
    %359 = vector.broadcast %cst_114 : f32 to vector<2x32xf32>
    %360 = arith.addf %359, %358 : vector<2x32xf32>
    %361 = arith.divf %359, %360 : vector<2x32xf32>
    %362 = arith.mulf %353, %296 : vector<2x32xf32>
    %363 = arith.mulf %347, %355 : vector<2x32xf32>
    %364 = arith.addf %362, %363 : vector<2x32xf32>
    %365 = math.tanh %364 : vector<2x32xf32>
    %366 = arith.mulf %361, %365 : vector<2x32xf32>
    %cst_115 = arith.constant 0.000000e+00 : f32
    %367 = vector.shape_cast %300 : vector<2x1xi1> to vector<2x1xi1>
    %368 = vector.broadcast %367 : vector<2x1xi1> to vector<2x32xi1>
    %369 = vector.broadcast %cst_115 : f32 to vector<2x32xf32>
    %370 = arith.select %368, %335, %369 : vector<2x32xi1>, vector<2x32xf32>
    %c3_116 = arith.constant 3 : index
    %c0_117 = arith.constant 0 : index
    %c0_118 = arith.constant 0 : index
    %371 = vector.load %arg9[%c3_116, %c0_117, %c0_118] : memref<8x2x64xf32, #tpu.memory_space<vmem>>, vector<1x2x32xf32>
    %372 = vector.shape_cast %371 : vector<1x2x32xf32> to vector<2x32xf32>
    %373 = vector.shape_cast %370 : vector<2x32xf32> to vector<1x2x32xf32>
    tpu.vector_store %arg9[%c3_116, %c0_117, %c0_118], %373 {strides = array<i32>} : memref<8x2x64xf32, #tpu.memory_space<vmem>>, vector<1x2x32xf32>,
    %cst_119 = arith.constant 0.000000e+00 : f32
    %374 = vector.shape_cast %304 : vector<2x1xi1> to vector<2x1xi1>
    %375 = vector.broadcast %374 : vector<2x1xi1> to vector<2x32xi1>
    %376 = vector.broadcast %cst_119 : f32 to vector<2x32xf32>
    %377 = arith.select %375, %366, %376 : vector<2x32xi1>, vector<2x32xf32>
    %c4_120 = arith.constant 4 : index
    %c0_121 = arith.constant 0 : index
    %c32_122 = arith.constant 32 : index
    %378 = vector.load %arg9[%c4_120, %c0_121, %c32_122] : memref<8x2x64xf32, #tpu.memory_space<vmem>>, vector<1x2x32xf32>
    %379 = vector.shape_cast %378 : vector<1x2x32xf32> to vector<2x32xf32>
    %380 = vector.shape_cast %377 : vector<2x32xf32> to vector<1x2x32xf32>
    tpu.vector_store %arg9[%c4_120, %c0_121, %c32_122], %380 {strides = array<i32>} : memref<8x2x64xf32, #tpu.memory_space<vmem>>, vector<1x2x32xf32>,
    %381 = vector.shape_cast %300 : vector<2x1xi1> to vector<2x1xi1>
    %382 = vector.broadcast %381 : vector<2x1xi1> to vector<2x32xi1>
    %383 = arith.select %382, %335, %287 : vector<2x32xi1>, vector<2x32xf32>
    %384 = vector.shape_cast %300 : vector<2x1xi1> to vector<2x1xi1>
    %385 = vector.broadcast %384 : vector<2x1xi1> to vector<2x32xi1>
    %386 = arith.select %385, %333, %290 : vector<2x32xi1>, vector<2x32xf32>
    %387 = vector.shape_cast %304 : vector<2x1xi1> to vector<2x1xi1>
    %388 = vector.broadcast %387 : vector<2x1xi1> to vector<2x32xi1>
    %389 = arith.select %388, %366, %293 : vector<2x32xi1>, vector<2x32xf32>
    %390 = vector.shape_cast %304 : vector<2x1xi1> to vector<2x1xi1>
    %391 = vector.broadcast %390 : vector<2x1xi1> to vector<2x32xi1>
    %392 = arith.select %391, %364, %296 : vector<2x32xi1>, vector<2x32xf32>
    %c4_123 = arith.constant 4 : index
    %c0_124 = arith.constant 0 : index
    %c0_125 = arith.constant 0 : index
    %393 = vector.load %arg1[%c4_123, %c0_124, %c0_125] : memref<8x2x1xf32, #tpu.memory_space<vmem>>, vector<1x2x1xf32>
    %394 = vector.shape_cast %393 : vector<1x2x1xf32> to vector<2x1xf32>
    %cst_126 = arith.constant 5.000000e-01 : f32
    %395 = vector.broadcast %cst_126 : f32 to vector<2x1xf32>
    %396 = arith.cmpf ogt, %394, %395 : vector<2x1xf32>
    %c3_127 = arith.constant 3 : index
    %c0_128 = arith.constant 0 : index
    %c0_129 = arith.constant 0 : index
    %397 = vector.load %arg1[%c3_127, %c0_128, %c0_129] : memref<8x2x1xf32, #tpu.memory_space<vmem>>, vector<1x2x1xf32>
    %398 = vector.shape_cast %397 : vector<1x2x1xf32> to vector<2x1xf32>
    %cst_130 = arith.constant 5.000000e-01 : f32
    %399 = vector.broadcast %cst_130 : f32 to vector<2x1xf32>
    %400 = arith.cmpf ogt, %398, %399 : vector<2x1xf32>
    %c4_131 = arith.constant 4 : index
    %c0_132 = arith.constant 0 : index
    %c0_133 = arith.constant 0 : index
    %401 = vector.load %arg0[%c4_131, %c0_132, %c0_133] : memref<8x2x32xf32, #tpu.memory_space<vmem>>, vector<1x2x32xf32>
    %402 = vector.shape_cast %401 : vector<1x2x32xf32> to vector<2x32xf32>
    %403 = tpu.concatenate %402, %383 in 1 : vector<2x32xf32>, vector<2x32xf32> -> vector<2x64xf32>
    %cst_134 = arith.constant dense<0.000000e+00> : vector<2x128xf32>
    %404 = tpu.matmul %403, %1, %cst_134 {dimension_numbers = #tpu.dot_dimension_numbers<[1], [0], [0], [1], [0, 0, 1, 1], [], []>} : vector<2x64xf32>, vector<64x128xf32>, vector<2x128xf32> -> vector<2x128xf32>
    %405 = vector.broadcast %5 : vector<1x128xf32> to vector<2x128xf32>
    %406 = arith.addf %404, %405 : vector<2x128xf32>
    %407 = vector.extract_strided_slice %406 {offsets = [0, 0], sizes = [2, 32], strides = [1, 1]} : vector<2x128xf32> to vector<2x32xf32>
    %408 = arith.negf %407 : vector<2x32xf32>
    %409 = math.exp %408 : vector<2x32xf32>
    %cst_135 = arith.constant 1.000000e+00 : f32
    %410 = vector.broadcast %cst_135 : f32 to vector<2x32xf32>
    %411 = arith.addf %410, %409 : vector<2x32xf32>
    %412 = arith.divf %410, %411 : vector<2x32xf32>
    %413 = vector.extract_strided_slice %406 {offsets = [0, 32], sizes = [2, 32], strides = [1, 1]} : vector<2x128xf32> to vector<2x32xf32>
    %414 = arith.negf %413 : vector<2x32xf32>
    %415 = math.exp %414 : vector<2x32xf32>
    %cst_136 = arith.constant 1.000000e+00 : f32
    %416 = vector.broadcast %cst_136 : f32 to vector<2x32xf32>
    %417 = arith.addf %416, %415 : vector<2x32xf32>
    %418 = arith.divf %416, %417 : vector<2x32xf32>
    %419 = vector.extract_strided_slice %406 {offsets = [0, 64], sizes = [2, 32], strides = [1, 1]} : vector<2x128xf32> to vector<2x32xf32>
    %420 = math.tanh %419 : vector<2x32xf32>
    %421 = vector.extract_strided_slice %406 {offsets = [0, 96], sizes = [2, 32], strides = [1, 1]} : vector<2x128xf32> to vector<2x32xf32>
    %422 = arith.negf %421 : vector<2x32xf32>
    %423 = math.exp %422 : vector<2x32xf32>
    %cst_137 = arith.constant 1.000000e+00 : f32
    %424 = vector.broadcast %cst_137 : f32 to vector<2x32xf32>
    %425 = arith.addf %424, %423 : vector<2x32xf32>
    %426 = arith.divf %424, %425 : vector<2x32xf32>
    %427 = arith.mulf %418, %386 : vector<2x32xf32>
    %428 = arith.mulf %412, %420 : vector<2x32xf32>
    %429 = arith.addf %427, %428 : vector<2x32xf32>
    %430 = math.tanh %429 : vector<2x32xf32>
    %431 = arith.mulf %426, %430 : vector<2x32xf32>
    %c3_138 = arith.constant 3 : index
    %c0_139 = arith.constant 0 : index
    %c0_140 = arith.constant 0 : index
    %432 = vector.load %arg0[%c3_138, %c0_139, %c0_140] : memref<8x2x32xf32, #tpu.memory_space<vmem>>, vector<1x2x32xf32>
    %433 = vector.shape_cast %432 : vector<1x2x32xf32> to vector<2x32xf32>
    %434 = tpu.concatenate %433, %389 in 1 : vector<2x32xf32>, vector<2x32xf32> -> vector<2x64xf32>
    %cst_141 = arith.constant dense<0.000000e+00> : vector<2x128xf32>
    %435 = tpu.matmul %434, %3, %cst_141 {dimension_numbers = #tpu.dot_dimension_numbers<[1], [0], [0], [1], [0, 0, 1, 1], [], []>} : vector<2x64xf32>, vector<64x128xf32>, vector<2x128xf32> -> vector<2x128xf32>
    %436 = vector.broadcast %7 : vector<1x128xf32> to vector<2x128xf32>
    %437 = arith.addf %435, %436 : vector<2x128xf32>
    %438 = vector.extract_strided_slice %437 {offsets = [0, 0], sizes = [2, 32], strides = [1, 1]} : vector<2x128xf32> to vector<2x32xf32>
    %439 = arith.negf %438 : vector<2x32xf32>
    %440 = math.exp %439 : vector<2x32xf32>
    %cst_142 = arith.constant 1.000000e+00 : f32
    %441 = vector.broadcast %cst_142 : f32 to vector<2x32xf32>
    %442 = arith.addf %441, %440 : vector<2x32xf32>
    %443 = arith.divf %441, %442 : vector<2x32xf32>
    %444 = vector.extract_strided_slice %437 {offsets = [0, 32], sizes = [2, 32], strides = [1, 1]} : vector<2x128xf32> to vector<2x32xf32>
    %445 = arith.negf %444 : vector<2x32xf32>
    %446 = math.exp %445 : vector<2x32xf32>
    %cst_143 = arith.constant 1.000000e+00 : f32
    %447 = vector.broadcast %cst_143 : f32 to vector<2x32xf32>
    %448 = arith.addf %447, %446 : vector<2x32xf32>
    %449 = arith.divf %447, %448 : vector<2x32xf32>
    %450 = vector.extract_strided_slice %437 {offsets = [0, 64], sizes = [2, 32], strides = [1, 1]} : vector<2x128xf32> to vector<2x32xf32>
    %451 = math.tanh %450 : vector<2x32xf32>
    %452 = vector.extract_strided_slice %437 {offsets = [0, 96], sizes = [2, 32], strides = [1, 1]} : vector<2x128xf32> to vector<2x32xf32>
    %453 = arith.negf %452 : vector<2x32xf32>
    %454 = math.exp %453 : vector<2x32xf32>
    %cst_144 = arith.constant 1.000000e+00 : f32
    %455 = vector.broadcast %cst_144 : f32 to vector<2x32xf32>
    %456 = arith.addf %455, %454 : vector<2x32xf32>
    %457 = arith.divf %455, %456 : vector<2x32xf32>
    %458 = arith.mulf %449, %392 : vector<2x32xf32>
    %459 = arith.mulf %443, %451 : vector<2x32xf32>
    %460 = arith.addf %458, %459 : vector<2x32xf32>
    %461 = math.tanh %460 : vector<2x32xf32>
    %462 = arith.mulf %457, %461 : vector<2x32xf32>
    %cst_145 = arith.constant 0.000000e+00 : f32
    %463 = vector.shape_cast %396 : vector<2x1xi1> to vector<2x1xi1>
    %464 = vector.broadcast %463 : vector<2x1xi1> to vector<2x32xi1>
    %465 = vector.broadcast %cst_145 : f32 to vector<2x32xf32>
    %466 = arith.select %464, %431, %465 : vector<2x32xi1>, vector<2x32xf32>
    %c4_146 = arith.constant 4 : index
    %c0_147 = arith.constant 0 : index
    %c0_148 = arith.constant 0 : index
    %467 = vector.load %arg9[%c4_146, %c0_147, %c0_148] : memref<8x2x64xf32, #tpu.memory_space<vmem>>, vector<1x2x32xf32>
    %468 = vector.shape_cast %467 : vector<1x2x32xf32> to vector<2x32xf32>
    %469 = vector.shape_cast %466 : vector<2x32xf32> to vector<1x2x32xf32>
    tpu.vector_store %arg9[%c4_146, %c0_147, %c0_148], %469 {strides = array<i32>} : memref<8x2x64xf32, #tpu.memory_space<vmem>>, vector<1x2x32xf32>,
    %cst_149 = arith.constant 0.000000e+00 : f32
    %470 = vector.shape_cast %400 : vector<2x1xi1> to vector<2x1xi1>
    %471 = vector.broadcast %470 : vector<2x1xi1> to vector<2x32xi1>
    %472 = vector.broadcast %cst_149 : f32 to vector<2x32xf32>
    %473 = arith.select %471, %462, %472 : vector<2x32xi1>, vector<2x32xf32>
    %c3_150 = arith.constant 3 : index
    %c0_151 = arith.constant 0 : index
    %c32_152 = arith.constant 32 : index
    %474 = vector.load %arg9[%c3_150, %c0_151, %c32_152] : memref<8x2x64xf32, #tpu.memory_space<vmem>>, vector<1x2x32xf32>
    %475 = vector.shape_cast %474 : vector<1x2x32xf32> to vector<2x32xf32>
    %476 = vector.shape_cast %473 : vector<2x32xf32> to vector<1x2x32xf32>
    tpu.vector_store %arg9[%c3_150, %c0_151, %c32_152], %476 {strides = array<i32>} : memref<8x2x64xf32, #tpu.memory_space<vmem>>, vector<1x2x32xf32>,
    %477 = vector.shape_cast %396 : vector<2x1xi1> to vector<2x1xi1>
    %478 = vector.broadcast %477 : vector<2x1xi1> to vector<2x32xi1>
    %479 = arith.select %478, %431, %383 : vector<2x32xi1>, vector<2x32xf32>
    %480 = vector.shape_cast %396 : vector<2x1xi1> to vector<2x1xi1>
    %481 = vector.broadcast %480 : vector<2x1xi1> to vector<2x32xi1>
    %482 = arith.select %481, %429, %386 : vector<2x32xi1>, vector<2x32xf32>
    %483 = vector.shape_cast %400 : vector<2x1xi1> to vector<2x1xi1>
    %484 = vector.broadcast %483 : vector<2x1xi1> to vector<2x32xi1>
    %485 = arith.select %484, %462, %389 : vector<2x32xi1>, vector<2x32xf32>
    %486 = vector.shape_cast %400 : vector<2x1xi1> to vector<2x1xi1>
    %487 = vector.broadcast %486 : vector<2x1xi1> to vector<2x32xi1>
    %488 = arith.select %487, %460, %392 : vector<2x32xi1>, vector<2x32xf32>
    %c5_153 = arith.constant 5 : index
    %c0_154 = arith.constant 0 : index
    %c0_155 = arith.constant 0 : index
    %489 = vector.load %arg1[%c5_153, %c0_154, %c0_155] : memref<8x2x1xf32, #tpu.memory_space<vmem>>, vector<1x2x1xf32>
    %490 = vector.shape_cast %489 : vector<1x2x1xf32> to vector<2x1xf32>
    %cst_156 = arith.constant 5.000000e-01 : f32
    %491 = vector.broadcast %cst_156 : f32 to vector<2x1xf32>
    %492 = arith.cmpf ogt, %490, %491 : vector<2x1xf32>
    %c2_157 = arith.constant 2 : index
    %c0_158 = arith.constant 0 : index
    %c0_159 = arith.constant 0 : index
    %493 = vector.load %arg1[%c2_157, %c0_158, %c0_159] : memref<8x2x1xf32, #tpu.memory_space<vmem>>, vector<1x2x1xf32>
    %494 = vector.shape_cast %493 : vector<1x2x1xf32> to vector<2x1xf32>
    %cst_160 = arith.constant 5.000000e-01 : f32
    %495 = vector.broadcast %cst_160 : f32 to vector<2x1xf32>
    %496 = arith.cmpf ogt, %494, %495 : vector<2x1xf32>
    %c5_161 = arith.constant 5 : index
    %c0_162 = arith.constant 0 : index
    %c0_163 = arith.constant 0 : index
    %497 = vector.load %arg0[%c5_161, %c0_162, %c0_163] : memref<8x2x32xf32, #tpu.memory_space<vmem>>, vector<1x2x32xf32>
    %498 = vector.shape_cast %497 : vector<1x2x32xf32> to vector<2x32xf32>
    %499 = tpu.concatenate %498, %479 in 1 : vector<2x32xf32>, vector<2x32xf32> -> vector<2x64xf32>
    %cst_164 = arith.constant dense<0.000000e+00> : vector<2x128xf32>
    %500 = tpu.matmul %499, %1, %cst_164 {dimension_numbers = #tpu.dot_dimension_numbers<[1], [0], [0], [1], [0, 0, 1, 1], [], []>} : vector<2x64xf32>, vector<64x128xf32>, vector<2x128xf32> -> vector<2x128xf32>
    %501 = vector.broadcast %5 : vector<1x128xf32> to vector<2x128xf32>
    %502 = arith.addf %500, %501 : vector<2x128xf32>
    %503 = vector.extract_strided_slice %502 {offsets = [0, 0], sizes = [2, 32], strides = [1, 1]} : vector<2x128xf32> to vector<2x32xf32>
    %504 = arith.negf %503 : vector<2x32xf32>
    %505 = math.exp %504 : vector<2x32xf32>
    %cst_165 = arith.constant 1.000000e+00 : f32
    %506 = vector.broadcast %cst_165 : f32 to vector<2x32xf32>
    %507 = arith.addf %506, %505 : vector<2x32xf32>
    %508 = arith.divf %506, %507 : vector<2x32xf32>
    %509 = vector.extract_strided_slice %502 {offsets = [0, 32], sizes = [2, 32], strides = [1, 1]} : vector<2x128xf32> to vector<2x32xf32>
    %510 = arith.negf %509 : vector<2x32xf32>
    %511 = math.exp %510 : vector<2x32xf32>
    %cst_166 = arith.constant 1.000000e+00 : f32
    %512 = vector.broadcast %cst_166 : f32 to vector<2x32xf32>
    %513 = arith.addf %512, %511 : vector<2x32xf32>
    %514 = arith.divf %512, %513 : vector<2x32xf32>
    %515 = vector.extract_strided_slice %502 {offsets = [0, 64], sizes = [2, 32], strides = [1, 1]} : vector<2x128xf32> to vector<2x32xf32>
    %516 = math.tanh %515 : vector<2x32xf32>
    %517 = vector.extract_strided_slice %502 {offsets = [0, 96], sizes = [2, 32], strides = [1, 1]} : vector<2x128xf32> to vector<2x32xf32>
    %518 = arith.negf %517 : vector<2x32xf32>
    %519 = math.exp %518 : vector<2x32xf32>
    %cst_167 = arith.constant 1.000000e+00 : f32
    %520 = vector.broadcast %cst_167 : f32 to vector<2x32xf32>
    %521 = arith.addf %520, %519 : vector<2x32xf32>
    %522 = arith.divf %520, %521 : vector<2x32xf32>
    %523 = arith.mulf %514, %482 : vector<2x32xf32>
    %524 = arith.mulf %508, %516 : vector<2x32xf32>
    %525 = arith.addf %523, %524 : vector<2x32xf32>
    %526 = math.tanh %525 : vector<2x32xf32>
    %527 = arith.mulf %522, %526 : vector<2x32xf32>
    %c2_168 = arith.constant 2 : index
    %c0_169 = arith.constant 0 : index
    %c0_170 = arith.constant 0 : index
    %528 = vector.load %arg0[%c2_168, %c0_169, %c0_170] : memref<8x2x32xf32, #tpu.memory_space<vmem>>, vector<1x2x32xf32>
    %529 = vector.shape_cast %528 : vector<1x2x32xf32> to vector<2x32xf32>
    %530 = tpu.concatenate %529, %485 in 1 : vector<2x32xf32>, vector<2x32xf32> -> vector<2x64xf32>
    %cst_171 = arith.constant dense<0.000000e+00> : vector<2x128xf32>
    %531 = tpu.matmul %530, %3, %cst_171 {dimension_numbers = #tpu.dot_dimension_numbers<[1], [0], [0], [1], [0, 0, 1, 1], [], []>} : vector<2x64xf32>, vector<64x128xf32>, vector<2x128xf32> -> vector<2x128xf32>
    %532 = vector.broadcast %7 : vector<1x128xf32> to vector<2x128xf32>
    %533 = arith.addf %531, %532 : vector<2x128xf32>
    %534 = vector.extract_strided_slice %533 {offsets = [0, 0], sizes = [2, 32], strides = [1, 1]} : vector<2x128xf32> to vector<2x32xf32>
    %535 = arith.negf %534 : vector<2x32xf32>
    %536 = math.exp %535 : vector<2x32xf32>
    %cst_172 = arith.constant 1.000000e+00 : f32
    %537 = vector.broadcast %cst_172 : f32 to vector<2x32xf32>
    %538 = arith.addf %537, %536 : vector<2x32xf32>
    %539 = arith.divf %537, %538 : vector<2x32xf32>
    %540 = vector.extract_strided_slice %533 {offsets = [0, 32], sizes = [2, 32], strides = [1, 1]} : vector<2x128xf32> to vector<2x32xf32>
    %541 = arith.negf %540 : vector<2x32xf32>
    %542 = math.exp %541 : vector<2x32xf32>
    %cst_173 = arith.constant 1.000000e+00 : f32
    %543 = vector.broadcast %cst_173 : f32 to vector<2x32xf32>
    %544 = arith.addf %543, %542 : vector<2x32xf32>
    %545 = arith.divf %543, %544 : vector<2x32xf32>
    %546 = vector.extract_strided_slice %533 {offsets = [0, 64], sizes = [2, 32], strides = [1, 1]} : vector<2x128xf32> to vector<2x32xf32>
    %547 = math.tanh %546 : vector<2x32xf32>
    %548 = vector.extract_strided_slice %533 {offsets = [0, 96], sizes = [2, 32], strides = [1, 1]} : vector<2x128xf32> to vector<2x32xf32>
    %549 = arith.negf %548 : vector<2x32xf32>
    %550 = math.exp %549 : vector<2x32xf32>
    %cst_174 = arith.constant 1.000000e+00 : f32
    %551 = vector.broadcast %cst_174 : f32 to vector<2x32xf32>
    %552 = arith.addf %551, %550 : vector<2x32xf32>
    %553 = arith.divf %551, %552 : vector<2x32xf32>
    %554 = arith.mulf %545, %488 : vector<2x32xf32>
    %555 = arith.mulf %539, %547 : vector<2x32xf32>
    %556 = arith.addf %554, %555 : vector<2x32xf32>
    %557 = math.tanh %556 : vector<2x32xf32>
    %558 = arith.mulf %553, %557 : vector<2x32xf32>
    %cst_175 = arith.constant 0.000000e+00 : f32
    %559 = vector.shape_cast %492 : vector<2x1xi1> to vector<2x1xi1>
    %560 = vector.broadcast %559 : vector<2x1xi1> to vector<2x32xi1>
    %561 = vector.broadcast %cst_175 : f32 to vector<2x32xf32>
    %562 = arith.select %560, %527, %561 : vector<2x32xi1>, vector<2x32xf32>
    %c5_176 = arith.constant 5 : index
    %c0_177 = arith.constant 0 : index
    %c0_178 = arith.constant 0 : index
    %563 = vector.load %arg9[%c5_176, %c0_177, %c0_178] : memref<8x2x64xf32, #tpu.memory_space<vmem>>, vector<1x2x32xf32>
    %564 = vector.shape_cast %563 : vector<1x2x32xf32> to vector<2x32xf32>
    %565 = vector.shape_cast %562 : vector<2x32xf32> to vector<1x2x32xf32>
    tpu.vector_store %arg9[%c5_176, %c0_177, %c0_178], %565 {strides = array<i32>} : memref<8x2x64xf32, #tpu.memory_space<vmem>>, vector<1x2x32xf32>,
    %cst_179 = arith.constant 0.000000e+00 : f32
    %566 = vector.shape_cast %496 : vector<2x1xi1> to vector<2x1xi1>
    %567 = vector.broadcast %566 : vector<2x1xi1> to vector<2x32xi1>
    %568 = vector.broadcast %cst_179 : f32 to vector<2x32xf32>
    %569 = arith.select %567, %558, %568 : vector<2x32xi1>, vector<2x32xf32>
    %c2_180 = arith.constant 2 : index
    %c0_181 = arith.constant 0 : index
    %c32_182 = arith.constant 32 : index
    %570 = vector.load %arg9[%c2_180, %c0_181, %c32_182] : memref<8x2x64xf32, #tpu.memory_space<vmem>>, vector<1x2x32xf32>
    %571 = vector.shape_cast %570 : vector<1x2x32xf32> to vector<2x32xf32>
    %572 = vector.shape_cast %569 : vector<2x32xf32> to vector<1x2x32xf32>
    tpu.vector_store %arg9[%c2_180, %c0_181, %c32_182], %572 {strides = array<i32>} : memref<8x2x64xf32, #tpu.memory_space<vmem>>, vector<1x2x32xf32>,
    %573 = vector.shape_cast %492 : vector<2x1xi1> to vector<2x1xi1>
    %574 = vector.broadcast %573 : vector<2x1xi1> to vector<2x32xi1>
    %575 = arith.select %574, %527, %479 : vector<2x32xi1>, vector<2x32xf32>
    %576 = vector.shape_cast %492 : vector<2x1xi1> to vector<2x1xi1>
    %577 = vector.broadcast %576 : vector<2x1xi1> to vector<2x32xi1>
    %578 = arith.select %577, %525, %482 : vector<2x32xi1>, vector<2x32xf32>
    %579 = vector.shape_cast %496 : vector<2x1xi1> to vector<2x1xi1>
    %580 = vector.broadcast %579 : vector<2x1xi1> to vector<2x32xi1>
    %581 = arith.select %580, %558, %485 : vector<2x32xi1>, vector<2x32xf32>
    %582 = vector.shape_cast %496 : vector<2x1xi1> to vector<2x1xi1>
    %583 = vector.broadcast %582 : vector<2x1xi1> to vector<2x32xi1>
    %584 = arith.select %583, %556, %488 : vector<2x32xi1>, vector<2x32xf32>
    %c6_183 = arith.constant 6 : index
    %c0_184 = arith.constant 0 : index
    %c0_185 = arith.constant 0 : index
    %585 = vector.load %arg1[%c6_183, %c0_184, %c0_185] : memref<8x2x1xf32, #tpu.memory_space<vmem>>, vector<1x2x1xf32>
    %586 = vector.shape_cast %585 : vector<1x2x1xf32> to vector<2x1xf32>
    %cst_186 = arith.constant 5.000000e-01 : f32
    %587 = vector.broadcast %cst_186 : f32 to vector<2x1xf32>
    %588 = arith.cmpf ogt, %586, %587 : vector<2x1xf32>
    %c1_187 = arith.constant 1 : index
    %c0_188 = arith.constant 0 : index
    %c0_189 = arith.constant 0 : index
    %589 = vector.load %arg1[%c1_187, %c0_188, %c0_189] : memref<8x2x1xf32, #tpu.memory_space<vmem>>, vector<1x2x1xf32>
    %590 = vector.shape_cast %589 : vector<1x2x1xf32> to vector<2x1xf32>
    %cst_190 = arith.constant 5.000000e-01 : f32
    %591 = vector.broadcast %cst_190 : f32 to vector<2x1xf32>
    %592 = arith.cmpf ogt, %590, %591 : vector<2x1xf32>
    %c6_191 = arith.constant 6 : index
    %c0_192 = arith.constant 0 : index
    %c0_193 = arith.constant 0 : index
    %593 = vector.load %arg0[%c6_191, %c0_192, %c0_193] : memref<8x2x32xf32, #tpu.memory_space<vmem>>, vector<1x2x32xf32>
    %594 = vector.shape_cast %593 : vector<1x2x32xf32> to vector<2x32xf32>
    %595 = tpu.concatenate %594, %575 in 1 : vector<2x32xf32>, vector<2x32xf32> -> vector<2x64xf32>
    %cst_194 = arith.constant dense<0.000000e+00> : vector<2x128xf32>
    %596 = tpu.matmul %595, %1, %cst_194 {dimension_numbers = #tpu.dot_dimension_numbers<[1], [0], [0], [1], [0, 0, 1, 1], [], []>} : vector<2x64xf32>, vector<64x128xf32>, vector<2x128xf32> -> vector<2x128xf32>
    %597 = vector.broadcast %5 : vector<1x128xf32> to vector<2x128xf32>
    %598 = arith.addf %596, %597 : vector<2x128xf32>
    %599 = vector.extract_strided_slice %598 {offsets = [0, 0], sizes = [2, 32], strides = [1, 1]} : vector<2x128xf32> to vector<2x32xf32>
    %600 = arith.negf %599 : vector<2x32xf32>
    %601 = math.exp %600 : vector<2x32xf32>
    %cst_195 = arith.constant 1.000000e+00 : f32
    %602 = vector.broadcast %cst_195 : f32 to vector<2x32xf32>
    %603 = arith.addf %602, %601 : vector<2x32xf32>
    %604 = arith.divf %602, %603 : vector<2x32xf32>
    %605 = vector.extract_strided_slice %598 {offsets = [0, 32], sizes = [2, 32], strides = [1, 1]} : vector<2x128xf32> to vector<2x32xf32>
    %606 = arith.negf %605 : vector<2x32xf32>
    %607 = math.exp %606 : vector<2x32xf32>
    %cst_196 = arith.constant 1.000000e+00 : f32
    %608 = vector.broadcast %cst_196 : f32 to vector<2x32xf32>
    %609 = arith.addf %608, %607 : vector<2x32xf32>
    %610 = arith.divf %608, %609 : vector<2x32xf32>
    %611 = vector.extract_strided_slice %598 {offsets = [0, 64], sizes = [2, 32], strides = [1, 1]} : vector<2x128xf32> to vector<2x32xf32>
    %612 = math.tanh %611 : vector<2x32xf32>
    %613 = vector.extract_strided_slice %598 {offsets = [0, 96], sizes = [2, 32], strides = [1, 1]} : vector<2x128xf32> to vector<2x32xf32>
    %614 = arith.negf %613 : vector<2x32xf32>
    %615 = math.exp %614 : vector<2x32xf32>
    %cst_197 = arith.constant 1.000000e+00 : f32
    %616 = vector.broadcast %cst_197 : f32 to vector<2x32xf32>
    %617 = arith.addf %616, %615 : vector<2x32xf32>
    %618 = arith.divf %616, %617 : vector<2x32xf32>
    %619 = arith.mulf %610, %578 : vector<2x32xf32>
    %620 = arith.mulf %604, %612 : vector<2x32xf32>
    %621 = arith.addf %619, %620 : vector<2x32xf32>
    %622 = math.tanh %621 : vector<2x32xf32>
    %623 = arith.mulf %618, %622 : vector<2x32xf32>
    %c1_198 = arith.constant 1 : index
    %c0_199 = arith.constant 0 : index
    %c0_200 = arith.constant 0 : index
    %624 = vector.load %arg0[%c1_198, %c0_199, %c0_200] : memref<8x2x32xf32, #tpu.memory_space<vmem>>, vector<1x2x32xf32>
    %625 = vector.shape_cast %624 : vector<1x2x32xf32> to vector<2x32xf32>
    %626 = tpu.concatenate %625, %581 in 1 : vector<2x32xf32>, vector<2x32xf32> -> vector<2x64xf32>
    %cst_201 = arith.constant dense<0.000000e+00> : vector<2x128xf32>
    %627 = tpu.matmul %626, %3, %cst_201 {dimension_numbers = #tpu.dot_dimension_numbers<[1], [0], [0], [1], [0, 0, 1, 1], [], []>} : vector<2x64xf32>, vector<64x128xf32>, vector<2x128xf32> -> vector<2x128xf32>
    %628 = vector.broadcast %7 : vector<1x128xf32> to vector<2x128xf32>
    %629 = arith.addf %627, %628 : vector<2x128xf32>
    %630 = vector.extract_strided_slice %629 {offsets = [0, 0], sizes = [2, 32], strides = [1, 1]} : vector<2x128xf32> to vector<2x32xf32>
    %631 = arith.negf %630 : vector<2x32xf32>
    %632 = math.exp %631 : vector<2x32xf32>
    %cst_202 = arith.constant 1.000000e+00 : f32
    %633 = vector.broadcast %cst_202 : f32 to vector<2x32xf32>
    %634 = arith.addf %633, %632 : vector<2x32xf32>
    %635 = arith.divf %633, %634 : vector<2x32xf32>
    %636 = vector.extract_strided_slice %629 {offsets = [0, 32], sizes = [2, 32], strides = [1, 1]} : vector<2x128xf32> to vector<2x32xf32>
    %637 = arith.negf %636 : vector<2x32xf32>
    %638 = math.exp %637 : vector<2x32xf32>
    %cst_203 = arith.constant 1.000000e+00 : f32
    %639 = vector.broadcast %cst_203 : f32 to vector<2x32xf32>
    %640 = arith.addf %639, %638 : vector<2x32xf32>
    %641 = arith.divf %639, %640 : vector<2x32xf32>
    %642 = vector.extract_strided_slice %629 {offsets = [0, 64], sizes = [2, 32], strides = [1, 1]} : vector<2x128xf32> to vector<2x32xf32>
    %643 = math.tanh %642 : vector<2x32xf32>
    %644 = vector.extract_strided_slice %629 {offsets = [0, 96], sizes = [2, 32], strides = [1, 1]} : vector<2x128xf32> to vector<2x32xf32>
    %645 = arith.negf %644 : vector<2x32xf32>
    %646 = math.exp %645 : vector<2x32xf32>
    %cst_204 = arith.constant 1.000000e+00 : f32
    %647 = vector.broadcast %cst_204 : f32 to vector<2x32xf32>
    %648 = arith.addf %647, %646 : vector<2x32xf32>
    %649 = arith.divf %647, %648 : vector<2x32xf32>
    %650 = arith.mulf %641, %584 : vector<2x32xf32>
    %651 = arith.mulf %635, %643 : vector<2x32xf32>
    %652 = arith.addf %650, %651 : vector<2x32xf32>
    %653 = math.tanh %652 : vector<2x32xf32>
    %654 = arith.mulf %649, %653 : vector<2x32xf32>
    %cst_205 = arith.constant 0.000000e+00 : f32
    %655 = vector.shape_cast %588 : vector<2x1xi1> to vector<2x1xi1>
    %656 = vector.broadcast %655 : vector<2x1xi1> to vector<2x32xi1>
    %657 = vector.broadcast %cst_205 : f32 to vector<2x32xf32>
    %658 = arith.select %656, %623, %657 : vector<2x32xi1>, vector<2x32xf32>
    %c6_206 = arith.constant 6 : index
    %c0_207 = arith.constant 0 : index
    %c0_208 = arith.constant 0 : index
    %659 = vector.load %arg9[%c6_206, %c0_207, %c0_208] : memref<8x2x64xf32, #tpu.memory_space<vmem>>, vector<1x2x32xf32>
    %660 = vector.shape_cast %659 : vector<1x2x32xf32> to vector<2x32xf32>
    %661 = vector.shape_cast %658 : vector<2x32xf32> to vector<1x2x32xf32>
    tpu.vector_store %arg9[%c6_206, %c0_207, %c0_208], %661 {strides = array<i32>} : memref<8x2x64xf32, #tpu.memory_space<vmem>>, vector<1x2x32xf32>,
    %cst_209 = arith.constant 0.000000e+00 : f32
    %662 = vector.shape_cast %592 : vector<2x1xi1> to vector<2x1xi1>
    %663 = vector.broadcast %662 : vector<2x1xi1> to vector<2x32xi1>
    %664 = vector.broadcast %cst_209 : f32 to vector<2x32xf32>
    %665 = arith.select %663, %654, %664 : vector<2x32xi1>, vector<2x32xf32>
    %c1_210 = arith.constant 1 : index
    %c0_211 = arith.constant 0 : index
    %c32_212 = arith.constant 32 : index
    %666 = vector.load %arg9[%c1_210, %c0_211, %c32_212] : memref<8x2x64xf32, #tpu.memory_space<vmem>>, vector<1x2x32xf32>
    %667 = vector.shape_cast %666 : vector<1x2x32xf32> to vector<2x32xf32>
    %668 = vector.shape_cast %665 : vector<2x32xf32> to vector<1x2x32xf32>
    tpu.vector_store %arg9[%c1_210, %c0_211, %c32_212], %668 {strides = array<i32>} : memref<8x2x64xf32, #tpu.memory_space<vmem>>, vector<1x2x32xf32>,
    %669 = vector.shape_cast %588 : vector<2x1xi1> to vector<2x1xi1>
    %670 = vector.broadcast %669 : vector<2x1xi1> to vector<2x32xi1>
    %671 = arith.select %670, %623, %575 : vector<2x32xi1>, vector<2x32xf32>
    %672 = vector.shape_cast %588 : vector<2x1xi1> to vector<2x1xi1>
    %673 = vector.broadcast %672 : vector<2x1xi1> to vector<2x32xi1>
    %674 = arith.select %673, %621, %578 : vector<2x32xi1>, vector<2x32xf32>
    %675 = vector.shape_cast %592 : vector<2x1xi1> to vector<2x1xi1>
    %676 = vector.broadcast %675 : vector<2x1xi1> to vector<2x32xi1>
    %677 = arith.select %676, %654, %581 : vector<2x32xi1>, vector<2x32xf32>
    %678 = vector.shape_cast %592 : vector<2x1xi1> to vector<2x1xi1>
    %679 = vector.broadcast %678 : vector<2x1xi1> to vector<2x32xi1>
    %680 = arith.select %679, %652, %584 : vector<2x32xi1>, vector<2x32xf32>
    %c7_213 = arith.constant 7 : index
    %c0_214 = arith.constant 0 : index
    %c0_215 = arith.constant 0 : index
    %681 = vector.load %arg1[%c7_213, %c0_214, %c0_215] : memref<8x2x1xf32, #tpu.memory_space<vmem>>, vector<1x2x1xf32>
    %682 = vector.shape_cast %681 : vector<1x2x1xf32> to vector<2x1xf32>
    %cst_216 = arith.constant 5.000000e-01 : f32
    %683 = vector.broadcast %cst_216 : f32 to vector<2x1xf32>
    %684 = arith.cmpf ogt, %682, %683 : vector<2x1xf32>
    %c0_217 = arith.constant 0 : index
    %c0_218 = arith.constant 0 : index
    %c0_219 = arith.constant 0 : index
    %685 = vector.load %arg1[%c0_217, %c0_218, %c0_219] : memref<8x2x1xf32, #tpu.memory_space<vmem>>, vector<1x2x1xf32>
    %686 = vector.shape_cast %685 : vector<1x2x1xf32> to vector<2x1xf32>
    %cst_220 = arith.constant 5.000000e-01 : f32
    %687 = vector.broadcast %cst_220 : f32 to vector<2x1xf32>
    %688 = arith.cmpf ogt, %686, %687 : vector<2x1xf32>
    %c7_221 = arith.constant 7 : index
    %c0_222 = arith.constant 0 : index
    %c0_223 = arith.constant 0 : index
    %689 = vector.load %arg0[%c7_221, %c0_222, %c0_223] : memref<8x2x32xf32, #tpu.memory_space<vmem>>, vector<1x2x32xf32>
    %690 = vector.shape_cast %689 : vector<1x2x32xf32> to vector<2x32xf32>
    %691 = tpu.concatenate %690, %671 in 1 : vector<2x32xf32>, vector<2x32xf32> -> vector<2x64xf32>
    %cst_224 = arith.constant dense<0.000000e+00> : vector<2x128xf32>
    %692 = tpu.matmul %691, %1, %cst_224 {dimension_numbers = #tpu.dot_dimension_numbers<[1], [0], [0], [1], [0, 0, 1, 1], [], []>} : vector<2x64xf32>, vector<64x128xf32>, vector<2x128xf32> -> vector<2x128xf32>
    %693 = vector.broadcast %5 : vector<1x128xf32> to vector<2x128xf32>
    %694 = arith.addf %692, %693 : vector<2x128xf32>
    %695 = vector.extract_strided_slice %694 {offsets = [0, 0], sizes = [2, 32], strides = [1, 1]} : vector<2x128xf32> to vector<2x32xf32>
    %696 = arith.negf %695 : vector<2x32xf32>
    %697 = math.exp %696 : vector<2x32xf32>
    %cst_225 = arith.constant 1.000000e+00 : f32
    %698 = vector.broadcast %cst_225 : f32 to vector<2x32xf32>
    %699 = arith.addf %698, %697 : vector<2x32xf32>
    %700 = arith.divf %698, %699 : vector<2x32xf32>
    %701 = vector.extract_strided_slice %694 {offsets = [0, 32], sizes = [2, 32], strides = [1, 1]} : vector<2x128xf32> to vector<2x32xf32>
    %702 = arith.negf %701 : vector<2x32xf32>
    %703 = math.exp %702 : vector<2x32xf32>
    %cst_226 = arith.constant 1.000000e+00 : f32
    %704 = vector.broadcast %cst_226 : f32 to vector<2x32xf32>
    %705 = arith.addf %704, %703 : vector<2x32xf32>
    %706 = arith.divf %704, %705 : vector<2x32xf32>
    %707 = vector.extract_strided_slice %694 {offsets = [0, 64], sizes = [2, 32], strides = [1, 1]} : vector<2x128xf32> to vector<2x32xf32>
    %708 = math.tanh %707 : vector<2x32xf32>
    %709 = vector.extract_strided_slice %694 {offsets = [0, 96], sizes = [2, 32], strides = [1, 1]} : vector<2x128xf32> to vector<2x32xf32>
    %710 = arith.negf %709 : vector<2x32xf32>
    %711 = math.exp %710 : vector<2x32xf32>
    %cst_227 = arith.constant 1.000000e+00 : f32
    %712 = vector.broadcast %cst_227 : f32 to vector<2x32xf32>
    %713 = arith.addf %712, %711 : vector<2x32xf32>
    %714 = arith.divf %712, %713 : vector<2x32xf32>
    %715 = arith.mulf %706, %674 : vector<2x32xf32>
    %716 = arith.mulf %700, %708 : vector<2x32xf32>
    %717 = arith.addf %715, %716 : vector<2x32xf32>
    %718 = math.tanh %717 : vector<2x32xf32>
    %719 = arith.mulf %714, %718 : vector<2x32xf32>
    %c0_228 = arith.constant 0 : index
    %c0_229 = arith.constant 0 : index
    %c0_230 = arith.constant 0 : index
    %720 = vector.load %arg0[%c0_228, %c0_229, %c0_230] : memref<8x2x32xf32, #tpu.memory_space<vmem>>, vector<1x2x32xf32>
    %721 = vector.shape_cast %720 : vector<1x2x32xf32> to vector<2x32xf32>
    %722 = tpu.concatenate %721, %677 in 1 : vector<2x32xf32>, vector<2x32xf32> -> vector<2x64xf32>
    %cst_231 = arith.constant dense<0.000000e+00> : vector<2x128xf32>
    %723 = tpu.matmul %722, %3, %cst_231 {dimension_numbers = #tpu.dot_dimension_numbers<[1], [0], [0], [1], [0, 0, 1, 1], [], []>} : vector<2x64xf32>, vector<64x128xf32>, vector<2x128xf32> -> vector<2x128xf32>
    %724 = vector.broadcast %7 : vector<1x128xf32> to vector<2x128xf32>
    %725 = arith.addf %723, %724 : vector<2x128xf32>
    %726 = vector.extract_strided_slice %725 {offsets = [0, 0], sizes = [2, 32], strides = [1, 1]} : vector<2x128xf32> to vector<2x32xf32>
    %727 = arith.negf %726 : vector<2x32xf32>
    %728 = math.exp %727 : vector<2x32xf32>
    %cst_232 = arith.constant 1.000000e+00 : f32
    %729 = vector.broadcast %cst_232 : f32 to vector<2x32xf32>
    %730 = arith.addf %729, %728 : vector<2x32xf32>
    %731 = arith.divf %729, %730 : vector<2x32xf32>
    %732 = vector.extract_strided_slice %725 {offsets = [0, 32], sizes = [2, 32], strides = [1, 1]} : vector<2x128xf32> to vector<2x32xf32>
    %733 = arith.negf %732 : vector<2x32xf32>
    %734 = math.exp %733 : vector<2x32xf32>
    %cst_233 = arith.constant 1.000000e+00 : f32
    %735 = vector.broadcast %cst_233 : f32 to vector<2x32xf32>
    %736 = arith.addf %735, %734 : vector<2x32xf32>
    %737 = arith.divf %735, %736 : vector<2x32xf32>
    %738 = vector.extract_strided_slice %725 {offsets = [0, 64], sizes = [2, 32], strides = [1, 1]} : vector<2x128xf32> to vector<2x32xf32>
    %739 = math.tanh %738 : vector<2x32xf32>
    %740 = vector.extract_strided_slice %725 {offsets = [0, 96], sizes = [2, 32], strides = [1, 1]} : vector<2x128xf32> to vector<2x32xf32>
    %741 = arith.negf %740 : vector<2x32xf32>
    %742 = math.exp %741 : vector<2x32xf32>
    %cst_234 = arith.constant 1.000000e+00 : f32
    %743 = vector.broadcast %cst_234 : f32 to vector<2x32xf32>
    %744 = arith.addf %743, %742 : vector<2x32xf32>
    %745 = arith.divf %743, %744 : vector<2x32xf32>
    %746 = arith.mulf %737, %680 : vector<2x32xf32>
    %747 = arith.mulf %731, %739 : vector<2x32xf32>
    %748 = arith.addf %746, %747 : vector<2x32xf32>
    %749 = math.tanh %748 : vector<2x32xf32>
    %750 = arith.mulf %745, %749 : vector<2x32xf32>
    %cst_235 = arith.constant 0.000000e+00 : f32
    %751 = vector.shape_cast %684 : vector<2x1xi1> to vector<2x1xi1>
    %752 = vector.broadcast %751 : vector<2x1xi1> to vector<2x32xi1>
    %753 = vector.broadcast %cst_235 : f32 to vector<2x32xf32>
    %754 = arith.select %752, %719, %753 : vector<2x32xi1>, vector<2x32xf32>
    %c7_236 = arith.constant 7 : index
    %c0_237 = arith.constant 0 : index
    %c0_238 = arith.constant 0 : index
    %755 = vector.load %arg9[%c7_236, %c0_237, %c0_238] : memref<8x2x64xf32, #tpu.memory_space<vmem>>, vector<1x2x32xf32>
    %756 = vector.shape_cast %755 : vector<1x2x32xf32> to vector<2x32xf32>
    %757 = vector.shape_cast %754 : vector<2x32xf32> to vector<1x2x32xf32>
    tpu.vector_store %arg9[%c7_236, %c0_237, %c0_238], %757 {strides = array<i32>} : memref<8x2x64xf32, #tpu.memory_space<vmem>>, vector<1x2x32xf32>,
    %cst_239 = arith.constant 0.000000e+00 : f32
    %758 = vector.shape_cast %688 : vector<2x1xi1> to vector<2x1xi1>
    %759 = vector.broadcast %758 : vector<2x1xi1> to vector<2x32xi1>
    %760 = vector.broadcast %cst_239 : f32 to vector<2x32xf32>
    %761 = arith.select %759, %750, %760 : vector<2x32xi1>, vector<2x32xf32>
    %c0_240 = arith.constant 0 : index
    %c0_241 = arith.constant 0 : index
    %c32_242 = arith.constant 32 : index
    %762 = vector.load %arg9[%c0_240, %c0_241, %c32_242] : memref<8x2x64xf32, #tpu.memory_space<vmem>>, vector<1x2x32xf32>
    %763 = vector.shape_cast %762 : vector<1x2x32xf32> to vector<2x32xf32>
    %764 = vector.shape_cast %761 : vector<2x32xf32> to vector<1x2x32xf32>
    tpu.vector_store %arg9[%c0_240, %c0_241, %c32_242], %764 {strides = array<i32>} : memref<8x2x64xf32, #tpu.memory_space<vmem>>, vector<1x2x32xf32>,
    %c0_243 = arith.constant 0 : index
    %c0_244 = arith.constant 0 : index
    %c0_245 = arith.constant 0 : index
    %765 = vector.load %arg4[%c0_243, %c0_244, %c0_245] : memref<2x96x128xf32, #tpu.memory_space<vmem>>, vector<1x96x128xf32>
    %766 = vector.shape_cast %765 : vector<1x96x128xf32> to vector<96x128xf32>
    %c1_246 = arith.constant 1 : index
    %c0_247 = arith.constant 0 : index
    %c0_248 = arith.constant 0 : index
    %767 = vector.load %arg4[%c1_246, %c0_247, %c0_248] : memref<2x96x128xf32, #tpu.memory_space<vmem>>, vector<1x96x128xf32>
    %768 = vector.shape_cast %767 : vector<1x96x128xf32> to vector<96x128xf32>
    %c0_249 = arith.constant 0 : index
    %c0_250 = arith.constant 0 : index
    %c0_251 = arith.constant 0 : index
    %769 = vector.load %arg5[%c0_249, %c0_250, %c0_251] : memref<2x1x128xf32, #tpu.memory_space<vmem>>, vector<1x1x128xf32>
    %770 = vector.shape_cast %769 : vector<1x1x128xf32> to vector<1x128xf32>
    %c1_252 = arith.constant 1 : index
    %c0_253 = arith.constant 0 : index
    %c0_254 = arith.constant 0 : index
    %771 = vector.load %arg5[%c1_252, %c0_253, %c0_254] : memref<2x1x128xf32, #tpu.memory_space<vmem>>, vector<1x1x128xf32>
    %772 = vector.shape_cast %771 : vector<1x1x128xf32> to vector<1x128xf32>
    %cst_255 = arith.constant 0.000000e+00 : f32
    %773 = vector.broadcast %cst_255 : f32 to vector<2x32xf32>
    %c0_256 = arith.constant 0 : index
    %c0_257 = arith.constant 0 : index
    %c0_258 = arith.constant 0 : index
    %774 = vector.load %arg1[%c0_256, %c0_257, %c0_258] : memref<8x2x1xf32, #tpu.memory_space<vmem>>, vector<1x2x1xf32>
    %775 = vector.shape_cast %774 : vector<1x2x1xf32> to vector<2x1xf32>
    %cst_259 = arith.constant 5.000000e-01 : f32
    %776 = vector.broadcast %cst_259 : f32 to vector<2x1xf32>
    %777 = arith.cmpf ogt, %775, %776 : vector<2x1xf32>
    %c7_260 = arith.constant 7 : index
    %c0_261 = arith.constant 0 : index
    %c0_262 = arith.constant 0 : index
    %778 = vector.load %arg1[%c7_260, %c0_261, %c0_262] : memref<8x2x1xf32, #tpu.memory_space<vmem>>, vector<1x2x1xf32>
    %779 = vector.shape_cast %778 : vector<1x2x1xf32> to vector<2x1xf32>
    %cst_263 = arith.constant 5.000000e-01 : f32
    %780 = vector.broadcast %cst_263 : f32 to vector<2x1xf32>
    %781 = arith.cmpf ogt, %779, %780 : vector<2x1xf32>
    %c0_264 = arith.constant 0 : index
    %c0_265 = arith.constant 0 : index
    %c0_266 = arith.constant 0 : index
    %782 = vector.load %arg9[%c0_264, %c0_265, %c0_266] : memref<8x2x64xf32, #tpu.memory_space<vmem>>, vector<1x2x64xf32>
    %783 = vector.shape_cast %782 : vector<1x2x64xf32> to vector<2x64xf32>
    %784 = tpu.concatenate %783, %773 in 1 : vector<2x64xf32>, vector<2x32xf32> -> vector<2x96xf32>
    %cst_267 = arith.constant dense<0.000000e+00> : vector<2x128xf32>
    %785 = tpu.matmul %784, %766, %cst_267 {dimension_numbers = #tpu.dot_dimension_numbers<[1], [0], [0], [1], [0, 0, 1, 1], [], []>} : vector<2x96xf32>, vector<96x128xf32>, vector<2x128xf32> -> vector<2x128xf32>
    %786 = vector.broadcast %770 : vector<1x128xf32> to vector<2x128xf32>
    %787 = arith.addf %785, %786 : vector<2x128xf32>
    %788 = vector.extract_strided_slice %787 {offsets = [0, 0], sizes = [2, 32], strides = [1, 1]} : vector<2x128xf32> to vector<2x32xf32>
    %789 = arith.negf %788 : vector<2x32xf32>
    %790 = math.exp %789 : vector<2x32xf32>
    %cst_268 = arith.constant 1.000000e+00 : f32
    %791 = vector.broadcast %cst_268 : f32 to vector<2x32xf32>
    %792 = arith.addf %791, %790 : vector<2x32xf32>
    %793 = arith.divf %791, %792 : vector<2x32xf32>
    %794 = vector.extract_strided_slice %787 {offsets = [0, 32], sizes = [2, 32], strides = [1, 1]} : vector<2x128xf32> to vector<2x32xf32>
    %795 = arith.negf %794 : vector<2x32xf32>
    %796 = math.exp %795 : vector<2x32xf32>
    %cst_269 = arith.constant 1.000000e+00 : f32
    %797 = vector.broadcast %cst_269 : f32 to vector<2x32xf32>
    %798 = arith.addf %797, %796 : vector<2x32xf32>
    %799 = arith.divf %797, %798 : vector<2x32xf32>
    %800 = vector.extract_strided_slice %787 {offsets = [0, 64], sizes = [2, 32], strides = [1, 1]} : vector<2x128xf32> to vector<2x32xf32>
    %801 = math.tanh %800 : vector<2x32xf32>
    %802 = vector.extract_strided_slice %787 {offsets = [0, 96], sizes = [2, 32], strides = [1, 1]} : vector<2x128xf32> to vector<2x32xf32>
    %803 = arith.negf %802 : vector<2x32xf32>
    %804 = math.exp %803 : vector<2x32xf32>
    %cst_270 = arith.constant 1.000000e+00 : f32
    %805 = vector.broadcast %cst_270 : f32 to vector<2x32xf32>
    %806 = arith.addf %805, %804 : vector<2x32xf32>
    %807 = arith.divf %805, %806 : vector<2x32xf32>
    %808 = arith.mulf %799, %773 : vector<2x32xf32>
    %809 = arith.mulf %793, %801 : vector<2x32xf32>
    %810 = arith.addf %808, %809 : vector<2x32xf32>
    %811 = math.tanh %810 : vector<2x32xf32>
    %812 = arith.mulf %807, %811 : vector<2x32xf32>
    %c7_271 = arith.constant 7 : index
    %c0_272 = arith.constant 0 : index
    %c0_273 = arith.constant 0 : index
    %813 = vector.load %arg9[%c7_271, %c0_272, %c0_273] : memref<8x2x64xf32, #tpu.memory_space<vmem>>, vector<1x2x64xf32>
    %814 = vector.shape_cast %813 : vector<1x2x64xf32> to vector<2x64xf32>
    %815 = tpu.concatenate %814, %773 in 1 : vector<2x64xf32>, vector<2x32xf32> -> vector<2x96xf32>
    %cst_274 = arith.constant dense<0.000000e+00> : vector<2x128xf32>
    %816 = tpu.matmul %815, %768, %cst_274 {dimension_numbers = #tpu.dot_dimension_numbers<[1], [0], [0], [1], [0, 0, 1, 1], [], []>} : vector<2x96xf32>, vector<96x128xf32>, vector<2x128xf32> -> vector<2x128xf32>
    %817 = vector.broadcast %772 : vector<1x128xf32> to vector<2x128xf32>
    %818 = arith.addf %816, %817 : vector<2x128xf32>
    %819 = vector.extract_strided_slice %818 {offsets = [0, 0], sizes = [2, 32], strides = [1, 1]} : vector<2x128xf32> to vector<2x32xf32>
    %820 = arith.negf %819 : vector<2x32xf32>
    %821 = math.exp %820 : vector<2x32xf32>
    %cst_275 = arith.constant 1.000000e+00 : f32
    %822 = vector.broadcast %cst_275 : f32 to vector<2x32xf32>
    %823 = arith.addf %822, %821 : vector<2x32xf32>
    %824 = arith.divf %822, %823 : vector<2x32xf32>
    %825 = vector.extract_strided_slice %818 {offsets = [0, 32], sizes = [2, 32], strides = [1, 1]} : vector<2x128xf32> to vector<2x32xf32>
    %826 = arith.negf %825 : vector<2x32xf32>
    %827 = math.exp %826 : vector<2x32xf32>
    %cst_276 = arith.constant 1.000000e+00 : f32
    %828 = vector.broadcast %cst_276 : f32 to vector<2x32xf32>
    %829 = arith.addf %828, %827 : vector<2x32xf32>
    %830 = arith.divf %828, %829 : vector<2x32xf32>
    %831 = vector.extract_strided_slice %818 {offsets = [0, 64], sizes = [2, 32], strides = [1, 1]} : vector<2x128xf32> to vector<2x32xf32>
    %832 = math.tanh %831 : vector<2x32xf32>
    %833 = vector.extract_strided_slice %818 {offsets = [0, 96], sizes = [2, 32], strides = [1, 1]} : vector<2x128xf32> to vector<2x32xf32>
    %834 = arith.negf %833 : vector<2x32xf32>
    %835 = math.exp %834 : vector<2x32xf32>
    %cst_277 = arith.constant 1.000000e+00 : f32
    %836 = vector.broadcast %cst_277 : f32 to vector<2x32xf32>
    %837 = arith.addf %836, %835 : vector<2x32xf32>
    %838 = arith.divf %836, %837 : vector<2x32xf32>
    %839 = arith.mulf %830, %773 : vector<2x32xf32>
    %840 = arith.mulf %824, %832 : vector<2x32xf32>
    %841 = arith.addf %839, %840 : vector<2x32xf32>
    %842 = math.tanh %841 : vector<2x32xf32>
    %843 = arith.mulf %838, %842 : vector<2x32xf32>
    %cst_278 = arith.constant 0.000000e+00 : f32
    %844 = vector.shape_cast %777 : vector<2x1xi1> to vector<2x1xi1>
    %845 = vector.broadcast %844 : vector<2x1xi1> to vector<2x32xi1>
    %846 = vector.broadcast %cst_278 : f32 to vector<2x32xf32>
    %847 = arith.select %845, %812, %846 : vector<2x32xi1>, vector<2x32xf32>
    %c0_279 = arith.constant 0 : index
    %c0_280 = arith.constant 0 : index
    %c0_281 = arith.constant 0 : index
    %848 = vector.load %arg10[%c0_279, %c0_280, %c0_281] : memref<8x2x64xf32, #tpu.memory_space<vmem>>, vector<1x2x32xf32>
    %849 = vector.shape_cast %848 : vector<1x2x32xf32> to vector<2x32xf32>
    %850 = vector.shape_cast %847 : vector<2x32xf32> to vector<1x2x32xf32>
    tpu.vector_store %arg10[%c0_279, %c0_280, %c0_281], %850 {strides = array<i32>} : memref<8x2x64xf32, #tpu.memory_space<vmem>>, vector<1x2x32xf32>,
    %cst_282 = arith.constant 0.000000e+00 : f32
    %851 = vector.shape_cast %781 : vector<2x1xi1> to vector<2x1xi1>
    %852 = vector.broadcast %851 : vector<2x1xi1> to vector<2x32xi1>
    %853 = vector.broadcast %cst_282 : f32 to vector<2x32xf32>
    %854 = arith.select %852, %843, %853 : vector<2x32xi1>, vector<2x32xf32>
    %c7_283 = arith.constant 7 : index
    %c0_284 = arith.constant 0 : index
    %c32_285 = arith.constant 32 : index
    %855 = vector.load %arg10[%c7_283, %c0_284, %c32_285] : memref<8x2x64xf32, #tpu.memory_space<vmem>>, vector<1x2x32xf32>
    %856 = vector.shape_cast %855 : vector<1x2x32xf32> to vector<2x32xf32>
    %857 = vector.shape_cast %854 : vector<2x32xf32> to vector<1x2x32xf32>
    tpu.vector_store %arg10[%c7_283, %c0_284, %c32_285], %857 {strides = array<i32>} : memref<8x2x64xf32, #tpu.memory_space<vmem>>, vector<1x2x32xf32>,
    %858 = vector.shape_cast %777 : vector<2x1xi1> to vector<2x1xi1>
    %859 = vector.broadcast %858 : vector<2x1xi1> to vector<2x32xi1>
    %860 = arith.select %859, %812, %773 : vector<2x32xi1>, vector<2x32xf32>
    %861 = vector.shape_cast %777 : vector<2x1xi1> to vector<2x1xi1>
    %862 = vector.broadcast %861 : vector<2x1xi1> to vector<2x32xi1>
    %863 = arith.select %862, %810, %773 : vector<2x32xi1>, vector<2x32xf32>
    %864 = vector.shape_cast %781 : vector<2x1xi1> to vector<2x1xi1>
    %865 = vector.broadcast %864 : vector<2x1xi1> to vector<2x32xi1>
    %866 = arith.select %865, %843, %773 : vector<2x32xi1>, vector<2x32xf32>
    %867 = vector.shape_cast %781 : vector<2x1xi1> to vector<2x1xi1>
    %868 = vector.broadcast %867 : vector<2x1xi1> to vector<2x32xi1>
    %869 = arith.select %868, %841, %773 : vector<2x32xi1>, vector<2x32xf32>
    %c1_286 = arith.constant 1 : index
    %c0_287 = arith.constant 0 : index
    %c0_288 = arith.constant 0 : index
    %870 = vector.load %arg1[%c1_286, %c0_287, %c0_288] : memref<8x2x1xf32, #tpu.memory_space<vmem>>, vector<1x2x1xf32>
    %871 = vector.shape_cast %870 : vector<1x2x1xf32> to vector<2x1xf32>
    %cst_289 = arith.constant 5.000000e-01 : f32
    %872 = vector.broadcast %cst_289 : f32 to vector<2x1xf32>
    %873 = arith.cmpf ogt, %871, %872 : vector<2x1xf32>
    %c6_290 = arith.constant 6 : index
    %c0_291 = arith.constant 0 : index
    %c0_292 = arith.constant 0 : index
    %874 = vector.load %arg1[%c6_290, %c0_291, %c0_292] : memref<8x2x1xf32, #tpu.memory_space<vmem>>, vector<1x2x1xf32>
    %875 = vector.shape_cast %874 : vector<1x2x1xf32> to vector<2x1xf32>
    %cst_293 = arith.constant 5.000000e-01 : f32
    %876 = vector.broadcast %cst_293 : f32 to vector<2x1xf32>
    %877 = arith.cmpf ogt, %875, %876 : vector<2x1xf32>
    %c1_294 = arith.constant 1 : index
    %c0_295 = arith.constant 0 : index
    %c0_296 = arith.constant 0 : index
    %878 = vector.load %arg9[%c1_294, %c0_295, %c0_296] : memref<8x2x64xf32, #tpu.memory_space<vmem>>, vector<1x2x64xf32>
    %879 = vector.shape_cast %878 : vector<1x2x64xf32> to vector<2x64xf32>
    %880 = tpu.concatenate %879, %860 in 1 : vector<2x64xf32>, vector<2x32xf32> -> vector<2x96xf32>
    %cst_297 = arith.constant dense<0.000000e+00> : vector<2x128xf32>
    %881 = tpu.matmul %880, %766, %cst_297 {dimension_numbers = #tpu.dot_dimension_numbers<[1], [0], [0], [1], [0, 0, 1, 1], [], []>} : vector<2x96xf32>, vector<96x128xf32>, vector<2x128xf32> -> vector<2x128xf32>
    %882 = vector.broadcast %770 : vector<1x128xf32> to vector<2x128xf32>
    %883 = arith.addf %881, %882 : vector<2x128xf32>
    %884 = vector.extract_strided_slice %883 {offsets = [0, 0], sizes = [2, 32], strides = [1, 1]} : vector<2x128xf32> to vector<2x32xf32>
    %885 = arith.negf %884 : vector<2x32xf32>
    %886 = math.exp %885 : vector<2x32xf32>
    %cst_298 = arith.constant 1.000000e+00 : f32
    %887 = vector.broadcast %cst_298 : f32 to vector<2x32xf32>
    %888 = arith.addf %887, %886 : vector<2x32xf32>
    %889 = arith.divf %887, %888 : vector<2x32xf32>
    %890 = vector.extract_strided_slice %883 {offsets = [0, 32], sizes = [2, 32], strides = [1, 1]} : vector<2x128xf32> to vector<2x32xf32>
    %891 = arith.negf %890 : vector<2x32xf32>
    %892 = math.exp %891 : vector<2x32xf32>
    %cst_299 = arith.constant 1.000000e+00 : f32
    %893 = vector.broadcast %cst_299 : f32 to vector<2x32xf32>
    %894 = arith.addf %893, %892 : vector<2x32xf32>
    %895 = arith.divf %893, %894 : vector<2x32xf32>
    %896 = vector.extract_strided_slice %883 {offsets = [0, 64], sizes = [2, 32], strides = [1, 1]} : vector<2x128xf32> to vector<2x32xf32>
    %897 = math.tanh %896 : vector<2x32xf32>
    %898 = vector.extract_strided_slice %883 {offsets = [0, 96], sizes = [2, 32], strides = [1, 1]} : vector<2x128xf32> to vector<2x32xf32>
    %899 = arith.negf %898 : vector<2x32xf32>
    %900 = math.exp %899 : vector<2x32xf32>
    %cst_300 = arith.constant 1.000000e+00 : f32
    %901 = vector.broadcast %cst_300 : f32 to vector<2x32xf32>
    %902 = arith.addf %901, %900 : vector<2x32xf32>
    %903 = arith.divf %901, %902 : vector<2x32xf32>
    %904 = arith.mulf %895, %863 : vector<2x32xf32>
    %905 = arith.mulf %889, %897 : vector<2x32xf32>
    %906 = arith.addf %904, %905 : vector<2x32xf32>
    %907 = math.tanh %906 : vector<2x32xf32>
    %908 = arith.mulf %903, %907 : vector<2x32xf32>
    %c6_301 = arith.constant 6 : index
    %c0_302 = arith.constant 0 : index
    %c0_303 = arith.constant 0 : index
    %909 = vector.load %arg9[%c6_301, %c0_302, %c0_303] : memref<8x2x64xf32, #tpu.memory_space<vmem>>, vector<1x2x64xf32>
    %910 = vector.shape_cast %909 : vector<1x2x64xf32> to vector<2x64xf32>
    %911 = tpu.concatenate %910, %866 in 1 : vector<2x64xf32>, vector<2x32xf32> -> vector<2x96xf32>
    %cst_304 = arith.constant dense<0.000000e+00> : vector<2x128xf32>
    %912 = tpu.matmul %911, %768, %cst_304 {dimension_numbers = #tpu.dot_dimension_numbers<[1], [0], [0], [1], [0, 0, 1, 1], [], []>} : vector<2x96xf32>, vector<96x128xf32>, vector<2x128xf32> -> vector<2x128xf32>
    %913 = vector.broadcast %772 : vector<1x128xf32> to vector<2x128xf32>
    %914 = arith.addf %912, %913 : vector<2x128xf32>
    %915 = vector.extract_strided_slice %914 {offsets = [0, 0], sizes = [2, 32], strides = [1, 1]} : vector<2x128xf32> to vector<2x32xf32>
    %916 = arith.negf %915 : vector<2x32xf32>
    %917 = math.exp %916 : vector<2x32xf32>
    %cst_305 = arith.constant 1.000000e+00 : f32
    %918 = vector.broadcast %cst_305 : f32 to vector<2x32xf32>
    %919 = arith.addf %918, %917 : vector<2x32xf32>
    %920 = arith.divf %918, %919 : vector<2x32xf32>
    %921 = vector.extract_strided_slice %914 {offsets = [0, 32], sizes = [2, 32], strides = [1, 1]} : vector<2x128xf32> to vector<2x32xf32>
    %922 = arith.negf %921 : vector<2x32xf32>
    %923 = math.exp %922 : vector<2x32xf32>
    %cst_306 = arith.constant 1.000000e+00 : f32
    %924 = vector.broadcast %cst_306 : f32 to vector<2x32xf32>
    %925 = arith.addf %924, %923 : vector<2x32xf32>
    %926 = arith.divf %924, %925 : vector<2x32xf32>
    %927 = vector.extract_strided_slice %914 {offsets = [0, 64], sizes = [2, 32], strides = [1, 1]} : vector<2x128xf32> to vector<2x32xf32>
    %928 = math.tanh %927 : vector<2x32xf32>
    %929 = vector.extract_strided_slice %914 {offsets = [0, 96], sizes = [2, 32], strides = [1, 1]} : vector<2x128xf32> to vector<2x32xf32>
    %930 = arith.negf %929 : vector<2x32xf32>
    %931 = math.exp %930 : vector<2x32xf32>
    %cst_307 = arith.constant 1.000000e+00 : f32
    %932 = vector.broadcast %cst_307 : f32 to vector<2x32xf32>
    %933 = arith.addf %932, %931 : vector<2x32xf32>
    %934 = arith.divf %932, %933 : vector<2x32xf32>
    %935 = arith.mulf %926, %869 : vector<2x32xf32>
    %936 = arith.mulf %920, %928 : vector<2x32xf32>
    %937 = arith.addf %935, %936 : vector<2x32xf32>
    %938 = math.tanh %937 : vector<2x32xf32>
    %939 = arith.mulf %934, %938 : vector<2x32xf32>
    %cst_308 = arith.constant 0.000000e+00 : f32
    %940 = vector.shape_cast %873 : vector<2x1xi1> to vector<2x1xi1>
    %941 = vector.broadcast %940 : vector<2x1xi1> to vector<2x32xi1>
    %942 = vector.broadcast %cst_308 : f32 to vector<2x32xf32>
    %943 = arith.select %941, %908, %942 : vector<2x32xi1>, vector<2x32xf32>
    %c1_309 = arith.constant 1 : index
    %c0_310 = arith.constant 0 : index
    %c0_311 = arith.constant 0 : index
    %944 = vector.load %arg10[%c1_309, %c0_310, %c0_311] : memref<8x2x64xf32, #tpu.memory_space<vmem>>, vector<1x2x32xf32>
    %945 = vector.shape_cast %944 : vector<1x2x32xf32> to vector<2x32xf32>
    %946 = vector.shape_cast %943 : vector<2x32xf32> to vector<1x2x32xf32>
    tpu.vector_store %arg10[%c1_309, %c0_310, %c0_311], %946 {strides = array<i32>} : memref<8x2x64xf32, #tpu.memory_space<vmem>>, vector<1x2x32xf32>,
    %cst_312 = arith.constant 0.000000e+00 : f32
    %947 = vector.shape_cast %877 : vector<2x1xi1> to vector<2x1xi1>
    %948 = vector.broadcast %947 : vector<2x1xi1> to vector<2x32xi1>
    %949 = vector.broadcast %cst_312 : f32 to vector<2x32xf32>
    %950 = arith.select %948, %939, %949 : vector<2x32xi1>, vector<2x32xf32>
    %c6_313 = arith.constant 6 : index
    %c0_314 = arith.constant 0 : index
    %c32_315 = arith.constant 32 : index
    %951 = vector.load %arg10[%c6_313, %c0_314, %c32_315] : memref<8x2x64xf32, #tpu.memory_space<vmem>>, vector<1x2x32xf32>
    %952 = vector.shape_cast %951 : vector<1x2x32xf32> to vector<2x32xf32>
    %953 = vector.shape_cast %950 : vector<2x32xf32> to vector<1x2x32xf32>
    tpu.vector_store %arg10[%c6_313, %c0_314, %c32_315], %953 {strides = array<i32>} : memref<8x2x64xf32, #tpu.memory_space<vmem>>, vector<1x2x32xf32>,
    %954 = vector.shape_cast %873 : vector<2x1xi1> to vector<2x1xi1>
    %955 = vector.broadcast %954 : vector<2x1xi1> to vector<2x32xi1>
    %956 = arith.select %955, %908, %860 : vector<2x32xi1>, vector<2x32xf32>
    %957 = vector.shape_cast %873 : vector<2x1xi1> to vector<2x1xi1>
    %958 = vector.broadcast %957 : vector<2x1xi1> to vector<2x32xi1>
    %959 = arith.select %958, %906, %863 : vector<2x32xi1>, vector<2x32xf32>
    %960 = vector.shape_cast %877 : vector<2x1xi1> to vector<2x1xi1>
    %961 = vector.broadcast %960 : vector<2x1xi1> to vector<2x32xi1>
    %962 = arith.select %961, %939, %866 : vector<2x32xi1>, vector<2x32xf32>
    %963 = vector.shape_cast %877 : vector<2x1xi1> to vector<2x1xi1>
    %964 = vector.broadcast %963 : vector<2x1xi1> to vector<2x32xi1>
    %965 = arith.select %964, %937, %869 : vector<2x32xi1>, vector<2x32xf32>
    %c2_316 = arith.constant 2 : index
    %c0_317 = arith.constant 0 : index
    %c0_318 = arith.constant 0 : index
    %966 = vector.load %arg1[%c2_316, %c0_317, %c0_318] : memref<8x2x1xf32, #tpu.memory_space<vmem>>, vector<1x2x1xf32>
    %967 = vector.shape_cast %966 : vector<1x2x1xf32> to vector<2x1xf32>
    %cst_319 = arith.constant 5.000000e-01 : f32
    %968 = vector.broadcast %cst_319 : f32 to vector<2x1xf32>
    %969 = arith.cmpf ogt, %967, %968 : vector<2x1xf32>
    %c5_320 = arith.constant 5 : index
    %c0_321 = arith.constant 0 : index
    %c0_322 = arith.constant 0 : index
    %970 = vector.load %arg1[%c5_320, %c0_321, %c0_322] : memref<8x2x1xf32, #tpu.memory_space<vmem>>, vector<1x2x1xf32>
    %971 = vector.shape_cast %970 : vector<1x2x1xf32> to vector<2x1xf32>
    %cst_323 = arith.constant 5.000000e-01 : f32
    %972 = vector.broadcast %cst_323 : f32 to vector<2x1xf32>
    %973 = arith.cmpf ogt, %971, %972 : vector<2x1xf32>
    %c2_324 = arith.constant 2 : index
    %c0_325 = arith.constant 0 : index
    %c0_326 = arith.constant 0 : index
    %974 = vector.load %arg9[%c2_324, %c0_325, %c0_326] : memref<8x2x64xf32, #tpu.memory_space<vmem>>, vector<1x2x64xf32>
    %975 = vector.shape_cast %974 : vector<1x2x64xf32> to vector<2x64xf32>
    %976 = tpu.concatenate %975, %956 in 1 : vector<2x64xf32>, vector<2x32xf32> -> vector<2x96xf32>
    %cst_327 = arith.constant dense<0.000000e+00> : vector<2x128xf32>
    %977 = tpu.matmul %976, %766, %cst_327 {dimension_numbers = #tpu.dot_dimension_numbers<[1], [0], [0], [1], [0, 0, 1, 1], [], []>} : vector<2x96xf32>, vector<96x128xf32>, vector<2x128xf32> -> vector<2x128xf32>
    %978 = vector.broadcast %770 : vector<1x128xf32> to vector<2x128xf32>
    %979 = arith.addf %977, %978 : vector<2x128xf32>
    %980 = vector.extract_strided_slice %979 {offsets = [0, 0], sizes = [2, 32], strides = [1, 1]} : vector<2x128xf32> to vector<2x32xf32>
    %981 = arith.negf %980 : vector<2x32xf32>
    %982 = math.exp %981 : vector<2x32xf32>
    %cst_328 = arith.constant 1.000000e+00 : f32
    %983 = vector.broadcast %cst_328 : f32 to vector<2x32xf32>
    %984 = arith.addf %983, %982 : vector<2x32xf32>
    %985 = arith.divf %983, %984 : vector<2x32xf32>
    %986 = vector.extract_strided_slice %979 {offsets = [0, 32], sizes = [2, 32], strides = [1, 1]} : vector<2x128xf32> to vector<2x32xf32>
    %987 = arith.negf %986 : vector<2x32xf32>
    %988 = math.exp %987 : vector<2x32xf32>
    %cst_329 = arith.constant 1.000000e+00 : f32
    %989 = vector.broadcast %cst_329 : f32 to vector<2x32xf32>
    %990 = arith.addf %989, %988 : vector<2x32xf32>
    %991 = arith.divf %989, %990 : vector<2x32xf32>
    %992 = vector.extract_strided_slice %979 {offsets = [0, 64], sizes = [2, 32], strides = [1, 1]} : vector<2x128xf32> to vector<2x32xf32>
    %993 = math.tanh %992 : vector<2x32xf32>
    %994 = vector.extract_strided_slice %979 {offsets = [0, 96], sizes = [2, 32], strides = [1, 1]} : vector<2x128xf32> to vector<2x32xf32>
    %995 = arith.negf %994 : vector<2x32xf32>
    %996 = math.exp %995 : vector<2x32xf32>
    %cst_330 = arith.constant 1.000000e+00 : f32
    %997 = vector.broadcast %cst_330 : f32 to vector<2x32xf32>
    %998 = arith.addf %997, %996 : vector<2x32xf32>
    %999 = arith.divf %997, %998 : vector<2x32xf32>
    %1000 = arith.mulf %991, %959 : vector<2x32xf32>
    %1001 = arith.mulf %985, %993 : vector<2x32xf32>
    %1002 = arith.addf %1000, %1001 : vector<2x32xf32>
    %1003 = math.tanh %1002 : vector<2x32xf32>
    %1004 = arith.mulf %999, %1003 : vector<2x32xf32>
    %c5_331 = arith.constant 5 : index
    %c0_332 = arith.constant 0 : index
    %c0_333 = arith.constant 0 : index
    %1005 = vector.load %arg9[%c5_331, %c0_332, %c0_333] : memref<8x2x64xf32, #tpu.memory_space<vmem>>, vector<1x2x64xf32>
    %1006 = vector.shape_cast %1005 : vector<1x2x64xf32> to vector<2x64xf32>
    %1007 = tpu.concatenate %1006, %962 in 1 : vector<2x64xf32>, vector<2x32xf32> -> vector<2x96xf32>
    %cst_334 = arith.constant dense<0.000000e+00> : vector<2x128xf32>
    %1008 = tpu.matmul %1007, %768, %cst_334 {dimension_numbers = #tpu.dot_dimension_numbers<[1], [0], [0], [1], [0, 0, 1, 1], [], []>} : vector<2x96xf32>, vector<96x128xf32>, vector<2x128xf32> -> vector<2x128xf32>
    %1009 = vector.broadcast %772 : vector<1x128xf32> to vector<2x128xf32>
    %1010 = arith.addf %1008, %1009 : vector<2x128xf32>
    %1011 = vector.extract_strided_slice %1010 {offsets = [0, 0], sizes = [2, 32], strides = [1, 1]} : vector<2x128xf32> to vector<2x32xf32>
    %1012 = arith.negf %1011 : vector<2x32xf32>
    %1013 = math.exp %1012 : vector<2x32xf32>
    %cst_335 = arith.constant 1.000000e+00 : f32
    %1014 = vector.broadcast %cst_335 : f32 to vector<2x32xf32>
    %1015 = arith.addf %1014, %1013 : vector<2x32xf32>
    %1016 = arith.divf %1014, %1015 : vector<2x32xf32>
    %1017 = vector.extract_strided_slice %1010 {offsets = [0, 32], sizes = [2, 32], strides = [1, 1]} : vector<2x128xf32> to vector<2x32xf32>
    %1018 = arith.negf %1017 : vector<2x32xf32>
    %1019 = math.exp %1018 : vector<2x32xf32>
    %cst_336 = arith.constant 1.000000e+00 : f32
    %1020 = vector.broadcast %cst_336 : f32 to vector<2x32xf32>
    %1021 = arith.addf %1020, %1019 : vector<2x32xf32>
    %1022 = arith.divf %1020, %1021 : vector<2x32xf32>
    %1023 = vector.extract_strided_slice %1010 {offsets = [0, 64], sizes = [2, 32], strides = [1, 1]} : vector<2x128xf32> to vector<2x32xf32>
    %1024 = math.tanh %1023 : vector<2x32xf32>
    %1025 = vector.extract_strided_slice %1010 {offsets = [0, 96], sizes = [2, 32], strides = [1, 1]} : vector<2x128xf32> to vector<2x32xf32>
    %1026 = arith.negf %1025 : vector<2x32xf32>
    %1027 = math.exp %1026 : vector<2x32xf32>
    %cst_337 = arith.constant 1.000000e+00 : f32
    %1028 = vector.broadcast %cst_337 : f32 to vector<2x32xf32>
    %1029 = arith.addf %1028, %1027 : vector<2x32xf32>
    %1030 = arith.divf %1028, %1029 : vector<2x32xf32>
    %1031 = arith.mulf %1022, %965 : vector<2x32xf32>
    %1032 = arith.mulf %1016, %1024 : vector<2x32xf32>
    %1033 = arith.addf %1031, %1032 : vector<2x32xf32>
    %1034 = math.tanh %1033 : vector<2x32xf32>
    %1035 = arith.mulf %1030, %1034 : vector<2x32xf32>
    %cst_338 = arith.constant 0.000000e+00 : f32
    %1036 = vector.shape_cast %969 : vector<2x1xi1> to vector<2x1xi1>
    %1037 = vector.broadcast %1036 : vector<2x1xi1> to vector<2x32xi1>
    %1038 = vector.broadcast %cst_338 : f32 to vector<2x32xf32>
    %1039 = arith.select %1037, %1004, %1038 : vector<2x32xi1>, vector<2x32xf32>
    %c2_339 = arith.constant 2 : index
    %c0_340 = arith.constant 0 : index
    %c0_341 = arith.constant 0 : index
    %1040 = vector.load %arg10[%c2_339, %c0_340, %c0_341] : memref<8x2x64xf32, #tpu.memory_space<vmem>>, vector<1x2x32xf32>
    %1041 = vector.shape_cast %1040 : vector<1x2x32xf32> to vector<2x32xf32>
    %1042 = vector.shape_cast %1039 : vector<2x32xf32> to vector<1x2x32xf32>
    tpu.vector_store %arg10[%c2_339, %c0_340, %c0_341], %1042 {strides = array<i32>} : memref<8x2x64xf32, #tpu.memory_space<vmem>>, vector<1x2x32xf32>,
    %cst_342 = arith.constant 0.000000e+00 : f32
    %1043 = vector.shape_cast %973 : vector<2x1xi1> to vector<2x1xi1>
    %1044 = vector.broadcast %1043 : vector<2x1xi1> to vector<2x32xi1>
    %1045 = vector.broadcast %cst_342 : f32 to vector<2x32xf32>
    %1046 = arith.select %1044, %1035, %1045 : vector<2x32xi1>, vector<2x32xf32>
    %c5_343 = arith.constant 5 : index
    %c0_344 = arith.constant 0 : index
    %c32_345 = arith.constant 32 : index
    %1047 = vector.load %arg10[%c5_343, %c0_344, %c32_345] : memref<8x2x64xf32, #tpu.memory_space<vmem>>, vector<1x2x32xf32>
    %1048 = vector.shape_cast %1047 : vector<1x2x32xf32> to vector<2x32xf32>
    %1049 = vector.shape_cast %1046 : vector<2x32xf32> to vector<1x2x32xf32>
    tpu.vector_store %arg10[%c5_343, %c0_344, %c32_345], %1049 {strides = array<i32>} : memref<8x2x64xf32, #tpu.memory_space<vmem>>, vector<1x2x32xf32>,
    %1050 = vector.shape_cast %969 : vector<2x1xi1> to vector<2x1xi1>
    %1051 = vector.broadcast %1050 : vector<2x1xi1> to vector<2x32xi1>
    %1052 = arith.select %1051, %1004, %956 : vector<2x32xi1>, vector<2x32xf32>
    %1053 = vector.shape_cast %969 : vector<2x1xi1> to vector<2x1xi1>
    %1054 = vector.broadcast %1053 : vector<2x1xi1> to vector<2x32xi1>
    %1055 = arith.select %1054, %1002, %959 : vector<2x32xi1>, vector<2x32xf32>
    %1056 = vector.shape_cast %973 : vector<2x1xi1> to vector<2x1xi1>
    %1057 = vector.broadcast %1056 : vector<2x1xi1> to vector<2x32xi1>
    %1058 = arith.select %1057, %1035, %962 : vector<2x32xi1>, vector<2x32xf32>
    %1059 = vector.shape_cast %973 : vector<2x1xi1> to vector<2x1xi1>
    %1060 = vector.broadcast %1059 : vector<2x1xi1> to vector<2x32xi1>
    %1061 = arith.select %1060, %1033, %965 : vector<2x32xi1>, vector<2x32xf32>
    %c3_346 = arith.constant 3 : index
    %c0_347 = arith.constant 0 : index
    %c0_348 = arith.constant 0 : index
    %1062 = vector.load %arg1[%c3_346, %c0_347, %c0_348] : memref<8x2x1xf32, #tpu.memory_space<vmem>>, vector<1x2x1xf32>
    %1063 = vector.shape_cast %1062 : vector<1x2x1xf32> to vector<2x1xf32>
    %cst_349 = arith.constant 5.000000e-01 : f32
    %1064 = vector.broadcast %cst_349 : f32 to vector<2x1xf32>
    %1065 = arith.cmpf ogt, %1063, %1064 : vector<2x1xf32>
    %c4_350 = arith.constant 4 : index
    %c0_351 = arith.constant 0 : index
    %c0_352 = arith.constant 0 : index
    %1066 = vector.load %arg1[%c4_350, %c0_351, %c0_352] : memref<8x2x1xf32, #tpu.memory_space<vmem>>, vector<1x2x1xf32>
    %1067 = vector.shape_cast %1066 : vector<1x2x1xf32> to vector<2x1xf32>
    %cst_353 = arith.constant 5.000000e-01 : f32
    %1068 = vector.broadcast %cst_353 : f32 to vector<2x1xf32>
    %1069 = arith.cmpf ogt, %1067, %1068 : vector<2x1xf32>
    %c3_354 = arith.constant 3 : index
    %c0_355 = arith.constant 0 : index
    %c0_356 = arith.constant 0 : index
    %1070 = vector.load %arg9[%c3_354, %c0_355, %c0_356] : memref<8x2x64xf32, #tpu.memory_space<vmem>>, vector<1x2x64xf32>
    %1071 = vector.shape_cast %1070 : vector<1x2x64xf32> to vector<2x64xf32>
    %1072 = tpu.concatenate %1071, %1052 in 1 : vector<2x64xf32>, vector<2x32xf32> -> vector<2x96xf32>
    %cst_357 = arith.constant dense<0.000000e+00> : vector<2x128xf32>
    %1073 = tpu.matmul %1072, %766, %cst_357 {dimension_numbers = #tpu.dot_dimension_numbers<[1], [0], [0], [1], [0, 0, 1, 1], [], []>} : vector<2x96xf32>, vector<96x128xf32>, vector<2x128xf32> -> vector<2x128xf32>
    %1074 = vector.broadcast %770 : vector<1x128xf32> to vector<2x128xf32>
    %1075 = arith.addf %1073, %1074 : vector<2x128xf32>
    %1076 = vector.extract_strided_slice %1075 {offsets = [0, 0], sizes = [2, 32], strides = [1, 1]} : vector<2x128xf32> to vector<2x32xf32>
    %1077 = arith.negf %1076 : vector<2x32xf32>
    %1078 = math.exp %1077 : vector<2x32xf32>
    %cst_358 = arith.constant 1.000000e+00 : f32
    %1079 = vector.broadcast %cst_358 : f32 to vector<2x32xf32>
    %1080 = arith.addf %1079, %1078 : vector<2x32xf32>
    %1081 = arith.divf %1079, %1080 : vector<2x32xf32>
    %1082 = vector.extract_strided_slice %1075 {offsets = [0, 32], sizes = [2, 32], strides = [1, 1]} : vector<2x128xf32> to vector<2x32xf32>
    %1083 = arith.negf %1082 : vector<2x32xf32>
    %1084 = math.exp %1083 : vector<2x32xf32>
    %cst_359 = arith.constant 1.000000e+00 : f32
    %1085 = vector.broadcast %cst_359 : f32 to vector<2x32xf32>
    %1086 = arith.addf %1085, %1084 : vector<2x32xf32>
    %1087 = arith.divf %1085, %1086 : vector<2x32xf32>
    %1088 = vector.extract_strided_slice %1075 {offsets = [0, 64], sizes = [2, 32], strides = [1, 1]} : vector<2x128xf32> to vector<2x32xf32>
    %1089 = math.tanh %1088 : vector<2x32xf32>
    %1090 = vector.extract_strided_slice %1075 {offsets = [0, 96], sizes = [2, 32], strides = [1, 1]} : vector<2x128xf32> to vector<2x32xf32>
    %1091 = arith.negf %1090 : vector<2x32xf32>
    %1092 = math.exp %1091 : vector<2x32xf32>
    %cst_360 = arith.constant 1.000000e+00 : f32
    %1093 = vector.broadcast %cst_360 : f32 to vector<2x32xf32>
    %1094 = arith.addf %1093, %1092 : vector<2x32xf32>
    %1095 = arith.divf %1093, %1094 : vector<2x32xf32>
    %1096 = arith.mulf %1087, %1055 : vector<2x32xf32>
    %1097 = arith.mulf %1081, %1089 : vector<2x32xf32>
    %1098 = arith.addf %1096, %1097 : vector<2x32xf32>
    %1099 = math.tanh %1098 : vector<2x32xf32>
    %1100 = arith.mulf %1095, %1099 : vector<2x32xf32>
    %c4_361 = arith.constant 4 : index
    %c0_362 = arith.constant 0 : index
    %c0_363 = arith.constant 0 : index
    %1101 = vector.load %arg9[%c4_361, %c0_362, %c0_363] : memref<8x2x64xf32, #tpu.memory_space<vmem>>, vector<1x2x64xf32>
    %1102 = vector.shape_cast %1101 : vector<1x2x64xf32> to vector<2x64xf32>
    %1103 = tpu.concatenate %1102, %1058 in 1 : vector<2x64xf32>, vector<2x32xf32> -> vector<2x96xf32>
    %cst_364 = arith.constant dense<0.000000e+00> : vector<2x128xf32>
    %1104 = tpu.matmul %1103, %768, %cst_364 {dimension_numbers = #tpu.dot_dimension_numbers<[1], [0], [0], [1], [0, 0, 1, 1], [], []>} : vector<2x96xf32>, vector<96x128xf32>, vector<2x128xf32> -> vector<2x128xf32>
    %1105 = vector.broadcast %772 : vector<1x128xf32> to vector<2x128xf32>
    %1106 = arith.addf %1104, %1105 : vector<2x128xf32>
    %1107 = vector.extract_strided_slice %1106 {offsets = [0, 0], sizes = [2, 32], strides = [1, 1]} : vector<2x128xf32> to vector<2x32xf32>
    %1108 = arith.negf %1107 : vector<2x32xf32>
    %1109 = math.exp %1108 : vector<2x32xf32>
    %cst_365 = arith.constant 1.000000e+00 : f32
    %1110 = vector.broadcast %cst_365 : f32 to vector<2x32xf32>
    %1111 = arith.addf %1110, %1109 : vector<2x32xf32>
    %1112 = arith.divf %1110, %1111 : vector<2x32xf32>
    %1113 = vector.extract_strided_slice %1106 {offsets = [0, 32], sizes = [2, 32], strides = [1, 1]} : vector<2x128xf32> to vector<2x32xf32>
    %1114 = arith.negf %1113 : vector<2x32xf32>
    %1115 = math.exp %1114 : vector<2x32xf32>
    %cst_366 = arith.constant 1.000000e+00 : f32
    %1116 = vector.broadcast %cst_366 : f32 to vector<2x32xf32>
    %1117 = arith.addf %1116, %1115 : vector<2x32xf32>
    %1118 = arith.divf %1116, %1117 : vector<2x32xf32>
    %1119 = vector.extract_strided_slice %1106 {offsets = [0, 64], sizes = [2, 32], strides = [1, 1]} : vector<2x128xf32> to vector<2x32xf32>
    %1120 = math.tanh %1119 : vector<2x32xf32>
    %1121 = vector.extract_strided_slice %1106 {offsets = [0, 96], sizes = [2, 32], strides = [1, 1]} : vector<2x128xf32> to vector<2x32xf32>
    %1122 = arith.negf %1121 : vector<2x32xf32>
    %1123 = math.exp %1122 : vector<2x32xf32>
    %cst_367 = arith.constant 1.000000e+00 : f32
    %1124 = vector.broadcast %cst_367 : f32 to vector<2x32xf32>
    %1125 = arith.addf %1124, %1123 : vector<2x32xf32>
    %1126 = arith.divf %1124, %1125 : vector<2x32xf32>
    %1127 = arith.mulf %1118, %1061 : vector<2x32xf32>
    %1128 = arith.mulf %1112, %1120 : vector<2x32xf32>
    %1129 = arith.addf %1127, %1128 : vector<2x32xf32>
    %1130 = math.tanh %1129 : vector<2x32xf32>
    %1131 = arith.mulf %1126, %1130 : vector<2x32xf32>
    %cst_368 = arith.constant 0.000000e+00 : f32
    %1132 = vector.shape_cast %1065 : vector<2x1xi1> to vector<2x1xi1>
    %1133 = vector.broadcast %1132 : vector<2x1xi1> to vector<2x32xi1>
    %1134 = vector.broadcast %cst_368 : f32 to vector<2x32xf32>
    %1135 = arith.select %1133, %1100, %1134 : vector<2x32xi1>, vector<2x32xf32>
    %c3_369 = arith.constant 3 : index
    %c0_370 = arith.constant 0 : index
    %c0_371 = arith.constant 0 : index
    %1136 = vector.load %arg10[%c3_369, %c0_370, %c0_371] : memref<8x2x64xf32, #tpu.memory_space<vmem>>, vector<1x2x32xf32>
    %1137 = vector.shape_cast %1136 : vector<1x2x32xf32> to vector<2x32xf32>
    %1138 = vector.shape_cast %1135 : vector<2x32xf32> to vector<1x2x32xf32>
    tpu.vector_store %arg10[%c3_369, %c0_370, %c0_371], %1138 {strides = array<i32>} : memref<8x2x64xf32, #tpu.memory_space<vmem>>, vector<1x2x32xf32>,
    %cst_372 = arith.constant 0.000000e+00 : f32
    %1139 = vector.shape_cast %1069 : vector<2x1xi1> to vector<2x1xi1>
    %1140 = vector.broadcast %1139 : vector<2x1xi1> to vector<2x32xi1>
    %1141 = vector.broadcast %cst_372 : f32 to vector<2x32xf32>
    %1142 = arith.select %1140, %1131, %1141 : vector<2x32xi1>, vector<2x32xf32>
    %c4_373 = arith.constant 4 : index
    %c0_374 = arith.constant 0 : index
    %c32_375 = arith.constant 32 : index
    %1143 = vector.load %arg10[%c4_373, %c0_374, %c32_375] : memref<8x2x64xf32, #tpu.memory_space<vmem>>, vector<1x2x32xf32>
    %1144 = vector.shape_cast %1143 : vector<1x2x32xf32> to vector<2x32xf32>
    %1145 = vector.shape_cast %1142 : vector<2x32xf32> to vector<1x2x32xf32>
    tpu.vector_store %arg10[%c4_373, %c0_374, %c32_375], %1145 {strides = array<i32>} : memref<8x2x64xf32, #tpu.memory_space<vmem>>, vector<1x2x32xf32>,
    %1146 = vector.shape_cast %1065 : vector<2x1xi1> to vector<2x1xi1>
    %1147 = vector.broadcast %1146 : vector<2x1xi1> to vector<2x32xi1>
    %1148 = arith.select %1147, %1100, %1052 : vector<2x32xi1>, vector<2x32xf32>
    %1149 = vector.shape_cast %1065 : vector<2x1xi1> to vector<2x1xi1>
    %1150 = vector.broadcast %1149 : vector<2x1xi1> to vector<2x32xi1>
    %1151 = arith.select %1150, %1098, %1055 : vector<2x32xi1>, vector<2x32xf32>
    %1152 = vector.shape_cast %1069 : vector<2x1xi1> to vector<2x1xi1>
    %1153 = vector.broadcast %1152 : vector<2x1xi1> to vector<2x32xi1>
    %1154 = arith.select %1153, %1131, %1058 : vector<2x32xi1>, vector<2x32xf32>
    %1155 = vector.shape_cast %1069 : vector<2x1xi1> to vector<2x1xi1>
    %1156 = vector.broadcast %1155 : vector<2x1xi1> to vector<2x32xi1>
    %1157 = arith.select %1156, %1129, %1061 : vector<2x32xi1>, vector<2x32xf32>
    %c4_376 = arith.constant 4 : index
    %c0_377 = arith.constant 0 : index
    %c0_378 = arith.constant 0 : index
    %1158 = vector.load %arg1[%c4_376, %c0_377, %c0_378] : memref<8x2x1xf32, #tpu.memory_space<vmem>>, vector<1x2x1xf32>
    %1159 = vector.shape_cast %1158 : vector<1x2x1xf32> to vector<2x1xf32>
    %cst_379 = arith.constant 5.000000e-01 : f32
    %1160 = vector.broadcast %cst_379 : f32 to vector<2x1xf32>
    %1161 = arith.cmpf ogt, %1159, %1160 : vector<2x1xf32>
    %c3_380 = arith.constant 3 : index
    %c0_381 = arith.constant 0 : index
    %c0_382 = arith.constant 0 : index
    %1162 = vector.load %arg1[%c3_380, %c0_381, %c0_382] : memref<8x2x1xf32, #tpu.memory_space<vmem>>, vector<1x2x1xf32>
    %1163 = vector.shape_cast %1162 : vector<1x2x1xf32> to vector<2x1xf32>
    %cst_383 = arith.constant 5.000000e-01 : f32
    %1164 = vector.broadcast %cst_383 : f32 to vector<2x1xf32>
    %1165 = arith.cmpf ogt, %1163, %1164 : vector<2x1xf32>
    %c4_384 = arith.constant 4 : index
    %c0_385 = arith.constant 0 : index
    %c0_386 = arith.constant 0 : index
    %1166 = vector.load %arg9[%c4_384, %c0_385, %c0_386] : memref<8x2x64xf32, #tpu.memory_space<vmem>>, vector<1x2x64xf32>
    %1167 = vector.shape_cast %1166 : vector<1x2x64xf32> to vector<2x64xf32>
    %1168 = tpu.concatenate %1167, %1148 in 1 : vector<2x64xf32>, vector<2x32xf32> -> vector<2x96xf32>
    %cst_387 = arith.constant dense<0.000000e+00> : vector<2x128xf32>
    %1169 = tpu.matmul %1168, %766, %cst_387 {dimension_numbers = #tpu.dot_dimension_numbers<[1], [0], [0], [1], [0, 0, 1, 1], [], []>} : vector<2x96xf32>, vector<96x128xf32>, vector<2x128xf32> -> vector<2x128xf32>
    %1170 = vector.broadcast %770 : vector<1x128xf32> to vector<2x128xf32>
    %1171 = arith.addf %1169, %1170 : vector<2x128xf32>
    %1172 = vector.extract_strided_slice %1171 {offsets = [0, 0], sizes = [2, 32], strides = [1, 1]} : vector<2x128xf32> to vector<2x32xf32>
    %1173 = arith.negf %1172 : vector<2x32xf32>
    %1174 = math.exp %1173 : vector<2x32xf32>
    %cst_388 = arith.constant 1.000000e+00 : f32
    %1175 = vector.broadcast %cst_388 : f32 to vector<2x32xf32>
    %1176 = arith.addf %1175, %1174 : vector<2x32xf32>
    %1177 = arith.divf %1175, %1176 : vector<2x32xf32>
    %1178 = vector.extract_strided_slice %1171 {offsets = [0, 32], sizes = [2, 32], strides = [1, 1]} : vector<2x128xf32> to vector<2x32xf32>
    %1179 = arith.negf %1178 : vector<2x32xf32>
    %1180 = math.exp %1179 : vector<2x32xf32>
    %cst_389 = arith.constant 1.000000e+00 : f32
    %1181 = vector.broadcast %cst_389 : f32 to vector<2x32xf32>
    %1182 = arith.addf %1181, %1180 : vector<2x32xf32>
    %1183 = arith.divf %1181, %1182 : vector<2x32xf32>
    %1184 = vector.extract_strided_slice %1171 {offsets = [0, 64], sizes = [2, 32], strides = [1, 1]} : vector<2x128xf32> to vector<2x32xf32>
    %1185 = math.tanh %1184 : vector<2x32xf32>
    %1186 = vector.extract_strided_slice %1171 {offsets = [0, 96], sizes = [2, 32], strides = [1, 1]} : vector<2x128xf32> to vector<2x32xf32>
    %1187 = arith.negf %1186 : vector<2x32xf32>
    %1188 = math.exp %1187 : vector<2x32xf32>
    %cst_390 = arith.constant 1.000000e+00 : f32
    %1189 = vector.broadcast %cst_390 : f32 to vector<2x32xf32>
    %1190 = arith.addf %1189, %1188 : vector<2x32xf32>
    %1191 = arith.divf %1189, %1190 : vector<2x32xf32>
    %1192 = arith.mulf %1183, %1151 : vector<2x32xf32>
    %1193 = arith.mulf %1177, %1185 : vector<2x32xf32>
    %1194 = arith.addf %1192, %1193 : vector<2x32xf32>
    %1195 = math.tanh %1194 : vector<2x32xf32>
    %1196 = arith.mulf %1191, %1195 : vector<2x32xf32>
    %c3_391 = arith.constant 3 : index
    %c0_392 = arith.constant 0 : index
    %c0_393 = arith.constant 0 : index
    %1197 = vector.load %arg9[%c3_391, %c0_392, %c0_393] : memref<8x2x64xf32, #tpu.memory_space<vmem>>, vector<1x2x64xf32>
    %1198 = vector.shape_cast %1197 : vector<1x2x64xf32> to vector<2x64xf32>
    %1199 = tpu.concatenate %1198, %1154 in 1 : vector<2x64xf32>, vector<2x32xf32> -> vector<2x96xf32>
    %cst_394 = arith.constant dense<0.000000e+00> : vector<2x128xf32>
    %1200 = tpu.matmul %1199, %768, %cst_394 {dimension_numbers = #tpu.dot_dimension_numbers<[1], [0], [0], [1], [0, 0, 1, 1], [], []>} : vector<2x96xf32>, vector<96x128xf32>, vector<2x128xf32> -> vector<2x128xf32>
    %1201 = vector.broadcast %772 : vector<1x128xf32> to vector<2x128xf32>
    %1202 = arith.addf %1200, %1201 : vector<2x128xf32>
    %1203 = vector.extract_strided_slice %1202 {offsets = [0, 0], sizes = [2, 32], strides = [1, 1]} : vector<2x128xf32> to vector<2x32xf32>
    %1204 = arith.negf %1203 : vector<2x32xf32>
    %1205 = math.exp %1204 : vector<2x32xf32>
    %cst_395 = arith.constant 1.000000e+00 : f32
    %1206 = vector.broadcast %cst_395 : f32 to vector<2x32xf32>
    %1207 = arith.addf %1206, %1205 : vector<2x32xf32>
    %1208 = arith.divf %1206, %1207 : vector<2x32xf32>
    %1209 = vector.extract_strided_slice %1202 {offsets = [0, 32], sizes = [2, 32], strides = [1, 1]} : vector<2x128xf32> to vector<2x32xf32>
    %1210 = arith.negf %1209 : vector<2x32xf32>
    %1211 = math.exp %1210 : vector<2x32xf32>
    %cst_396 = arith.constant 1.000000e+00 : f32
    %1212 = vector.broadcast %cst_396 : f32 to vector<2x32xf32>
    %1213 = arith.addf %1212, %1211 : vector<2x32xf32>
    %1214 = arith.divf %1212, %1213 : vector<2x32xf32>
    %1215 = vector.extract_strided_slice %1202 {offsets = [0, 64], sizes = [2, 32], strides = [1, 1]} : vector<2x128xf32> to vector<2x32xf32>
    %1216 = math.tanh %1215 : vector<2x32xf32>
    %1217 = vector.extract_strided_slice %1202 {offsets = [0, 96], sizes = [2, 32], strides = [1, 1]} : vector<2x128xf32> to vector<2x32xf32>
    %1218 = arith.negf %1217 : vector<2x32xf32>
    %1219 = math.exp %1218 : vector<2x32xf32>
    %cst_397 = arith.constant 1.000000e+00 : f32
    %1220 = vector.broadcast %cst_397 : f32 to vector<2x32xf32>
    %1221 = arith.addf %1220, %1219 : vector<2x32xf32>
    %1222 = arith.divf %1220, %1221 : vector<2x32xf32>
    %1223 = arith.mulf %1214, %1157 : vector<2x32xf32>
    %1224 = arith.mulf %1208, %1216 : vector<2x32xf32>
    %1225 = arith.addf %1223, %1224 : vector<2x32xf32>
    %1226 = math.tanh %1225 : vector<2x32xf32>
    %1227 = arith.mulf %1222, %1226 : vector<2x32xf32>
    %cst_398 = arith.constant 0.000000e+00 : f32
    %1228 = vector.shape_cast %1161 : vector<2x1xi1> to vector<2x1xi1>
    %1229 = vector.broadcast %1228 : vector<2x1xi1> to vector<2x32xi1>
    %1230 = vector.broadcast %cst_398 : f32 to vector<2x32xf32>
    %1231 = arith.select %1229, %1196, %1230 : vector<2x32xi1>, vector<2x32xf32>
    %c4_399 = arith.constant 4 : index
    %c0_400 = arith.constant 0 : index
    %c0_401 = arith.constant 0 : index
    %1232 = vector.load %arg10[%c4_399, %c0_400, %c0_401] : memref<8x2x64xf32, #tpu.memory_space<vmem>>, vector<1x2x32xf32>
    %1233 = vector.shape_cast %1232 : vector<1x2x32xf32> to vector<2x32xf32>
    %1234 = vector.shape_cast %1231 : vector<2x32xf32> to vector<1x2x32xf32>
    tpu.vector_store %arg10[%c4_399, %c0_400, %c0_401], %1234 {strides = array<i32>} : memref<8x2x64xf32, #tpu.memory_space<vmem>>, vector<1x2x32xf32>,
    %cst_402 = arith.constant 0.000000e+00 : f32
    %1235 = vector.shape_cast %1165 : vector<2x1xi1> to vector<2x1xi1>
    %1236 = vector.broadcast %1235 : vector<2x1xi1> to vector<2x32xi1>
    %1237 = vector.broadcast %cst_402 : f32 to vector<2x32xf32>
    %1238 = arith.select %1236, %1227, %1237 : vector<2x32xi1>, vector<2x32xf32>
    %c3_403 = arith.constant 3 : index
    %c0_404 = arith.constant 0 : index
    %c32_405 = arith.constant 32 : index
    %1239 = vector.load %arg10[%c3_403, %c0_404, %c32_405] : memref<8x2x64xf32, #tpu.memory_space<vmem>>, vector<1x2x32xf32>
    %1240 = vector.shape_cast %1239 : vector<1x2x32xf32> to vector<2x32xf32>
    %1241 = vector.shape_cast %1238 : vector<2x32xf32> to vector<1x2x32xf32>
    tpu.vector_store %arg10[%c3_403, %c0_404, %c32_405], %1241 {strides = array<i32>} : memref<8x2x64xf32, #tpu.memory_space<vmem>>, vector<1x2x32xf32>,
    %1242 = vector.shape_cast %1161 : vector<2x1xi1> to vector<2x1xi1>
    %1243 = vector.broadcast %1242 : vector<2x1xi1> to vector<2x32xi1>
    %1244 = arith.select %1243, %1196, %1148 : vector<2x32xi1>, vector<2x32xf32>
    %1245 = vector.shape_cast %1161 : vector<2x1xi1> to vector<2x1xi1>
    %1246 = vector.broadcast %1245 : vector<2x1xi1> to vector<2x32xi1>
    %1247 = arith.select %1246, %1194, %1151 : vector<2x32xi1>, vector<2x32xf32>
    %1248 = vector.shape_cast %1165 : vector<2x1xi1> to vector<2x1xi1>
    %1249 = vector.broadcast %1248 : vector<2x1xi1> to vector<2x32xi1>
    %1250 = arith.select %1249, %1227, %1154 : vector<2x32xi1>, vector<2x32xf32>
    %1251 = vector.shape_cast %1165 : vector<2x1xi1> to vector<2x1xi1>
    %1252 = vector.broadcast %1251 : vector<2x1xi1> to vector<2x32xi1>
    %1253 = arith.select %1252, %1225, %1157 : vector<2x32xi1>, vector<2x32xf32>
    %c5_406 = arith.constant 5 : index
    %c0_407 = arith.constant 0 : index
    %c0_408 = arith.constant 0 : index
    %1254 = vector.load %arg1[%c5_406, %c0_407, %c0_408] : memref<8x2x1xf32, #tpu.memory_space<vmem>>, vector<1x2x1xf32>
    %1255 = vector.shape_cast %1254 : vector<1x2x1xf32> to vector<2x1xf32>
    %cst_409 = arith.constant 5.000000e-01 : f32
    %1256 = vector.broadcast %cst_409 : f32 to vector<2x1xf32>
    %1257 = arith.cmpf ogt, %1255, %1256 : vector<2x1xf32>
    %c2_410 = arith.constant 2 : index
    %c0_411 = arith.constant 0 : index
    %c0_412 = arith.constant 0 : index
    %1258 = vector.load %arg1[%c2_410, %c0_411, %c0_412] : memref<8x2x1xf32, #tpu.memory_space<vmem>>, vector<1x2x1xf32>
    %1259 = vector.shape_cast %1258 : vector<1x2x1xf32> to vector<2x1xf32>
    %cst_413 = arith.constant 5.000000e-01 : f32
    %1260 = vector.broadcast %cst_413 : f32 to vector<2x1xf32>
    %1261 = arith.cmpf ogt, %1259, %1260 : vector<2x1xf32>
    %c5_414 = arith.constant 5 : index
    %c0_415 = arith.constant 0 : index
    %c0_416 = arith.constant 0 : index
    %1262 = vector.load %arg9[%c5_414, %c0_415, %c0_416] : memref<8x2x64xf32, #tpu.memory_space<vmem>>, vector<1x2x64xf32>
    %1263 = vector.shape_cast %1262 : vector<1x2x64xf32> to vector<2x64xf32>
    %1264 = tpu.concatenate %1263, %1244 in 1 : vector<2x64xf32>, vector<2x32xf32> -> vector<2x96xf32>
    %cst_417 = arith.constant dense<0.000000e+00> : vector<2x128xf32>
    %1265 = tpu.matmul %1264, %766, %cst_417 {dimension_numbers = #tpu.dot_dimension_numbers<[1], [0], [0], [1], [0, 0, 1, 1], [], []>} : vector<2x96xf32>, vector<96x128xf32>, vector<2x128xf32> -> vector<2x128xf32>
    %1266 = vector.broadcast %770 : vector<1x128xf32> to vector<2x128xf32>
    %1267 = arith.addf %1265, %1266 : vector<2x128xf32>
    %1268 = vector.extract_strided_slice %1267 {offsets = [0, 0], sizes = [2, 32], strides = [1, 1]} : vector<2x128xf32> to vector<2x32xf32>
    %1269 = arith.negf %1268 : vector<2x32xf32>
    %1270 = math.exp %1269 : vector<2x32xf32>
    %cst_418 = arith.constant 1.000000e+00 : f32
    %1271 = vector.broadcast %cst_418 : f32 to vector<2x32xf32>
    %1272 = arith.addf %1271, %1270 : vector<2x32xf32>
    %1273 = arith.divf %1271, %1272 : vector<2x32xf32>
    %1274 = vector.extract_strided_slice %1267 {offsets = [0, 32], sizes = [2, 32], strides = [1, 1]} : vector<2x128xf32> to vector<2x32xf32>
    %1275 = arith.negf %1274 : vector<2x32xf32>
    %1276 = math.exp %1275 : vector<2x32xf32>
    %cst_419 = arith.constant 1.000000e+00 : f32
    %1277 = vector.broadcast %cst_419 : f32 to vector<2x32xf32>
    %1278 = arith.addf %1277, %1276 : vector<2x32xf32>
    %1279 = arith.divf %1277, %1278 : vector<2x32xf32>
    %1280 = vector.extract_strided_slice %1267 {offsets = [0, 64], sizes = [2, 32], strides = [1, 1]} : vector<2x128xf32> to vector<2x32xf32>
    %1281 = math.tanh %1280 : vector<2x32xf32>
    %1282 = vector.extract_strided_slice %1267 {offsets = [0, 96], sizes = [2, 32], strides = [1, 1]} : vector<2x128xf32> to vector<2x32xf32>
    %1283 = arith.negf %1282 : vector<2x32xf32>
    %1284 = math.exp %1283 : vector<2x32xf32>
    %cst_420 = arith.constant 1.000000e+00 : f32
    %1285 = vector.broadcast %cst_420 : f32 to vector<2x32xf32>
    %1286 = arith.addf %1285, %1284 : vector<2x32xf32>
    %1287 = arith.divf %1285, %1286 : vector<2x32xf32>
    %1288 = arith.mulf %1279, %1247 : vector<2x32xf32>
    %1289 = arith.mulf %1273, %1281 : vector<2x32xf32>
    %1290 = arith.addf %1288, %1289 : vector<2x32xf32>
    %1291 = math.tanh %1290 : vector<2x32xf32>
    %1292 = arith.mulf %1287, %1291 : vector<2x32xf32>
    %c2_421 = arith.constant 2 : index
    %c0_422 = arith.constant 0 : index
    %c0_423 = arith.constant 0 : index
    %1293 = vector.load %arg9[%c2_421, %c0_422, %c0_423] : memref<8x2x64xf32, #tpu.memory_space<vmem>>, vector<1x2x64xf32>
    %1294 = vector.shape_cast %1293 : vector<1x2x64xf32> to vector<2x64xf32>
    %1295 = tpu.concatenate %1294, %1250 in 1 : vector<2x64xf32>, vector<2x32xf32> -> vector<2x96xf32>
    %cst_424 = arith.constant dense<0.000000e+00> : vector<2x128xf32>
    %1296 = tpu.matmul %1295, %768, %cst_424 {dimension_numbers = #tpu.dot_dimension_numbers<[1], [0], [0], [1], [0, 0, 1, 1], [], []>} : vector<2x96xf32>, vector<96x128xf32>, vector<2x128xf32> -> vector<2x128xf32>
    %1297 = vector.broadcast %772 : vector<1x128xf32> to vector<2x128xf32>
    %1298 = arith.addf %1296, %1297 : vector<2x128xf32>
    %1299 = vector.extract_strided_slice %1298 {offsets = [0, 0], sizes = [2, 32], strides = [1, 1]} : vector<2x128xf32> to vector<2x32xf32>
    %1300 = arith.negf %1299 : vector<2x32xf32>
    %1301 = math.exp %1300 : vector<2x32xf32>
    %cst_425 = arith.constant 1.000000e+00 : f32
    %1302 = vector.broadcast %cst_425 : f32 to vector<2x32xf32>
    %1303 = arith.addf %1302, %1301 : vector<2x32xf32>
    %1304 = arith.divf %1302, %1303 : vector<2x32xf32>
    %1305 = vector.extract_strided_slice %1298 {offsets = [0, 32], sizes = [2, 32], strides = [1, 1]} : vector<2x128xf32> to vector<2x32xf32>
    %1306 = arith.negf %1305 : vector<2x32xf32>
    %1307 = math.exp %1306 : vector<2x32xf32>
    %cst_426 = arith.constant 1.000000e+00 : f32
    %1308 = vector.broadcast %cst_426 : f32 to vector<2x32xf32>
    %1309 = arith.addf %1308, %1307 : vector<2x32xf32>
    %1310 = arith.divf %1308, %1309 : vector<2x32xf32>
    %1311 = vector.extract_strided_slice %1298 {offsets = [0, 64], sizes = [2, 32], strides = [1, 1]} : vector<2x128xf32> to vector<2x32xf32>
    %1312 = math.tanh %1311 : vector<2x32xf32>
    %1313 = vector.extract_strided_slice %1298 {offsets = [0, 96], sizes = [2, 32], strides = [1, 1]} : vector<2x128xf32> to vector<2x32xf32>
    %1314 = arith.negf %1313 : vector<2x32xf32>
    %1315 = math.exp %1314 : vector<2x32xf32>
    %cst_427 = arith.constant 1.000000e+00 : f32
    %1316 = vector.broadcast %cst_427 : f32 to vector<2x32xf32>
    %1317 = arith.addf %1316, %1315 : vector<2x32xf32>
    %1318 = arith.divf %1316, %1317 : vector<2x32xf32>
    %1319 = arith.mulf %1310, %1253 : vector<2x32xf32>
    %1320 = arith.mulf %1304, %1312 : vector<2x32xf32>
    %1321 = arith.addf %1319, %1320 : vector<2x32xf32>
    %1322 = math.tanh %1321 : vector<2x32xf32>
    %1323 = arith.mulf %1318, %1322 : vector<2x32xf32>
    %cst_428 = arith.constant 0.000000e+00 : f32
    %1324 = vector.shape_cast %1257 : vector<2x1xi1> to vector<2x1xi1>
    %1325 = vector.broadcast %1324 : vector<2x1xi1> to vector<2x32xi1>
    %1326 = vector.broadcast %cst_428 : f32 to vector<2x32xf32>
    %1327 = arith.select %1325, %1292, %1326 : vector<2x32xi1>, vector<2x32xf32>
    %c5_429 = arith.constant 5 : index
    %c0_430 = arith.constant 0 : index
    %c0_431 = arith.constant 0 : index
    %1328 = vector.load %arg10[%c5_429, %c0_430, %c0_431] : memref<8x2x64xf32, #tpu.memory_space<vmem>>, vector<1x2x32xf32>
    %1329 = vector.shape_cast %1328 : vector<1x2x32xf32> to vector<2x32xf32>
    %1330 = vector.shape_cast %1327 : vector<2x32xf32> to vector<1x2x32xf32>
    tpu.vector_store %arg10[%c5_429, %c0_430, %c0_431], %1330 {strides = array<i32>} : memref<8x2x64xf32, #tpu.memory_space<vmem>>, vector<1x2x32xf32>,
    %cst_432 = arith.constant 0.000000e+00 : f32
    %1331 = vector.shape_cast %1261 : vector<2x1xi1> to vector<2x1xi1>
    %1332 = vector.broadcast %1331 : vector<2x1xi1> to vector<2x32xi1>
    %1333 = vector.broadcast %cst_432 : f32 to vector<2x32xf32>
    %1334 = arith.select %1332, %1323, %1333 : vector<2x32xi1>, vector<2x32xf32>
    %c2_433 = arith.constant 2 : index
    %c0_434 = arith.constant 0 : index
    %c32_435 = arith.constant 32 : index
    %1335 = vector.load %arg10[%c2_433, %c0_434, %c32_435] : memref<8x2x64xf32, #tpu.memory_space<vmem>>, vector<1x2x32xf32>
    %1336 = vector.shape_cast %1335 : vector<1x2x32xf32> to vector<2x32xf32>
    %1337 = vector.shape_cast %1334 : vector<2x32xf32> to vector<1x2x32xf32>
    tpu.vector_store %arg10[%c2_433, %c0_434, %c32_435], %1337 {strides = array<i32>} : memref<8x2x64xf32, #tpu.memory_space<vmem>>, vector<1x2x32xf32>,
    %1338 = vector.shape_cast %1257 : vector<2x1xi1> to vector<2x1xi1>
    %1339 = vector.broadcast %1338 : vector<2x1xi1> to vector<2x32xi1>
    %1340 = arith.select %1339, %1292, %1244 : vector<2x32xi1>, vector<2x32xf32>
    %1341 = vector.shape_cast %1257 : vector<2x1xi1> to vector<2x1xi1>
    %1342 = vector.broadcast %1341 : vector<2x1xi1> to vector<2x32xi1>
    %1343 = arith.select %1342, %1290, %1247 : vector<2x32xi1>, vector<2x32xf32>
    %1344 = vector.shape_cast %1261 : vector<2x1xi1> to vector<2x1xi1>
    %1345 = vector.broadcast %1344 : vector<2x1xi1> to vector<2x32xi1>
    %1346 = arith.select %1345, %1323, %1250 : vector<2x32xi1>, vector<2x32xf32>
    %1347 = vector.shape_cast %1261 : vector<2x1xi1> to vector<2x1xi1>
    %1348 = vector.broadcast %1347 : vector<2x1xi1> to vector<2x32xi1>
    %1349 = arith.select %1348, %1321, %1253 : vector<2x32xi1>, vector<2x32xf32>
    %c6_436 = arith.constant 6 : index
    %c0_437 = arith.constant 0 : index
    %c0_438 = arith.constant 0 : index
    %1350 = vector.load %arg1[%c6_436, %c0_437, %c0_438] : memref<8x2x1xf32, #tpu.memory_space<vmem>>, vector<1x2x1xf32>
    %1351 = vector.shape_cast %1350 : vector<1x2x1xf32> to vector<2x1xf32>
    %cst_439 = arith.constant 5.000000e-01 : f32
    %1352 = vector.broadcast %cst_439 : f32 to vector<2x1xf32>
    %1353 = arith.cmpf ogt, %1351, %1352 : vector<2x1xf32>
    %c1_440 = arith.constant 1 : index
    %c0_441 = arith.constant 0 : index
    %c0_442 = arith.constant 0 : index
    %1354 = vector.load %arg1[%c1_440, %c0_441, %c0_442] : memref<8x2x1xf32, #tpu.memory_space<vmem>>, vector<1x2x1xf32>
    %1355 = vector.shape_cast %1354 : vector<1x2x1xf32> to vector<2x1xf32>
    %cst_443 = arith.constant 5.000000e-01 : f32
    %1356 = vector.broadcast %cst_443 : f32 to vector<2x1xf32>
    %1357 = arith.cmpf ogt, %1355, %1356 : vector<2x1xf32>
    %c6_444 = arith.constant 6 : index
    %c0_445 = arith.constant 0 : index
    %c0_446 = arith.constant 0 : index
    %1358 = vector.load %arg9[%c6_444, %c0_445, %c0_446] : memref<8x2x64xf32, #tpu.memory_space<vmem>>, vector<1x2x64xf32>
    %1359 = vector.shape_cast %1358 : vector<1x2x64xf32> to vector<2x64xf32>
    %1360 = tpu.concatenate %1359, %1340 in 1 : vector<2x64xf32>, vector<2x32xf32> -> vector<2x96xf32>
    %cst_447 = arith.constant dense<0.000000e+00> : vector<2x128xf32>
    %1361 = tpu.matmul %1360, %766, %cst_447 {dimension_numbers = #tpu.dot_dimension_numbers<[1], [0], [0], [1], [0, 0, 1, 1], [], []>} : vector<2x96xf32>, vector<96x128xf32>, vector<2x128xf32> -> vector<2x128xf32>
    %1362 = vector.broadcast %770 : vector<1x128xf32> to vector<2x128xf32>
    %1363 = arith.addf %1361, %1362 : vector<2x128xf32>
    %1364 = vector.extract_strided_slice %1363 {offsets = [0, 0], sizes = [2, 32], strides = [1, 1]} : vector<2x128xf32> to vector<2x32xf32>
    %1365 = arith.negf %1364 : vector<2x32xf32>
    %1366 = math.exp %1365 : vector<2x32xf32>
    %cst_448 = arith.constant 1.000000e+00 : f32
    %1367 = vector.broadcast %cst_448 : f32 to vector<2x32xf32>
    %1368 = arith.addf %1367, %1366 : vector<2x32xf32>
    %1369 = arith.divf %1367, %1368 : vector<2x32xf32>
    %1370 = vector.extract_strided_slice %1363 {offsets = [0, 32], sizes = [2, 32], strides = [1, 1]} : vector<2x128xf32> to vector<2x32xf32>
    %1371 = arith.negf %1370 : vector<2x32xf32>
    %1372 = math.exp %1371 : vector<2x32xf32>
    %cst_449 = arith.constant 1.000000e+00 : f32
    %1373 = vector.broadcast %cst_449 : f32 to vector<2x32xf32>
    %1374 = arith.addf %1373, %1372 : vector<2x32xf32>
    %1375 = arith.divf %1373, %1374 : vector<2x32xf32>
    %1376 = vector.extract_strided_slice %1363 {offsets = [0, 64], sizes = [2, 32], strides = [1, 1]} : vector<2x128xf32> to vector<2x32xf32>
    %1377 = math.tanh %1376 : vector<2x32xf32>
    %1378 = vector.extract_strided_slice %1363 {offsets = [0, 96], sizes = [2, 32], strides = [1, 1]} : vector<2x128xf32> to vector<2x32xf32>
    %1379 = arith.negf %1378 : vector<2x32xf32>
    %1380 = math.exp %1379 : vector<2x32xf32>
    %cst_450 = arith.constant 1.000000e+00 : f32
    %1381 = vector.broadcast %cst_450 : f32 to vector<2x32xf32>
    %1382 = arith.addf %1381, %1380 : vector<2x32xf32>
    %1383 = arith.divf %1381, %1382 : vector<2x32xf32>
    %1384 = arith.mulf %1375, %1343 : vector<2x32xf32>
    %1385 = arith.mulf %1369, %1377 : vector<2x32xf32>
    %1386 = arith.addf %1384, %1385 : vector<2x32xf32>
    %1387 = math.tanh %1386 : vector<2x32xf32>
    %1388 = arith.mulf %1383, %1387 : vector<2x32xf32>
    %c1_451 = arith.constant 1 : index
    %c0_452 = arith.constant 0 : index
    %c0_453 = arith.constant 0 : index
    %1389 = vector.load %arg9[%c1_451, %c0_452, %c0_453] : memref<8x2x64xf32, #tpu.memory_space<vmem>>, vector<1x2x64xf32>
    %1390 = vector.shape_cast %1389 : vector<1x2x64xf32> to vector<2x64xf32>
    %1391 = tpu.concatenate %1390, %1346 in 1 : vector<2x64xf32>, vector<2x32xf32> -> vector<2x96xf32>
    %cst_454 = arith.constant dense<0.000000e+00> : vector<2x128xf32>
    %1392 = tpu.matmul %1391, %768, %cst_454 {dimension_numbers = #tpu.dot_dimension_numbers<[1], [0], [0], [1], [0, 0, 1, 1], [], []>} : vector<2x96xf32>, vector<96x128xf32>, vector<2x128xf32> -> vector<2x128xf32>
    %1393 = vector.broadcast %772 : vector<1x128xf32> to vector<2x128xf32>
    %1394 = arith.addf %1392, %1393 : vector<2x128xf32>
    %1395 = vector.extract_strided_slice %1394 {offsets = [0, 0], sizes = [2, 32], strides = [1, 1]} : vector<2x128xf32> to vector<2x32xf32>
    %1396 = arith.negf %1395 : vector<2x32xf32>
    %1397 = math.exp %1396 : vector<2x32xf32>
    %cst_455 = arith.constant 1.000000e+00 : f32
    %1398 = vector.broadcast %cst_455 : f32 to vector<2x32xf32>
    %1399 = arith.addf %1398, %1397 : vector<2x32xf32>
    %1400 = arith.divf %1398, %1399 : vector<2x32xf32>
    %1401 = vector.extract_strided_slice %1394 {offsets = [0, 32], sizes = [2, 32], strides = [1, 1]} : vector<2x128xf32> to vector<2x32xf32>
    %1402 = arith.negf %1401 : vector<2x32xf32>
    %1403 = math.exp %1402 : vector<2x32xf32>
    %cst_456 = arith.constant 1.000000e+00 : f32
    %1404 = vector.broadcast %cst_456 : f32 to vector<2x32xf32>
    %1405 = arith.addf %1404, %1403 : vector<2x32xf32>
    %1406 = arith.divf %1404, %1405 : vector<2x32xf32>
    %1407 = vector.extract_strided_slice %1394 {offsets = [0, 64], sizes = [2, 32], strides = [1, 1]} : vector<2x128xf32> to vector<2x32xf32>
    %1408 = math.tanh %1407 : vector<2x32xf32>
    %1409 = vector.extract_strided_slice %1394 {offsets = [0, 96], sizes = [2, 32], strides = [1, 1]} : vector<2x128xf32> to vector<2x32xf32>
    %1410 = arith.negf %1409 : vector<2x32xf32>
    %1411 = math.exp %1410 : vector<2x32xf32>
    %cst_457 = arith.constant 1.000000e+00 : f32
    %1412 = vector.broadcast %cst_457 : f32 to vector<2x32xf32>
    %1413 = arith.addf %1412, %1411 : vector<2x32xf32>
    %1414 = arith.divf %1412, %1413 : vector<2x32xf32>
    %1415 = arith.mulf %1406, %1349 : vector<2x32xf32>
    %1416 = arith.mulf %1400, %1408 : vector<2x32xf32>
    %1417 = arith.addf %1415, %1416 : vector<2x32xf32>
    %1418 = math.tanh %1417 : vector<2x32xf32>
    %1419 = arith.mulf %1414, %1418 : vector<2x32xf32>
    %cst_458 = arith.constant 0.000000e+00 : f32
    %1420 = vector.shape_cast %1353 : vector<2x1xi1> to vector<2x1xi1>
    %1421 = vector.broadcast %1420 : vector<2x1xi1> to vector<2x32xi1>
    %1422 = vector.broadcast %cst_458 : f32 to vector<2x32xf32>
    %1423 = arith.select %1421, %1388, %1422 : vector<2x32xi1>, vector<2x32xf32>
    %c6_459 = arith.constant 6 : index
    %c0_460 = arith.constant 0 : index
    %c0_461 = arith.constant 0 : index
    %1424 = vector.load %arg10[%c6_459, %c0_460, %c0_461] : memref<8x2x64xf32, #tpu.memory_space<vmem>>, vector<1x2x32xf32>
    %1425 = vector.shape_cast %1424 : vector<1x2x32xf32> to vector<2x32xf32>
    %1426 = vector.shape_cast %1423 : vector<2x32xf32> to vector<1x2x32xf32>
    tpu.vector_store %arg10[%c6_459, %c0_460, %c0_461], %1426 {strides = array<i32>} : memref<8x2x64xf32, #tpu.memory_space<vmem>>, vector<1x2x32xf32>,
    %cst_462 = arith.constant 0.000000e+00 : f32
    %1427 = vector.shape_cast %1357 : vector<2x1xi1> to vector<2x1xi1>
    %1428 = vector.broadcast %1427 : vector<2x1xi1> to vector<2x32xi1>
    %1429 = vector.broadcast %cst_462 : f32 to vector<2x32xf32>
    %1430 = arith.select %1428, %1419, %1429 : vector<2x32xi1>, vector<2x32xf32>
    %c1_463 = arith.constant 1 : index
    %c0_464 = arith.constant 0 : index
    %c32_465 = arith.constant 32 : index
    %1431 = vector.load %arg10[%c1_463, %c0_464, %c32_465] : memref<8x2x64xf32, #tpu.memory_space<vmem>>, vector<1x2x32xf32>
    %1432 = vector.shape_cast %1431 : vector<1x2x32xf32> to vector<2x32xf32>
    %1433 = vector.shape_cast %1430 : vector<2x32xf32> to vector<1x2x32xf32>
    tpu.vector_store %arg10[%c1_463, %c0_464, %c32_465], %1433 {strides = array<i32>} : memref<8x2x64xf32, #tpu.memory_space<vmem>>, vector<1x2x32xf32>,
    %1434 = vector.shape_cast %1353 : vector<2x1xi1> to vector<2x1xi1>
    %1435 = vector.broadcast %1434 : vector<2x1xi1> to vector<2x32xi1>
    %1436 = arith.select %1435, %1388, %1340 : vector<2x32xi1>, vector<2x32xf32>
    %1437 = vector.shape_cast %1353 : vector<2x1xi1> to vector<2x1xi1>
    %1438 = vector.broadcast %1437 : vector<2x1xi1> to vector<2x32xi1>
    %1439 = arith.select %1438, %1386, %1343 : vector<2x32xi1>, vector<2x32xf32>
    %1440 = vector.shape_cast %1357 : vector<2x1xi1> to vector<2x1xi1>
    %1441 = vector.broadcast %1440 : vector<2x1xi1> to vector<2x32xi1>
    %1442 = arith.select %1441, %1419, %1346 : vector<2x32xi1>, vector<2x32xf32>
    %1443 = vector.shape_cast %1357 : vector<2x1xi1> to vector<2x1xi1>
    %1444 = vector.broadcast %1443 : vector<2x1xi1> to vector<2x32xi1>
    %1445 = arith.select %1444, %1417, %1349 : vector<2x32xi1>, vector<2x32xf32>
    %c7_466 = arith.constant 7 : index
    %c0_467 = arith.constant 0 : index
    %c0_468 = arith.constant 0 : index
    %1446 = vector.load %arg1[%c7_466, %c0_467, %c0_468] : memref<8x2x1xf32, #tpu.memory_space<vmem>>, vector<1x2x1xf32>
    %1447 = vector.shape_cast %1446 : vector<1x2x1xf32> to vector<2x1xf32>
    %cst_469 = arith.constant 5.000000e-01 : f32
    %1448 = vector.broadcast %cst_469 : f32 to vector<2x1xf32>
    %1449 = arith.cmpf ogt, %1447, %1448 : vector<2x1xf32>
    %c0_470 = arith.constant 0 : index
    %c0_471 = arith.constant 0 : index
    %c0_472 = arith.constant 0 : index
    %1450 = vector.load %arg1[%c0_470, %c0_471, %c0_472] : memref<8x2x1xf32, #tpu.memory_space<vmem>>, vector<1x2x1xf32>
    %1451 = vector.shape_cast %1450 : vector<1x2x1xf32> to vector<2x1xf32>
    %cst_473 = arith.constant 5.000000e-01 : f32
    %1452 = vector.broadcast %cst_473 : f32 to vector<2x1xf32>
    %1453 = arith.cmpf ogt, %1451, %1452 : vector<2x1xf32>
    %c7_474 = arith.constant 7 : index
    %c0_475 = arith.constant 0 : index
    %c0_476 = arith.constant 0 : index
    %1454 = vector.load %arg9[%c7_474, %c0_475, %c0_476] : memref<8x2x64xf32, #tpu.memory_space<vmem>>, vector<1x2x64xf32>
    %1455 = vector.shape_cast %1454 : vector<1x2x64xf32> to vector<2x64xf32>
    %1456 = tpu.concatenate %1455, %1436 in 1 : vector<2x64xf32>, vector<2x32xf32> -> vector<2x96xf32>
    %cst_477 = arith.constant dense<0.000000e+00> : vector<2x128xf32>
    %1457 = tpu.matmul %1456, %766, %cst_477 {dimension_numbers = #tpu.dot_dimension_numbers<[1], [0], [0], [1], [0, 0, 1, 1], [], []>} : vector<2x96xf32>, vector<96x128xf32>, vector<2x128xf32> -> vector<2x128xf32>
    %1458 = vector.broadcast %770 : vector<1x128xf32> to vector<2x128xf32>
    %1459 = arith.addf %1457, %1458 : vector<2x128xf32>
    %1460 = vector.extract_strided_slice %1459 {offsets = [0, 0], sizes = [2, 32], strides = [1, 1]} : vector<2x128xf32> to vector<2x32xf32>
    %1461 = arith.negf %1460 : vector<2x32xf32>
    %1462 = math.exp %1461 : vector<2x32xf32>
    %cst_478 = arith.constant 1.000000e+00 : f32
    %1463 = vector.broadcast %cst_478 : f32 to vector<2x32xf32>
    %1464 = arith.addf %1463, %1462 : vector<2x32xf32>
    %1465 = arith.divf %1463, %1464 : vector<2x32xf32>
    %1466 = vector.extract_strided_slice %1459 {offsets = [0, 32], sizes = [2, 32], strides = [1, 1]} : vector<2x128xf32> to vector<2x32xf32>
    %1467 = arith.negf %1466 : vector<2x32xf32>
    %1468 = math.exp %1467 : vector<2x32xf32>
    %cst_479 = arith.constant 1.000000e+00 : f32
    %1469 = vector.broadcast %cst_479 : f32 to vector<2x32xf32>
    %1470 = arith.addf %1469, %1468 : vector<2x32xf32>
    %1471 = arith.divf %1469, %1470 : vector<2x32xf32>
    %1472 = vector.extract_strided_slice %1459 {offsets = [0, 64], sizes = [2, 32], strides = [1, 1]} : vector<2x128xf32> to vector<2x32xf32>
    %1473 = math.tanh %1472 : vector<2x32xf32>
    %1474 = vector.extract_strided_slice %1459 {offsets = [0, 96], sizes = [2, 32], strides = [1, 1]} : vector<2x128xf32> to vector<2x32xf32>
    %1475 = arith.negf %1474 : vector<2x32xf32>
    %1476 = math.exp %1475 : vector<2x32xf32>
    %cst_480 = arith.constant 1.000000e+00 : f32
    %1477 = vector.broadcast %cst_480 : f32 to vector<2x32xf32>
    %1478 = arith.addf %1477, %1476 : vector<2x32xf32>
    %1479 = arith.divf %1477, %1478 : vector<2x32xf32>
    %1480 = arith.mulf %1471, %1439 : vector<2x32xf32>
    %1481 = arith.mulf %1465, %1473 : vector<2x32xf32>
    %1482 = arith.addf %1480, %1481 : vector<2x32xf32>
    %1483 = math.tanh %1482 : vector<2x32xf32>
    %1484 = arith.mulf %1479, %1483 : vector<2x32xf32>
    %c0_481 = arith.constant 0 : index
    %c0_482 = arith.constant 0 : index
    %c0_483 = arith.constant 0 : index
    %1485 = vector.load %arg9[%c0_481, %c0_482, %c0_483] : memref<8x2x64xf32, #tpu.memory_space<vmem>>, vector<1x2x64xf32>
    %1486 = vector.shape_cast %1485 : vector<1x2x64xf32> to vector<2x64xf32>
    %1487 = tpu.concatenate %1486, %1442 in 1 : vector<2x64xf32>, vector<2x32xf32> -> vector<2x96xf32>
    %cst_484 = arith.constant dense<0.000000e+00> : vector<2x128xf32>
    %1488 = tpu.matmul %1487, %768, %cst_484 {dimension_numbers = #tpu.dot_dimension_numbers<[1], [0], [0], [1], [0, 0, 1, 1], [], []>} : vector<2x96xf32>, vector<96x128xf32>, vector<2x128xf32> -> vector<2x128xf32>
    %1489 = vector.broadcast %772 : vector<1x128xf32> to vector<2x128xf32>
    %1490 = arith.addf %1488, %1489 : vector<2x128xf32>
    %1491 = vector.extract_strided_slice %1490 {offsets = [0, 0], sizes = [2, 32], strides = [1, 1]} : vector<2x128xf32> to vector<2x32xf32>
    %1492 = arith.negf %1491 : vector<2x32xf32>
    %1493 = math.exp %1492 : vector<2x32xf32>
    %cst_485 = arith.constant 1.000000e+00 : f32
    %1494 = vector.broadcast %cst_485 : f32 to vector<2x32xf32>
    %1495 = arith.addf %1494, %1493 : vector<2x32xf32>
    %1496 = arith.divf %1494, %1495 : vector<2x32xf32>
    %1497 = vector.extract_strided_slice %1490 {offsets = [0, 32], sizes = [2, 32], strides = [1, 1]} : vector<2x128xf32> to vector<2x32xf32>
    %1498 = arith.negf %1497 : vector<2x32xf32>
    %1499 = math.exp %1498 : vector<2x32xf32>
    %cst_486 = arith.constant 1.000000e+00 : f32
    %1500 = vector.broadcast %cst_486 : f32 to vector<2x32xf32>
    %1501 = arith.addf %1500, %1499 : vector<2x32xf32>
    %1502 = arith.divf %1500, %1501 : vector<2x32xf32>
    %1503 = vector.extract_strided_slice %1490 {offsets = [0, 64], sizes = [2, 32], strides = [1, 1]} : vector<2x128xf32> to vector<2x32xf32>
    %1504 = math.tanh %1503 : vector<2x32xf32>
    %1505 = vector.extract_strided_slice %1490 {offsets = [0, 96], sizes = [2, 32], strides = [1, 1]} : vector<2x128xf32> to vector<2x32xf32>
    %1506 = arith.negf %1505 : vector<2x32xf32>
    %1507 = math.exp %1506 : vector<2x32xf32>
    %cst_487 = arith.constant 1.000000e+00 : f32
    %1508 = vector.broadcast %cst_487 : f32 to vector<2x32xf32>
    %1509 = arith.addf %1508, %1507 : vector<2x32xf32>
    %1510 = arith.divf %1508, %1509 : vector<2x32xf32>
    %1511 = arith.mulf %1502, %1445 : vector<2x32xf32>
    %1512 = arith.mulf %1496, %1504 : vector<2x32xf32>
    %1513 = arith.addf %1511, %1512 : vector<2x32xf32>
    %1514 = math.tanh %1513 : vector<2x32xf32>
    %1515 = arith.mulf %1510, %1514 : vector<2x32xf32>
    %cst_488 = arith.constant 0.000000e+00 : f32
    %1516 = vector.shape_cast %1449 : vector<2x1xi1> to vector<2x1xi1>
    %1517 = vector.broadcast %1516 : vector<2x1xi1> to vector<2x32xi1>
    %1518 = vector.broadcast %cst_488 : f32 to vector<2x32xf32>
    %1519 = arith.select %1517, %1484, %1518 : vector<2x32xi1>, vector<2x32xf32>
    %c7_489 = arith.constant 7 : index
    %c0_490 = arith.constant 0 : index
    %c0_491 = arith.constant 0 : index
    %1520 = vector.load %arg10[%c7_489, %c0_490, %c0_491] : memref<8x2x64xf32, #tpu.memory_space<vmem>>, vector<1x2x32xf32>
    %1521 = vector.shape_cast %1520 : vector<1x2x32xf32> to vector<2x32xf32>
    %1522 = vector.shape_cast %1519 : vector<2x32xf32> to vector<1x2x32xf32>
    tpu.vector_store %arg10[%c7_489, %c0_490, %c0_491], %1522 {strides = array<i32>} : memref<8x2x64xf32, #tpu.memory_space<vmem>>, vector<1x2x32xf32>,
    %cst_492 = arith.constant 0.000000e+00 : f32
    %1523 = vector.shape_cast %1453 : vector<2x1xi1> to vector<2x1xi1>
    %1524 = vector.broadcast %1523 : vector<2x1xi1> to vector<2x32xi1>
    %1525 = vector.broadcast %cst_492 : f32 to vector<2x32xf32>
    %1526 = arith.select %1524, %1515, %1525 : vector<2x32xi1>, vector<2x32xf32>
    %c0_493 = arith.constant 0 : index
    %c0_494 = arith.constant 0 : index
    %c32_495 = arith.constant 32 : index
    %1527 = vector.load %arg10[%c0_493, %c0_494, %c32_495] : memref<8x2x64xf32, #tpu.memory_space<vmem>>, vector<1x2x32xf32>
    %1528 = vector.shape_cast %1527 : vector<1x2x32xf32> to vector<2x32xf32>
    %1529 = vector.shape_cast %1526 : vector<2x32xf32> to vector<1x2x32xf32>
    tpu.vector_store %arg10[%c0_493, %c0_494, %c32_495], %1529 {strides = array<i32>} : memref<8x2x64xf32, #tpu.memory_space<vmem>>, vector<1x2x32xf32>,
    %c0_496 = arith.constant 0 : index
    %c0_497 = arith.constant 0 : index
    %1530 = vector.load %arg6[%c0_496, %c0_497] : memref<64x5xf32, #tpu.memory_space<vmem>>, vector<64x5xf32>
    %c0_498 = arith.constant 0 : index
    %c0_499 = arith.constant 0 : index
    %1531 = vector.load %arg7[%c0_498, %c0_499] : memref<1x5xf32, #tpu.memory_space<vmem>>, vector<1x5xf32>
    %c0_500 = arith.constant 0 : index
    %c0_501 = arith.constant 0 : index
    %c0_502 = arith.constant 0 : index
    %1532 = vector.load %arg10[%c0_500, %c0_501, %c0_502] : memref<8x2x64xf32, #tpu.memory_space<vmem>>, vector<1x2x64xf32>
    %1533 = vector.shape_cast %1532 : vector<1x2x64xf32> to vector<2x64xf32>
    %cst_503 = arith.constant dense<0.000000e+00> : vector<2x5xf32>
    %1534 = tpu.matmul %1533, %1530, %cst_503 {dimension_numbers = #tpu.dot_dimension_numbers<[1], [0], [0], [1], [0, 0, 1, 1], [], []>} : vector<2x64xf32>, vector<64x5xf32>, vector<2x5xf32> -> vector<2x5xf32>
    %1535 = vector.broadcast %1531 : vector<1x5xf32> to vector<2x5xf32>
    %1536 = arith.addf %1534, %1535 : vector<2x5xf32>
    %c0_504 = arith.constant 0 : index
    %c0_505 = arith.constant 0 : index
    %c0_506 = arith.constant 0 : index
    %1537 = vector.load %arg8[%c0_504, %c0_505, %c0_506] : memref<8x2x5xf32, #tpu.memory_space<vmem>>, vector<1x2x5xf32>
    %1538 = vector.shape_cast %1537 : vector<1x2x5xf32> to vector<2x5xf32>
    %1539 = vector.shape_cast %1536 : vector<2x5xf32> to vector<1x2x5xf32>
    tpu.vector_store %arg8[%c0_504, %c0_505, %c0_506], %1539 {strides = array<i32>} : memref<8x2x5xf32, #tpu.memory_space<vmem>>, vector<1x2x5xf32>,
    %c1_507 = arith.constant 1 : index
    %c0_508 = arith.constant 0 : index
    %c0_509 = arith.constant 0 : index
    %1540 = vector.load %arg10[%c1_507, %c0_508, %c0_509] : memref<8x2x64xf32, #tpu.memory_space<vmem>>, vector<1x2x64xf32>
    %1541 = vector.shape_cast %1540 : vector<1x2x64xf32> to vector<2x64xf32>
    %cst_510 = arith.constant dense<0.000000e+00> : vector<2x5xf32>
    %1542 = tpu.matmul %1541, %1530, %cst_510 {dimension_numbers = #tpu.dot_dimension_numbers<[1], [0], [0], [1], [0, 0, 1, 1], [], []>} : vector<2x64xf32>, vector<64x5xf32>, vector<2x5xf32> -> vector<2x5xf32>
    %1543 = vector.broadcast %1531 : vector<1x5xf32> to vector<2x5xf32>
    %1544 = arith.addf %1542, %1543 : vector<2x5xf32>
    %c1_511 = arith.constant 1 : index
    %c0_512 = arith.constant 0 : index
    %c0_513 = arith.constant 0 : index
    %1545 = vector.load %arg8[%c1_511, %c0_512, %c0_513] : memref<8x2x5xf32, #tpu.memory_space<vmem>>, vector<1x2x5xf32>
    %1546 = vector.shape_cast %1545 : vector<1x2x5xf32> to vector<2x5xf32>
    %1547 = vector.shape_cast %1544 : vector<2x5xf32> to vector<1x2x5xf32>
    tpu.vector_store %arg8[%c1_511, %c0_512, %c0_513], %1547 {strides = array<i32>} : memref<8x2x5xf32, #tpu.memory_space<vmem>>, vector<1x2x5xf32>,
    %c2_514 = arith.constant 2 : index
    %c0_515 = arith.constant 0 : index
    %c0_516 = arith.constant 0 : index
    %1548 = vector.load %arg10[%c2_514, %c0_515, %c0_516] : memref<8x2x64xf32, #tpu.memory_space<vmem>>, vector<1x2x64xf32>
    %1549 = vector.shape_cast %1548 : vector<1x2x64xf32> to vector<2x64xf32>
    %cst_517 = arith.constant dense<0.000000e+00> : vector<2x5xf32>
    %1550 = tpu.matmul %1549, %1530, %cst_517 {dimension_numbers = #tpu.dot_dimension_numbers<[1], [0], [0], [1], [0, 0, 1, 1], [], []>} : vector<2x64xf32>, vector<64x5xf32>, vector<2x5xf32> -> vector<2x5xf32>
    %1551 = vector.broadcast %1531 : vector<1x5xf32> to vector<2x5xf32>
    %1552 = arith.addf %1550, %1551 : vector<2x5xf32>
    %c2_518 = arith.constant 2 : index
    %c0_519 = arith.constant 0 : index
    %c0_520 = arith.constant 0 : index
    %1553 = vector.load %arg8[%c2_518, %c0_519, %c0_520] : memref<8x2x5xf32, #tpu.memory_space<vmem>>, vector<1x2x5xf32>
    %1554 = vector.shape_cast %1553 : vector<1x2x5xf32> to vector<2x5xf32>
    %1555 = vector.shape_cast %1552 : vector<2x5xf32> to vector<1x2x5xf32>
    tpu.vector_store %arg8[%c2_518, %c0_519, %c0_520], %1555 {strides = array<i32>} : memref<8x2x5xf32, #tpu.memory_space<vmem>>, vector<1x2x5xf32>,
    %c3_521 = arith.constant 3 : index
    %c0_522 = arith.constant 0 : index
    %c0_523 = arith.constant 0 : index
    %1556 = vector.load %arg10[%c3_521, %c0_522, %c0_523] : memref<8x2x64xf32, #tpu.memory_space<vmem>>, vector<1x2x64xf32>
    %1557 = vector.shape_cast %1556 : vector<1x2x64xf32> to vector<2x64xf32>
    %cst_524 = arith.constant dense<0.000000e+00> : vector<2x5xf32>
    %1558 = tpu.matmul %1557, %1530, %cst_524 {dimension_numbers = #tpu.dot_dimension_numbers<[1], [0], [0], [1], [0, 0, 1, 1], [], []>} : vector<2x64xf32>, vector<64x5xf32>, vector<2x5xf32> -> vector<2x5xf32>
    %1559 = vector.broadcast %1531 : vector<1x5xf32> to vector<2x5xf32>
    %1560 = arith.addf %1558, %1559 : vector<2x5xf32>
    %c3_525 = arith.constant 3 : index
    %c0_526 = arith.constant 0 : index
    %c0_527 = arith.constant 0 : index
    %1561 = vector.load %arg8[%c3_525, %c0_526, %c0_527] : memref<8x2x5xf32, #tpu.memory_space<vmem>>, vector<1x2x5xf32>
    %1562 = vector.shape_cast %1561 : vector<1x2x5xf32> to vector<2x5xf32>
    %1563 = vector.shape_cast %1560 : vector<2x5xf32> to vector<1x2x5xf32>
    tpu.vector_store %arg8[%c3_525, %c0_526, %c0_527], %1563 {strides = array<i32>} : memref<8x2x5xf32, #tpu.memory_space<vmem>>, vector<1x2x5xf32>,
    %c4_528 = arith.constant 4 : index
    %c0_529 = arith.constant 0 : index
    %c0_530 = arith.constant 0 : index
    %1564 = vector.load %arg10[%c4_528, %c0_529, %c0_530] : memref<8x2x64xf32, #tpu.memory_space<vmem>>, vector<1x2x64xf32>
    %1565 = vector.shape_cast %1564 : vector<1x2x64xf32> to vector<2x64xf32>
    %cst_531 = arith.constant dense<0.000000e+00> : vector<2x5xf32>
    %1566 = tpu.matmul %1565, %1530, %cst_531 {dimension_numbers = #tpu.dot_dimension_numbers<[1], [0], [0], [1], [0, 0, 1, 1], [], []>} : vector<2x64xf32>, vector<64x5xf32>, vector<2x5xf32> -> vector<2x5xf32>
    %1567 = vector.broadcast %1531 : vector<1x5xf32> to vector<2x5xf32>
    %1568 = arith.addf %1566, %1567 : vector<2x5xf32>
    %c4_532 = arith.constant 4 : index
    %c0_533 = arith.constant 0 : index
    %c0_534 = arith.constant 0 : index
    %1569 = vector.load %arg8[%c4_532, %c0_533, %c0_534] : memref<8x2x5xf32, #tpu.memory_space<vmem>>, vector<1x2x5xf32>
    %1570 = vector.shape_cast %1569 : vector<1x2x5xf32> to vector<2x5xf32>
    %1571 = vector.shape_cast %1568 : vector<2x5xf32> to vector<1x2x5xf32>
    tpu.vector_store %arg8[%c4_532, %c0_533, %c0_534], %1571 {strides = array<i32>} : memref<8x2x5xf32, #tpu.memory_space<vmem>>, vector<1x2x5xf32>,
    %c5_535 = arith.constant 5 : index
    %c0_536 = arith.constant 0 : index
    %c0_537 = arith.constant 0 : index
    %1572 = vector.load %arg10[%c5_535, %c0_536, %c0_537] : memref<8x2x64xf32, #tpu.memory_space<vmem>>, vector<1x2x64xf32>
    %1573 = vector.shape_cast %1572 : vector<1x2x64xf32> to vector<2x64xf32>
    %cst_538 = arith.constant dense<0.000000e+00> : vector<2x5xf32>
    %1574 = tpu.matmul %1573, %1530, %cst_538 {dimension_numbers = #tpu.dot_dimension_numbers<[1], [0], [0], [1], [0, 0, 1, 1], [], []>} : vector<2x64xf32>, vector<64x5xf32>, vector<2x5xf32> -> vector<2x5xf32>
    %1575 = vector.broadcast %1531 : vector<1x5xf32> to vector<2x5xf32>
    %1576 = arith.addf %1574, %1575 : vector<2x5xf32>
    %c5_539 = arith.constant 5 : index
    %c0_540 = arith.constant 0 : index
    %c0_541 = arith.constant 0 : index
    %1577 = vector.load %arg8[%c5_539, %c0_540, %c0_541] : memref<8x2x5xf32, #tpu.memory_space<vmem>>, vector<1x2x5xf32>
    %1578 = vector.shape_cast %1577 : vector<1x2x5xf32> to vector<2x5xf32>
    %1579 = vector.shape_cast %1576 : vector<2x5xf32> to vector<1x2x5xf32>
    tpu.vector_store %arg8[%c5_539, %c0_540, %c0_541], %1579 {strides = array<i32>} : memref<8x2x5xf32, #tpu.memory_space<vmem>>, vector<1x2x5xf32>,
    %c6_542 = arith.constant 6 : index
    %c0_543 = arith.constant 0 : index
    %c0_544 = arith.constant 0 : index
    %1580 = vector.load %arg10[%c6_542, %c0_543, %c0_544] : memref<8x2x64xf32, #tpu.memory_space<vmem>>, vector<1x2x64xf32>
    %1581 = vector.shape_cast %1580 : vector<1x2x64xf32> to vector<2x64xf32>
    %cst_545 = arith.constant dense<0.000000e+00> : vector<2x5xf32>
    %1582 = tpu.matmul %1581, %1530, %cst_545 {dimension_numbers = #tpu.dot_dimension_numbers<[1], [0], [0], [1], [0, 0, 1, 1], [], []>} : vector<2x64xf32>, vector<64x5xf32>, vector<2x5xf32> -> vector<2x5xf32>
    %1583 = vector.broadcast %1531 : vector<1x5xf32> to vector<2x5xf32>
    %1584 = arith.addf %1582, %1583 : vector<2x5xf32>
    %c6_546 = arith.constant 6 : index
    %c0_547 = arith.constant 0 : index
    %c0_548 = arith.constant 0 : index
    %1585 = vector.load %arg8[%c6_546, %c0_547, %c0_548] : memref<8x2x5xf32, #tpu.memory_space<vmem>>, vector<1x2x5xf32>
    %1586 = vector.shape_cast %1585 : vector<1x2x5xf32> to vector<2x5xf32>
    %1587 = vector.shape_cast %1584 : vector<2x5xf32> to vector<1x2x5xf32>
    tpu.vector_store %arg8[%c6_546, %c0_547, %c0_548], %1587 {strides = array<i32>} : memref<8x2x5xf32, #tpu.memory_space<vmem>>, vector<1x2x5xf32>,
    %c7_549 = arith.constant 7 : index
    %c0_550 = arith.constant 0 : index
    %c0_551 = arith.constant 0 : index
    %1588 = vector.load %arg10[%c7_549, %c0_550, %c0_551] : memref<8x2x64xf32, #tpu.memory_space<vmem>>, vector<1x2x64xf32>
    %1589 = vector.shape_cast %1588 : vector<1x2x64xf32> to vector<2x64xf32>
    %cst_552 = arith.constant dense<0.000000e+00> : vector<2x5xf32>
    %1590 = tpu.matmul %1589, %1530, %cst_552 {dimension_numbers = #tpu.dot_dimension_numbers<[1], [0], [0], [1], [0, 0, 1, 1], [], []>} : vector<2x64xf32>, vector<64x5xf32>, vector<2x5xf32> -> vector<2x5xf32>
    %1591 = vector.broadcast %1531 : vector<1x5xf32> to vector<2x5xf32>
    %1592 = arith.addf %1590, %1591 : vector<2x5xf32>
    %c7_553 = arith.constant 7 : index
    %c0_554 = arith.constant 0 : index
    %c0_555 = arith.constant 0 : index
    %1593 = vector.load %arg8[%c7_553, %c0_554, %c0_555] : memref<8x2x5xf32, #tpu.memory_space<vmem>>, vector<1x2x5xf32>
    %1594 = vector.shape_cast %1593 : vector<1x2x5xf32> to vector<2x5xf32>
    %1595 = vector.shape_cast %1592 : vector<2x5xf32> to vector<1x2x5xf32>
    tpu.vector_store %arg8[%c7_553, %c0_554, %c0_555], %1595 {strides = array<i32>} : memref<8x2x5xf32, #tpu.memory_space<vmem>>, vector<1x2x5xf32>,
    return
  }
}

</mosaic_0001>

<bundles_post_ra>
// kernel: bert_bilstm_forward.1
= control target key start
LH: loop header
LB: loop body
LE: loop exit
PB: predicated region body
PF: predicated region fallthrough
CT: control target
= control target key end

     0   :  { %vm55_vm0 = vcmask 261120   ;;  %vm60_vm1 = vcmask 523264   ;;  %s3333_s22 = smov 64   ;;  %v3334_v35 = vmov 0   ;;  %s3335_s23 = smov 32   ;;  %vm210_vm14 = vcmask 517376   ;;  %s5127_s2 = inlined_call_operand.vmem [shape: f32[2,64,128], index: 2, kind: input, shape index: {}]   ;;  %s5128_s3 = inlined_call_operand.vmem [shape: f32[2,1,128], index: 3, kind: input, shape index: {}]   ;;  %s5129_s0 = inlined_call_operand.vmem [shape: f32[8,2,32], index: 0, kind: input, shape index: {}]   ;;  %s5130_s1 = inlined_call_operand.vmem [shape: f32[8,2,1], index: 1, kind: input, shape index: {}]   ;;  %s5131_s4 = inlined_call_operand.vmem [shape: f32[2,96,128], index: 4, kind: input, shape index: {}]   ;;  %s5132_s5 = inlined_call_operand.vmem [shape: f32[2,1,128], index: 5, kind: input, shape index: {}]   ;;  %s5133_s6 = inlined_call_operand.vmem [shape: f32[64,5], index: 6, kind: input, shape index: {}]   ;;  %s5134_s7 = inlined_call_operand.vmem [shape: f32[1,5], index: 7, kind: input, shape index: {}]   ;;  %s5135_s8 = inlined_call_operand.vmem [shape: f32[8,2,5], index: 8, kind: output, shape index: {}]  }
   0x1   :  { %v3385_v0 = vld [vmem:[%s5127_s2 + $0x38] sm:$0xff]  ;;  %v3395_v2 = vld [vmem:[%s5127_s2 + $0x30] sm:$0xff]  ;;  %v3407_v4 = vld [vmem:[%s5127_s2 + $0x28] sm:$0xff]  ;;  %3051 = vset.pattern.permute.xlu1 %v3334_v35  ;;  %3050 = vset.pattern.permute.xlu2 %v3334_v35  ;;  %s3336_s10 = smov 96  }
   0x2   :  { %v3390_v1 = vld [vmem:[%s5127_s2 + $0x78] sm:$0xff]  ;;  %72 = vmatpush.msra.mxu0 %v3385_v0  ;;  %v3402_v3 = vld [vmem:[%s5127_s2 + $0x70] sm:$0xff]  ;;  %v3412_v5 = vld [vmem:[%s5127_s2 + $0x68] sm:$0xff]  ;;  %237 = vmatpush.msra.mxu2 %v3385_v0 }
   0x3   :  { %138 = vmatpush.msra.mxu1 %v3390_v1  ;;  %300 = vmatpush.msra.mxu3 %v3390_v1  ;;  %v3421_v6 = vld [vmem:[%s5127_s2 + $0x20] sm:$0xff]  ;;  %v3435_v8 = vld [vmem:[%s5127_s2 + $0x18] sm:$0xff]  ;;  %v3449_v10 = vld [vmem:[%s5127_s2 + $0x10] sm:$0xff] }
   0x4   :  { %73 = vmatpush.msra.mxu0 %v3395_v2  ;;  %v3426_v7 = vld [vmem:[%s5127_s2 + $0x60] sm:$0xff]  ;;  %238 = vmatpush.msra.mxu2 %v3395_v2  ;;  %v3440_v9 = vld [vmem:[%s5127_s2 + $0x58] sm:$0xff]  ;;  %v3454_v11 = vld [vmem:[%s5127_s2 + $0x50] sm:$0xff] }
   0x5   :  { %139 = vmatpush.msra.mxu1 %v3402_v3  ;;  %301 = vmatpush.msra.mxu3 %v3402_v3  ;;  %v3463_v12 = vld [vmem:[%s5127_s2 + $0x8] sm:$0xff]  ;;  %v54_v14 = vld [vmem:[%s5129_s0] sm:$0x3] }
   0x6   :  { %74 = vmatpush.msra.mxu0 %v3407_v4  ;;  %239 = vmatpush.msra.mxu2 %v3407_v4  ;;  %v3468_v13 = vld [vmem:[%s5127_s2 + $0x48] sm:$0xff]  ;;  %v3483_v16 = vld [vmem:[%s5127_s2] sm:$0xff]  ;;  %v56_v18 = vsel %vm55_vm0, %v54_v14, 0.0 }
   0x7   :  { %140 = vmatpush.msra.mxu1 %v3412_v5  ;;  %302 = vmatpush.msra.mxu3 %v3412_v5  ;;  %v2915_v15 = vld [vmem:[%s5129_s0 + $0xe] sm:$0x3]  ;;  %v3488_v17 = vld [vmem:[%s5127_s2 + $0x40] sm:$0xff] }
   0x8   :  { %75 = vmatpush.msra.mxu0 %v3421_v6  ;;  %240 = vmatpush.msra.mxu2 %v3421_v6  ;;  %v123_v19 = vsel %vm55_vm0, %v2915_v15, 0.0  ;;  %v3555_v20 = vld [vmem:[%s5128_s3] ss:$0 sm:$0xff]  ;;  %v3561_v23 = vld [vmem:[%s5128_s3 + $0x1] ss:$0 sm:$0xff] }
   0x9   :  { %141 = vmatpush.msra.mxu1 %v3426_v7  ;;  %303 = vmatpush.msra.mxu3 %v3426_v7  ;;  %v2912_v59 = vld [vmem:[%s5130_s1 + $0xe] sm:$0x3] }
   0xa   :  { %76 = vmatpush.msra.mxu0 %v3435_v8  ;;  %241 = vmatpush.msra.mxu2 %v3435_v8  ;;  %vm53_vm10 = vcmp.gt.f32.partialorder %v2912_v59, 0.5 }
   0xb   :  { %142 = vmatpush.msra.mxu1 %v3440_v9  ;;  %304 = vmatpush.msra.mxu3 %v3440_v9  ;;  %v199_v60 = vsel %vm53_vm10, 1, %v3334_v35 }
   0xc   :  { %77 = vmatpush.msra.mxu0 %v3449_v10  ;;  %242 = vmatpush.msra.mxu2 %v3449_v10 }
   0xd   :  { %143 = vmatpush.msra.mxu1 %v3454_v11  ;;  %305 = vmatpush.msra.mxu3 %v3454_v11 }
   0xe   :  { %78 = vmatpush.msra.mxu0 %v3463_v12  ;;  %243 = vmatpush.msra.mxu2 %v3463_v12 }
   0xf   :  { %144 = vmatpush.msra.mxu1 %v3468_v13  ;;  %306 = vmatpush.msra.mxu3 %v3468_v13 }
  0x10   :  { %79 = vmatpush.msra.mxu0 %v3483_v16  ;;  %244 = vmatpush.msra.mxu2 %v3483_v16 }
  0x11   :  { %145 = vmatpush.msra.mxu1 %v3488_v17  ;;  %2913 = vmatmul.msk.f32.vlgmr.msra.gmra.mxu0 %vm60_vm1, %v56_v18 }
  0x12   :  { %2916 = vmatmul.msk.f32.vlgmr.msra.gmra.mxu1 %vm60_vm1, %v123_v19  ;;  %307 = vmatpush.msra.mxu3 %v3488_v17 }
  0x13   :  { %401 = vmatpush.msrb.mxu0 %v3385_v0  ;;  %468 = vmatpush.msrb.mxu1 %v3390_v1 }
  0x14   :  { %569 = vmatpush.msrb.mxu2 %v3385_v0  ;;  %636 = vmatpush.msrb.mxu3 %v3390_v1 }
  0x15   :  { %402 = vmatpush.msrb.mxu0 %v3395_v2  ;;  %469 = vmatpush.msrb.mxu1 %v3402_v3 }
  0x16   :  { %570 = vmatpush.msrb.mxu2 %v3395_v2  ;;  %637 = vmatpush.msrb.mxu3 %v3402_v3 }
  0x17   :  { %403 = vmatpush.msrb.mxu0 %v3407_v4  ;;  %470 = vmatpush.msrb.mxu1 %v3412_v5 }
  0x18   :  { %571 = vmatpush.msrb.mxu2 %v3407_v4  ;;  %638 = vmatpush.msrb.mxu3 %v3412_v5 }
  0x19   :  { %404 = vmatpush.msrb.mxu0 %v3421_v6  ;;  %471 = vmatpush.msrb.mxu1 %v3426_v7 }
  0x1a   :  { %572 = vmatpush.msrb.mxu2 %v3421_v6  ;;  %639 = vmatpush.msrb.mxu3 %v3426_v7 }
  0x1b   :  { %405 = vmatpush.msrb.mxu0 %v3435_v8  ;;  %472 = vmatpush.msrb.mxu1 %v3440_v9 }
  0x1c   :  { %573 = vmatpush.msrb.mxu2 %v3435_v8  ;;  %640 = vmatpush.msrb.mxu3 %v3440_v9 }
  0x1d   :  { %406 = vmatpush.msrb.mxu0 %v3449_v10  ;;  %473 = vmatpush.msrb.mxu1 %v3454_v11 }
  0x1e   :  { %574 = vmatpush.msrb.mxu2 %v3449_v10  ;;  %641 = vmatpush.msrb.mxu3 %v3454_v11 }
  0x1f   :  { %407 = vmatpush.msrb.mxu0 %v3463_v12  ;;  %474 = vmatpush.msrb.mxu1 %v3468_v13 }
  0x20   :  { %575 = vmatpush.msrb.mxu2 %v3463_v12  ;;  %642 = vmatpush.msrb.mxu3 %v3468_v13 }
  0x21   :  { %408 = vmatpush.msrb.mxu0 %v3483_v16  ;;  %475 = vmatpush.msrb.mxu1 %v3488_v17 }
  0x22   :  { %576 = vmatpush.msrb.mxu2 %v3483_v16  ;;  %643 = vmatpush.msrb.mxu3 %v3488_v17 }
  0x23   :  { %734 = vmatpush.msra.mxu0 %v3385_v0  ;;  %800 = vmatpush.msra.mxu1 %v3390_v1 }
  0x24   :  { %3052 = vset.pattern.permute.xlu0 %v3334_v35 }
  0x25   :  { %735 = vmatpush.msra.mxu0 %v3395_v2  ;;  %801 = vmatpush.msra.mxu1 %v3402_v3 }
  0x27   :  { %736 = vmatpush.msra.mxu0 %v3407_v4  ;;  %802 = vmatpush.msra.mxu1 %v3412_v5 }
  0x29   :  { %737 = vmatpush.msra.mxu0 %v3421_v6  ;;  %803 = vmatpush.msra.mxu1 %v3426_v7 }
  0x2b   :  { %738 = vmatpush.msra.mxu0 %v3435_v8  ;;  %804 = vmatpush.msra.mxu1 %v3440_v9 }
  0x2d   :  { %739 = vmatpush.msra.mxu0 %v3449_v10  ;;  %805 = vmatpush.msra.mxu1 %v3454_v11 }
  0x2f   :  { %740 = vmatpush.msra.mxu0 %v3463_v12  ;;  %806 = vmatpush.msra.mxu1 %v3468_v13 }
  0x31   :  { %741 = vmatpush.msra.mxu0 %v3483_v16  ;;  %807 = vmatpush.msra.mxu1 %v3488_v17 }
  0x8e   :  { %v81_v21 = vpop.f32.mrf.mxu0 }
  0x8f   :  { %v82_v22 = vadd.f32 %v3555_v20, %v81_v21  ;;  %v147_v24 = vpop.f32.mrf.mxu1  ;;  %v49_v21 = vld [vmem:[%s5130_s1] sm:$0x3] }
  0x90   :  { %v148_v25 = vadd.f32 %v3561_v23, %v147_v24  ;;  %vm50_vm11 = vcmp.gt.f32.partialorder %v49_v21, 0.5 }
  0x91   :  { %3058 = vtanh.f32 %v82_v22  ;;  %v2914_v28 = vmul.f32 -1.442695, %v82_v22  ;;  %v187_v22 = vsel %vm50_vm11, 1, %v3334_v35 }
  0x92   :  { %3060 = vtanh.f32 %v148_v25  ;;  %v2917_v29 = vmul.f32 -1.442695, %v148_v25 }
  0x93   :  { %3062 = vpow2.f32 %v2914_v28 }
  0x94   :  { %3064 = vpow2.f32 %v2917_v29 }
  0x97   :  { %v3059_v26 = vpop.eup %3058 }
  0x98   :  { %106 = vrot.lane.b32.xlu0 %v3059_v26, %s3333_s22  ;;  %v3061_v27 = vpop.eup %3060 }
  0x99   :  { %v3063_v30 = vpop.eup %3062 }
  0x9a   :  { %v87_v31 = vadd.f32 1.0, %v3063_v30  ;;  %v3065_v32 = vpop.eup %3064 }
  0x9b   :  { %v153_v33 = vadd.f32 1.0, %v3065_v32 }
  0x9c   :  { %3066 = vrcp.f32 %v87_v31  ;;  %v99_v43 = vand.u32 2147483648, %v87_v31  ;;  %vm93_vm3 = vweird.f32 %v87_v31  ;;  %v97_v44 = vand.u32 2147483647, %v87_v31 }
  0x9d   :  { %3068 = vrcp.f32 %v153_v33  ;;  %vm159_vm6 = vweird.f32 %v153_v33  ;;  %v165_v52 = vand.u32 2147483648, %v153_v33  ;;  %v163_v53 = vand.u32 2147483647, %v153_v33 }
  0x9e   :  { %v100_v47 = vor.u32 1.1754944e-38, %v99_v43  ;;  %vm98_vm5 = vcmp.eq.f32.partialorder %v97_v44, 8.507059e+37 }
  0x9f   :  { %v166_v55 = vor.u32 1.1754944e-38, %v165_v52  ;;  %vm164_vm9 = vcmp.eq.f32.partialorder %v163_v53, 8.507059e+37 }
  0xa0   :  { %172 = vrot.lane.b32.xlu0 %v3061_v27, %s3333_s22 }
  0xa2   :  { %v3067_v34 = vpop.eup %3066 }
  0xa3   :  { %v89_v36 = vmul.f32 %v3067_v34, %v87_v31  ;;  %v3069_v38 = vpop.eup %3068  ;;  %vm94_vm2 = vweird.f32 %v3067_v34 }
  0xa4   :  { %v155_v40 = vmul.f32 %v3069_v38, %v153_v33  ;;  %vm95_vm4 = vmor %vm93_vm3, %vm94_vm2  ;;  %vm160_vm7 = vweird.f32 %v3069_v38  ;;  %v2920_v33 = vld [vmem:[%s5129_s0 + $0x2] sm:$0x3] }
  0xa5   :  { %v90_v37 = vsub.f32 1.0, %v89_v36  ;;  %vm161_vm8 = vmor %vm159_vm6, %vm160_vm7 }
  0xa6   :  { %v156_v42 = vsub.f32 1.0, %v155_v40 }
  0xa7   :  { %v91_v39 = vmul.f32 %v3067_v34, %v90_v37  ;;  %v2923_v37 = vld [vmem:[%s5129_s0 + $0xc] sm:$0x3] }
  0xa8   :  { %v157_v46 = vmul.f32 %v3069_v38, %v156_v42 }
  0xa9   :  { %v92_v41 = vadd.f32 %v3067_v34, %v91_v39 }
  0xaa   :  { %v158_v51 = vadd.f32 %v3069_v38, %v157_v46 }
  0xab   :  { %v96_v45 = vsel %vm95_vm4, %v3067_v34, %v92_v41 }
  0xac   :  { %v101_v49 = vsel %vm98_vm5, %v100_v47, %v96_v45  ;;  %v162_v54 = vsel %vm161_vm8, %v3069_v38, %v158_v51 }
  0xad   :  { %v167_v56 = vsel %vm164_vm9, %v166_v55, %v162_v54  ;;  %v104_v61 = vmul.f32 0.0, %v101_v49 }
  0xae   :  { %v170_v14 = vmul.f32 0.0, %v167_v56 }
 0x10a   :  { %v107_v48 = vpop.permute.xlu0 %106 }
 0x10b   :  { %v109_v50 = vmul.f32 %v107_v48, %v101_v49 }
 0x10d   :  { %111 = vrot.lane.b32.xlu1 %v109_v50, %s3335_s23 }
 0x112   :  { %v173_v57 = vpop.permute.xlu0 %172 }
 0x113   :  { %v175_v58 = vmul.f32 %v173_v57, %v167_v56 }
 0x115   :  { %177 = vrot.lane.b32.xlu1 %v175_v58, %s3335_s23 }
 0x11d   :  { %201 = vperm.xlu1 %3051, %v199_v60  }
 0x17f   :  { %v112_v62 = vpop.permute.xlu1 %111 }
 0x180   :  { %v3575_v63 = vadd.f32 %v112_v62, %v104_v61 }
 0x182   :  { %3070 = vtanh.f32 %v3575_v63 }
 0x187   :  { %v178_v15 = vpop.permute.xlu1 %177 }
 0x188   :  { %v3071_v18 = vpop.eup %3070  ;;  %v3578_v19 = vadd.f32 %v178_v15, %v170_v14  ;;  %v2918_v15 = vld [vmem:[%s5130_s1 + $0x2] sm:$0x3] }
 0x189   :  { %117 = vrot.lane.b32.xlu2 %v3071_v18, %s3333_s22  ;;  %vm216_vm5 = vcmp.gt.f32.partialorder %v2918_v15, 0.5 }
 0x18a   :  { %3072 = vtanh.f32 %v3578_v19 }
 0x18f   :  { %v3596_v29 = vpop.permute.xlu1 %201 }
 0x190   :  { %v3073_v24 = vpop.eup %3072  ;;  %vm203_vm13 = vcmp.eq.s32.totalorder %v3596_v29, 1 }
 0x191   :  { %183 = vrot.lane.b32.xlu0 %v3073_v24, %s3333_s22  ;;  %189 = vperm.xlu2 %3050, %v187_v22   ;;  %v349_v22 = vsel %vm216_vm5, 1, %v3334_v35 }
 0x1e3   :  { %v118_v25 = vpop.permute.xlu2 %117 }
 0x1e4   :  { %v120_v26 = vmul.f32 %v118_v25, %v101_v49 }
 0x1eb   :  { %v3587_v27 = vpop.permute.xlu2 %189 }
 0x1ec   :  { %vm191_vm12 = vcmp.eq.s32.totalorder %v3587_v27, 1 }
 0x1ed   :  { %v3592_v28 = vsel %vm191_vm12, %v120_v26, 0.0 }
 0x1ee   :  { %222 = vrot.lane.b32.xlu2 %v3592_v28, %s3333_s22 }
 0x203   :  { %v184_v30 = vpop.permute.xlu0 %183 }
 0x204   :  { %v186_v31 = vmul.f32 %v184_v30, %v167_v56 }
 0x206   :  { %v3601_v32 = vsel %vm203_vm13, %v186_v31, 0.0 }
 0x207   :  { %206 = vrot.lane.b32.xlu0 %v3601_v32, %s3333_s22 }
 0x248   :  { %v223_v34 = vpop.permute.xlu2 %222 }
 0x249   :  { %v225_v36 = vsel %vm55_vm0, %v2920_v33, %v223_v34 }
 0x24a   :  { %2921 = vmatmul.msk.f32.vlgmr.msra.gmra.mxu2 %vm60_vm1, %v225_v36 }
 0x24b   :  { %896 = vmatpush.msra.mxu2 %v3385_v0 }
 0x24d   :  { %897 = vmatpush.msra.mxu2 %v3395_v2 }
 0x24f   :  { %898 = vmatpush.msra.mxu2 %v3407_v4 }
 0x251   :  { %899 = vmatpush.msra.mxu2 %v3421_v6 }
 0x253   :  { %900 = vmatpush.msra.mxu2 %v3435_v8 }
 0x255   :  { %901 = vmatpush.msra.mxu2 %v3449_v10 }
 0x257   :  { %902 = vmatpush.msra.mxu2 %v3463_v12 }
 0x259   :  { %903 = vmatpush.msra.mxu2 %v3483_v16 }
 0x279   :  { %v207_v38 = vpop.permute.xlu0 %206 }
 0x27a   :  { %211 = vst.msk [vmem:[#allocation2 + $0xe] sm:$0x3] %vm210_vm14, %v207_v38  ;;  %v288_v39 = vsel %vm55_vm0, %v2923_v37, %v207_v38 }
 0x27b   :  { %2924 = vmatmul.msk.f32.vlgmr.msra.gmra.mxu3 %vm60_vm1, %v288_v39  ;;  %v3645_v39 = vsel %vm191_vm12, %v3575_v63, 0.0  ;;  %v3659_v63 = vsel %vm203_vm13, %v3578_v19, 0.0 }
 0x27c   :  { %962 = vmatpush.msra.mxu3 %v3390_v1 }
 0x27e   :  { %963 = vmatpush.msra.mxu3 %v3402_v3 }
 0x280   :  { %964 = vmatpush.msra.mxu3 %v3412_v5 }
 0x282   :  { %965 = vmatpush.msra.mxu3 %v3426_v7 }
 0x284   :  { %966 = vmatpush.msra.mxu3 %v3440_v9 }
 0x286   :  { %967 = vmatpush.msra.mxu3 %v3454_v11 }
 0x288   :  { %968 = vmatpush.msra.mxu3 %v3468_v13 }
 0x28a   :  { %969 = vmatpush.msra.mxu3 %v3488_v17 }
 0x2cd   :  { %v246_v40 = vpop.f32.mrf.mxu2 }
 0x2ce   :  { %v247_v41 = vadd.f32 %v3555_v20, %v246_v40 }
 0x2d0   :  { %3074 = vtanh.f32 %v247_v41  ;;  %v2922_v46 = vmul.f32 -1.442695, %v247_v41 }
 0x2d6   :  { %v3075_v42 = vpop.eup %3074 }
 0x2d7   :  { %271 = vrot.lane.b32.xlu1 %v3075_v42, %s3333_s22 }
 0x2fe   :  { %v309_v43 = vpop.f32.mrf.mxu3 }
 0x2ff   :  { %v310_v44 = vadd.f32 %v3561_v23, %v309_v43 }
 0x301   :  { %3076 = vtanh.f32 %v310_v44  ;;  %v2925_v50 = vmul.f32 -1.442695, %v310_v44  ;;  %v2919_v44 = vld [vmem:[%s5130_s1 + $0xc] sm:$0x3] }
 0x302   :  { %3078 = vpow2.f32 %v2922_v46  ;;  %vm219_vm10 = vcmp.gt.f32.partialorder %v2919_v44, 0.5 }
 0x307   :  { %v3077_v45 = vpop.eup %3076 }
 0x308   :  { %334 = vrot.lane.b32.xlu2 %v3077_v45, %s3333_s22  ;;  %v3079_v47 = vpop.eup %3078  ;;  %v361_v45 = vsel %vm219_vm10, 1, %v3334_v35 }
 0x309   :  { %v252_v48 = vadd.f32 1.0, %v3079_v47 }
 0x30b   :  { %3080 = vrcp.f32 %v252_v48  ;;  %v264_v57 = vand.u32 2147483648, %v252_v48  ;;  %vm258_vm2 = vweird.f32 %v252_v48  ;;  %v262_v58 = vand.u32 2147483647, %v252_v48 }
 0x30c   :  { %3082 = vpow2.f32 %v2925_v50 }
 0x30d   :  { %v265_v60 = vor.u32 1.1754944e-38, %v264_v57  ;;  %vm263_vm4 = vcmp.eq.f32.partialorder %v262_v58, 8.507059e+37 }
 0x311   :  { %v3081_v49 = vpop.eup %3080 }
 0x312   :  { %v254_v51 = vmul.f32 %v3081_v49, %v252_v48  ;;  %v3083_v54 = vpop.eup %3082  ;;  %vm259_vm15 = vweird.f32 %v3081_v49 }
 0x313   :  { %v315_v55 = vadd.f32 1.0, %v3083_v54  ;;  %vm260_vm3 = vmor %vm258_vm2, %vm259_vm15 }
 0x314   :  { %v255_v52 = vsub.f32 1.0, %v254_v51 }
 0x315   :  { %3084 = vrcp.f32 %v315_v55  ;;  %v327_v30 = vand.u32 2147483648, %v315_v55  ;;  %vm321_vm7 = vweird.f32 %v315_v55  ;;  %v325_v31 = vand.u32 2147483647, %v315_v55 }
 0x316   :  { %v256_v53 = vmul.f32 %v3081_v49, %v255_v52 }
 0x317   :  { %v328_v34 = vor.u32 1.1754944e-38, %v327_v30  ;;  %vm326_vm9 = vcmp.eq.f32.partialorder %v325_v31, 8.507059e+37 }
 0x318   :  { %v257_v56 = vadd.f32 %v3081_v49, %v256_v53 }
 0x31a   :  { %v261_v59 = vsel %vm260_vm3, %v3081_v49, %v257_v56  ;;  %v2928_v56 = vld [vmem:[%s5129_s0 + $0x4] sm:$0x3] }
 0x31b   :  { %v266_v62 = vsel %vm263_vm4, %v265_v60, %v261_v59  ;;  %v3085_v18 = vpop.eup %3084 }
 0x31c   :  { %v317_v21 = vmul.f32 %v3085_v18, %v315_v55  ;;  %vm322_vm6 = vweird.f32 %v3085_v18  ;;  %v269_v40 = vmul.f32 %v266_v62, %v3645_v39 }
 0x31d   :  { %vm323_vm8 = vmor %vm321_vm7, %vm322_vm6 }
 0x31e   :  { %v318_v24 = vsub.f32 1.0, %v317_v21 }
 0x320   :  { %v319_v25 = vmul.f32 %v3085_v18, %v318_v24 }
 0x322   :  { %v320_v26 = vadd.f32 %v3085_v18, %v319_v25 }
 0x324   :  { %v324_v33 = vsel %vm323_vm8, %v3085_v18, %v320_v26 }
 0x325   :  { %v329_v36 = vsel %vm326_vm9, %v328_v34, %v324_v33 }
 0x326   :  { %v332_v27 = vmul.f32 %v329_v36, %v3659_v63 }
 0x349   :  { %v272_v61 = vpop.permute.xlu1 %271 }
 0x34a   :  { %v274_v14 = vmul.f32 %v272_v61, %v266_v62 }
 0x34c   :  { %276 = vrot.lane.b32.xlu0 %v274_v14, %s3335_s23 }
 0x354   :  { %351 = vperm.xlu0 %3052, %v349_v22  }
 0x362   :  { %v335_v37 = vpop.permute.xlu2 %334 }
 0x363   :  { %v337_v38 = vmul.f32 %v335_v37, %v329_v36 }
 0x365   :  { %339 = vrot.lane.b32.xlu1 %v337_v38, %s3335_s23 }
 0x3be   :  { %v277_v41 = vpop.permute.xlu0 %276 }
 0x3bf   :  { %v3648_v42 = vadd.f32 %v277_v41, %v269_v40 }
 0x3c1   :  { %3086 = vtanh.f32 %v3648_v42 }
 0x3c6   :  { %v3666_v49 = vpop.permute.xlu0 %351 }
 0x3c7   :  { %v3087_v43 = vpop.eup %3086  ;;  %vm353_vm11 = vcmp.eq.s32.totalorder %v3666_v49, 1 }
 0x3c8   :  { %282 = vrot.lane.b32.xlu2 %v3087_v43, %s3333_s22 }
 0x3d0   :  { %363 = vperm.xlu2 %3050, %v361_v45  }
 0x3d7   :  { %v340_v46 = vpop.permute.xlu1 %339 }
 0x3d8   :  { %v3662_v47 = vadd.f32 %v340_v46, %v332_v27 }
 0x3da   :  { %3088 = vtanh.f32 %v3662_v47 }
 0x3e0   :  { %v3089_v48 = vpop.eup %3088 }
 0x3e1   :  { %345 = vrot.lane.b32.xlu1 %v3089_v48, %s3333_s22  ;;  %v2926_v48 = vld [vmem:[%s5130_s1 + $0x4] sm:$0x3] }
 0x3e2   :  { %vm379_vm4 = vcmp.gt.f32.partialorder %v2926_v48, 0.5 }
 0x422   :  { %v283_v50 = vpop.permute.xlu2 %282 }
 0x423   :  { %v3668_v51 = vmul.f32 %v283_v50, %v266_v62 }
 0x425   :  { %v3675_v19 = vsel %vm353_vm11, %v3668_v51, %v3592_v28 }
 0x426   :  { %386 = vrot.lane.b32.xlu1 %v3675_v19, %s3333_s22 }
 0x42a   :  { %v3679_v29 = vpop.permute.xlu2 %363 }
 0x42b   :  { %vm365_vm12 = vcmp.eq.s32.totalorder %v3679_v29, 1 }
 0x453   :  { %v346_v52 = vpop.permute.xlu1 %345 }
 0x454   :  { %v348_v53 = vmul.f32 %v346_v52, %v329_v36 }
 0x456   :  { %v3685_v54 = vsel %vm365_vm12, %v348_v53, %v3601_v32  ;;  %v3689_v55 = vsel %vm365_vm12, %v348_v53, 0.0  ;;  %v2931_v32 = vld [vmem:[%s5129_s0 + $0xa] sm:$0x3]  ;;  %v517_v53 = vsel %vm379_vm4, 1, %v3334_v35 }
 0x457   :  { %453 = vrot.lane.b32.xlu2 %v3685_v54, %s3333_s22 }
 0x498   :  { %v387_v57 = vpop.permute.xlu1 %386 }
 0x499   :  { %v389_v58 = vsel %vm55_vm0, %v2928_v56, %v387_v57 }
 0x49a   :  { %2929 = vmatmul.msk.f32.vlgmr.msrb.gmra.mxu0 %vm60_vm1, %v389_v58 }
 0x49b   :  { %1058 = vmatpush.msrb.mxu0 %v3385_v0 }
 0x49d   :  { %1059 = vmatpush.msrb.mxu0 %v3395_v2 }
 0x49f   :  { %1060 = vmatpush.msrb.mxu0 %v3407_v4 }
 0x4a1   :  { %1061 = vmatpush.msrb.mxu0 %v3421_v6 }
 0x4a3   :  { %1062 = vmatpush.msrb.mxu0 %v3435_v8 }
 0x4a5   :  { %1063 = vmatpush.msrb.mxu0 %v3449_v10 }
 0x4a7   :  { %1064 = vmatpush.msrb.mxu0 %v3463_v12 }
 0x4a9   :  { %1065 = vmatpush.msrb.mxu0 %v3483_v16 }
 0x4b1   :  { %v454_v59 = vpop.permute.xlu2 %453 }
 0x4b2   :  { %v456_v60 = vsel %vm55_vm0, %v2931_v32, %v454_v59 }
 0x4b3   :  { %2932 = vmatmul.msk.f32.vlgmr.msrb.gmra.mxu1 %vm60_vm1, %v456_v60 }
 0x4b4   :  { %1124 = vmatpush.msrb.mxu1 %v3390_v1 }
 0x4b6   :  { %1125 = vmatpush.msrb.mxu1 %v3402_v3 }
 0x4b8   :  { %1126 = vmatpush.msrb.mxu1 %v3412_v5 }
 0x4ba   :  { %1127 = vmatpush.msrb.mxu1 %v3426_v7 }
 0x4bc   :  { %1128 = vmatpush.msrb.mxu1 %v3440_v9 }
 0x4be   :  { %1129 = vmatpush.msrb.mxu1 %v3454_v11 }
 0x4c0   :  { %1130 = vmatpush.msrb.mxu1 %v3468_v13 }
 0x4c2   :  { %1131 = vmatpush.msrb.mxu1 %v3488_v17 }
 0x517   :  { %v410_v61 = vpop.f32.mrf.mxu0 }
 0x518   :  { %v411_v62 = vadd.f32 %v3555_v20, %v410_v61 }
 0x51a   :  { %3090 = vtanh.f32 %v411_v62  ;;  %v2930_v22 = vmul.f32 -1.442695, %v411_v62 }
 0x520   :  { %v3091_v14 = vpop.eup %3090 }
 0x521   :  { %435 = vrot.lane.b32.xlu0 %v3091_v14, %s3333_s22 }
 0x530   :  { %v477_v15 = vpop.f32.mrf.mxu1 }
 0x531   :  { %v478_v18 = vadd.f32 %v3561_v23, %v477_v15 }
 0x533   :  { %3092 = vtanh.f32 %v478_v18  ;;  %v2933_v30 = vmul.f32 -1.442695, %v478_v18  ;;  %v3733_v18 = vsel %vm353_vm11, %v3648_v42, %v3645_v39  ;;  %v3748_v39 = vsel %vm365_vm12, %v3662_v47, %v3659_v63 }
 0x534   :  { %3094 = vpow2.f32 %v2930_v22 }
 0x539   :  { %v3093_v21 = vpop.eup %3092 }
 0x53a   :  { %502 = vrot.lane.b32.xlu1 %v3093_v21, %s3333_s22  ;;  %v3095_v24 = vpop.eup %3094 }
 0x53b   :  { %v416_v25 = vadd.f32 1.0, %v3095_v24 }
 0x53d   :  { %3096 = vrcp.f32 %v416_v25  ;;  %v428_v40 = vand.u32 2147483648, %v416_v25  ;;  %vm422_vm15 = vweird.f32 %v416_v25  ;;  %v426_v41 = vand.u32 2147483647, %v416_v25 }
 0x53e   :  { %3098 = vpow2.f32 %v2933_v30 }
 0x53f   :  { %v429_v44 = vor.u32 1.1754944e-38, %v428_v40  ;;  %vm427_vm3 = vcmp.eq.f32.partialorder %v426_v41, 8.507059e+37 }
 0x543   :  { %v3097_v26 = vpop.eup %3096 }
 0x544   :  { %v418_v31 = vmul.f32 %v3097_v26, %v416_v25  ;;  %v3099_v36 = vpop.eup %3098  ;;  %vm423_vm13 = vweird.f32 %v3097_v26 }
 0x545   :  { %v483_v37 = vadd.f32 1.0, %v3099_v36  ;;  %vm424_vm2 = vmor %vm422_vm15, %vm423_vm13 }
 0x546   :  { %v419_v33 = vsub.f32 1.0, %v418_v31 }
 0x547   :  { %3100 = vrcp.f32 %v483_v37  ;;  %v495_v32 = vand.u32 2147483648, %v483_v37  ;;  %vm489_vm6 = vweird.f32 %v483_v37  ;;  %v493_v59 = vand.u32 2147483647, %v483_v37 }
 0x548   :  { %v420_v34 = vmul.f32 %v3097_v26, %v419_v33 }
 0x549   :  { %v496_v61 = vor.u32 1.1754944e-38, %v495_v32  ;;  %vm494_vm8 = vcmp.eq.f32.partialorder %v493_v59, 8.507059e+37 }
 0x54a   :  { %v421_v38 = vadd.f32 %v3097_v26, %v420_v34 }
 0x54c   :  { %v425_v43 = vsel %vm424_vm2, %v3097_v26, %v421_v38  ;;  %v2927_v26 = vld [vmem:[%s5130_s1 + $0xa] sm:$0x3] }
 0x54d   :  { %v430_v27 = vsel %vm427_vm3, %v429_v44, %v425_v43  ;;  %v3101_v50 = vpop.eup %3100  ;;  %vm382_vm9 = vcmp.gt.f32.partialorder %v2927_v26, 0.5 }
 0x54e   :  { %v485_v52 = vmul.f32 %v3101_v50, %v483_v37  ;;  %vm490_vm5 = vweird.f32 %v3101_v50  ;;  %v433_v21 = vmul.f32 %v430_v27, %v3733_v18  ;;  %v529_v30 = vsel %vm382_vm9, 1, %v3334_v35 }
 0x54f   :  { %vm491_vm7 = vmor %vm489_vm6, %vm490_vm5 }
 0x550   :  { %v486_v56 = vsub.f32 1.0, %v485_v52 }
 0x552   :  { %v487_v57 = vmul.f32 %v3101_v50, %v486_v56 }
 0x554   :  { %v488_v58 = vadd.f32 %v3101_v50, %v487_v57  ;;  %v2934_v57 = vld [vmem:[%s5130_s1 + $0x6] sm:$0x3] }
 0x555   :  { %vm547_vm4 = vcmp.gt.f32.partialorder %v2934_v57, 0.5 }
 0x556   :  { %v492_v60 = vsel %vm491_vm7, %v3101_v50, %v488_v58  ;;  %v685_v32 = vsel %vm547_vm4, 1, %v3334_v35 }
 0x557   :  { %v497_v14 = vsel %vm494_vm8, %v496_v61, %v492_v60 }
 0x558   :  { %v500_v42 = vmul.f32 %v497_v14, %v3748_v39 }
 0x593   :  { %v436_v45 = vpop.permute.xlu0 %435 }
 0x594   :  { %v438_v46 = vmul.f32 %v436_v45, %v430_v27 }
 0x596   :  { %440 = vrot.lane.b32.xlu2 %v438_v46, %s3335_s23 }
 0x59e   :  { %519 = vperm.xlu2 %3050, %v517_v53  }
 0x5ac   :  { %v503_v62 = vpop.permute.xlu1 %502 }
 0x5ad   :  { %v505_v15 = vmul.f32 %v503_v62, %v497_v14 }
 0x5af   :  { %507 = vrot.lane.b32.xlu0 %v505_v15, %s3335_s23 }
 0x5f0   :  { %v441_v22 = vpop.permute.xlu2 %440 }
 0x5f1   :  { %v3736_v24 = vadd.f32 %v441_v22, %v433_v21 }
 0x5f3   :  { %3102 = vtanh.f32 %v3736_v24 }
 0x5f8   :  { %v3755_v36 = vpop.permute.xlu2 %519 }
 0x5f9   :  { %v3103_v25 = vpop.eup %3102  ;;  %vm521_vm10 = vcmp.eq.s32.totalorder %v3755_v36, 1 }
 0x5fa   :  { %446 = vrot.lane.b32.xlu1 %v3103_v25, %s3333_s22 }
 0x602   :  { %531 = vperm.xlu1 %3051, %v529_v30  }
 0x621   :  { %v508_v31 = vpop.permute.xlu0 %507 }
 0x622   :  { %v3751_v33 = vadd.f32 %v508_v31, %v500_v42 }
 0x624   :  { %3104 = vtanh.f32 %v3751_v33 }
 0x62a   :  { %v3105_v34 = vpop.eup %3104 }
 0x62b   :  { %513 = vrot.lane.b32.xlu0 %v3105_v34, %s3333_s22 }
 0x66c   :  { %v447_v37 = vpop.permute.xlu1 %446 }
 0x66d   :  { %v3757_v38 = vmul.f32 %v447_v37, %v430_v27  ;;  %v3822_v37 = vsel %vm521_vm10, %v3736_v24, %v3733_v18 }
 0x66f   :  { %v3764_v63 = vsel %vm521_vm10, %v3757_v38, %v3675_v19  ;;  %v2936_v19 = vld [vmem:[%s5129_s0 + $0x6] sm:$0x3] }
 0x670   :  { %554 = vrot.lane.b32.xlu2 %v3764_v63, %s3333_s22 }
 0x674   :  { %v3768_v47 = vpop.permute.xlu1 %531 }
 0x675   :  { %vm533_vm12 = vcmp.eq.s32.totalorder %v3768_v47, 1 }
 0x676   :  { %v3837_v18 = vsel %vm533_vm12, %v3751_v33, %v3748_v39 }
 0x69d   :  { %v514_v29 = vpop.permute.xlu0 %513 }
 0x69e   :  { %v516_v40 = vmul.f32 %v514_v29, %v497_v14 }
 0x6a0   :  { %v3774_v41 = vsel %vm533_vm12, %v516_v40, %v3685_v54  ;;  %v3778_v43 = vsel %vm533_vm12, %v516_v40, 0.0  ;;  %v2939_v54 = vld [vmem:[%s5129_s0 + $0x8] sm:$0x3] }
 0x6a1   :  { %621 = vrot.lane.b32.xlu0 %v3774_v41, %s3333_s22 }
 0x6ca   :  { %v555_v44 = vpop.permute.xlu2 %554 }
 0x6cb   :  { %v557_v45 = vsel %vm55_vm0, %v2936_v19, %v555_v44 }
 0x6cc   :  { %2937 = vmatmul.msk.f32.vlgmr.msrb.gmra.mxu2 %vm60_vm1, %v557_v45  ;;  %v2935_v45 = vld [vmem:[%s5130_s1 + $0x8] sm:$0x3] }
 0x6cd   :  { %1220 = vmatpush.msrb.mxu2 %v3385_v0  ;;  %vm550_vm9 = vcmp.gt.f32.partialorder %v2935_v45, 0.5 }
 0x6cf   :  { %1221 = vmatpush.msrb.mxu2 %v3395_v2 }
 0x6d1   :  { %1222 = vmatpush.msrb.mxu2 %v3407_v4 }
 0x6d3   :  { %1223 = vmatpush.msrb.mxu2 %v3421_v6 }
 0x6d5   :  { %1224 = vmatpush.msrb.mxu2 %v3435_v8 }
 0x6d7   :  { %1225 = vmatpush.msrb.mxu2 %v3449_v10 }
 0x6d9   :  { %1226 = vmatpush.msrb.mxu2 %v3463_v12 }
 0x6db   :  { %1227 = vmatpush.msrb.mxu2 %v3483_v16 }
 0x713   :  { %v622_v27 = vpop.permute.xlu0 %621 }
 0x714   :  { %v624_v0 = vsel %vm55_vm0, %v2939_v54, %v622_v27  ;;  %v697_v54 = vsel %vm550_vm9, 1, %v3334_v35 }
 0x715   :  { %2940 = vmatmul.msk.f32.vlgmr.msrb.gmra.mxu3 %vm60_vm1, %v624_v0 }
 0x716   :  { %1286 = vmatpush.msrb.mxu3 %v3390_v1 }
 0x718   :  { %1287 = vmatpush.msrb.mxu3 %v3402_v3 }
 0x71a   :  { %1288 = vmatpush.msrb.mxu3 %v3412_v5 }
 0x71c   :  { %1289 = vmatpush.msrb.mxu3 %v3426_v7 }
 0x71e   :  { %1290 = vmatpush.msrb.mxu3 %v3440_v9 }
 0x720   :  { %1291 = vmatpush.msrb.mxu3 %v3454_v11 }
 0x722   :  { %1292 = vmatpush.msrb.mxu3 %v3468_v13 }
 0x724   :  { %1293 = vmatpush.msrb.mxu3 %v3488_v17 }
 0x74f   :  { %v578_v2 = vpop.f32.mrf.mxu2 }
 0x750   :  { %v579_v4 = vadd.f32 %v3555_v20, %v578_v2 }
 0x752   :  { %3106 = vtanh.f32 %v579_v4  ;;  %v2938_v5 = vmul.f32 -1.442695, %v579_v4 }
 0x758   :  { %v3107_v6 = vpop.eup %3106 }
 0x759   :  { %603 = vrot.lane.b32.xlu1 %v3107_v6, %s3333_s22 }
 0x798   :  { %v645_v1 = vpop.f32.mrf.mxu3 }
 0x799   :  { %v646_v3 = vadd.f32 %v3561_v23, %v645_v1 }
 0x79b   :  { %3108 = vtanh.f32 %v646_v3  ;;  %v2941_v58 = vmul.f32 -1.442695, %v646_v3 }
 0x79c   :  { %3110 = vpow2.f32 %v2938_v5 }
 0x7a1   :  { %v3109_v7 = vpop.eup %3108 }
 0x7a2   :  { %670 = vrot.lane.b32.xlu2 %v3109_v7, %s3333_s22  ;;  %v3111_v8 = vpop.eup %3110 }
 0x7a3   :  { %v584_v9 = vadd.f32 1.0, %v3111_v8 }
 0x7a5   :  { %3112 = vrcp.f32 %v584_v9  ;;  %v596_v17 = vand.u32 2147483648, %v584_v9  ;;  %vm590_vm15 = vweird.f32 %v584_v9  ;;  %v594_v46 = vand.u32 2147483647, %v584_v9 }
 0x7a6   :  { %3114 = vpow2.f32 %v2941_v58 }
 0x7a7   :  { %v597_v50 = vor.u32 1.1754944e-38, %v596_v17  ;;  %vm595_vm3 = vcmp.eq.f32.partialorder %v594_v46, 8.507059e+37 }
 0x7ab   :  { %v3113_v10 = vpop.eup %3112 }
 0x7ac   :  { %v586_v11 = vmul.f32 %v3113_v10, %v584_v9  ;;  %vm591_vm13 = vweird.f32 %v3113_v10  ;;  %v3115_v59 = vpop.eup %3114  ;;  %v2947_v9 = vld [vmem:[%s5129_s0 + $0x6] sm:$0x3] }
 0x7ad   :  { %vm592_vm2 = vmor %vm590_vm15, %vm591_vm13  ;;  %v651_v60 = vadd.f32 1.0, %v3115_v59 }
 0x7ae   :  { %v587_v12 = vsub.f32 1.0, %v586_v11 }
 0x7af   :  { %3116 = vrcp.f32 %v651_v60  ;;  %v663_v22 = vand.u32 2147483648, %v651_v60  ;;  %vm657_vm6 = vweird.f32 %v651_v60  ;;  %v661_v25 = vand.u32 2147483647, %v651_v60 }
 0x7b0   :  { %v588_v13 = vmul.f32 %v3113_v10, %v587_v12 }
 0x7b1   :  { %v664_v30 = vor.u32 1.1754944e-38, %v663_v22  ;;  %vm662_vm8 = vcmp.eq.f32.partialorder %v661_v25, 8.507059e+37 }
 0x7b2   :  { %v589_v16 = vadd.f32 %v3113_v10, %v588_v13 }
 0x7b4   :  { %v593_v48 = vsel %vm592_vm2, %v3113_v10, %v589_v16 }
 0x7b5   :  { %v598_v53 = vsel %vm595_vm3, %v597_v50, %v593_v48  ;;  %v3117_v61 = vpop.eup %3116 }
 0x7b6   :  { %v653_v62 = vmul.f32 %v3117_v61, %v651_v60  ;;  %vm658_vm5 = vweird.f32 %v3117_v61  ;;  %v601_v29 = vmul.f32 %v598_v53, %v3822_v37 }
 0x7b7   :  { %vm659_vm7 = vmor %vm657_vm6, %vm658_vm5 }
 0x7b8   :  { %v654_v14 = vsub.f32 1.0, %v653_v62 }
 0x7ba   :  { %v655_v15 = vmul.f32 %v3117_v61, %v654_v14 }
 0x7bc   :  { %v656_v21 = vadd.f32 %v3117_v61, %v655_v15  ;;  %v2942_v15 = vld [vmem:[%s5130_s1 + $0x8] sm:$0x3] }
 0x7bd   :  { %vm714_vm5 = vcmp.gt.f32.partialorder %v2942_v15, 0.5 }
 0x7be   :  { %v660_v26 = vsel %vm659_vm7, %v3117_v61, %v656_v21  ;;  %v849_v21 = vsel %vm714_vm5, 1, %v3334_v35 }
 0x7bf   :  { %v665_v42 = vsel %vm662_vm8, %v664_v30, %v660_v26 }
 0x7c0   :  { %v668_v24 = vmul.f32 %v665_v42, %v3837_v18 }
 0x7cb   :  { %v604_v52 = vpop.permute.xlu1 %603 }
 0x7cc   :  { %v606_v56 = vmul.f32 %v604_v52, %v598_v53 }
 0x7ce   :  { %608 = vrot.lane.b32.xlu0 %v606_v56, %s3335_s23 }
 0x7d6   :  { %687 = vperm.xlu0 %3052, %v685_v32  }
 0x7fc   :  { %v671_v31 = vpop.permute.xlu2 %670 }
 0x7fd   :  { %v673_v34 = vmul.f32 %v671_v31, %v665_v42 }
 0x7ff   :  { %675 = vrot.lane.b32.xlu1 %v673_v34, %s3335_s23 }
 0x840   :  { %v609_v40 = vpop.permute.xlu0 %608 }
 0x841   :  { %v3825_v19 = vadd.f32 %v609_v40, %v601_v29 }
 0x843   :  { %3118 = vtanh.f32 %v3825_v19 }
 0x848   :  { %v3844_v4 = vpop.permute.xlu0 %687 }
 0x849   :  { %v3119_v44 = vpop.eup %3118  ;;  %vm689_vm13 = vcmp.eq.s32.totalorder %v3844_v4, 1 }
 0x84a   :  { %614 = vrot.lane.b32.xlu2 %v3119_v44, %s3333_s22 }
 0x852   :  { %699 = vperm.xlu2 %3050, %v697_v54  }
 0x871   :  { %v676_v27 = vpop.permute.xlu1 %675 }
 0x872   :  { %v3840_v0 = vadd.f32 %v676_v27, %v668_v24 }
 0x874   :  { %3120 = vtanh.f32 %v3840_v0 }
 0x87a   :  { %v3121_v2 = vpop.eup %3120 }
 0x87b   :  { %681 = vrot.lane.b32.xlu1 %v3121_v2, %s3333_s22 }
 0x8a4   :  { %v615_v6 = vpop.permute.xlu2 %614 }
 0x8a5   :  { %v3846_v1 = vmul.f32 %v615_v6, %v598_v53  ;;  %v3894_v6 = vsel %vm689_vm13, %v3825_v19, %v3822_v37 }
 0x8a7   :  { %v3853_v39 = vsel %vm689_vm13, %v3846_v1, %v3764_v63  ;;  %v2944_v63 = vld [vmem:[%s5129_s0 + $0x8] sm:$0x3] }
 0x8a8   :  { %719 = vrot.lane.b32.xlu0 %v3853_v39, %s3333_s22 }
 0x8ac   :  { %v3857_v33 = vpop.permute.xlu2 %699 }
 0x8ad   :  { %vm701_vm12 = vcmp.eq.s32.totalorder %v3857_v33, 1 }
 0x8ae   :  { %v712_v37 = vsel %vm701_vm12, %v3840_v0, %v3837_v18 }
 0x8ed   :  { %v682_v47 = vpop.permute.xlu1 %681 }
 0x8ee   :  { %v3859_v3 = vmul.f32 %v682_v47, %v665_v42 }
 0x8f0   :  { %v3866_v5 = vsel %vm701_vm12, %v3859_v3, %v3774_v41 }
 0x8f1   :  { %785 = vrot.lane.b32.xlu1 %v3866_v5, %s3333_s22 }
 0x91a   :  { %v720_v7 = vpop.permute.xlu0 %719 }
 0x91b   :  { %v722_v8 = vsel %vm55_vm0, %v2944_v63, %v720_v7 }
 0x91c   :  { %2945 = vmatmul.msk.f32.vlgmr.msra.gmra.mxu0 %vm60_vm1, %v722_v8 }
 0x963   :  { %v786_v10 = vpop.permute.xlu1 %785 }
 0x964   :  { %v788_v41 = vsel %vm55_vm0, %v2947_v9, %v786_v10  ;;  %v2943_v9 = vld [vmem:[%s5130_s1 + $0x6] sm:$0x3] }
 0x965   :  { %2948 = vmatmul.msk.f32.vlgmr.msra.gmra.mxu1 %vm60_vm1, %v788_v41 }
 0x999   :  { %v743_v11 = vpop.f32.mrf.mxu0 }
 0x99a   :  { %v744_v12 = vadd.f32 %v3555_v20, %v743_v11 }
 0x99c   :  { %3122 = vtanh.f32 %v744_v12  ;;  %v2946_v16 = vmul.f32 -1.442695, %v744_v12 }
 0x99e   :  { %3124 = vpow2.f32 %v2946_v16 }
 0x9a2   :  { %v3123_v13 = vpop.eup %3122 }
 0x9a3   :  { %768 = vrot.lane.b32.xlu2 %v3123_v13, %s3333_s22 }
 0x9a4   :  { %v3125_v17 = vpop.eup %3124 }
 0x9a5   :  { %v749_v46 = vadd.f32 1.0, %v3125_v17 }
 0x9a7   :  { %3126 = vrcp.f32 %v749_v46  ;;  %v761_v32 = vand.u32 2147483648, %v749_v46  ;;  %vm755_vm2 = vweird.f32 %v749_v46  ;;  %v759_v59 = vand.u32 2147483647, %v749_v46 }
 0x9a9   :  { %v762_v61 = vor.u32 1.1754944e-38, %v761_v32  ;;  %vm760_vm4 = vcmp.eq.f32.partialorder %v759_v59, 8.507059e+37  ;;  %v3945_v59 = vld [vmem:[%s5128_s3] ss:$0 sm:$0xff] }
 0x9ad   :  { %v3127_v52 = vpop.eup %3126 }
 0x9ae   :  { %v751_v53 = vmul.f32 %v3127_v52, %v749_v46  ;;  %vm756_vm15 = vweird.f32 %v3127_v52 }
 0x9af   :  { %vm757_vm3 = vmor %vm755_vm2, %vm756_vm15  ;;  %vm716_vm15 = vcmp.gt.f32.partialorder %v2943_v9, 0.5 }
 0x9b0   :  { %v752_v57 = vsub.f32 1.0, %v751_v53  ;;  %v860_v10 = vsel %vm716_vm15, 1, %v3334_v35 }
 0x9b2   :  { %v753_v20 = vmul.f32 %v3127_v52, %v752_v57 }
 0x9b4   :  { %v754_v58 = vadd.f32 %v3127_v52, %v753_v20  ;;  %v2955_v20 = vld [vmem:[%s5129_s0 + $0x4] sm:$0x3] }
 0x9b6   :  { %v758_v60 = vsel %vm757_vm3, %v3127_v52, %v754_v58 }
 0x9b7   :  { %v763_v62 = vsel %vm760_vm4, %v762_v61, %v758_v60 }
 0x9b8   :  { %v766_v47 = vmul.f32 %v763_v62, %v3894_v6 }
 0x9e2   :  { %v809_v48 = vpop.f32.mrf.mxu1 }
 0x9e3   :  { %v810_v50 = vadd.f32 %v3561_v23, %v809_v48 }
 0x9e5   :  { %3128 = vtanh.f32 %v810_v50  ;;  %v2949_v22 = vmul.f32 -1.442695, %v810_v50 }
 0x9e7   :  { %3130 = vpow2.f32 %v2949_v22 }
 0x9eb   :  { %v3129_v56 = vpop.eup %3128 }
 0x9ec   :  { %834 = vrot.lane.b32.xlu0 %v3129_v56, %s3333_s22 }
 0x9ed   :  { %v3131_v25 = vpop.eup %3130 }
 0x9ee   :  { %v815_v26 = vadd.f32 1.0, %v3131_v25 }
 0x9f0   :  { %3132 = vrcp.f32 %v815_v26  ;;  %v827_v40 = vand.u32 2147483648, %v815_v26  ;;  %vm821_vm7 = vweird.f32 %v815_v26  ;;  %v825_v44 = vand.u32 2147483647, %v815_v26 }
 0x9f2   :  { %v828_v54 = vor.u32 1.1754944e-38, %v827_v40  ;;  %vm826_vm9 = vcmp.eq.f32.partialorder %v825_v44, 8.507059e+37 }
 0x9f6   :  { %v3133_v30 = vpop.eup %3132 }
 0x9f7   :  { %v817_v42 = vmul.f32 %v3133_v30, %v815_v26  ;;  %vm822_vm6 = vweird.f32 %v3133_v30 }
 0x9f8   :  { %vm823_vm8 = vmor %vm821_vm7, %vm822_vm6 }
 0x9f9   :  { %v818_v31 = vsub.f32 1.0, %v817_v42 }
 0x9fb   :  { %v819_v34 = vmul.f32 %v3133_v30, %v818_v31 }
 0x9fd   :  { %v769_v14 = vpop.permute.xlu2 %768  ;;  %v820_v29 = vadd.f32 %v3133_v30, %v819_v34 }
 0x9fe   :  { %v771_v23 = vmul.f32 %v769_v14, %v763_v62  ;;  %v3952_v14 = vld [vmem:[%s5128_s3 + $0x1] ss:$0 sm:$0xff] }
 0x9ff   :  { %v824_v45 = vsel %vm823_vm8, %v3133_v30, %v820_v29 }
 0xa00   :  { %773 = vrot.lane.b32.xlu1 %v771_v23, %s3335_s23  ;;  %v829_v27 = vsel %vm826_vm9, %v828_v54, %v824_v45 }
 0xa01   :  { %v832_v19 = vmul.f32 %v829_v27, %v712_v37 }
 0xa08   :  { %851 = vperm.xlu1 %3051, %v849_v21  }
 0xa5e   :  { %v835_v24 = vpop.permute.xlu0 %834 }
 0xa5f   :  { %v837_v2 = vmul.f32 %v835_v24, %v829_v27 }
 0xa61   :  { %839 = vrot.lane.b32.xlu2 %v837_v2, %s3335_s23 }
 0xa72   :  { %v774_v63 = vpop.permute.xlu1 %773 }
 0xa73   :  { %v3897_v7 = vadd.f32 %v774_v63, %v766_v47 }
 0xa75   :  { %3134 = vtanh.f32 %v3897_v7 }
 0xa7a   :  { %v3910_v13 = vpop.permute.xlu1 %851 }
 0xa7b   :  { %v3135_v8 = vpop.eup %3134  ;;  %vm5136_vm2 = vcmp.eq.s32.totalorder %v3910_v13, 1 }
 0xa7c   :  { %779 = vrot.lane.b32.xlu0 %v3135_v8, %s3333_s22  ;;  %v2950_v8 = vld [vmem:[%s5130_s1 + $0xa] sm:$0x3] }
 0xa7d   :  { %vm876_vm8 = vcmp.gt.f32.partialorder %v2950_v8, 0.5 }
 0xa84   :  { %862 = vperm.xlu0 %3052, %v860_v10  }
 0xabb   :  { %v840_v41 = vpop.permute.xlu2 %839 }
 0xabc   :  { %v842_v11 = vadd.f32 %v840_v41, %v832_v19 }
 0xabe   :  { %3136 = vtanh.f32 %v842_v11 }
 0xac4   :  { %v3137_v12 = vpop.eup %3136 }
 0xac5   :  { %845 = vrot.lane.b32.xlu2 %v3137_v12, %s3333_s22 }
 0xaee   :  { %v780_v16 = vpop.permute.xlu0 %779 }
 0xaef   :  { %v3912_v17 = vmul.f32 %v780_v16, %v763_v62 }
 0xaf1   :  { %v3919_v46 = vsel %vm5136_vm2, %v3912_v17, %v3853_v39  ;;  %v2952_v39 = vld [vmem:[%s5129_s0 + $0xa] sm:$0x3] }
 0xaf2   :  { %881 = vrot.lane.b32.xlu1 %v3919_v46, %s3333_s22 }
 0xaf6   :  { %v863_v18 = vpop.permute.xlu0 %862 }
 0xaf7   :  { %vm864_vm3 = vcmp.eq.s32.totalorder %v863_v18, 1 }
 0xaf8   :  { %v3923_v0 = vsel %vm864_vm3, %v842_v11, %v712_v37  ;;  %v1011_v37 = vsel %vm876_vm8, 1, %v3334_v35 }
 0xb1f   :  { %v846_v48 = vpop.permute.xlu2 %845 }
 0xb20   :  { %v848_v50 = vmul.f32 %v846_v48, %v829_v27 }
 0xb22   :  { %v3926_v52 = vsel %vm864_vm3, %v848_v50, %v3866_v5  ;;  %v3928_v53 = vsel %vm864_vm3, %v848_v50, 0.0 }
 0xb23   :  { %947 = vrot.lane.b32.xlu2 %v3926_v52, %s3333_s22 }
 0xb64   :  { %v882_v56 = vpop.permute.xlu1 %881 }
 0xb65   :  { %v884_v57 = vsel %vm55_vm0, %v2952_v39, %v882_v56 }
 0xb66   :  { %2953 = vmatmul.msk.f32.vlgmr.msra.gmra.mxu2 %vm60_vm1, %v884_v57  ;;  %v3966_v57 = vsel %vm5136_vm2, %v3897_v7, %v3894_v6 }
 0xb7d   :  { %v948_v5 = vpop.permute.xlu2 %947 }
 0xb7e   :  { %v950_v58 = vsel %vm55_vm0, %v2955_v20, %v948_v5 }
 0xb7f   :  { %2956 = vmatmul.msk.f32.vlgmr.msra.gmra.mxu3 %vm60_vm1, %v950_v58 }
 0xbe9   :  { %v905_v32 = vpop.f32.mrf.mxu2 }
 0xbea   :  { %v906_v60 = vadd.f32 %v3945_v59, %v905_v32 }
 0xbec   :  { %3138 = vtanh.f32 %v906_v60  ;;  %v2954_v21 = vmul.f32 -1.442695, %v906_v60  ;;  %v2951_v60 = vld [vmem:[%s5130_s1 + $0x4] sm:$0x3] }
 0xbf2   :  { %v3139_v61 = vpop.eup %3138 }
 0xbf3   :  { %930 = vrot.lane.b32.xlu0 %v3139_v61, %s3333_s22 }
 0xc02   :  { %v971_v62 = vpop.f32.mrf.mxu3 }
 0xc03   :  { %v972_v23 = vadd.f32 %v3952_v14, %v971_v62 }
 0xc05   :  { %3140 = vtanh.f32 %v972_v23  ;;  %v2957_v30 = vmul.f32 -1.442695, %v972_v23 }
 0xc06   :  { %3142 = vpow2.f32 %v2954_v21 }
 0xc0b   :  { %v3141_v15 = vpop.eup %3140 }
 0xc0c   :  { %996 = vrot.lane.b32.xlu1 %v3141_v15, %s3333_s22  ;;  %v3143_v22 = vpop.eup %3142 }
 0xc0d   :  { %v911_v25 = vadd.f32 1.0, %v3143_v22 }
 0xc0f   :  { %3144 = vrcp.f32 %v911_v25  ;;  %v923_v45 = vand.u32 2147483648, %v911_v25  ;;  %vm917_vm5 = vweird.f32 %v911_v25  ;;  %v921_v54 = vand.u32 2147483647, %v911_v25 }
 0xc10   :  { %3146 = vpow2.f32 %v2957_v30 }
 0xc11   :  { %v924_v27 = vor.u32 1.1754944e-38, %v923_v45  ;;  %vm922_vm7 = vcmp.eq.f32.partialorder %v921_v54, 8.507059e+37 }
 0xc15   :  { %v3145_v26 = vpop.eup %3144 }
 0xc16   :  { %v913_v42 = vmul.f32 %v3145_v26, %v911_v25  ;;  %v3147_v29 = vpop.eup %3146  ;;  %vm918_vm4 = vweird.f32 %v3145_v26 }
 0xc17   :  { %v977_v40 = vadd.f32 1.0, %v3147_v29  ;;  %vm919_vm6 = vmor %vm917_vm5, %vm918_vm4  ;;  %vm878_vm5 = vcmp.gt.f32.partialorder %v2951_v60, 0.5 }
 0xc18   :  { %v914_v31 = vsub.f32 1.0, %v913_v42  ;;  %v1022_v61 = vsel %vm878_vm5, 1, %v3334_v35 }
 0xc19   :  { %3148 = vrcp.f32 %v977_v40  ;;  %v989_v12 = vand.u32 2147483648, %v977_v40  ;;  %vm983_vm15 = vweird.f32 %v977_v40  ;;  %v987_v16 = vand.u32 2147483647, %v977_v40 }
 0xc1a   :  { %v915_v34 = vmul.f32 %v3145_v26, %v914_v31 }
 0xc1b   :  { %v990_v48 = vor.u32 1.1754944e-38, %v989_v12  ;;  %vm988_vm4 = vcmp.eq.f32.partialorder %v987_v16, 8.507059e+37 }
 0xc1c   :  { %v916_v44 = vadd.f32 %v3145_v26, %v915_v34 }
 0xc1e   :  { %v920_v24 = vsel %vm919_vm6, %v3145_v26, %v916_v44 }
 0xc1f   :  { %v925_v47 = vsel %vm922_vm7, %v924_v27, %v920_v24  ;;  %v3149_v9 = vpop.eup %3148 }
 0xc20   :  { %v979_v10 = vmul.f32 %v3149_v9, %v977_v40  ;;  %vm984_vm9 = vweird.f32 %v3149_v9  ;;  %v928_v20 = vmul.f32 %v925_v47, %v3966_v57 }
 0xc21   :  { %vm985_vm3 = vmor %vm983_vm15, %vm984_vm9 }
 0xc22   :  { %v980_v19 = vsub.f32 1.0, %v979_v10 }
 0xc24   :  { %v981_v41 = vmul.f32 %v3149_v9, %v980_v19 }
 0xc26   :  { %v982_v11 = vadd.f32 %v3149_v9, %v981_v41 }
 0xc28   :  { %v986_v18 = vsel %vm985_vm3, %v3149_v9, %v982_v11 }
 0xc29   :  { %v991_v39 = vsel %vm988_vm4, %v990_v48, %v986_v18 }
 0xc2a   :  { %v994_v6 = vmul.f32 %v991_v39, %v3923_v0 }
 0xc65   :  { %v931_v2 = vpop.permute.xlu0 %930 }
 0xc66   :  { %v933_v63 = vmul.f32 %v931_v2, %v925_v47 }
 0xc68   :  { %935 = vrot.lane.b32.xlu2 %v933_v63, %s3335_s23 }
 0xc70   :  { %1013 = vperm.xlu2 %3050, %v1011_v37  }
 0xc7e   :  { %v997_v50 = vpop.permute.xlu1 %996 }
 0xc7f   :  { %v999_v56 = vmul.f32 %v997_v50, %v991_v39 }
 0xc81   :  { %1001 = vrot.lane.b32.xlu0 %v999_v56, %s3335_s23 }
 0xcc2   :  { %v936_v5 = vpop.permute.xlu2 %935 }
 0xcc3   :  { %v3969_v58 = vadd.f32 %v936_v5, %v928_v20  ;;  %v2958_v5 = vld [vmem:[%s5130_s1 + $0xc] sm:$0x3] }
 0xcc4   :  { %vm1038_vm4 = vcmp.gt.f32.partialorder %v2958_v5, 0.5 }
 0xcc5   :  { %3150 = vtanh.f32 %v3969_v58  ;;  %v1173_v60 = vsel %vm1038_vm4, 1, %v3334_v35 }
 0xcca   :  { %v3982_v15 = vpop.permute.xlu2 %1013 }
 0xccb   :  { %v3151_v32 = vpop.eup %3150  ;;  %vm1015_vm6 = vcmp.eq.s32.totalorder %v3982_v15, 1 }
 0xccc   :  { %941 = vrot.lane.b32.xlu1 %v3151_v32, %s3333_s22 }
 0xcd4   :  { %1024 = vperm.xlu1 %3051, %v1022_v61  }
 0xcf3   :  { %v1002_v7 = vpop.permute.xlu0 %1001 }
 0xcf4   :  { %v3978_v62 = vadd.f32 %v1002_v7, %v994_v6 }
 0xcf6   :  { %3152 = vtanh.f32 %v3978_v62 }
 0xcfc   :  { %v3153_v23 = vpop.eup %3152 }
 0xcfd   :  { %1007 = vrot.lane.b32.xlu0 %v3153_v23, %s3333_s22 }
 0xd3e   :  { %v942_v21 = vpop.permute.xlu1 %941 }
 0xd3f   :  { %v3984_v22 = vmul.f32 %v942_v21, %v925_v47 }
 0xd41   :  { %v3991_v25 = vsel %vm1015_vm6, %v3984_v22, %v3919_v46  ;;  %v2960_v46 = vld [vmem:[%s5129_s0 + $0xc] sm:$0x3]  ;;  %v1016_v36 = vsel %vm1015_vm6, %v3984_v22, 0.0 }
 0xd42   :  { %1043 = vrot.lane.b32.xlu2 %v3991_v25, %s3333_s22 }
 0xd46   :  { %v3995_v26 = vpop.permute.xlu1 %1024 }
 0xd47   :  { %vm1026_vm7 = vcmp.eq.s32.totalorder %v3995_v26, 1 }
 0xd6f   :  { %v1008_v30 = vpop.permute.xlu0 %1007 }
 0xd70   :  { %v1010_v42 = vmul.f32 %v1008_v30, %v991_v39 }
 0xd72   :  { %v4001_v31 = vsel %vm1026_vm7, %v1010_v42, %v3926_v52  ;;  %v4005_v34 = vsel %vm1026_vm7, %v1010_v42, 0.0  ;;  %v2963_v52 = vld [vmem:[%s5129_s0 + $0x2] sm:$0x3] }
 0xd73   :  { %1109 = vrot.lane.b32.xlu0 %v4001_v31, %s3333_s22 }
 0xd9c   :  { %v1044_v29 = vpop.permute.xlu2 %1043 }
 0xd9d   :  { %v1046_v40 = vsel %vm55_vm0, %v2960_v46, %v1044_v29 }
 0xd9e   :  { %2961 = vmatmul.msk.f32.vlgmr.msrb.gmra.mxu0 %vm60_vm1, %v1046_v40 }
 0xde5   :  { %v1110_v44 = vpop.permute.xlu0 %1109 }
 0xde6   :  { %v1112_v45 = vsel %vm55_vm0, %v2963_v52, %v1110_v44 }
 0xde7   :  { %2964 = vmatmul.msk.f32.vlgmr.msrb.gmra.mxu1 %vm60_vm1, %v1112_v45 }
 0xe1b   :  { %v1067_v54 = vpop.f32.mrf.mxu0 }
 0xe1c   :  { %v1068_v24 = vadd.f32 %v3945_v59, %v1067_v54 }
 0xe1e   :  { %3154 = vtanh.f32 %v1068_v24  ;;  %v2962_v63 = vmul.f32 -1.442695, %v1068_v24  ;;  %v4033_v24 = vsel %vm1015_vm6, %v3969_v58, %v3966_v57  ;;  %v4048_v57 = vsel %vm1026_vm7, %v3978_v62, %v3923_v0 }
 0xe24   :  { %v3155_v27 = vpop.eup %3154 }
 0xe25   :  { %1092 = vrot.lane.b32.xlu1 %v3155_v27, %s3333_s22 }
 0xe64   :  { %v1133_v2 = vpop.f32.mrf.mxu1 }
 0xe65   :  { %v1134_v47 = vadd.f32 %v3952_v14, %v1133_v2 }
 0xe67   :  { %3156 = vtanh.f32 %v1134_v47  ;;  %v2965_v32 = vmul.f32 -1.442695, %v1134_v47 }
 0xe68   :  { %3158 = vpow2.f32 %v2962_v63 }
 0xe6d   :  { %v3157_v8 = vpop.eup %3156 }
 0xe6e   :  { %1158 = vrot.lane.b32.xlu2 %v3157_v8, %s3333_s22  ;;  %v3159_v9 = vpop.eup %3158  ;;  %v2959_v8 = vld [vmem:[%s5130_s1 + $0x2] sm:$0x3] }
 0xe6f   :  { %v1073_v10 = vadd.f32 1.0, %v3159_v9 }
 0xe71   :  { %3160 = vrcp.f32 %v1073_v10  ;;  %v1085_v16 = vand.u32 2147483648, %v1073_v10  ;;  %vm1079_vm9 = vweird.f32 %v1073_v10  ;;  %v1083_v18 = vand.u32 2147483647, %v1073_v10 }
 0xe72   :  { %3162 = vpow2.f32 %v2965_v32 }
 0xe73   :  { %v1086_v50 = vor.u32 1.1754944e-38, %v1085_v16  ;;  %vm1084_vm3 = vcmp.eq.f32.partialorder %v1083_v18, 8.507059e+37 }
 0xe77   :  { %v3161_v37 = vpop.eup %3160 }
 0xe78   :  { %v1075_v19 = vmul.f32 %v3161_v37, %v1073_v10  ;;  %vm1080_vm8 = vweird.f32 %v3161_v37  ;;  %v3163_v61 = vpop.eup %3162 }
 0xe79   :  { %vm1081_vm15 = vmor %vm1079_vm9, %vm1080_vm8  ;;  %v1139_v6 = vadd.f32 1.0, %v3163_v61 }
 0xe7a   :  { %v1076_v41 = vsub.f32 1.0, %v1075_v19 }
 0xe7b   :  { %3164 = vrcp.f32 %v1139_v6  ;;  %v1151_v46 = vand.u32 2147483648, %v1139_v6  ;;  %vm1145_vm8 = vweird.f32 %v1139_v6  ;;  %v1149_v29 = vand.u32 2147483647, %v1139_v6 }
 0xe7c   :  { %v1077_v11 = vmul.f32 %v3161_v37, %v1076_v41 }
 0xe7d   :  { %v1152_v52 = vor.u32 1.1754944e-38, %v1151_v46 }
 0xe7e   :  { %v1078_v12 = vadd.f32 %v3161_v37, %v1077_v11 }
 0xe80   :  { %v1082_v48 = vsel %vm1081_vm15, %v3161_v37, %v1078_v12  ;;  %vm1150_vm15 = vcmp.eq.f32.partialorder %v1149_v29, 8.507059e+37 }
 0xe81   :  { %v1087_v56 = vsel %vm1084_vm3, %v1086_v50, %v1082_v48  ;;  %v3165_v7 = vpop.eup %3164  ;;  %vm1040_vm3 = vcmp.gt.f32.partialorder %v2959_v8, 0.5 }
 0xe82   :  { %v1141_v23 = vmul.f32 %v3165_v7, %v1139_v6  ;;  %vm1146_vm5 = vweird.f32 %v3165_v7  ;;  %v1090_v27 = vmul.f32 %v1087_v56, %v4033_v24  ;;  %v1184_v9 = vsel %vm1040_vm3, 1, %v3334_v35 }
 0xe83   :  { %vm1147_vm9 = vmor %vm1145_vm8, %vm1146_vm5 }
 0xe84   :  { %v1142_v21 = vsub.f32 1.0, %v1141_v23 }
 0xe86   :  { %v1143_v30 = vmul.f32 %v3165_v7, %v1142_v21 }
 0xe88   :  { %v1144_v42 = vadd.f32 %v3165_v7, %v1143_v30 }
 0xe8a   :  { %v1148_v40 = vsel %vm1147_vm9, %v3165_v7, %v1144_v42 }
 0xe8b   :  { %v1153_v44 = vsel %vm1150_vm15, %v1152_v52, %v1148_v40 }
 0xe8c   :  { %v1156_v58 = vmul.f32 %v1153_v44, %v4048_v57 }
 0xe97   :  { %v1093_v39 = vpop.permute.xlu1 %1092 }
 0xe98   :  { %v1095_v20 = vmul.f32 %v1093_v39, %v1087_v56  ;;  %v1269_v39 = vld [vmem:[%s5129_s0] sm:$0x3] }
 0xe9a   :  { %1097 = vrot.lane.b32.xlu0 %v1095_v20, %s3335_s23 }
 0xea2   :  { %1175 = vperm.xlu0 %3052, %v1173_v60  }
 0xec8   :  { %v1159_v45 = vpop.permute.xlu2 %1158 }
 0xec9   :  { %v1161_v54 = vmul.f32 %v1159_v45, %v1153_v44 }
 0xecb   :  { %1163 = vrot.lane.b32.xlu1 %v1161_v54, %s3335_s23 }
 0xf0c   :  { %v1098_v2 = vpop.permute.xlu0 %1097 }
 0xf0d   :  { %v4036_v47 = vadd.f32 %v1098_v2, %v1090_v27  ;;  %v2966_v2 = vld [vmem:[%s5130_s1 + $0xe] sm:$0x3] }
 0xf0e   :  { %vm1200_vm15 = vcmp.gt.f32.partialorder %v2966_v2, 0.5 }
 0xf0f   :  { %3166 = vtanh.f32 %v4036_v47 }
 0xf14   :  { %v4055_v41 = vpop.permute.xlu0 %1175 }
 0xf15   :  { %v3167_v63 = vpop.eup %3166  ;;  %vm1177_vm4 = vcmp.eq.s32.totalorder %v4055_v41, 1 }
 0xf16   :  { %1103 = vrot.lane.b32.xlu2 %v3167_v63, %s3333_s22  ;;  %v1335_v63 = vsel %vm1200_vm15, 1, %v3334_v35 }
 0xf1e   :  { %1186 = vperm.xlu2 %3050, %v1184_v9  }
 0xf3d   :  { %v1164_v10 = vpop.permute.xlu1 %1163 }
 0xf3e   :  { %v4051_v37 = vadd.f32 %v1164_v10, %v1156_v58 }
 0xf40   :  { %3168 = vtanh.f32 %v4051_v37 }
 0xf46   :  { %v3169_v19 = vpop.eup %3168 }
 0xf47   :  { %1169 = vrot.lane.b32.xlu1 %v3169_v19, %s3333_s22 }
 0xf70   :  { %v1104_v11 = vpop.permute.xlu2 %1103 }
 0xf71   :  { %v4057_v12 = vmul.f32 %v1104_v11, %v1087_v56 }
 0xf73   :  { %v1195_v0 = vsel %vm1177_vm4, %v4057_v12, %v3991_v25  ;;  %v2967_v25 = vld [vmem:[%s5129_s0 + $0xe] sm:$0x3] }
 0xf74   :  { %1205 = vrot.lane.b32.xlu0 %v1195_v0, %s3333_s22 }
 0xf78   :  { %v4065_v62 = vpop.permute.xlu2 %1186 }
 0xf79   :  { %vm1188_vm7 = vcmp.eq.s32.totalorder %v4065_v62, 1 }
 0xfb9   :  { %v1170_v26 = vpop.permute.xlu1 %1169 }
 0xfba   :  { %v4067_v16 = vmul.f32 %v1170_v26, %v1153_v44 }
 0xfbc   :  { %v1197_v18 = vsel %vm1188_vm7, %v4067_v16, %v4001_v31 }
 0xfbd   :  { %1271 = vrot.lane.b32.xlu1 %v1197_v18, %s3333_s22 }
 0xfe6   :  { %v1206_v48 = vpop.permute.xlu0 %1205 }
 0xfe7   :  { %v1208_v50 = vsel %vm55_vm0, %v2967_v25, %v1206_v48 }
 0xfe8   :  { %2968 = vmatmul.msk.f32.vlgmr.msrb.gmra.mxu2 %vm60_vm1, %v1208_v50 }
0x102f   :  { %v1272_v56 = vpop.permute.xlu1 %1271 }
0x1030   :  { %v1274_v20 = vsel %vm55_vm0, %v1269_v39, %v1272_v56 }
0x1031   :  { %2970 = vmatmul.msk.f32.vlgmr.msrb.gmra.mxu3 %vm60_vm1, %v1274_v20 }
0x106b   :  { %v1229_v31 = vpop.f32.mrf.mxu2 }
0x106c   :  { %v1230_v5 = vadd.f32 %v3945_v59, %v1229_v31  ;;  %v1196_v31 = vsel %vm1177_vm4, %v4036_v47, %v4033_v24  ;;  %v1198_v24 = vsel %vm1188_vm7, %v4051_v37, %v4048_v57  ;;  %v4115_v57 = vld [vmem:[%s5131_s4 + $0xb8] sm:$0xff]  ;;  %v4120_v37 = vld [vmem:[%s5131_s4 + $0xb0] sm:$0xff] }
0x106d   :  { %1467 = vmatpush.msra.mxu1 %v4115_v57  ;;  %1626 = vmatpush.msra.mxu3 %v4115_v57 }
0x106e   :  { %3170 = vtanh.f32 %v1230_v5  ;;  %v2969_v60 = vmul.f32 -1.442695, %v1230_v5 }
0x106f   :  { %1468 = vmatpush.msra.mxu1 %v4120_v37  ;;  %1627 = vmatpush.msra.mxu3 %v4120_v37 }
0x1070   :  { %3172 = vpow2.f32 %v2969_v60 }
0x1074   :  { %v3171_v32 = vpop.eup %3170 }
0x1075   :  { %1254 = vrot.lane.b32.xlu2 %v3171_v32, %s3333_s22 }
0x1076   :  { %v3173_v61 = vpop.eup %3172 }
0x1077   :  { %v1235_v6 = vadd.f32 1.0, %v3173_v61 }
0x1079   :  { %3174 = vrcp.f32 %v1235_v6  ;;  %v1247_v40 = vand.u32 2147483648, %v1235_v6  ;;  %vm1241_vm5 = vweird.f32 %v1235_v6  ;;  %v1245_v52 = vand.u32 2147483647, %v1235_v6 }
0x107b   :  { %v1248_v45 = vor.u32 1.1754944e-38, %v1247_v40  ;;  %vm1246_vm9 = vcmp.eq.f32.partialorder %v1245_v52, 8.507059e+37  ;;  %v4134_v40 = vld [vmem:[%s5131_s4 + $0xa0] sm:$0xff]  ;;  %v4141_v52 = vld [vmem:[%s5131_s4 + $0x98] sm:$0xff] }
0x107f   :  { %v3175_v21 = vpop.eup %3174 }
0x1080   :  { %v1237_v30 = vmul.f32 %v3175_v21, %v1235_v6  ;;  %vm1242_vm0 = vweird.f32 %v3175_v21  ;;  %v1201_v6 = vld [vmem:[%s5130_s1] sm:$0x3] }
0x1081   :  { %vm1243_vm8 = vmor %vm1241_vm5, %vm1242_vm0 }
0x1082   :  { %v1238_v46 = vsub.f32 1.0, %v1237_v30 }
0x1084   :  { %v1239_v59 = vmul.f32 %v3175_v21, %v1238_v46 }
0x1086   :  { %v1240_v29 = vadd.f32 %v3175_v21, %v1239_v59 }
0x1088   :  { %v1244_v44 = vsel %vm1243_vm8, %v3175_v21, %v1240_v29 }
0x1089   :  { %v1249_v54 = vsel %vm1246_vm9, %v1248_v45, %v1244_v44  ;;  %vm1202_vm9 = vcmp.gt.f32.partialorder %v1201_v6, 0.5  ;;  %v4148_v44 = vld [vmem:[%s5131_s4 + $0x90] sm:$0xff]  ;;  %v4155_v45 = vld [vmem:[%s5131_s4 + $0x88] sm:$0xff] }
0x108a   :  { %v1252_v5 = vmul.f32 %v1249_v54, %v1196_v31  ;;  %v4281_v31 = vld [vmem:[%s5131_s4 + $0x20] sm:$0xff] }
0x10b4   :  { %v1295_v7 = vpop.f32.mrf.mxu3 }
0x10b5   :  { %v1296_v23 = vadd.f32 %v3952_v14, %v1295_v7  ;;  %v1346_v7 = vsel %vm1202_vm9, 1, %v3334_v35 }
0x10b7   :  { %3176 = vtanh.f32 %v1296_v23  ;;  %v2971_v8 = vmul.f32 -1.442695, %v1296_v23 }
0x10b9   :  { %3178 = vpow2.f32 %v2971_v8  ;;  %v4166_v8 = vld [vmem:[%s5131_s4 + $0x80] sm:$0xff] }
0x10bd   :  { %v3177_v42 = vpop.eup %3176 }
0x10be   :  { %1320 = vrot.lane.b32.xlu0 %v3177_v42, %s3333_s22 }
0x10bf   :  { %v3179_v9 = vpop.eup %3178 }
0x10c0   :  { %v1301_v58 = vadd.f32 1.0, %v3179_v9  ;;  %v4171_v9 = vld [vmem:[%s5131_s4 + $0x78] sm:$0xff] }
0x10c2   :  { %3180 = vrcp.f32 %v1301_v58  ;;  %v1313_v18 = vand.u32 2147483648, %v1301_v58  ;;  %vm1307_vm0 = vweird.f32 %v1301_v58  ;;  %v1311_v25 = vand.u32 2147483647, %v1301_v58 }
0x10c4   :  { %v1314_v50 = vor.u32 1.1754944e-38, %v1313_v18  ;;  %vm1312_vm8 = vcmp.eq.f32.partialorder %v1311_v25, 8.507059e+37  ;;  %v4222_v18 = vld [vmem:[%s5131_s4 + $0x40] sm:$0xff]  ;;  %v4231_v25 = vld [vmem:[%s5131_s4 + $0x38] sm:$0xff] }
0x10c8   :  { %v3181_v10 = vpop.eup %3180 }
0x10c9   :  { %v1303_v19 = vmul.f32 %v3181_v10, %v1301_v58  ;;  %vm1308_vm3 = vweird.f32 %v3181_v10  ;;  %v4178_v58 = vld [vmem:[%s5131_s4 + $0x70] sm:$0xff] }
0x10ca   :  { %vm1309_vm5 = vmor %vm1307_vm0, %vm1308_vm3  ;;  %vm197_vm0 = vcmask 254976  }
0x10cb   :  { %v1304_v11 = vsub.f32 1.0, %v1303_v19  ;;  %v4192_v19 = vld [vmem:[%s5131_s4 + $0x60] sm:$0xff] }
0x10cd   :  { %v1305_v0 = vmul.f32 %v3181_v10, %v1304_v11  ;;  %v4200_v11 = vld [vmem:[%s5131_s4 + $0x58] sm:$0xff] }
0x10ce   :  { %1402 = vmatpush.msra.mxu0 %v4200_v11  ;;  %1561 = vmatpush.msra.mxu2 %v4200_v11 }
0x10cf   :  { %v1255_v27 = vpop.permute.xlu2 %1254  ;;  %v1306_v26 = vadd.f32 %v3181_v10, %v1305_v0  ;;  %v4205_v0 = vld [vmem:[%s5131_s4 + $0x50] sm:$0xff] }
0x10d0   :  { %v1257_v14 = vmul.f32 %v1255_v27, %v1249_v54  ;;  %1403 = vmatpush.msra.mxu0 %v4205_v0  ;;  %1562 = vmatpush.msra.mxu2 %v4205_v0 }
0x10d1   :  { %v1310_v48 = vsel %vm1309_vm5, %v3181_v10, %v1306_v26  ;;  %v4185_v10 = vld [vmem:[%s5131_s4 + $0x68] sm:$0xff]  ;;  %vm1394_vm5 = vcmask 785408  }
0x10d2   :  { %1259 = vrot.lane.b32.xlu1 %v1257_v14, %s3335_s23  ;;  %v1315_v56 = vsel %vm1312_vm8, %v1314_v50, %v1310_v48  ;;  %v4213_v26 = vld [vmem:[%s5131_s4 + $0x48] sm:$0xff]  ;;  %v4240_v48 = vld [vmem:[%s5131_s4 + $0x30] sm:$0xff] }
0x10d3   :  { %v1318_v47 = vmul.f32 %v1315_v56, %v1198_v24  ;;  %1404 = vmatpush.msra.mxu0 %v4213_v26  ;;  %1563 = vmatpush.msra.mxu2 %v4213_v26  ;;  %v4249_v50 = vld [vmem:[%s5131_s4 + $0x28] sm:$0xff] }
0x10d5   :  { %1405 = vmatpush.msra.mxu0 %v4222_v18  ;;  %1564 = vmatpush.msra.mxu2 %v4222_v18 }
0x10d7   :  { %1406 = vmatpush.msra.mxu0 %v4231_v25  ;;  %1565 = vmatpush.msra.mxu2 %v4231_v25 }
0x10d9   :  { %1407 = vmatpush.msra.mxu0 %v4240_v48  ;;  %1566 = vmatpush.msra.mxu2 %v4240_v48 }
0x10da   :  { %1337 = vperm.xlu1 %3051, %v1335_v63  }
0x10db   :  { %1408 = vmatpush.msra.mxu0 %v4249_v50  ;;  %1567 = vmatpush.msra.mxu2 %v4249_v50 }
0x10dd   :  { %1409 = vmatpush.msra.mxu0 %v4281_v31  ;;  %1568 = vmatpush.msra.mxu2 %v4281_v31 }
0x1130   :  { %v1321_v39 = vpop.permute.xlu0 %1320 }
0x1131   :  { %v1323_v20 = vmul.f32 %v1321_v39, %v1315_v56 }
0x1133   :  { %1325 = vrot.lane.b32.xlu2 %v1323_v20, %s3335_s23 }
0x1144   :  { %v1260_v32 = vpop.permute.xlu1 %1259 }
0x1145   :  { %v1262_v60 = vadd.f32 %v1260_v32, %v1252_v5  ;;  %v4286_v5 = vld [vmem:[%s5131_s4 + $0x18] sm:$0xff]  ;;  %v4293_v32 = vld [vmem:[%s5131_s4 + $0x10] sm:$0xff] }
0x1146   :  { %1410 = vmatpush.msra.mxu0 %v4286_v5  ;;  %1569 = vmatpush.msra.mxu2 %v4286_v5 }
0x1147   :  { %3182 = vtanh.f32 %v1262_v60  ;;  %v4301_v60 = vld [vmem:[%s5131_s4 + $0x8] sm:$0xff] }
0x1148   :  { %1411 = vmatpush.msra.mxu0 %v4293_v32  ;;  %1570 = vmatpush.msra.mxu2 %v4293_v32 }
0x114a   :  { %1412 = vmatpush.msra.mxu0 %v4301_v60  ;;  %1571 = vmatpush.msra.mxu2 %v4301_v60 }
0x114c   :  { %v1338_v42 = vpop.permute.xlu1 %1337 }
0x114d   :  { %v3183_v61 = vpop.eup %3182  ;;  %vm1339_vm15 = vcmp.eq.s32.totalorder %v1338_v42, 1  ;;  %v4370_v42 = vld [vmem:[%s5132_s5] ss:$0 sm:$0xff] }
0x114e   :  { %1265 = vrot.lane.b32.xlu0 %v3183_v61, %s3333_s22  ;;  %v4309_v61 = vld [vmem:[%s5131_s4] sm:$0xff] }
0x114f   :  { %1413 = vmatpush.msra.mxu0 %v4309_v61  ;;  %1572 = vmatpush.msra.mxu2 %v4309_v61 }
0x1151   :  { %1724 = vmatpush.msrb.mxu0 %v4200_v11  ;;  %1888 = vmatpush.msrb.mxu2 %v4200_v11 }
0x1153   :  { %1725 = vmatpush.msrb.mxu0 %v4205_v0  ;;  %1889 = vmatpush.msrb.mxu2 %v4205_v0 }
0x1155   :  { %1726 = vmatpush.msrb.mxu0 %v4213_v26  ;;  %1890 = vmatpush.msrb.mxu2 %v4213_v26 }
0x1156   :  { %1348 = vperm.xlu0 %3052, %v1346_v7  }
0x1157   :  { %1727 = vmatpush.msrb.mxu0 %v4222_v18  ;;  %1891 = vmatpush.msrb.mxu2 %v4222_v18 }
0x1159   :  { %1728 = vmatpush.msrb.mxu0 %v4231_v25  ;;  %1892 = vmatpush.msrb.mxu2 %v4231_v25 }
0x115b   :  { %1729 = vmatpush.msrb.mxu0 %v4240_v48  ;;  %1893 = vmatpush.msrb.mxu2 %v4240_v48 }
0x115d   :  { %1730 = vmatpush.msrb.mxu0 %v4249_v50  ;;  %1894 = vmatpush.msrb.mxu2 %v4249_v50 }
0x115f   :  { %1731 = vmatpush.msrb.mxu0 %v4281_v31  ;;  %1895 = vmatpush.msrb.mxu2 %v4281_v31 }
0x1161   :  { %1732 = vmatpush.msrb.mxu0 %v4286_v5  ;;  %1896 = vmatpush.msrb.mxu2 %v4286_v5 }
0x1163   :  { %1733 = vmatpush.msrb.mxu0 %v4293_v32  ;;  %1897 = vmatpush.msrb.mxu2 %v4293_v32 }
0x1165   :  { %1734 = vmatpush.msrb.mxu0 %v4301_v60  ;;  %1898 = vmatpush.msrb.mxu2 %v4301_v60 }
0x1167   :  { %1735 = vmatpush.msrb.mxu0 %v4309_v61  ;;  %1899 = vmatpush.msrb.mxu2 %v4309_v61 }
0x118d   :  { %v1326_v23 = vpop.permute.xlu2 %1325 }
0x118e   :  { %v1328_v21 = vadd.f32 %v1326_v23, %v1318_v47  ;;  %v4363_v47 = vld [vmem:[%s5132_s5 + $0x1] ss:$0 sm:$0xff] }
0x1190   :  { %3184 = vtanh.f32 %v1328_v21 }
0x1196   :  { %v3185_v30 = vpop.eup %3184 }
0x1197   :  { %1331 = vrot.lane.b32.xlu2 %v3185_v30, %s3333_s22 }
0x119f   :  { %194 = vrot.lane.b32.xlu2 %v3592_v28, %s3335_s23  ;;  %v4127_v28 = vld [vmem:[%s5131_s4 + $0xa8] sm:$0xff] }
0x11a0   :  { %1469 = vmatpush.msra.mxu1 %v4127_v28  ;;  %1628 = vmatpush.msra.mxu3 %v4127_v28 }
0x11a2   :  { %1470 = vmatpush.msra.mxu1 %v4134_v40  ;;  %1629 = vmatpush.msra.mxu3 %v4134_v40 }
0x11a4   :  { %1471 = vmatpush.msra.mxu1 %v4141_v52  ;;  %1630 = vmatpush.msra.mxu3 %v4141_v52 }
0x11a6   :  { %1472 = vmatpush.msra.mxu1 %v4148_v44  ;;  %1631 = vmatpush.msra.mxu3 %v4148_v44 }
0x11a8   :  { %1473 = vmatpush.msra.mxu1 %v4155_v45  ;;  %1632 = vmatpush.msra.mxu3 %v4155_v45 }
0x11aa   :  { %1474 = vmatpush.msra.mxu1 %v4166_v8  ;;  %1633 = vmatpush.msra.mxu3 %v4166_v8 }
0x11ac   :  { %1475 = vmatpush.msra.mxu1 %v4171_v9  ;;  %1634 = vmatpush.msra.mxu3 %v4171_v9 }
0x11ae   :  { %1476 = vmatpush.msra.mxu1 %v4178_v58  ;;  %1635 = vmatpush.msra.mxu3 %v4178_v58 }
0x11b0   :  { %1477 = vmatpush.msra.mxu1 %v4185_v10  ;;  %1636 = vmatpush.msra.mxu3 %v4185_v10 }
0x11b2   :  { %1478 = vmatpush.msra.mxu1 %v4192_v19  ;;  %1637 = vmatpush.msra.mxu3 %v4192_v19 }
0x11b4   :  { %1790 = vmatpush.msrb.mxu1 %v4115_v57  ;;  %1954 = vmatpush.msrb.mxu3 %v4115_v57 }
0x11b6   :  { %1791 = vmatpush.msrb.mxu1 %v4120_v37  ;;  %1955 = vmatpush.msrb.mxu3 %v4120_v37 }
0x11b8   :  { %1792 = vmatpush.msrb.mxu1 %v4127_v28  ;;  %1956 = vmatpush.msrb.mxu3 %v4127_v28 }
0x11ba   :  { %1793 = vmatpush.msrb.mxu1 %v4134_v40  ;;  %1957 = vmatpush.msrb.mxu3 %v4134_v40 }
0x11bc   :  { %1794 = vmatpush.msrb.mxu1 %v4141_v52  ;;  %1958 = vmatpush.msrb.mxu3 %v4141_v52 }
0x11be   :  { %1795 = vmatpush.msrb.mxu1 %v4148_v44  ;;  %1959 = vmatpush.msrb.mxu3 %v4148_v44 }
0x11c0   :  { %v1266_v46 = vpop.permute.xlu0 %1265  ;;  %1796 = vmatpush.msrb.mxu1 %v4155_v45  ;;  %1960 = vmatpush.msrb.mxu3 %v4155_v45 }
0x11c1   :  { %v1268_v59 = vmul.f32 %v1266_v46, %v1249_v54 }
0x11c2   :  { %1797 = vmatpush.msrb.mxu1 %v4166_v8  ;;  %1961 = vmatpush.msrb.mxu3 %v4166_v8 }
0x11c3   :  { %v1340_v29 = vsel %vm1339_vm15, %v1268_v59, 0.0 }
0x11c4   :  { %1342 = vrot.lane.b32.xlu1 %v1340_v29, %s3335_s23  ;;  %1798 = vmatpush.msrb.mxu1 %v4171_v9 }
0x11c5   :  { %1962 = vmatpush.msrb.mxu3 %v4171_v9 }
0x11c6   :  { %1799 = vmatpush.msrb.mxu1 %v4178_v58 }
0x11c7   :  { %1963 = vmatpush.msrb.mxu3 %v4178_v58 }
0x11c8   :  { %v1349_v54 = vpop.permute.xlu0 %1348  ;;  %1800 = vmatpush.msrb.mxu1 %v4185_v10 }
0x11c9   :  { %vm1350_vm3 = vcmp.eq.s32.totalorder %v1349_v54, 1  ;;  %1964 = vmatpush.msrb.mxu3 %v4185_v10 }
0x11ca   :  { %1801 = vmatpush.msrb.mxu1 %v4192_v19 }
0x11cb   :  { %1965 = vmatpush.msrb.mxu3 %v4192_v19 }
0x11f1   :  { %v1332_v27 = vpop.permute.xlu2 %1331 }
0x11f2   :  { %v1334_v14 = vmul.f32 %v1332_v27, %v1315_v56 }
0x11f4   :  { %v1351_v2 = vsel %vm1350_vm3, %v1334_v14, 0.0 }
0x11f5   :  { %1353 = vrot.lane.b32.xlu0 %v1351_v2, %s3333_s22 }
0x11f9   :  { %v195_v63 = vpop.permute.xlu2 %194 }
0x11fa   :  { %198 = vst.msk [vmem:[#allocation2] sm:$0x3] %vm197_vm0, %v195_v63 }
0x1236   :  { %v1343_v39 = vpop.permute.xlu1 %1342 }
0x1237   :  { %1345 = vst.msk [vmem:[#allocation2 + $0xe] sm:$0x3] %vm197_vm0, %v1343_v39 }
0x123e   :  { %v1455_v56 = vld [vmem:[#allocation2 + $0xe] sm:$0x3] }
0x123f   :  { %v1456_v20 = vsel %vm60_vm1, %v1455_v56, 0.0 }
0x1240   :  { %2988 = vmatmul.msk.f32.vlgmr.msra.gmra.mxu1 %vm1394_vm5, %v1456_v20 }
0x1241   :  { %2118 = vmatpush.msra.mxu1 %v4115_v57 }
0x1243   :  { %2119 = vmatpush.msra.mxu1 %v4120_v37 }
0x1245   :  { %2120 = vmatpush.msra.mxu1 %v4127_v28 }
0x1247   :  { %2121 = vmatpush.msra.mxu1 %v4134_v40 }
0x1249   :  { %2122 = vmatpush.msra.mxu1 %v4141_v52 }
0x124b   :  { %2123 = vmatpush.msra.mxu1 %v4148_v44 }
0x124d   :  { %2124 = vmatpush.msra.mxu1 %v4155_v45 }
0x124f   :  { %2125 = vmatpush.msra.mxu1 %v4166_v8 }
0x1251   :  { %2126 = vmatpush.msra.mxu1 %v4171_v9 }
0x1253   :  { %2127 = vmatpush.msra.mxu1 %v4178_v58 }
0x1255   :  { %2128 = vmatpush.msra.mxu1 %v4185_v10 }
0x1257   :  { %2129 = vmatpush.msra.mxu1 %v4192_v19 }
0x1267   :  { %v1354_v6 = vpop.permute.xlu0 %1353 }
0x1268   :  { %1356 = vst.msk [vmem:[#allocation2] sm:$0x3] %vm210_vm14, %v1354_v6 }
0x126f   :  { %v1389_v7 = vld [vmem:[#allocation2] sm:$0x3] }
0x1270   :  { %v1390_v24 = vsel %vm60_vm1, %v1389_v7, 0.0 }
0x1271   :  { %2986 = vmatmul.msk.f32.vlgmr.msra.gmra.mxu0 %vm1394_vm5, %v1390_v24 }
0x1272   :  { %2052 = vmatpush.msra.mxu0 %v4200_v11 }
0x1274   :  { %2053 = vmatpush.msra.mxu0 %v4205_v0 }
0x1276   :  { %2054 = vmatpush.msra.mxu0 %v4213_v26 }
0x1278   :  { %2055 = vmatpush.msra.mxu0 %v4222_v18 }
0x127a   :  { %2056 = vmatpush.msra.mxu0 %v4231_v25 }
0x127c   :  { %2057 = vmatpush.msra.mxu0 %v4240_v48 }
0x127e   :  { %2058 = vmatpush.msra.mxu0 %v4249_v50 }
0x1280   :  { %2059 = vmatpush.msra.mxu0 %v4281_v31 }
0x1282   :  { %2060 = vmatpush.msra.mxu0 %v4286_v5 }
0x1284   :  { %2061 = vmatpush.msra.mxu0 %v4293_v32 }
0x1286   :  { %2062 = vmatpush.msra.mxu0 %v4301_v60 }
0x1288   :  { %2063 = vmatpush.msra.mxu0 %v4309_v61 }
0x12bd   :  { %v1480_v23 = vpop.f32.mrf.mxu1 }
0x12be   :  { %v1481_v21 = vadd.f32 %v4363_v47, %v1480_v23 }
0x12c0   :  { %3186 = vtanh.f32 %v1481_v21  ;;  %v2989_v54 = vmul.f32 -1.442695, %v1481_v21 }
0x12c6   :  { %v3187_v30 = vpop.eup %3186 }
0x12c7   :  { %1505 = vrot.lane.b32.xlu1 %v3187_v30, %s3333_s22 }
0x12ee   :  { %v1415_v46 = vpop.f32.mrf.mxu0 }
0x12ef   :  { %v1416_v59 = vadd.f32 %v4370_v42, %v1415_v46 }
0x12f1   :  { %3188 = vtanh.f32 %v1416_v59  ;;  %v2987_v63 = vmul.f32 -1.442695, %v1416_v59  ;;  %v2985_v59 = vld [vmem:[%s5130_s1 + $0xe] sm:$0x3] }
0x12f2   :  { %3190 = vpow2.f32 %v2989_v54  ;;  %vm1388_vm2 = vcmp.gt.f32.partialorder %v2985_v59, 0.5 }
0x12f7   :  { %v3189_v29 = vpop.eup %3188 }
0x12f8   :  { %1440 = vrot.lane.b32.xlu2 %v3189_v29, %s3333_s22  ;;  %v3191_v27 = vpop.eup %3190 }
0x12f9   :  { %v1486_v14 = vadd.f32 1.0, %v3191_v27 }
0x12fb   :  { %3192 = vrcp.f32 %v1486_v14  ;;  %v1498_v23 = vand.u32 2147483648, %v1486_v14  ;;  %vm1492_vm9 = vweird.f32 %v1486_v14  ;;  %v1496_v30 = vand.u32 2147483647, %v1486_v14 }
0x12fc   :  { %3194 = vpow2.f32 %v2987_v63 }
0x12fd   :  { %v1499_v46 = vor.u32 1.1754944e-38, %v1498_v23  ;;  %vm1497_vm3 = vcmp.eq.f32.partialorder %v1496_v30, 8.507059e+37 }
0x1301   :  { %v3193_v2 = vpop.eup %3192 }
0x1302   :  { %v1488_v39 = vmul.f32 %v3193_v2, %v1486_v14  ;;  %v3195_v6 = vpop.eup %3194  ;;  %vm1493_vm8 = vweird.f32 %v3193_v2 }
0x1303   :  { %v1421_v7 = vadd.f32 1.0, %v3195_v6  ;;  %vm1494_vm15 = vmor %vm1492_vm9, %vm1493_vm8 }
0x1304   :  { %v1489_v56 = vsub.f32 1.0, %v1488_v39 }
0x1305   :  { %3196 = vrcp.f32 %v1421_v7  ;;  %v1433_v6 = vand.u32 2147483648, %v1421_v7  ;;  %vm1427_vm9 = vweird.f32 %v1421_v7 }
0x1306   :  { %v1490_v20 = vmul.f32 %v3193_v2, %v1489_v56  ;;  %v1531_v56 = vsel %vm1388_vm2, 1, %v3334_v35 }
0x1307   :  { %v1434_v30 = vor.u32 1.1754944e-38, %v1433_v6 }
0x1308   :  { %v1491_v24 = vadd.f32 %v3193_v2, %v1490_v20 }
0x130a   :  { %v1495_v21 = vsel %vm1494_vm15, %v3193_v2, %v1491_v24  ;;  %v1431_v24 = vand.u32 2147483647, %v1421_v7 }
0x130b   :  { %v1500_v54 = vsel %vm1497_vm3, %v1499_v46, %v1495_v21  ;;  %v3197_v63 = vpop.eup %3196 }
0x130c   :  { %v1423_v39 = vmul.f32 %v3197_v63, %v1421_v7  ;;  %vm1428_vm8 = vweird.f32 %v3197_v63  ;;  %vm1432_vm3 = vcmp.eq.f32.partialorder %v1431_v24, 8.507059e+37  ;;  %v1503_v59 = vmul.f32 0.0, %v1500_v54 }
0x130d   :  { %vm1429_vm15 = vmor %vm1427_vm9, %vm1428_vm8 }
0x130e   :  { %v1424_v14 = vsub.f32 1.0, %v1423_v39 }
0x1310   :  { %v1425_v20 = vmul.f32 %v3197_v63, %v1424_v14 }
0x1312   :  { %v1426_v2 = vadd.f32 %v3197_v63, %v1425_v20 }
0x1314   :  { %v1430_v23 = vsel %vm1429_vm15, %v3197_v63, %v1426_v2  ;;  %v354_v2 = vsel %vm353_vm11, %v3668_v51, 0.0 }
0x1315   :  { %v1435_v46 = vsel %vm1432_vm3, %v1434_v30, %v1430_v23  ;;  %v1178_v23 = vsel %vm1177_vm4, %v4057_v12, 0.0 }
0x1316   :  { %v1438_v14 = vmul.f32 0.0, %v1435_v46 }
0x1339   :  { %v1506_v29 = vpop.permute.xlu1 %1505 }
0x133a   :  { %v1508_v27 = vmul.f32 %v1506_v29, %v1500_v54 }
0x133c   :  { %1510 = vrot.lane.b32.xlu0 %v1508_v27, %s3335_s23  ;;  %v1189_v27 = vsel %vm1188_vm7, %v4067_v16, 0.0 }
0x1344   :  { %1533 = vperm.xlu0 %3052, %v1531_v56   ;;  %v1385_v56 = vld [vmem:[%s5130_s1] sm:$0x3] }
0x1345   :  { %vm1386_vm2 = vcmp.gt.f32.partialorder %v1385_v56, 0.5 }
0x1346   :  { %v1520_v62 = vsel %vm1386_vm2, 1, %v3334_v35 }
0x134c   :  { %368 = vrot.lane.b32.xlu0 %v3689_v55, %s3333_s22 }
0x1352   :  { %v1441_v21 = vpop.permute.xlu2 %1440 }
0x1353   :  { %v1443_v29 = vmul.f32 %v1441_v21, %v1435_v46 }
0x1354   :  { %1191 = vrot.lane.b32.xlu0 %v1189_v27, %s3333_s22 }
0x1355   :  { %1445 = vrot.lane.b32.xlu1 %v1443_v29, %s3335_s23 }
0x13ae   :  { %v1511_v55 = vpop.permute.xlu0 %1510 }
0x13af   :  { %v4386_v39 = vadd.f32 %v1511_v55, %v1503_v59 }
0x13b1   :  { %3198 = vtanh.f32 %v4386_v39 }
0x13b6   :  { %v4389_v7 = vpop.permute.xlu0 %1533 }
0x13b7   :  { %v3199_v63 = vpop.eup %3198  ;;  %vm1535_vm7 = vcmp.eq.s32.totalorder %v4389_v7, 1 }
0x13b8   :  { %1516 = vrot.lane.b32.xlu2 %v3199_v63, %s3333_s22 }
0x13be   :  { %v369_v16 = vpop.permute.xlu0 %368 }
0x13bf   :  { %372 = vst.msk [vmem:[#allocation2 + $0xc] sm:$0x3] %vm210_vm14, %v369_v16 }
0x13c0   :  { %1522 = vperm.xlu2 %3050, %v1520_v62  }
0x13c6   :  { %v1192_v27 = vpop.permute.xlu0 %1191 }
0x13c7   :  { %v1446_v20 = vpop.permute.xlu1 %1445 }
0x13c8   :  { %v4400_v6 = vadd.f32 %v1446_v20, %v1438_v14  ;;  %356 = vrot.lane.b32.xlu2 %v354_v2, %s3335_s23 }
0x13ca   :  { %3200 = vtanh.f32 %v4400_v6 }
0x13d0   :  { %v3201_v24 = vpop.eup %3200 }
0x13d1   :  { %1451 = vrot.lane.b32.xlu1 %v3201_v24, %s3333_s22 }
0x13d9   :  { %1180 = vrot.lane.b32.xlu1 %v1178_v23, %s3335_s23 }
0x1412   :  { %v1517_v30 = vpop.permute.xlu2 %1516 }
0x1413   :  { %v1519_v21 = vmul.f32 %v1517_v30, %v1500_v54 }
0x1415   :  { %v4412_v49 = vsel %vm1535_vm7, %v1519_v21, 0.0 }
0x1416   :  { %1615 = vrot.lane.b32.xlu1 %v4412_v49, %s3336_s10 }
0x141a   :  { %v4416_v51 = vpop.permute.xlu2 %1522 }
0x141b   :  { %vm1524_vm11 = vcmp.eq.s32.totalorder %v4416_v51, 1 }
0x1422   :  { %v357_v29 = vpop.permute.xlu2 %356 }
0x1423   :  { %360 = vst.msk [vmem:[#allocation2 + $0x2] sm:$0x3] %vm197_vm0, %v357_v29 }
0x1424   :  { %1194 = vst.msk [vmem:[#allocation2 + $0x2] sm:$0x3] %vm210_vm14, %v1192_v27 }
0x142b   :  { %v1549_v62 = vld [vmem:[#allocation2 + $0x2] sm:$0x3] }
0x1443   :  { %v1452_v41 = vpop.permute.xlu1 %1451 }
0x1444   :  { %v1454_v12 = vmul.f32 %v1452_v41, %v1435_v46 }
0x1446   :  { %v4423_v54 = vsel %vm1524_vm11, %v1454_v12, 0.0 }
0x1447   :  { %1550 = vrot.lane.b32.xlu2 %v4423_v54, %s3336_s10 }
0x144b   :  { %v1181_v59 = vpop.permute.xlu1 %1180 }
0x144c   :  { %1183 = vst.msk [vmem:[#allocation2 + $0xc] sm:$0x3] %vm197_vm0, %v1181_v59 }
0x1453   :  { %v1614_v63 = vld [vmem:[#allocation2 + $0xc] sm:$0x3] }
0x1488   :  { %v1616_v55 = vpop.permute.xlu1 %1615 }
0x1489   :  { %v1618_v56 = vsel %vm60_vm1, %v1614_v63, %v1616_v55 }
0x148a   :  { %2994 = vmatmul.msk.f32.vlgmr.msra.gmra.mxu3 %vm1394_vm5, %v1618_v56 }
0x148b   :  { %2280 = vmatpush.msra.mxu3 %v4115_v57 }
0x148d   :  { %2281 = vmatpush.msra.mxu3 %v4120_v37 }
0x148f   :  { %2282 = vmatpush.msra.mxu3 %v4127_v28 }
0x1491   :  { %2283 = vmatpush.msra.mxu3 %v4134_v40 }
0x1493   :  { %2284 = vmatpush.msra.mxu3 %v4141_v52 }
0x1495   :  { %2285 = vmatpush.msra.mxu3 %v4148_v44 }
0x1497   :  { %2286 = vmatpush.msra.mxu3 %v4155_v45 }
0x1499   :  { %2287 = vmatpush.msra.mxu3 %v4166_v8 }
0x149b   :  { %2288 = vmatpush.msra.mxu3 %v4171_v9 }
0x149d   :  { %2289 = vmatpush.msra.mxu3 %v4178_v58 }
0x149f   :  { %2290 = vmatpush.msra.mxu3 %v4185_v10 }
0x14a1   :  { %v1551_v46 = vpop.permute.xlu2 %1550  ;;  %2291 = vmatpush.msra.mxu3 %v4192_v19 }
0x14a2   :  { %v1553_v16 = vsel %vm60_vm1, %v1549_v62, %v1551_v46 }
0x14a3   :  { %2992 = vmatmul.msk.f32.vlgmr.msra.gmra.mxu2 %vm1394_vm5, %v1553_v16 }
0x14a4   :  { %2214 = vmatpush.msra.mxu2 %v4200_v11 }
0x14a6   :  { %2215 = vmatpush.msra.mxu2 %v4205_v0 }
0x14a8   :  { %2216 = vmatpush.msra.mxu2 %v4213_v26 }
0x14aa   :  { %2217 = vmatpush.msra.mxu2 %v4222_v18 }
0x14ac   :  { %2218 = vmatpush.msra.mxu2 %v4231_v25 }
0x14ae   :  { %2219 = vmatpush.msra.mxu2 %v4240_v48 }
0x14b0   :  { %2220 = vmatpush.msra.mxu2 %v4249_v50 }
0x14b2   :  { %2221 = vmatpush.msra.mxu2 %v4281_v31 }
0x14b4   :  { %2222 = vmatpush.msra.mxu2 %v4286_v5 }
0x14b6   :  { %2223 = vmatpush.msra.mxu2 %v4293_v32 }
0x14b8   :  { %2224 = vmatpush.msra.mxu2 %v4301_v60 }
0x14ba   :  { %2225 = vmatpush.msra.mxu2 %v4309_v61 }
0x150d   :  { %v1639_v14 = vpop.f32.mrf.mxu3 }
0x150e   :  { %v1640_v20 = vadd.f32 %v4363_v47, %v1639_v14 }
0x1510   :  { %3202 = vtanh.f32 %v1640_v20  ;;  %v2995_v21 = vmul.f32 -1.442695, %v1640_v20 }
0x1516   :  { %v3203_v2 = vpop.eup %3202 }
0x1517   :  { %1664 = vrot.lane.b32.xlu0 %v3203_v2, %s3333_s22 }
0x1526   :  { %v1574_v24 = vpop.f32.mrf.mxu2 }
0x1527   :  { %v1575_v23 = vadd.f32 %v4370_v42, %v1574_v24 }
0x1529   :  { %3204 = vtanh.f32 %v1575_v23  ;;  %v2993_v12 = vmul.f32 -1.442695, %v1575_v23  ;;  %v2991_v23 = vld [vmem:[%s5130_s1 + $0xc] sm:$0x3] }
0x152a   :  { %3206 = vpow2.f32 %v2995_v21  ;;  %vm1548_vm3 = vcmp.gt.f32.partialorder %v2991_v23, 0.5 }
0x152f   :  { %v3205_v30 = vpop.eup %3204 }
0x1530   :  { %1599 = vrot.lane.b32.xlu1 %v3205_v30, %s3333_s22  ;;  %v3207_v29 = vpop.eup %3206 }
0x1531   :  { %v1645_v27 = vadd.f32 1.0, %v3207_v29 }
0x1533   :  { %3208 = vrcp.f32 %v1645_v27  ;;  %v1657_v16 = vand.u32 2147483648, %v1645_v27  ;;  %vm1651_vm8 = vweird.f32 %v1645_v27  ;;  %v1655_v14 = vand.u32 2147483647, %v1645_v27 }
0x1534   :  { %3210 = vpow2.f32 %v2993_v12 }
0x1535   :  { %v1658_v2 = vor.u32 1.1754944e-38, %v1657_v16  ;;  %vm1656_vm15 = vcmp.eq.f32.partialorder %v1655_v14, 8.507059e+37 }
0x1539   :  { %v3209_v41 = vpop.eup %3208 }
0x153a   :  { %v1647_v59 = vmul.f32 %v3209_v41, %v1645_v27  ;;  %v3211_v56 = vpop.eup %3210  ;;  %vm1652_vm4 = vweird.f32 %v3209_v41 }
0x153b   :  { %v1580_v46 = vadd.f32 1.0, %v3211_v56  ;;  %vm1653_vm9 = vmor %vm1651_vm8, %vm1652_vm4 }
0x153c   :  { %v1648_v55 = vsub.f32 1.0, %v1647_v59  ;;  %v1691_v59 = vsel %vm1548_vm3, 1, %v3334_v35 }
0x153d   :  { %3212 = vrcp.f32 %v1580_v46  ;;  %vm1586_vm4 = vweird.f32 %v1580_v46  ;;  %v1590_v56 = vand.u32 2147483647, %v1580_v46 }
0x153e   :  { %v1649_v63 = vmul.f32 %v3209_v41, %v1648_v55 }
0x1540   :  { %v1650_v62 = vadd.f32 %v3209_v41, %v1649_v63  ;;  %v1592_v63 = vand.u32 2147483648, %v1580_v46 }
0x1542   :  { %v1654_v20 = vsel %vm1653_vm9, %v3209_v41, %v1650_v62  ;;  %v1593_v16 = vor.u32 1.1754944e-38, %v1592_v63  ;;  %vm1591_vm9 = vcmp.eq.f32.partialorder %v1590_v56, 8.507059e+37 }
0x1543   :  { %v1659_v24 = vsel %vm1656_vm15, %v1658_v2, %v1654_v20  ;;  %v3213_v29 = vpop.eup %3212 }
0x1544   :  { %v1582_v12 = vmul.f32 %v3213_v29, %v1580_v46  ;;  %vm1587_vm2 = vweird.f32 %v3213_v29 }
0x1545   :  { %vm1588_vm8 = vmor %vm1586_vm4, %vm1587_vm2 }
0x1546   :  { %v1583_v27 = vsub.f32 1.0, %v1582_v12  ;;  %v522_v12 = vsel %vm521_vm10, %v3757_v38, 0.0 }
0x1548   :  { %v1584_v55 = vmul.f32 %v3213_v29, %v1583_v27 }
0x154a   :  { %v1585_v41 = vadd.f32 %v3213_v29, %v1584_v55 }
0x154c   :  { %v1589_v62 = vsel %vm1588_vm8, %v3213_v29, %v1585_v41 }
0x154d   :  { %v1594_v20 = vsel %vm1591_vm9, %v1593_v16, %v1589_v62 }
0x1589   :  { %v1665_v30 = vpop.permute.xlu0 %1664 }
0x158a   :  { %v1667_v21 = vmul.f32 %v1665_v30, %v1659_v24  ;;  %v4473_v30 = vsel %vm1535_vm7, %v4386_v39, 0.0 }
0x158c   :  { %1669 = vrot.lane.b32.xlu2 %v1667_v21, %s3335_s23 }
0x1594   :  { %1693 = vperm.xlu2 %3050, %v1691_v59   ;;  %v4494_v59 = vsel %vm1524_vm11, %v4400_v6, 0.0 }
0x1595   :  { %v1597_v27 = vmul.f32 %v1594_v20, %v4494_v59 }
0x159c   :  { %536 = vrot.lane.b32.xlu2 %v3778_v43, %s3333_s22  ;;  %v1662_v43 = vmul.f32 %v1659_v24, %v4473_v30 }
0x15a2   :  { %v1600_v14 = vpop.permute.xlu1 %1599 }
0x15a3   :  { %v1602_v2 = vmul.f32 %v1600_v14, %v1594_v20 }
0x15a4   :  { %1029 = vrot.lane.b32.xlu2 %v4005_v34, %s3333_s22  ;;  %v2990_v34 = vld [vmem:[%s5130_s1 + $0x2] sm:$0x3] }
0x15a5   :  { %1604 = vrot.lane.b32.xlu0 %v1602_v2, %s3335_s23  ;;  %vm1546_vm15 = vcmp.gt.f32.partialorder %v2990_v34, 0.5 }
0x15a6   :  { %v1679_v39 = vsel %vm1546_vm15, 1, %v3334_v35 }
0x15e6   :  { %v1670_v46 = vpop.permute.xlu2 %1669 }
0x15e7   :  { %v4476_v21 = vadd.f32 %v1670_v46, %v1662_v43 }
0x15e9   :  { %3214 = vtanh.f32 %v4476_v21 }
0x15ee   :  { %v4479_v23 = vpop.permute.xlu2 %1693 }
0x15ef   :  { %v3215_v29 = vpop.eup %3214  ;;  %vm1695_vm10 = vcmp.eq.s32.totalorder %v4479_v23, 1 }
0x15f0   :  { %1675 = vrot.lane.b32.xlu1 %v3215_v29, %s3333_s22 }
0x15f6   :  { %v537_v7 = vpop.permute.xlu2 %536 }
0x15f7   :  { %540 = vst.msk [vmem:[#allocation2 + $0xa] sm:$0x3] %vm210_vm14, %v537_v7 }
0x15f8   :  { %1681 = vperm.xlu1 %3051, %v1679_v39  }
0x15fe   :  { %v1030_v22 = vpop.permute.xlu2 %1029 }
0x1600   :  { %524 = vrot.lane.b32.xlu1 %v522_v12, %s3335_s23 }
0x1617   :  { %v1605_v55 = vpop.permute.xlu0 %1604 }
0x1618   :  { %v4497_v41 = vadd.f32 %v1605_v55, %v1597_v27 }
0x161a   :  { %3216 = vtanh.f32 %v4497_v41 }
0x1620   :  { %v3217_v63 = vpop.eup %3216 }
0x1621   :  { %1610 = vrot.lane.b32.xlu0 %v3217_v63, %s3333_s22 }
0x1629   :  { %1018 = vrot.lane.b32.xlu0 %v1016_v36, %s3335_s23 }
0x1662   :  { %v1676_v38 = vpop.permute.xlu1 %1675 }
0x1663   :  { %v4505_v51 = vmul.f32 %v1676_v38, %v1659_v24  ;;  %v2997_v38 = vld [vmem:[%s5130_s1 + $0xa] sm:$0x3] }
0x1664   :  { %vm1710_vm4 = vcmp.gt.f32.partialorder %v2997_v38, 0.5 }
0x1665   :  { %v4512_v6 = vsel %vm1695_vm10, %v4505_v51, %v4412_v49 }
0x1666   :  { %1779 = vrot.lane.b32.xlu0 %v4512_v6, %s3336_s10 }
0x166a   :  { %v4516_v56 = vpop.permute.xlu1 %1681 }
0x166b   :  { %vm1683_vm6 = vcmp.eq.s32.totalorder %v4516_v56, 1 }
0x1672   :  { %v525_v15 = vpop.permute.xlu1 %524 }
0x1673   :  { %528 = vst.msk [vmem:[#allocation2 + $0x4] sm:$0x3] %vm197_vm0, %v525_v15  ;;  %v1855_v15 = vsel %vm1710_vm4, 1, %v3334_v35 }
0x1674   :  { %1032 = vst.msk [vmem:[#allocation2 + $0x4] sm:$0x3] %vm210_vm14, %v1030_v22  ;;  %v702_v22 = vsel %vm701_vm12, %v3859_v3, 0.0 }
0x1693   :  { %v1611_v24 = vpop.permute.xlu0 %1610 }
0x1694   :  { %v1613_v62 = vmul.f32 %v1611_v24, %v1594_v20 }
0x1696   :  { %v4523_v16 = vsel %vm1683_vm6, %v1613_v62, 0.0  ;;  %v4528_v14 = vsel %vm1683_vm6, %v1613_v62, %v4423_v54 }
0x1697   :  { %1713 = vrot.lane.b32.xlu1 %v4528_v14, %s3336_s10 }
0x169b   :  { %v1019_v2 = vpop.permute.xlu0 %1018 }
0x169c   :  { %1021 = vst.msk [vmem:[#allocation2 + $0xa] sm:$0x3] %vm197_vm0, %v1019_v2 }
0x16a3   :  { %v1777_v43 = vld [vmem:[#allocation2 + $0xa] sm:$0x3] }
0x16d8   :  { %v1780_v46 = vpop.permute.xlu0 %1779 }
0x16d9   :  { %v1782_v20 = vsel %vm60_vm1, %v1777_v43, %v1780_v46 }
0x16da   :  { %3000 = vmatmul.msk.f32.vlgmr.msrb.gmra.mxu1 %vm1394_vm5, %v1782_v20 }
0x16db   :  { %2442 = vmatpush.msrb.mxu1 %v4115_v57  ;;  %v1711_v57 = vld [vmem:[#allocation2 + $0x4] sm:$0x3] }
0x16dd   :  { %2443 = vmatpush.msrb.mxu1 %v4120_v37 }
0x16df   :  { %2444 = vmatpush.msrb.mxu1 %v4127_v28 }
0x16e1   :  { %2445 = vmatpush.msrb.mxu1 %v4134_v40 }
0x16e3   :  { %2446 = vmatpush.msrb.mxu1 %v4141_v52 }
0x16e5   :  { %2447 = vmatpush.msrb.mxu1 %v4148_v44 }
0x16e7   :  { %2448 = vmatpush.msrb.mxu1 %v4155_v45 }
0x16e9   :  { %2449 = vmatpush.msrb.mxu1 %v4166_v8 }
0x16eb   :  { %2450 = vmatpush.msrb.mxu1 %v4171_v9 }
0x16ed   :  { %2451 = vmatpush.msrb.mxu1 %v4178_v58 }
0x16ef   :  { %2452 = vmatpush.msrb.mxu1 %v4185_v10 }
0x16f1   :  { %2453 = vmatpush.msrb.mxu1 %v4192_v19 }
0x1709   :  { %v1714_v37 = vpop.permute.xlu1 %1713 }
0x170a   :  { %v1716_v28 = vsel %vm60_vm1, %v1711_v57, %v1714_v37 }
0x170b   :  { %2998 = vmatmul.msk.f32.vlgmr.msrb.gmra.mxu0 %vm1394_vm5, %v1716_v28 }
0x170c   :  { %2376 = vmatpush.msrb.mxu0 %v4200_v11 }
0x170e   :  { %2377 = vmatpush.msrb.mxu0 %v4205_v0 }
0x1710   :  { %2378 = vmatpush.msrb.mxu0 %v4213_v26 }
0x1712   :  { %2379 = vmatpush.msrb.mxu0 %v4222_v18 }
0x1714   :  { %2380 = vmatpush.msrb.mxu0 %v4231_v25 }
0x1716   :  { %2381 = vmatpush.msrb.mxu0 %v4240_v48 }
0x1718   :  { %2382 = vmatpush.msrb.mxu0 %v4249_v50 }
0x171a   :  { %2383 = vmatpush.msrb.mxu0 %v4281_v31 }
0x171c   :  { %2384 = vmatpush.msrb.mxu0 %v4286_v5 }
0x171e   :  { %2385 = vmatpush.msrb.mxu0 %v4293_v32 }
0x1720   :  { %2386 = vmatpush.msrb.mxu0 %v4301_v60 }
0x1722   :  { %2387 = vmatpush.msrb.mxu0 %v4309_v61 }
0x1757   :  { %v1803_v40 = vpop.f32.mrf.mxu1 }
0x1758   :  { %v1804_v52 = vadd.f32 %v4363_v47, %v1803_v40 }
0x175a   :  { %3218 = vtanh.f32 %v1804_v52  ;;  %v3001_v9 = vmul.f32 -1.442695, %v1804_v52 }
0x1760   :  { %v3219_v44 = vpop.eup %3218 }
0x1761   :  { %1828 = vrot.lane.b32.xlu2 %v3219_v44, %s3333_s22 }
0x1788   :  { %v1737_v45 = vpop.f32.mrf.mxu0 }
0x1789   :  { %v1738_v8 = vadd.f32 %v4370_v42, %v1737_v45  ;;  %v4581_v45 = vsel %vm1695_vm10, %v4476_v21, %v4473_v30 }
0x178b   :  { %3220 = vtanh.f32 %v1738_v8  ;;  %v2999_v24 = vmul.f32 -1.442695, %v1738_v8 }
0x178c   :  { %3222 = vpow2.f32 %v3001_v9 }
0x1791   :  { %v3221_v58 = vpop.eup %3220 }
0x1792   :  { %1762 = vrot.lane.b32.xlu0 %v3221_v58, %s3333_s22  ;;  %v3223_v10 = vpop.eup %3222 }
0x1793   :  { %v1809_v19 = vadd.f32 1.0, %v3223_v10 }
0x1795   :  { %3224 = vrcp.f32 %v1809_v19  ;;  %v1821_v39 = vand.u32 2147483648, %v1809_v19  ;;  %vm1815_vm11 = vweird.f32 %v1809_v19  ;;  %v1819_v7 = vand.u32 2147483647, %v1809_v19 }
0x1796   :  { %3226 = vpow2.f32 %v2999_v24  ;;  %v3318_v24 = vld [vmem:[%s5131_s4 + $0xa8] sm:$0xff] }
0x1797   :  { %v1822_v27 = vor.u32 1.1754944e-38, %v1821_v39  ;;  %vm1820_vm2 = vcmp.eq.f32.partialorder %v1819_v7, 8.507059e+37 }
0x179b   :  { %v3225_v11 = vpop.eup %3224 }
0x179c   :  { %v1811_v0 = vmul.f32 %v3225_v11, %v1809_v19  ;;  %vm1816_vm7 = vweird.f32 %v3225_v11  ;;  %v3227_v62 = vpop.eup %3226 }
0x179d   :  { %vm1817_vm3 = vmor %vm1815_vm11, %vm1816_vm7  ;;  %v1743_v2 = vadd.f32 1.0, %v3227_v62  ;;  %v3319_v62 = vld [vmem:[%s5131_s4 + $0xa0] sm:$0xff] }
0x179e   :  { %v1812_v26 = vsub.f32 1.0, %v1811_v0  ;;  %v690_v0 = vsel %vm689_vm13, %v3846_v1, 0.0  ;;  %vm5138_vm13 = vcmp.eq.s32.totalorder %v3910_v13, 1 }
0x179f   :  { %3228 = vrcp.f32 %v1743_v2  ;;  %v1755_v28 = vand.u32 2147483648, %v1743_v2  ;;  %vm1749_vm9 = vweird.f32 %v1743_v2  ;;  %v1753_v33 = vand.u32 2147483647, %v1743_v2 }
0x17a0   :  { %v1813_v29 = vmul.f32 %v3225_v11, %v1812_v26  ;;  %v4603_v26 = vsel %vm1683_vm6, %v4497_v41, %v4494_v59  ;;  %v854_v4 = vsel %vm5138_vm13, %v3912_v17, 0.0 }
0x17a1   :  { %v1756_v40 = vor.u32 1.1754944e-38, %v1755_v28  ;;  %vm1754_vm15 = vcmp.eq.f32.partialorder %v1753_v33, 8.507059e+37  ;;  %v3326_v28 = vld [vmem:[%s5131_s4 + $0x68] sm:$0xff]  ;;  %v3327_v33 = vld [vmem:[%s5131_s4 + $0x60] sm:$0xff] }
0x17a2   :  { %v1814_v34 = vadd.f32 %v3225_v11, %v1813_v29 }
0x17a4   :  { %v1818_v12 = vsel %vm1817_vm3, %v3225_v11, %v1814_v34  ;;  %v2996_v11 = vld [vmem:[%s5130_s1 + $0x4] sm:$0x3] }
0x17a5   :  { %v1823_v63 = vsel %vm1820_vm2, %v1822_v27, %v1818_v12  ;;  %v3229_v43 = vpop.eup %3228  ;;  %vm1708_vm7 = vcmp.gt.f32.partialorder %v2996_v11, 0.5 }
0x17a6   :  { %v1745_v46 = vmul.f32 %v3229_v43, %v1743_v2  ;;  %vm1750_vm8 = vweird.f32 %v3229_v43  ;;  %v1826_v8 = vmul.f32 %v1823_v63, %v4581_v45  ;;  %v1843_v30 = vsel %vm1708_vm7, 1, %v3334_v35  ;;  %v3320_v2 = vld [vmem:[%s5131_s4 + $0x98] sm:$0xff] }
0x17a7   :  { %vm1751_vm12 = vmor %vm1749_vm9, %vm1750_vm8 }
0x17a8   :  { %v1746_v20 = vsub.f32 1.0, %v1745_v46  ;;  %v3322_v46 = vld [vmem:[%s5131_s4 + $0x88] sm:$0xff] }
0x17aa   :  { %v1747_v57 = vmul.f32 %v3229_v43, %v1746_v20  ;;  %v3323_v20 = vld [vmem:[%s5131_s4 + $0x80] sm:$0xff] }
0x17ac   :  { %v1748_v37 = vadd.f32 %v3229_v43, %v1747_v57  ;;  %v3324_v57 = vld [vmem:[%s5131_s4 + $0x78] sm:$0xff] }
0x17ae   :  { %v1752_v3 = vsel %vm1751_vm12, %v3229_v43, %v1748_v37  ;;  %v3321_v43 = vld [vmem:[%s5131_s4 + $0x90] sm:$0xff] }
0x17af   :  { %v1757_v52 = vsel %vm1754_vm15, %v1756_v40, %v1752_v3  ;;  %v3325_v37 = vld [vmem:[%s5131_s4 + $0x70] sm:$0xff] }
0x17b0   :  { %v1760_v29 = vmul.f32 %v1757_v52, %v4603_v26 }
0x17bb   :  { %v1829_v55 = vpop.permute.xlu2 %1828 }
0x17bc   :  { %v1831_v36 = vmul.f32 %v1829_v55, %v1823_v63 }
0x17be   :  { %1833 = vrot.lane.b32.xlu1 %v1831_v36, %s3335_s23 }
0x17c6   :  { %1857 = vperm.xlu1 %3051, %v1855_v15  }
0x17ce   :  { %704 = vrot.lane.b32.xlu1 %v702_v22, %s3333_s22  ;;  %v3316_v22 = vld [vmem:[%s5131_s4 + $0xb8] sm:$0xff] }
0x17d6   :  { %867 = vrot.lane.b32.xlu1 %v3928_v53, %s3333_s22 }
0x1804   :  { %v1763_v53 = vpop.permute.xlu0 %1762 }
0x1805   :  { %v1765_v44 = vmul.f32 %v1763_v53, %v1757_v52  ;;  %v3328_v53 = vld [vmem:[%s5131_s4 + $0x58] sm:$0xff] }
0x1807   :  { %1767 = vrot.lane.b32.xlu2 %v1765_v44, %s3335_s23  ;;  %v3329_v44 = vld [vmem:[%s5131_s4 + $0x50] sm:$0xff] }
0x1830   :  { %v1834_v9 = vpop.permute.xlu1 %1833 }
0x1831   :  { %v4584_v58 = vadd.f32 %v1834_v9, %v1826_v8  ;;  %v3330_v8 = vld [vmem:[%s5131_s4 + $0x48] sm:$0xff] }
0x1833   :  { %3230 = vtanh.f32 %v4584_v58 }
0x1838   :  { %v4587_v10 = vpop.permute.xlu1 %1857 }
0x1839   :  { %v3231_v19 = vpop.eup %3230  ;;  %vm1859_vm6 = vcmp.eq.s32.totalorder %v4587_v10, 1 }
0x183a   :  { %1839 = vrot.lane.b32.xlu0 %v3231_v19, %s3333_s22 }
0x1840   :  { %v705_v21 = vpop.permute.xlu1 %704 }
0x1841   :  { %708 = vst.msk [vmem:[#allocation2 + $0x8] sm:$0x3] %vm210_vm14, %v705_v21 }
0x1842   :  { %1845 = vperm.xlu0 %3052, %v1843_v30  }
0x1848   :  { %v868_v17 = vpop.permute.xlu1 %867 }
0x184a   :  { %692 = vrot.lane.b32.xlu0 %v690_v0, %s3335_s23 }
0x1861   :  { %v1768_v34 = vpop.permute.xlu2 %1767 }
0x1862   :  { %v4606_v39 = vadd.f32 %v1768_v34, %v1760_v29 }
0x1864   :  { %3232 = vtanh.f32 %v4606_v39 }
0x186a   :  { %v3233_v7 = vpop.eup %3232 }
0x186b   :  { %1773 = vrot.lane.b32.xlu2 %v3233_v7, %s3333_s22 }
0x1873   :  { %856 = vrot.lane.b32.xlu2 %v854_v4, %s3335_s23 }
0x18ac   :  { %v1840_v1 = vpop.permute.xlu0 %1839 }
0x18ad   :  { %v4614_v56 = vmul.f32 %v1840_v1, %v1823_v63 }
0x18af   :  { %v4621_v59 = vsel %vm1859_vm6, %v4614_v56, %v4512_v6 }
0x18b0   :  { %1943 = vrot.lane.b32.xlu2 %v4621_v59, %s3336_s10 }
0x18b4   :  { %v4625_v41 = vpop.permute.xlu0 %1845 }
0x18b5   :  { %vm1847_vm11 = vcmp.eq.s32.totalorder %v4625_v41, 1 }
0x18bc   :  { %v693_v13 = vpop.permute.xlu0 %692 }
0x18bd   :  { %696 = vst.msk [vmem:[#allocation2 + $0x6] sm:$0x3] %vm197_vm0, %v693_v13 }
0x18be   :  { %870 = vst.msk [vmem:[#allocation2 + $0x6] sm:$0x3] %vm210_vm14, %v868_v17 }
0x18c5   :  { %v1774_v12 = vpop.permute.xlu2 %1773  ;;  %v1875_v3 = vld [vmem:[#allocation2 + $0x6] sm:$0x3] }
0x18c6   :  { %v1776_v27 = vmul.f32 %v1774_v12, %v1757_v52 }
0x18c8   :  { %v4632_v55 = vsel %vm1847_vm11, %v1776_v27, 0.0  ;;  %v4637_v6 = vsel %vm1847_vm11, %v1776_v27, %v4528_v14  ;;  %v3317_v14 = vld [vmem:[%s5131_s4 + $0xb0] sm:$0xff] }
0x18c9   :  { %1877 = vrot.lane.b32.xlu0 %v4637_v6, %s3336_s10 }
0x18cd   :  { %v857_v63 = vpop.permute.xlu2 %856 }
0x18ce   :  { %859 = vst.msk [vmem:[#allocation2 + $0x8] sm:$0x3] %vm197_vm0, %v857_v63  ;;  %v3003_v63 = vld [vmem:[%s5130_s1 + $0x8] sm:$0x3] }
0x18cf   :  { %vm1874_vm9 = vcmp.gt.f32.partialorder %v3003_v63, 0.5 }
0x18d5   :  { %v1941_v36 = vld [vmem:[#allocation2 + $0x8] sm:$0x3] }
0x190a   :  { %v1944_v38 = vpop.permute.xlu2 %1943 }
0x190b   :  { %v1946_v15 = vsel %vm60_vm1, %v1941_v36, %v1944_v38 }
0x190c   :  { %3006 = vmatmul.msk.f32.vlgmr.msrb.gmra.mxu3 %vm1394_vm5, %v1946_v15  ;;  %v2019_v15 = vsel %vm1874_vm9, 1, %v3334_v35 }
0x190d   :  { %2604 = vmatpush.msrb.mxu3 %v3316_v22 }
0x190f   :  { %2605 = vmatpush.msrb.mxu3 %v3317_v14 }
0x1911   :  { %2606 = vmatpush.msrb.mxu3 %v3318_v24 }
0x1913   :  { %2607 = vmatpush.msrb.mxu3 %v3319_v62 }
0x1915   :  { %2608 = vmatpush.msrb.mxu3 %v3320_v2 }
0x1917   :  { %2609 = vmatpush.msrb.mxu3 %v3321_v43 }
0x1919   :  { %2610 = vmatpush.msrb.mxu3 %v3322_v46 }
0x191b   :  { %2611 = vmatpush.msrb.mxu3 %v3323_v20 }
0x191d   :  { %2612 = vmatpush.msrb.mxu3 %v3324_v57 }
0x191f   :  { %2613 = vmatpush.msrb.mxu3 %v3325_v37 }
0x1921   :  { %2614 = vmatpush.msrb.mxu3 %v3326_v28  ;;  %v4714_v28 = vsel %vm1859_vm6, %v4584_v58, %v4581_v45  ;;  %v4729_v45 = vsel %vm1847_vm11, %v4606_v39, %v4603_v26 }
0x1923   :  { %2615 = vmatpush.msrb.mxu3 %v3327_v33 }
0x193b   :  { %v1878_v40 = vpop.permute.xlu0 %1877 }
0x193c   :  { %v1880_v52 = vsel %vm60_vm1, %v1875_v3, %v1878_v40 }
0x193d   :  { %3004 = vmatmul.msk.f32.vlgmr.msrb.gmra.mxu2 %vm1394_vm5, %v1880_v52 }
0x193e   :  { %2538 = vmatpush.msrb.mxu2 %v3328_v53  ;;  %v3002_v53 = vld [vmem:[%s5130_s1 + $0x6] sm:$0x3] }
0x1940   :  { %2539 = vmatpush.msrb.mxu2 %v3329_v44 }
0x1942   :  { %2540 = vmatpush.msrb.mxu2 %v3330_v8 }
0x1944   :  { %2541 = vmatpush.msrb.mxu2 %v4222_v18 }
0x1946   :  { %2542 = vmatpush.msrb.mxu2 %v4231_v25 }
0x1948   :  { %2543 = vmatpush.msrb.mxu2 %v4240_v48 }
0x194a   :  { %2544 = vmatpush.msrb.mxu2 %v4249_v50 }
0x194c   :  { %2545 = vmatpush.msrb.mxu2 %v4281_v31 }
0x194e   :  { %2546 = vmatpush.msrb.mxu2 %v4286_v5 }
0x1950   :  { %2547 = vmatpush.msrb.mxu2 %v4293_v32 }
0x1952   :  { %2548 = vmatpush.msrb.mxu2 %v4301_v60 }
0x1954   :  { %2549 = vmatpush.msrb.mxu2 %v4309_v61 }
0x198f   :  { %v1967_v9 = vpop.f32.mrf.mxu3 }
0x1990   :  { %v1968_v19 = vadd.f32 %v4363_v47, %v1967_v9 }
0x1992   :  { %3234 = vtanh.f32 %v1968_v19  ;;  %v3007_v31 = vmul.f32 -1.442695, %v1968_v19 }
0x1998   :  { %v3235_v18 = vpop.eup %3234 }
0x1999   :  { %1992 = vrot.lane.b32.xlu1 %v3235_v18, %s3333_s22 }
0x19c0   :  { %v1901_v25 = vpop.f32.mrf.mxu2 }
0x19c1   :  { %v1902_v48 = vadd.f32 %v4370_v42, %v1901_v25 }
0x19c3   :  { %3236 = vtanh.f32 %v1902_v48  ;;  %v3005_v61 = vmul.f32 -1.442695, %v1902_v48 }
0x19c4   :  { %3238 = vpow2.f32 %v3007_v31 }
0x19c9   :  { %v3237_v50 = vpop.eup %3236 }
0x19ca   :  { %1926 = vrot.lane.b32.xlu2 %v3237_v50, %s3333_s22  ;;  %v3239_v5 = vpop.eup %3238 }
0x19cb   :  { %v1973_v32 = vadd.f32 1.0, %v3239_v5 }
0x19cd   :  { %3240 = vrcp.f32 %v1973_v32  ;;  %v1985_v7 = vand.u32 2147483648, %v1973_v32  ;;  %vm1979_vm2 = vweird.f32 %v1973_v32  ;;  %v1983_v4 = vand.u32 2147483647, %v1973_v32 }
0x19ce   :  { %3242 = vpow2.f32 %v3005_v61  ;;  %v2039_v61 = vld [vmem:[#allocation2 + $0x8] sm:$0x3] }
0x19cf   :  { %v1986_v13 = vor.u32 1.1754944e-38, %v1985_v7  ;;  %vm1984_vm8 = vcmp.eq.f32.partialorder %v1983_v4, 8.507059e+37 }
0x19d3   :  { %v3241_v60 = vpop.eup %3240 }
0x19d4   :  { %v1975_v11 = vmul.f32 %v3241_v60, %v1973_v32  ;;  %v3243_v0 = vpop.eup %3242  ;;  %vm1980_vm3 = vweird.f32 %v3241_v60 }
0x19d5   :  { %v1907_v29 = vadd.f32 1.0, %v3243_v0  ;;  %vm1981_vm4 = vmor %vm1979_vm2, %vm1980_vm3  ;;  %vm1872_vm3 = vcmp.gt.f32.partialorder %v3002_v53, 0.5 }
0x19d6   :  { %v1976_v30 = vsub.f32 1.0, %v1975_v11  ;;  %v2007_v44 = vsel %vm1872_vm3, 1, %v3334_v35 }
0x19d7   :  { %3244 = vrcp.f32 %v1907_v29  ;;  %v1919_v62 = vand.u32 2147483648, %v1907_v29  ;;  %vm1913_vm15 = vweird.f32 %v1907_v29  ;;  %v1917_v2 = vand.u32 2147483647, %v1907_v29 }
0x19d8   :  { %v1977_v21 = vmul.f32 %v3241_v60, %v1976_v30 }
0x19d9   :  { %v1920_v46 = vor.u32 1.1754944e-38, %v1919_v62  ;;  %vm1918_vm13 = vcmp.eq.f32.partialorder %v1917_v2, 8.507059e+37  ;;  %v3009_v62 = vld [vmem:[%s5130_s1 + $0x6] sm:$0x3] }
0x19da   :  { %v1978_v34 = vadd.f32 %v3241_v60, %v1977_v21 }
0x19dc   :  { %v1982_v1 = vsel %vm1981_vm4, %v3241_v60, %v1978_v34 }
0x19dd   :  { %v1987_v12 = vsel %vm1984_vm8, %v1986_v13, %v1982_v1  ;;  %v3245_v36 = vpop.eup %3244 }
0x19de   :  { %v1909_v38 = vmul.f32 %v3245_v36, %v1907_v29  ;;  %vm1914_vm12 = vweird.f32 %v3245_v36  ;;  %v1990_v33 = vmul.f32 %v1987_v12, %v4714_v28 }
0x19df   :  { %vm1915_vm7 = vmor %vm1913_vm15, %vm1914_vm12  ;;  %vm2038_vm15 = vcmp.gt.f32.partialorder %v3009_v62, 0.5 }
0x19e0   :  { %v1910_v22 = vsub.f32 1.0, %v1909_v38  ;;  %v2182_v2 = vsel %vm2038_vm15, 1, %v3334_v35 }
0x19e2   :  { %v1911_v14 = vmul.f32 %v3245_v36, %v1910_v22 }
0x19e4   :  { %v1912_v24 = vadd.f32 %v3245_v36, %v1911_v14 }
0x19e6   :  { %v1916_v43 = vsel %vm1915_vm7, %v3245_v36, %v1912_v24 }
0x19e7   :  { %v1921_v57 = vsel %vm1918_vm13, %v1920_v46, %v1916_v43 }
0x19e8   :  { %v1924_v58 = vmul.f32 %v1921_v57, %v4729_v45 }
0x1a0b   :  { %v1993_v17 = vpop.permute.xlu1 %1992 }
0x1a0c   :  { %v1995_v27 = vmul.f32 %v1993_v17, %v1987_v12 }
0x1a0e   :  { %1997 = vrot.lane.b32.xlu0 %v1995_v27, %s3335_s23 }
0x1a16   :  { %2021 = vperm.xlu0 %3052, %v2019_v15  }
0x1a24   :  { %v1927_v20 = vpop.permute.xlu2 %1926 }
0x1a25   :  { %v1929_v37 = vmul.f32 %v1927_v20, %v1921_v57 }
0x1a27   :  { %1931 = vrot.lane.b32.xlu1 %v1929_v37, %s3335_s23 }
0x1a80   :  { %v1998_v3 = vpop.permute.xlu0 %1997 }
0x1a81   :  { %v4717_v40 = vadd.f32 %v1998_v3, %v1990_v33 }
0x1a83   :  { %3246 = vtanh.f32 %v4717_v40 }
0x1a88   :  { %v4736_v18 = vpop.permute.xlu0 %2021 }
0x1a89   :  { %v3247_v52 = vpop.eup %3246  ;;  %vm5137_vm2 = vcmp.eq.s32.totalorder %v4736_v18, 1 }
0x1a8a   :  { %2003 = vrot.lane.b32.xlu2 %v3247_v52, %s3333_s22 }
0x1a92   :  { %2009 = vperm.xlu2 %3050, %v2007_v44  }
0x1a99   :  { %v1932_v8 = vpop.permute.xlu1 %1931 }
0x1a9a   :  { %v4732_v9 = vadd.f32 %v1932_v8, %v1924_v58 }
0x1a9c   :  { %3248 = vtanh.f32 %v4732_v9 }
0x1aa2   :  { %v3249_v19 = vpop.eup %3248 }
0x1aa3   :  { %1937 = vrot.lane.b32.xlu1 %v3249_v19, %s3333_s22 }
0x1ae4   :  { %v2004_v25 = vpop.permute.xlu2 %2003 }
0x1ae5   :  { %v4738_v48 = vmul.f32 %v2004_v25, %v1987_v12 }
0x1ae7   :  { %v4745_v26 = vsel %vm5137_vm2, %v4738_v48, %v4621_v59  ;;  %v2105_v59 = vld [vmem:[#allocation2 + $0x6] sm:$0x3] }
0x1ae8   :  { %2107 = vrot.lane.b32.xlu0 %v4745_v26, %s3336_s10 }
0x1aec   :  { %v4749_v39 = vpop.permute.xlu2 %2009 }
0x1aed   :  { %vm2011_vm11 = vcmp.eq.s32.totalorder %v4749_v39, 1 }
0x1b15   :  { %v1938_v41 = vpop.permute.xlu1 %1937 }
0x1b16   :  { %v1940_v50 = vmul.f32 %v1938_v41, %v1921_v57 }
0x1b18   :  { %v4754_v31 = vsel %vm2011_vm11, %v1940_v50, 0.0  ;;  %v4759_v5 = vsel %vm2011_vm11, %v1940_v50, %v4637_v6  ;;  %v4781_v50 = vsel %vm5137_vm2, %v4717_v40, %v4714_v28  ;;  %v4796_v28 = vsel %vm2011_vm11, %v4732_v9, %v4729_v45 }
0x1b19   :  { %2041 = vrot.lane.b32.xlu1 %v4759_v5, %s3336_s10 }
0x1b5a   :  { %v2108_v32 = vpop.permute.xlu0 %2107 }
0x1b5b   :  { %v2110_v60 = vsel %vm60_vm1, %v2105_v59, %v2108_v32 }
0x1b5c   :  { %3012 = vmatmul.msk.f32.vlgmr.msra.gmra.mxu1 %vm1394_vm5, %v2110_v60 }
0x1b8b   :  { %v2042_v11 = vpop.permute.xlu1 %2041 }
0x1b8c   :  { %v2044_v30 = vsel %vm60_vm1, %v2039_v61, %v2042_v11  ;;  %v3008_v11 = vld [vmem:[%s5130_s1 + $0x8] sm:$0x3] }
0x1b8d   :  { %3010 = vmatmul.msk.f32.vlgmr.msra.gmra.mxu0 %vm1394_vm5, %v2044_v30 }
0x1bd9   :  { %v2131_v21 = vpop.f32.mrf.mxu1 }
0x1bda   :  { %v2132_v0 = vadd.f32 %v4363_v47, %v2131_v21 }
0x1bdc   :  { %3250 = vtanh.f32 %v2132_v0  ;;  %v3013_v7 = vmul.f32 -1.442695, %v2132_v0 }
0x1be2   :  { %v3251_v6 = vpop.eup %3250 }
0x1be3   :  { %2156 = vrot.lane.b32.xlu2 %v3251_v6, %s3333_s22 }
0x1c0a   :  { %v2065_v29 = vpop.f32.mrf.mxu0 }
0x1c0b   :  { %v2066_v34 = vadd.f32 %v4370_v42, %v2065_v29 }
0x1c0d   :  { %3252 = vtanh.f32 %v2066_v34  ;;  %v3011_v43 = vmul.f32 -1.442695, %v2066_v34 }
0x1c0e   :  { %3254 = vpow2.f32 %v3013_v7 }
0x1c13   :  { %v3253_v4 = vpop.eup %3252 }
0x1c14   :  { %2090 = vrot.lane.b32.xlu0 %v3253_v4, %s3333_s22  ;;  %v3255_v1 = vpop.eup %3254 }
0x1c15   :  { %v2137_v13 = vadd.f32 1.0, %v3255_v1 }
0x1c17   :  { %3256 = vrcp.f32 %v2137_v13  ;;  %v2149_v36 = vand.u32 2147483648, %v2137_v13  ;;  %vm2143_vm8 = vweird.f32 %v2137_v13  ;;  %v2147_v38 = vand.u32 2147483647, %v2137_v13 }
0x1c18   :  { %3258 = vpow2.f32 %v3011_v43 }
0x1c19   :  { %v2150_v15 = vor.u32 1.1754944e-38, %v2149_v36  ;;  %vm2148_vm12 = vcmp.eq.f32.partialorder %v2147_v38, 8.507059e+37 }
0x1c1d   :  { %v3257_v17 = vpop.eup %3256 }
0x1c1e   :  { %v2139_v12 = vmul.f32 %v3257_v17, %v2137_v13  ;;  %vm2144_vm4 = vweird.f32 %v3257_v17  ;;  %v3259_v46 = vpop.eup %3258 }
0x1c1f   :  { %vm2145_vm9 = vmor %vm2143_vm8, %vm2144_vm4  ;;  %v2071_v20 = vadd.f32 1.0, %v3259_v46  ;;  %vm2036_vm8 = vcmp.gt.f32.partialorder %v3008_v11, 0.5 }
0x1c20   :  { %v2140_v27 = vsub.f32 1.0, %v2139_v12  ;;  %v2171_v30 = vsel %vm2036_vm8, 1, %v3334_v35 }
0x1c21   :  { %3260 = vrcp.f32 %v2071_v20  ;;  %v2083_v53 = vand.u32 2147483648, %v2071_v20  ;;  %vm2077_vm13 = vweird.f32 %v2071_v20  ;;  %v2081_v44 = vand.u32 2147483647, %v2071_v20 }
0x1c22   :  { %v2141_v47 = vmul.f32 %v3257_v17, %v2140_v27  ;;  %v2201_v27 = vld [vmem:[#allocation2 + $0xa] sm:$0x3] }
0x1c23   :  { %v2084_v8 = vor.u32 1.1754944e-38, %v2083_v53  ;;  %vm2082_vm4 = vcmp.eq.f32.partialorder %v2081_v44, 8.507059e+37 }
0x1c24   :  { %v2142_v63 = vadd.f32 %v3257_v17, %v2141_v47 }
0x1c26   :  { %v2146_v42 = vsel %vm2145_vm9, %v3257_v17, %v2142_v63 }
0x1c27   :  { %v2151_v14 = vsel %vm2148_vm12, %v2150_v15, %v2146_v42  ;;  %v3261_v57 = vpop.eup %3260  ;;  %v4843_v15 = vld [vmem:[%s5132_s5] ss:$0 sm:$0xff] }
0x1c28   :  { %v2073_v37 = vmul.f32 %v3261_v57, %v2071_v20  ;;  %vm2078_vm7 = vweird.f32 %v3261_v57  ;;  %v2154_v59 = vmul.f32 %v2151_v14, %v4781_v50 }
0x1c29   :  { %vm2079_vm3 = vmor %vm2077_vm13, %vm2078_vm7 }
0x1c2a   :  { %v2074_v33 = vsub.f32 1.0, %v2073_v37 }
0x1c2c   :  { %v2075_v3 = vmul.f32 %v3261_v57, %v2074_v33 }
0x1c2e   :  { %v2076_v52 = vadd.f32 %v3261_v57, %v2075_v3 }
0x1c30   :  { %v2080_v58 = vsel %vm2079_vm3, %v3261_v57, %v2076_v52 }
0x1c31   :  { %v2085_v19 = vsel %vm2082_vm4, %v2084_v8, %v2080_v58 }
0x1c32   :  { %v2088_v40 = vmul.f32 %v2085_v19, %v4796_v28 }
0x1c3d   :  { %v2157_v22 = vpop.permute.xlu2 %2156 }
0x1c3e   :  { %v2159_v24 = vmul.f32 %v2157_v22, %v2151_v14 }
0x1c40   :  { %2161 = vrot.lane.b32.xlu1 %v2159_v24, %s3335_s23 }
0x1c48   :  { %2184 = vperm.xlu1 %3051, %v2182_v2  }
0x1c86   :  { %v2091_v25 = vpop.permute.xlu0 %2090 }
0x1c87   :  { %v2093_v41 = vmul.f32 %v2091_v25, %v2085_v19 }
0x1c89   :  { %2095 = vrot.lane.b32.xlu2 %v2093_v41, %s3335_s23 }
0x1cb2   :  { %v2162_v32 = vpop.permute.xlu1 %2161 }
0x1cb3   :  { %v4784_v60 = vadd.f32 %v2162_v32, %v2154_v59 }
0x1cb5   :  { %3262 = vtanh.f32 %v4784_v60 }
0x1cba   :  { %v4803_v29 = vpop.permute.xlu1 %2184 }
0x1cbb   :  { %v3263_v61 = vpop.eup %3262  ;;  %vm2186_vm9 = vcmp.eq.s32.totalorder %v4803_v29, 1 }
0x1cbc   :  { %2167 = vrot.lane.b32.xlu0 %v3263_v61, %s3333_s22 }
0x1cc4   :  { %2173 = vperm.xlu0 %3052, %v2171_v30  }
0x1ce3   :  { %v2096_v21 = vpop.permute.xlu2 %2095 }
0x1ce4   :  { %v4799_v0 = vadd.f32 %v2096_v21, %v2088_v40 }
0x1ce6   :  { %3264 = vtanh.f32 %v4799_v0 }
0x1cec   :  { %v3265_v6 = vpop.eup %3264 }
0x1ced   :  { %2101 = vrot.lane.b32.xlu2 %v3265_v6, %s3333_s22 }
0x1d2e   :  { %v2168_v34 = vpop.permute.xlu0 %2167 }
0x1d2f   :  { %v4805_v7 = vmul.f32 %v2168_v34, %v2151_v14 }
0x1d31   :  { %v4812_v45 = vsel %vm2186_vm9, %v4805_v7, %v4745_v26  ;;  %v2267_v26 = vld [vmem:[#allocation2 + $0x4] sm:$0x3] }
0x1d32   :  { %2269 = vrot.lane.b32.xlu1 %v4812_v45, %s3336_s10 }
0x1d36   :  { %v4816_v9 = vpop.permute.xlu0 %2173 }
0x1d37   :  { %vm2175_vm11 = vcmp.eq.s32.totalorder %v4816_v9, 1 }
0x1d47   :  { %v2102_v39 = vpop.permute.xlu2 %2101 }
0x1d48   :  { %v2104_v4 = vmul.f32 %v2102_v39, %v2085_v19 }
0x1d4a   :  { %v4821_v1 = vsel %vm2175_vm11, %v2104_v4, 0.0  ;;  %v4826_v13 = vsel %vm2175_vm11, %v2104_v4, %v4759_v5  ;;  %v4837_v5 = vld [vmem:[%s5132_s5 + $0x1] ss:$0 sm:$0xff] }
0x1d4b   :  { %2203 = vrot.lane.b32.xlu2 %v4826_v13, %s3336_s10 }
0x1da4   :  { %v2270_v17 = vpop.permute.xlu1 %2269 }
0x1da5   :  { %v2272_v12 = vsel %vm60_vm1, %v2267_v26, %v2270_v17  ;;  %v2204_v47 = vpop.permute.xlu2 %2203 }
0x1da6   :  { %v2206_v63 = vsel %vm60_vm1, %v2201_v27, %v2204_v47  ;;  %3018 = vmatmul.msk.f32.vlgmr.msra.gmra.mxu3 %vm1394_vm5, %v2272_v12  ;;  %v3015_v12 = vld [vmem:[%s5130_s1 + $0x4] sm:$0x3]  ;;  %v4858_v47 = vsel %vm2186_vm9, %v4784_v60, %v4781_v50  ;;  %v4873_v50 = vsel %vm2175_vm11, %v4799_v0, %v4796_v28 }
0x1da7   :  { %3016 = vmatmul.msk.f32.vlgmr.msra.gmra.mxu2 %vm1394_vm5, %v2206_v63 }
0x1e29   :  { %v2293_v36 = vpop.f32.mrf.mxu3 }
0x1e2a   :  { %v2294_v38 = vadd.f32 %v4837_v5, %v2293_v36  ;;  %v2227_v42 = vpop.f32.mrf.mxu2 }
0x1e2b   :  { %v2228_v22 = vadd.f32 %v4843_v15, %v2227_v42 }
0x1e2c   :  { %3266 = vtanh.f32 %v2294_v38  ;;  %v3019_v62 = vmul.f32 -1.442695, %v2294_v38 }
0x1e2d   :  { %3268 = vtanh.f32 %v2228_v22  ;;  %v3017_v2 = vmul.f32 -1.442695, %v2228_v22  ;;  %v3014_v22 = vld [vmem:[%s5130_s1 + $0xa] sm:$0x3] }
0x1e2e   :  { %3270 = vpow2.f32 %v3019_v62 }
0x1e2f   :  { %3272 = vpow2.f32 %v3017_v2 }
0x1e32   :  { %v3267_v14 = vpop.eup %3266 }
0x1e33   :  { %v3269_v24 = vpop.eup %3268  ;;  %2318 = vrot.lane.b32.xlu0 %v3267_v14, %s3333_s22 }
0x1e34   :  { %2252 = vrot.lane.b32.xlu1 %v3269_v24, %s3333_s22  ;;  %v3271_v43 = vpop.eup %3270 }
0x1e35   :  { %v3273_v46 = vpop.eup %3272  ;;  %v2299_v20 = vadd.f32 1.0, %v3271_v43 }
0x1e36   :  { %v2233_v57 = vadd.f32 1.0, %v3273_v46 }
0x1e37   :  { %3274 = vrcp.f32 %v2299_v20  ;;  %v2311_v25 = vand.u32 2147483648, %v2299_v20  ;;  %vm2305_vm7 = vweird.f32 %v2299_v20  ;;  %v2309_v59 = vand.u32 2147483647, %v2299_v20 }
0x1e38   :  { %3276 = vrcp.f32 %v2233_v57  ;;  %v2245_v32 = vand.u32 2147483648, %v2233_v57  ;;  %vm2239_vm3 = vweird.f32 %v2233_v57  ;;  %v2243_v61 = vand.u32 2147483647, %v2233_v57 }
0x1e39   :  { %v2312_v30 = vor.u32 1.1754944e-38, %v2311_v25  ;;  %vm2310_vm8 = vcmp.eq.f32.partialorder %v2309_v59, 8.507059e+37 }
0x1e3a   :  { %v2246_v21 = vor.u32 1.1754944e-38, %v2245_v32  ;;  %vm2244_vm2 = vcmp.eq.f32.partialorder %v2243_v61, 8.507059e+37 }
0x1e3d   :  { %v3275_v37 = vpop.eup %3274 }
0x1e3e   :  { %v3277_v33 = vpop.eup %3276  ;;  %v2301_v3 = vmul.f32 %v3275_v37, %v2299_v20  ;;  %vm2306_vm12 = vweird.f32 %v3275_v37 }
0x1e3f   :  { %v2235_v52 = vmul.f32 %v3277_v33, %v2233_v57  ;;  %vm2240_vm15 = vweird.f32 %v3277_v33  ;;  %vm2307_vm13 = vmor %vm2305_vm7, %vm2306_vm12  ;;  %vm2200_vm12 = vcmp.gt.f32.partialorder %v3015_v12, 0.5 }
0x1e40   :  { %v2302_v53 = vsub.f32 1.0, %v2301_v3  ;;  %vm2241_vm4 = vmor %vm2239_vm3, %vm2240_vm15  ;;  %v2344_v27 = vsel %vm2200_vm12, 1, %v3334_v35 }
0x1e41   :  { %v2236_v44 = vsub.f32 1.0, %v2235_v52 }
0x1e42   :  { %v2303_v58 = vmul.f32 %v3275_v37, %v2302_v53  ;;  %v2363_v53 = vld [vmem:[#allocation2 + $0xc] sm:$0x3] }
0x1e43   :  { %v2237_v8 = vmul.f32 %v3277_v33, %v2236_v44 }
0x1e44   :  { %v2304_v19 = vadd.f32 %v3275_v37, %v2303_v58 }
0x1e45   :  { %v2238_v41 = vadd.f32 %v3277_v33, %v2237_v8 }
0x1e46   :  { %v2308_v11 = vsel %vm2307_vm13, %v3275_v37, %v2304_v19 }
0x1e47   :  { %v2242_v40 = vsel %vm2241_vm4, %v3277_v33, %v2238_v41  ;;  %v2313_v6 = vsel %vm2310_vm8, %v2312_v30, %v2308_v11 }
0x1e48   :  { %v2247_v26 = vsel %vm2244_vm2, %v2246_v21, %v2242_v40  ;;  %v2316_v63 = vmul.f32 %v2313_v6, %v4858_v47  ;;  %vm2198_vm2 = vcmp.gt.f32.partialorder %v3014_v22, 0.5 }
0x1e49   :  { %v2333_v14 = vsel %vm2198_vm2, 1, %v3334_v35  ;;  %v2250_v60 = vmul.f32 %v2247_v26, %v4873_v50 }
0x1ea5   :  { %v2319_v34 = vpop.permute.xlu0 %2318 }
0x1ea6   :  { %v2321_v39 = vmul.f32 %v2319_v34, %v2313_v6  ;;  %v2253_v4 = vpop.permute.xlu1 %2252 }
0x1ea7   :  { %v2255_v17 = vmul.f32 %v2253_v4, %v2247_v26 }
0x1ea8   :  { %2323 = vrot.lane.b32.xlu2 %v2321_v39, %s3335_s23 }
0x1ea9   :  { %2257 = vrot.lane.b32.xlu0 %v2255_v17, %s3335_s23 }
0x1eb0   :  { %2346 = vperm.xlu2 %3050, %v2344_v27  }
0x1f02   :  { %v2324_v36 = vpop.permute.xlu2 %2323 }
0x1f03   :  { %v4861_v38 = vadd.f32 %v2324_v36, %v2316_v63 }
0x1f05   :  { %3278 = vtanh.f32 %v4861_v38 }
0x1f0a   :  { %v4880_v43 = vpop.permute.xlu2 %2346 }
0x1f0b   :  { %v3279_v42 = vpop.eup %3278  ;;  %vm2348_vm15 = vcmp.eq.s32.totalorder %v4880_v43, 1 }
0x1f0c   :  { %2329 = vrot.lane.b32.xlu1 %v3279_v42, %s3333_s22 }
0x1f14   :  { %2335 = vperm.xlu1 %3051, %v2333_v14   ;;  %v3021_v14 = vld [vmem:[%s5130_s1 + $0x2] sm:$0x3] }
0x1f15   :  { %vm2362_vm8 = vcmp.gt.f32.partialorder %v3021_v14, 0.5 }
0x1f1b   :  { %v2258_v24 = vpop.permute.xlu0 %2257 }
0x1f1c   :  { %v4876_v62 = vadd.f32 %v2258_v24, %v2250_v60 }
0x1f1e   :  { %3280 = vtanh.f32 %v4876_v62 }
0x1f24   :  { %v3281_v2 = vpop.eup %3280 }
0x1f25   :  { %2263 = vrot.lane.b32.xlu0 %v3281_v2, %s3333_s22  ;;  %v2506_v2 = vsel %vm2362_vm8, 1, %v3334_v35 }
0x1f7e   :  { %v2330_v46 = vpop.permute.xlu1 %2329 }
0x1f7f   :  { %v4882_v20 = vmul.f32 %v2330_v46, %v2313_v6 }
0x1f81   :  { %v4889_v28 = vsel %vm2348_vm15, %v4882_v20, %v4812_v45  ;;  %v2429_v45 = vld [vmem:[#allocation2 + $0x2] sm:$0x3] }
0x1f82   :  { %2431 = vrot.lane.b32.xlu2 %v4889_v28, %s3336_s10 }
0x1f86   :  { %v4893_v0 = vpop.permute.xlu1 %2335 }
0x1f87   :  { %vm2337_vm11 = vcmp.eq.s32.totalorder %v4893_v0, 1 }
0x1f97   :  { %v2264_v9 = vpop.permute.xlu0 %2263 }
0x1f98   :  { %v2266_v57 = vmul.f32 %v2264_v9, %v2247_v26 }
0x1f9a   :  { %v4898_v37 = vsel %vm2337_vm11, %v2266_v57, 0.0  ;;  %v4903_v33 = vsel %vm2337_vm11, %v2266_v57, %v4826_v13 }
0x1f9b   :  { %2365 = vrot.lane.b32.xlu0 %v4903_v33, %s3336_s10 }
0x1fdc   :  { %v2432_v3 = vpop.permute.xlu2 %2431 }
0x1fdd   :  { %v2434_v52 = vsel %vm60_vm1, %v2429_v45, %v2432_v3 }
0x1fde   :  { %3024 = vmatmul.msk.f32.vlgmr.msrb.gmra.mxu1 %vm1394_vm5, %v2434_v52 }
0x200d   :  { %v2366_v44 = vpop.permute.xlu0 %2365 }
0x200e   :  { %v2368_v58 = vsel %vm60_vm1, %v2363_v53, %v2366_v44 }
0x200f   :  { %3022 = vmatmul.msk.f32.vlgmr.msrb.gmra.mxu0 %vm1394_vm5, %v2368_v58 }
0x205b   :  { %v2455_v8 = vpop.f32.mrf.mxu1 }
0x205c   :  { %v2456_v19 = vadd.f32 %v4837_v5, %v2455_v8 }
0x205e   :  { %3282 = vtanh.f32 %v2456_v19  ;;  %v3025_v32 = vmul.f32 -1.442695, %v2456_v19  ;;  %v4925_v19 = vsel %vm2348_vm15, %v4861_v38, %v4858_v47  ;;  %v4940_v47 = vsel %vm2337_vm11, %v4876_v62, %v4873_v50 }
0x2064   :  { %v3283_v13 = vpop.eup %3282 }
0x2065   :  { %2480 = vrot.lane.b32.xlu1 %v3283_v13, %s3333_s22 }
0x208c   :  { %v2389_v25 = vpop.f32.mrf.mxu0 }
0x208d   :  { %v2390_v41 = vadd.f32 %v4843_v15, %v2389_v25 }
0x208f   :  { %3284 = vtanh.f32 %v2390_v41  ;;  %v3023_v40 = vmul.f32 -1.442695, %v2390_v41 }
0x2090   :  { %3286 = vpow2.f32 %v3025_v32  ;;  %v3020_v32 = vld [vmem:[%s5130_s1 + $0xc] sm:$0x3] }
0x2095   :  { %v3285_v59 = vpop.eup %3284 }
0x2096   :  { %2414 = vrot.lane.b32.xlu2 %v3285_v59, %s3333_s22  ;;  %v3287_v61 = vpop.eup %3286 }
0x2097   :  { %v2461_v11 = vadd.f32 1.0, %v3287_v61 }
0x2099   :  { %3288 = vrcp.f32 %v2461_v11  ;;  %v2473_v17 = vand.u32 2147483648, %v2461_v11  ;;  %vm2467_vm13 = vweird.f32 %v2461_v11  ;;  %v2471_v12 = vand.u32 2147483647, %v2461_v11 }
0x209a   :  { %3290 = vpow2.f32 %v3023_v40 }
0x209b   :  { %v2474_v63 = vor.u32 1.1754944e-38, %v2473_v17  ;;  %vm2472_vm4 = vcmp.eq.f32.partialorder %v2471_v12, 8.507059e+37  ;;  %v2591_v17 = vld [vmem:[#allocation2] sm:$0x3] }
0x209f   :  { %v3289_v30 = vpop.eup %3288 }
0x20a0   :  { %v2463_v21 = vmul.f32 %v3289_v30, %v2461_v11  ;;  %v3291_v39 = vpop.eup %3290  ;;  %vm2468_vm7 = vweird.f32 %v3289_v30 }
0x20a1   :  { %v2395_v4 = vadd.f32 1.0, %v3291_v39  ;;  %vm2469_vm3 = vmor %vm2467_vm13, %vm2468_vm7 }
0x20a2   :  { %v2464_v6 = vsub.f32 1.0, %v2463_v21 }
0x20a3   :  { %3292 = vrcp.f32 %v2395_v4  ;;  %v2407_v45 = vand.u32 2147483648, %v2395_v4  ;;  %vm2401_vm2 = vweird.f32 %v2395_v4  ;;  %v2405_v3 = vand.u32 2147483647, %v2395_v4 }
0x20a4   :  { %v2465_v34 = vmul.f32 %v3289_v30, %v2464_v6 }
0x20a5   :  { %v2408_v53 = vor.u32 1.1754944e-38, %v2407_v45  ;;  %vm2406_vm13 = vcmp.eq.f32.partialorder %v2405_v3, 8.507059e+37 }
0x20a6   :  { %v2466_v26 = vadd.f32 %v3289_v30, %v2465_v34 }
0x20a8   :  { %v2470_v27 = vsel %vm2469_vm3, %v3289_v30, %v2466_v26  ;;  %vm2360_vm3 = vcmp.gt.f32.partialorder %v3020_v32, 0.5 }
0x20a9   :  { %v2475_v42 = vsel %vm2472_vm4, %v2474_v63, %v2470_v27  ;;  %v3293_v60 = vpop.eup %3292  ;;  %v2495_v61 = vsel %vm2360_vm3, 1, %v3334_v35  ;;  %v2525_v27 = vld [vmem:[#allocation2 + $0xe] sm:$0x3] }
0x20aa   :  { %v2397_v24 = vmul.f32 %v3293_v60, %v2395_v4  ;;  %vm2402_vm12 = vweird.f32 %v3293_v60  ;;  %v2478_v13 = vmul.f32 %v2475_v42, %v4925_v19 }
0x20ab   :  { %vm2403_vm7 = vmor %vm2401_vm2, %vm2402_vm12 }
0x20ac   :  { %v2398_v46 = vsub.f32 1.0, %v2397_v24 }
0x20ae   :  { %v2399_v9 = vmul.f32 %v3293_v60, %v2398_v46 }
0x20b0   :  { %v2400_v57 = vadd.f32 %v3293_v60, %v2399_v9 }
0x20b2   :  { %v2404_v52 = vsel %vm2403_vm7, %v3293_v60, %v2400_v57 }
0x20b3   :  { %v2409_v58 = vsel %vm2406_vm13, %v2408_v53, %v2404_v52 }
0x20b4   :  { %v2412_v38 = vmul.f32 %v2409_v58, %v4940_v47 }
0x20d7   :  { %v2481_v36 = vpop.permute.xlu1 %2480 }
0x20d8   :  { %v2483_v22 = vmul.f32 %v2481_v36, %v2475_v42 }
0x20da   :  { %2485 = vrot.lane.b32.xlu0 %v2483_v22, %s3335_s23 }
0x20e2   :  { %2508 = vperm.xlu0 %3052, %v2506_v2  }
0x20f0   :  { %v2415_v44 = vpop.permute.xlu2 %2414 }
0x20f1   :  { %v2417_v8 = vmul.f32 %v2415_v44, %v2409_v58 }
0x20f3   :  { %2419 = vrot.lane.b32.xlu1 %v2417_v8, %s3335_s23 }
0x214c   :  { %v2486_v25 = vpop.permute.xlu0 %2485 }
0x214d   :  { %v4928_v41 = vadd.f32 %v2486_v25, %v2478_v13 }
0x214f   :  { %3294 = vtanh.f32 %v4928_v41 }
0x2154   :  { %v4947_v21 = vpop.permute.xlu0 %2508 }
0x2155   :  { %v3295_v59 = vpop.eup %3294  ;;  %vm2510_vm4 = vcmp.eq.s32.totalorder %v4947_v21, 1  ;;  %v3026_v21 = vld [vmem:[%s5130_s1 + $0xe] sm:$0x3] }
0x2156   :  { %2491 = vrot.lane.b32.xlu2 %v3295_v59, %s3333_s22  ;;  %v2523_v59 = vld [vmem:[%s5130_s1] sm:$0x3] }
0x2157   :  { %vm2524_vm7 = vcmp.gt.f32.partialorder %v2523_v59, 0.5  ;;  %v3057_v59 = vld [vmem:[%s5134_s7] ss:$0 sm:$0xff] }
0x2158   :  { %v2668_v32 = vsel %vm2524_vm7, 1, %v3334_v35 }
0x215e   :  { %2497 = vperm.xlu2 %3050, %v2495_v61   ;;  %v2349_v61 = vsel %vm2348_vm15, %v4882_v20, 0.0 }
0x2165   :  { %v2420_v11 = vpop.permute.xlu1 %2419 }
0x2166   :  { %v4943_v30 = vadd.f32 %v2420_v11, %v2412_v38 }
0x2168   :  { %3296 = vtanh.f32 %v4943_v30 }
0x216e   :  { %v3297_v40 = vpop.eup %3296 }
0x216f   :  { %2425 = vrot.lane.b32.xlu1 %v3297_v40, %s3333_s22 }
0x21b0   :  { %v2492_v6 = vpop.permute.xlu2 %2491 }
0x21b1   :  { %v2494_v34 = vmul.f32 %v2492_v6, %v2475_v42 }
0x21b3   :  { %v2519_v50 = vsel %vm2510_vm4, %v2494_v34, %v4889_v28  ;;  %v2511_v11 = vsel %vm2510_vm4, %v2494_v34, 0.0 }
0x21b4   :  { %2593 = vrot.lane.b32.xlu0 %v2519_v50, %s3336_s10  ;;  %v1696_v50 = vsel %vm1695_vm10, %v4505_v51, 0.0 }
0x21b8   :  { %v4954_v62 = vpop.permute.xlu2 %2497 }
0x21b9   :  { %vm2499_vm11 = vcmp.eq.s32.totalorder %v4954_v62, 1 }
0x21ba   :  { %v2518_v29 = vsel %vm2499_vm11, %v4943_v30, %v4940_v47 }
0x21e1   :  { %v2426_v0 = vpop.permute.xlu1 %2425 }
0x21e2   :  { %v2428_v39 = vmul.f32 %v2426_v0, %v2409_v58 }
0x21e4   :  { %v4959_v4 = vsel %vm2499_vm11, %v2428_v39, 0.0  ;;  %v2517_v26 = vsel %vm2499_vm11, %v2428_v39, %v4903_v33 }
0x21e5   :  { %2527 = vrot.lane.b32.xlu1 %v2517_v26, %s3336_s10 }
0x2226   :  { %v2594_v28 = vpop.permute.xlu0 %2593 }
0x2227   :  { %v2596_v12 = vsel %vm60_vm1, %v2591_v17, %v2594_v28 }
0x2228   :  { %3029 = vmatmul.msk.f32.vlgmr.msrb.gmra.mxu3 %vm1394_vm5, %v2596_v12  ;;  %v2685_v12 = vld [vmem:[%s5133_s6 + $0x30] sm:$0xff] }
0x2257   :  { %v2528_v63 = vpop.permute.xlu1 %2527 }
0x2258   :  { %v2530_v36 = vsel %vm60_vm1, %v2525_v27, %v2528_v63  ;;  %v2684_v27 = vld [vmem:[%s5133_s6 + $0x28] sm:$0xff]  ;;  %v2683_v63 = vld [vmem:[%s5133_s6 + $0x20] sm:$0xff] }
0x2259   :  { %3027 = vmatmul.msk.f32.vlgmr.msrb.gmra.mxu2 %vm1394_vm5, %v2530_v36  ;;  %v2682_v36 = vld [vmem:[%s5133_s6 + $0x18] sm:$0xff] }
0x22ab   :  { %v2617_v42 = vpop.f32.mrf.mxu3 }
0x22ac   :  { %v2618_v22 = vadd.f32 %v4837_v5, %v2617_v42  ;;  %v2681_v42 = vld [vmem:[%s5133_s6 + $0x10] sm:$0xff] }
0x22ae   :  { %3298 = vtanh.f32 %v2618_v22  ;;  %v3030_v24 = vmul.f32 -1.442695, %v2618_v22  ;;  %v2680_v22 = vld [vmem:[%s5133_s6 + $0x8] sm:$0xff] }
0x22b4   :  { %v3299_v14 = vpop.eup %3298 }
0x22b5   :  { %2642 = vrot.lane.b32.xlu2 %v3299_v14, %s3333_s22  ;;  %v2679_v14 = vld [vmem:[%s5133_s6] sm:$0xff] }
0x22dc   :  { %v2551_v33 = vpop.f32.mrf.mxu2 }
0x22dd   :  { %v2552_v60 = vadd.f32 %v4843_v15, %v2551_v33  ;;  %v2520_v33 = vsel %vm2510_vm4, %v4928_v41, %v4925_v19  ;;  %vm5139_vm4 = vcmp.eq.s32.totalorder %v4736_v18, 1 }
0x22df   :  { %3300 = vtanh.f32 %v2552_v60  ;;  %v3028_v38 = vmul.f32 -1.442695, %v2552_v60 }
0x22e0   :  { %3302 = vpow2.f32 %v3030_v24 }
0x22e5   :  { %v3301_v2 = vpop.eup %3300 }
0x22e6   :  { %2576 = vrot.lane.b32.xlu0 %v3301_v2, %s3333_s22  ;;  %v3303_v46 = vpop.eup %3302 }
0x22e7   :  { %v2623_v9 = vadd.f32 1.0, %v3303_v46 }
0x22e9   :  { %3304 = vrcp.f32 %v2623_v9  ;;  %v2635_v53 = vand.u32 2147483648, %v2623_v9  ;;  %vm2629_vm8 = vweird.f32 %v2623_v9  ;;  %v2633_v44 = vand.u32 2147483647, %v2623_v9 }
0x22ea   :  { %3306 = vpow2.f32 %v3028_v38 }
0x22eb   :  { %v2636_v58 = vor.u32 1.1754944e-38, %v2635_v53  ;;  %vm2634_vm2 = vcmp.eq.f32.partialorder %v2633_v44, 8.507059e+37 }
0x22ef   :  { %v3305_v57 = vpop.eup %3304 }
0x22f0   :  { %v2625_v45 = vmul.f32 %v3305_v57, %v2623_v9  ;;  %vm2630_vm5 = vweird.f32 %v3305_v57  ;;  %v3307_v40 = vpop.eup %3306 }
0x22f1   :  { %vm2631_vm12 = vmor %vm2629_vm8, %vm2630_vm5  ;;  %v2557_v6 = vadd.f32 1.0, %v3307_v40  ;;  %vm2715_vm5 = vcmask 33792  }
0x22f2   :  { %v2626_v3 = vsub.f32 1.0, %v2625_v45  ;;  %v2187_v45 = vsel %vm2186_vm9, %v4805_v7, 0.0 }
0x22f3   :  { %3308 = vrcp.f32 %v2557_v6  ;;  %v2569_v23 = vand.u32 2147483648, %v2557_v6  ;;  %vm2563_vm10 = vweird.f32 %v2557_v6  ;;  %v2567_v51 = vand.u32 2147483647, %v2557_v6 }
0x22f4   :  { %v2627_v5 = vmul.f32 %v3305_v57, %v2626_v3 }
0x22f5   :  { %v2570_v17 = vor.u32 1.1754944e-38, %v2569_v23  ;;  %vm2568_vm3 = vcmp.eq.f32.partialorder %v2567_v51, 8.507059e+37 }
0x22f6   :  { %v2628_v52 = vadd.f32 %v3305_v57, %v2627_v5 }
0x22f8   :  { %v2632_v15 = vsel %vm2631_vm12, %v3305_v57, %v2628_v52 }
0x22f9   :  { %v4973_v13 = vsel %vm2634_vm2, %v2636_v58, %v2632_v15  ;;  %v3309_v43 = vpop.eup %3308  ;;  %v2024_v58 = vsel %vm5139_vm4, %v4738_v48, 0.0 }
0x22fa   :  { %v2559_v20 = vmul.f32 %v3309_v43, %v2557_v6  ;;  %vm2564_vm15 = vweird.f32 %v3309_v43  ;;  %v2640_v60 = vmul.f32 %v4973_v13, %v2520_v33 }
0x22fb   :  { %vm2565_vm13 = vmor %vm2563_vm10, %vm2564_vm15 }
0x22fc   :  { %v2560_v34 = vsub.f32 1.0, %v2559_v20 }
0x22fe   :  { %v2561_v0 = vmul.f32 %v3309_v43, %v2560_v34 }
0x2300   :  { %v2562_v39 = vadd.f32 %v3309_v43, %v2561_v0 }
0x2302   :  { %v2566_v26 = vsel %vm2565_vm13, %v3309_v43, %v2562_v39 }
0x2303   :  { %v5000_v10 = vsel %vm2568_vm3, %v2570_v17, %v2566_v26 }
0x2304   :  { %v2574_v52 = vmul.f32 %v5000_v10, %v2518_v29 }
0x230f   :  { %v2643_v8 = vpop.permute.xlu2 %2642 }
0x2310   :  { %v2645_v25 = vmul.f32 %v2643_v8, %v4973_v13 }
0x2312   :  { %2647 = vrot.lane.b32.xlu1 %v2645_v25, %s3335_s23 }
0x231a   :  { %2670 = vperm.xlu1 %3051, %v2668_v32  }
0x2322   :  { %1850 = vrot.lane.b32.xlu1 %v4632_v55, %s3335_s23  ;;  %v1860_v55 = vsel %vm1859_vm6, %v4614_v56, 0.0  ;;  %vm2522_vm6 = vcmp.gt.f32.partialorder %v3026_v21, 0.5 }
0x2323   :  { %v2657_v46 = vsel %vm2522_vm6, 1, %v3334_v35 }
0x232a   :  { %2351 = vrot.lane.b32.xlu1 %v2349_v61, %s3333_s22 }
0x2332   :  { %2513 = vrot.lane.b32.xlu1 %v2511_v11, %s3333_s22 }
0x233a   :  { %1698 = vrot.lane.b32.xlu1 %v1696_v50, %s3333_s22 }
0x2342   :  { %1862 = vrot.lane.b32.xlu1 %v1860_v55, %s3333_s22 }
0x234a   :  { %2340 = vrot.lane.b32.xlu1 %v4898_v37, %s3335_s23  ;;  %v2686_v37 = vld [vmem:[%s5133_s6 + $0x38] sm:$0xff] }
0x234b   :  { %2755 = vmatpush.msra.mxu2 %v2686_v37  ;;  %2729 = vmatpush.msra.mxu1 %v2686_v37 }
0x234c   :  { %2781 = vmatpush.msra.mxu3 %v2686_v37  ;;  %2703 = vmatpush.msra.mxu0 %v2686_v37 }
0x234d   :  { %2756 = vmatpush.msra.mxu2 %v2685_v12  ;;  %2730 = vmatpush.msra.mxu1 %v2685_v12 }
0x234e   :  { %2782 = vmatpush.msra.mxu3 %v2685_v12  ;;  %2704 = vmatpush.msra.mxu0 %v2685_v12 }
0x234f   :  { %2757 = vmatpush.msra.mxu2 %v2684_v27  ;;  %2731 = vmatpush.msra.mxu1 %v2684_v27 }
0x2350   :  { %2783 = vmatpush.msra.mxu3 %v2684_v27  ;;  %2705 = vmatpush.msra.mxu0 %v2684_v27 }
0x2351   :  { %2758 = vmatpush.msra.mxu2 %v2683_v63  ;;  %2732 = vmatpush.msra.mxu1 %v2683_v63 }
0x2352   :  { %2784 = vmatpush.msra.mxu3 %v2683_v63  ;;  %2706 = vmatpush.msra.mxu0 %v2683_v63 }
0x2353   :  { %2759 = vmatpush.msra.mxu2 %v2682_v36  ;;  %2733 = vmatpush.msra.mxu1 %v2682_v36 }
0x2354   :  { %2785 = vmatpush.msra.mxu3 %v2682_v36  ;;  %2707 = vmatpush.msra.mxu0 %v2682_v36 }
0x2355   :  { %2760 = vmatpush.msra.mxu2 %v2681_v42  ;;  %2734 = vmatpush.msra.mxu1 %v2681_v42 }
0x2356   :  { %2786 = vmatpush.msra.mxu3 %v2681_v42  ;;  %2708 = vmatpush.msra.mxu0 %v2681_v42 }
0x2357   :  { %2761 = vmatpush.msra.mxu2 %v2680_v22  ;;  %2735 = vmatpush.msra.mxu1 %v2680_v22 }
0x2358   :  { %v2577_v56 = vpop.permute.xlu0 %2576  ;;  %2787 = vmatpush.msra.mxu3 %v2680_v22  ;;  %2709 = vmatpush.msra.mxu0 %v2680_v22 }
0x2359   :  { %v2579_v28 = vmul.f32 %v2577_v56, %v5000_v10  ;;  %2762 = vmatpush.msra.mxu2 %v2679_v14  ;;  %2736 = vmatpush.msra.mxu1 %v2679_v14 }
0x235a   :  { %2788 = vmatpush.msra.mxu3 %v2679_v14  ;;  %2710 = vmatpush.msra.mxu0 %v2679_v14 }
0x235b   :  { %2581 = vrot.lane.b32.xlu2 %v2579_v28, %s3335_s23  ;;  %2833 = vmatpush.msrb.mxu1 %v2686_v37 }
0x235c   :  { %2859 = vmatpush.msrb.mxu2 %v2686_v37  ;;  %2885 = vmatpush.msrb.mxu3 %v2686_v37 }
0x235d   :  { %2834 = vmatpush.msrb.mxu1 %v2685_v12  ;;  %2807 = vmatpush.msrb.mxu0 %v2686_v37 }
0x235e   :  { %2860 = vmatpush.msrb.mxu2 %v2685_v12  ;;  %2886 = vmatpush.msrb.mxu3 %v2685_v12 }
0x235f   :  { %2835 = vmatpush.msrb.mxu1 %v2684_v27  ;;  %2808 = vmatpush.msrb.mxu0 %v2685_v12 }
0x2360   :  { %2861 = vmatpush.msrb.mxu2 %v2684_v27  ;;  %2887 = vmatpush.msrb.mxu3 %v2684_v27 }
0x2361   :  { %2836 = vmatpush.msrb.mxu1 %v2683_v63  ;;  %2809 = vmatpush.msrb.mxu0 %v2684_v27 }
0x2362   :  { %2862 = vmatpush.msrb.mxu2 %v2683_v63  ;;  %2888 = vmatpush.msrb.mxu3 %v2683_v63 }
0x2363   :  { %2837 = vmatpush.msrb.mxu1 %v2682_v36  ;;  %2810 = vmatpush.msrb.mxu0 %v2683_v63 }
0x2364   :  { %2863 = vmatpush.msrb.mxu2 %v2682_v36  ;;  %2889 = vmatpush.msrb.mxu3 %v2682_v36 }
0x2365   :  { %2838 = vmatpush.msrb.mxu1 %v2681_v42  ;;  %2811 = vmatpush.msrb.mxu0 %v2682_v36 }
0x2366   :  { %2864 = vmatpush.msrb.mxu2 %v2681_v42  ;;  %2890 = vmatpush.msrb.mxu3 %v2681_v42 }
0x2367   :  { %2839 = vmatpush.msrb.mxu1 %v2680_v22  ;;  %2812 = vmatpush.msrb.mxu0 %v2681_v42 }
0x2368   :  { %2865 = vmatpush.msrb.mxu2 %v2680_v22  ;;  %2891 = vmatpush.msrb.mxu3 %v2680_v22 }
0x2369   :  { %2840 = vmatpush.msrb.mxu1 %v2679_v14  ;;  %2813 = vmatpush.msrb.mxu0 %v2680_v22 }
0x236a   :  { %2866 = vmatpush.msrb.mxu2 %v2679_v14  ;;  %2892 = vmatpush.msrb.mxu3 %v2679_v14 }
0x236b   :  { %2814 = vmatpush.msrb.mxu0 %v2679_v14 }
0x2384   :  { %v2648_v24 = vpop.permute.xlu1 %2647 }
0x2385   :  { %v2650_v2 = vadd.f32 %v2648_v24, %v2640_v60 }
0x2387   :  { %3310 = vtanh.f32 %v2650_v2 }
0x238c   :  { %v2671_v19 = vpop.permute.xlu1 %2670 }
0x238d   :  { %v3311_v41 = vpop.eup %3310  ;;  %vm2672_vm9 = vcmp.eq.s32.totalorder %v2671_v19, 1 }
0x238e   :  { %2653 = vrot.lane.b32.xlu0 %v3311_v41, %s3333_s22 }
0x2394   :  { %v1851_v9 = vpop.permute.xlu1 %1850 }
0x2395   :  { %1854 = vst.msk [vmem:[#allocation3 + $0x4] sm:$0x3] %vm197_vm0, %v1851_v9 }
0x2396   :  { %2659 = vperm.xlu0 %3052, %v2657_v46  }
0x239c   :  { %v2352_v57 = vpop.permute.xlu1 %2351 }
0x239d   :  { %2354 = vst.msk [vmem:[#allocation3 + $0x4] sm:$0x3] %vm210_vm14, %v2352_v57 }
0x239e   :  { %2189 = vrot.lane.b32.xlu0 %v2187_v45, %s3333_s22 }
0x23a4   :  { %v2514_v35 = vpop.permute.xlu1 %2513  ;;  %v2743_v3 = vld [vmem:[#allocation3 + $0x4] sm:$0x3] }
0x23a5   :  { %3034 = vmatmul.msk.f32.vlgmr.msra.gmra.mxu2 %vm60_vm1, %v2743_v3 }
0x23a6   :  { %1686 = vrot.lane.b32.xlu0 %v4523_v16, %s3335_s23 }
0x23ac   :  { %v1699_v5 = vpop.permute.xlu1 %1698 }
0x23ad   :  { %1702 = vst.msk [vmem:[#allocation3 + $0xc] sm:$0x3] %vm210_vm14, %v1699_v5 }
0x23ae   :  { %1538 = vrot.lane.b32.xlu0 %v4412_v49, %s3333_s22 }
0x23b4   :  { %v1863_v7 = vpop.permute.xlu1 %1862 }
0x23b5   :  { %1866 = vst.msk [vmem:[#allocation3 + $0xa] sm:$0x3] %vm210_vm14, %v1863_v7  ;;  %v2582_v53 = vpop.permute.xlu2 %2581 }
0x23b6   :  { %v2584_v44 = vadd.f32 %v2582_v53, %v2574_v52 }
0x23b8   :  { %3312 = vtanh.f32 %v2584_v44 }
0x23bc   :  { %v2341_v16 = vpop.permute.xlu1 %2340 }
0x23bd   :  { %2343 = vst.msk [vmem:[#allocation3 + $0xa] sm:$0x3] %vm197_vm0, %v2341_v16 }
0x23be   :  { %v3313_v15 = vpop.eup %3312 }
0x23bf   :  { %2587 = vrot.lane.b32.xlu2 %v3313_v15, %s3333_s22 }
0x23c4   :  { %v2821_v11 = vld [vmem:[#allocation3 + $0xa] sm:$0x3] }
0x23c7   :  { %2014 = vrot.lane.b32.xlu2 %v4754_v31, %s3335_s23 }
0x23cf   :  { %1527 = vrot.lane.b32.xlu2 %v4423_v54, %s3335_s23 }
0x23d7   :  { %2502 = vrot.lane.b32.xlu2 %v4959_v4, %s3335_s23 }
0x2400   :  { %v2654_v49 = vpop.permute.xlu0 %2653 }
0x2401   :  { %v2656_v47 = vmul.f32 %v2654_v49, %v4973_v13 }
0x2403   :  { %v2673_v30 = vsel %vm2672_vm9, %v2656_v47, 0.0 }
0x2404   :  { %2675 = vrot.lane.b32.xlu2 %v2673_v30, %s3333_s22 }
0x2408   :  { %v2660_v62 = vpop.permute.xlu0 %2659 }
0x2409   :  { %vm2661_vm11 = vcmp.eq.s32.totalorder %v2660_v62, 1 }
0x240c   :  { %2026 = vrot.lane.b32.xlu2 %v2024_v58, %s3333_s22 }
0x2410   :  { %v2190_v31 = vpop.permute.xlu0 %2189 }
0x2418   :  { %v1687_v8 = vpop.permute.xlu0 %1686 }
0x2419   :  { %1690 = vst.msk [vmem:[#allocation3 + $0x2] sm:$0x3] %vm197_vm0, %v1687_v8  ;;  %v2588_v54 = vpop.permute.xlu2 %2587 }
0x241a   :  { %2516 = vst.msk [vmem:[#allocation3 + $0x2] sm:$0x3] %vm210_vm14, %v2514_v35  ;;  %v2590_v4 = vmul.f32 %v2588_v54, %v5000_v10 }
0x241c   :  { %v2662_v13 = vsel %vm2661_vm11, %v2590_v4, 0.0 }
0x241d   :  { %2664 = vrot.lane.b32.xlu0 %v2662_v13, %s3335_s23 }
0x2420   :  { %v1539_v25 = vpop.permute.xlu0 %1538 }
0x2421   :  { %1542 = vst.msk [vmem:[#allocation3 + $0xe] sm:$0x3] %vm210_vm14, %v1539_v25  ;;  %v2015_v18 = vpop.permute.xlu2 %2014  ;;  %v2717_v48 = vld [vmem:[#allocation3 + $0x2] sm:$0x3] }
0x2422   :  { %2018 = vst.msk [vmem:[#allocation3 + $0x6] sm:$0x3] %vm197_vm0, %v2015_v18  ;;  %3032 = vmatmul.msk.f32.vlgmr.msra.gmra.mxu1 %vm60_vm1, %v2717_v48 }
0x2423   :  { %2192 = vst.msk [vmem:[#allocation3 + $0x6] sm:$0x3] %vm210_vm14, %v2190_v31 }
0x2425   :  { %2178 = vrot.lane.b32.xlu0 %v4821_v1, %s3335_s23 }
0x2428   :  { %v2764_v32 = vpop.f32.mrf.mxu2 }
0x2429   :  { %v2765_v61 = vadd.f32 %v3057_v59, %v2764_v32  ;;  %v1528_v38 = vpop.permute.xlu2 %1527 }
0x242a   :  { %1530 = vst.msk [vmem:[#allocation3] sm:$0x3] %vm197_vm0, %v1528_v38  ;;  %3040 = vmatmul.msk.f32.vlgmr.msrb.gmra.mxu1 %vm60_vm1, %v2821_v11  ;;  %v2769_v40 = vld [vmem:[#allocation3 + $0x6] sm:$0x3] }
0x242b   :  { %3035 = vst.msk [vmem:[%s5135_s8 + $0x4] sm:$0x3] %vm2715_vm5, %v2765_v61  ;;  %3036 = vmatmul.msk.f32.vlgmr.msra.gmra.mxu3 %vm60_vm1, %v2769_v40 }
0x2431   :  { %v2503_v1 = vpop.permute.xlu2 %2502 }
0x2432   :  { %2505 = vst.msk [vmem:[#allocation3 + $0xc] sm:$0x3] %vm197_vm0, %v2503_v1 }
0x2439   :  { %v2847_v6 = vld [vmem:[#allocation3 + $0xc] sm:$0x3] }
0x243a   :  { %3042 = vmatmul.msk.f32.vlgmr.msrb.gmra.mxu2 %vm60_vm1, %v2847_v6 }
0x245e   :  { %v2676_v50 = vpop.permute.xlu2 %2675 }
0x245f   :  { %2678 = vst.msk [vmem:[#allocation3] sm:$0x3] %vm210_vm14, %v2676_v50 }
0x2466   :  { %v2027_v55 = vpop.permute.xlu2 %2026  ;;  %v2688_v43 = vld [vmem:[#allocation3] sm:$0x3] }
0x2467   :  { %2030 = vst.msk [vmem:[#allocation3 + $0x8] sm:$0x3] %vm210_vm14, %v2027_v55  ;;  %3031 = vmatmul.msk.f32.vlgmr.msra.gmra.mxu0 %vm60_vm1, %v2688_v43 }
0x248f   :  { %v2665_v20 = vpop.permute.xlu0 %2664 }
0x2490   :  { %2667 = vst.msk [vmem:[#allocation3 + $0xe] sm:$0x3] %vm197_vm0, %v2665_v20 }
0x2497   :  { %v2179_v34 = vpop.permute.xlu0 %2178  ;;  %v2873_v0 = vld [vmem:[#allocation3 + $0xe] sm:$0x3] }
0x2498   :  { %2181 = vst.msk [vmem:[#allocation3 + $0x8] sm:$0x3] %vm197_vm0, %v2179_v34  ;;  %3044 = vmatmul.msk.f32.vlgmr.msrb.gmra.mxu3 %vm60_vm1, %v2873_v0 }
0x249f   :  { %v2738_v39 = vpop.f32.mrf.mxu1  ;;  %v2795_v23 = vld [vmem:[#allocation3 + $0x8] sm:$0x3] }
0x24a0   :  { %v2739_v51 = vadd.f32 %v3057_v59, %v2738_v39  ;;  %3038 = vmatmul.msk.f32.vlgmr.msrb.gmra.mxu0 %vm60_vm1, %v2795_v23 }
0x24a2   :  { %3033 = vst.msk [vmem:[%s5135_s8 + $0x2] sm:$0x3] %vm2715_vm5, %v2739_v51 }
0x24a7   :  { %v2842_v26 = vpop.f32.mrf.mxu1 }
0x24a8   :  { %v2843_v17 = vadd.f32 %v3057_v59, %v2842_v26 }
0x24aa   :  { %3041 = vst.msk [vmem:[%s5135_s8 + $0xa] sm:$0x3] %vm2715_vm5, %v2843_v17 }
0x24ae   :  { %v2790_v10 = vpop.f32.mrf.mxu3 }
0x24af   :  { %v2791_v56 = vadd.f32 %v3057_v59, %v2790_v10 }
0x24b1   :  { %3037 = vst.msk [vmem:[%s5135_s8 + $0x6] sm:$0x3] %vm2715_vm5, %v2791_v56 }
0x24bd   :  { %v2868_v28 = vpop.f32.mrf.mxu2 }
0x24be   :  { %v2869_v37 = vadd.f32 %v3057_v59, %v2868_v28 }
0x24c0   :  { %3043 = vst.msk [vmem:[%s5135_s8 + $0xc] sm:$0x3] %vm2715_vm5, %v2869_v37 }
0x24e4   :  { %v2712_v12 = vpop.f32.mrf.mxu0 }
0x24e5   :  { %v2713_v27 = vadd.f32 %v3057_v59, %v2712_v12 }
0x24e7   :  { %2716 = vst.msk [vmem:[%s5135_s8] sm:$0x3] %vm2715_vm5, %v2713_v27 }
0x251b   :  { %v2894_v63 = vpop.f32.mrf.mxu3 }
0x251c   :  { %v2895_v36 = vadd.f32 %v3057_v59, %v2894_v63 }
0x251d   :  { %v2816_v42 = vpop.f32.mrf.mxu0 }
0x251e   :  { %3045 = vst.msk [vmem:[%s5135_s8 + $0xe] sm:$0x3] %vm2715_vm5, %v2895_v36  ;;  %v2817_v22 = vadd.f32 %v3057_v59, %v2816_v42 }
0x2520   :  { %3039 = vst.msk [vmem:[%s5135_s8 + $0x8] sm:$0x3] %vm2715_vm5, %v2817_v22 }

</bundles_post_ra>
